<compile_context>
chip_gen: v7x
topology: tpu7x:2x2x1
jax: 0.10.0
libtpu: 0.0.40
codegen_flags: <defaults>
</compile_context>

<pallas_src>
import jax
import jax.numpy as jnp
from jax import lax
from jax.experimental import pallas as pl
from jax.experimental.pallas import tpu as pltpu

d_model = 512
dff = 2048
h = 8
max_seq_len = 128
dk = d_model // h          # 64
dv = dk                    # 64

SM_SCALE = 1.0 / (dk ** 0.5)
FOLD = d_model // dk               # 8 per-head rows fold into one 512-wide output row
ROWS_PER_HEAD = max_seq_len // FOLD  # 16 output rows owned by each head


# ---------------------------------------------------------------------------
# Fully fused kernel: QKV projections + 8-head attention + quirky head-major
# repack + output projection, for one batch element per grid step.
# ---------------------------------------------------------------------------
def _mha_kernel(q_ref, k_ref, v_ref,
                wq_ref, wk_ref, wv_ref, wo_ref,
                bq_ref, bk_ref, bv_ref, bo_ref,
                o_ref,
                qp_sc, kp_sc, vp_sc, x_sc, oh_sc):
    # --- Q/K/V projections: bf16 MXU operands, f32 accumulate + bias, bf16 scratch.
    # 1/sqrt(dk) is already folded into wq_ref / bq_ref (pack_params).
    qp_sc[...] = (jnp.dot(q_ref[0], wq_ref[...],
                          preferred_element_type=jnp.float32)
                  + bq_ref[...]).astype(qp_sc.dtype)
    kp_sc[...] = (jnp.dot(k_ref[0], wk_ref[...],
                          preferred_element_type=jnp.float32)
                  + bk_ref[...]).astype(kp_sc.dtype)
    vp_sc[...] = (jnp.dot(v_ref[0], wv_ref[...],
                          preferred_element_type=jnp.float32)
                  + bv_ref[...]).astype(vp_sc.dtype)

    # --- per-head attention (unrolled; each head's result lands in VMEM scratch so
    #     live vreg ranges stay bounded per iteration).
    for hh in range(h):
        lo = hh * dk
        qh = qp_sc[:, lo:lo + dk]            # (S, dk) bf16
        kh = kp_sc[:, lo:lo + dk]            # (S, dk) bf16
        vh = vp_sc[:, lo:lo + dk]            # (S, dk) bf16

        # q @ k^T without materializing a transpose: contract the minor dims.
        s = lax.dot_general(qh, kh, (((1,), (1,)), ((), ())),
                            preferred_element_type=jnp.float32)     # (S, S) f32
        # numerically stable softmax, kept in f32 (also on v5e: no bf16 VPU)
        s = s - jnp.max(s, axis=-1, keepdims=True)
        p = jnp.exp(s)
        denom = jnp.sum(p, axis=-1, keepdims=True)                  # (S, 1)
        o = jnp.dot(p.astype(jnp.bfloat16), vh,
                    preferred_element_type=jnp.float32)             # (S, dk) f32
        # normalize the small (S, dk) result; reciprocal goes to the EUP slot
        oh_sc[...] = o * pl.reciprocal(denom, approx=True)

        # Quirky x.view(-1, S, h*dk) WITHOUT transposing heads back:
        #   x[hh*16 + q, r*64 + d] = o_head[q*8 + r, d]
        # Assemble rows [hh*16, (hh+1)*16) with sublane-strided reads of the staged
        # per-head output + lane concatenation, then one dense aligned store.
        row_blk = jnp.concatenate(
            [oh_sc[pl.ds(r, ROWS_PER_HEAD, stride=FOLD), :] for r in range(FOLD)],
            axis=-1)                                                # (16, 512) f32
        x_sc[hh * ROWS_PER_HEAD:(hh + 1) * ROWS_PER_HEAD, :] = (
            row_blk.astype(x_sc.dtype))

    # --- fused output projection: final result, single lane-dense HBM write.
    y = (jnp.dot(x_sc[...], wo_ref[...], preferred_element_type=jnp.float32)
         + bo_ref[...])
    o_ref[0] = y.astype(o_ref.dtype)


def multi_head_attention_forward(q, k, v, packed):
    """q/k/v: (B, S, d_model) f32 -> (B, S, d_model) f32."""
    B, S, D = q.shape
    assert S == max_seq_len and D == d_model and S % FOLD == 0
    out_dtype = q.dtype

    # bf16 MXU operands (weights were cast once at pack time).
    qb = q.astype(jnp.bfloat16)
    kb = k.astype(jnp.bfloat16)
    vb = v.astype(jnp.bfloat16)

    in_specs = [
        pl.BlockSpec((1, S, D), lambda b: (b, 0, 0)),    # q
        pl.BlockSpec((1, S, D), lambda b: (b, 0, 0)),    # k
        pl.BlockSpec((1, S, D), lambda b: (b, 0, 0)),    # v
        pl.BlockSpec((D, D), lambda b: (0, 0)),          # Wq (constant -> DMA'd once)
        pl.BlockSpec((D, D), lambda b: (0, 0)),          # Wk
        pl.BlockSpec((D, D), lambda b: (0, 0)),          # Wv
        pl.BlockSpec((D, D), lambda b: (0, 0)),          # Wo
        pl.BlockSpec((1, D), lambda b: (0, 0)),          # bq
        pl.BlockSpec((1, D), lambda b: (0, 0)),          # bk
        pl.BlockSpec((1, D), lambda b: (0, 0)),          # bv
        pl.BlockSpec((1, D), lambda b: (0, 0)),          # bo
    ]
    out_spec = pl.BlockSpec((1, S, D), lambda b: (b, 0, 0))

    return pl.pallas_call(
        _mha_kernel,
        out_shape=jax.ShapeDtypeStruct((B, S, D), out_dtype),
        grid_spec=pltpu.PrefetchScalarGridSpec(
            num_scalar_prefetch=0,
            grid=(B,),
            in_specs=in_specs,
            out_specs=out_spec,
            scratch_shapes=[
                pltpu.VMEM((S, D), jnp.bfloat16),   # q projection
                pltpu.VMEM((S, D), jnp.bfloat16),   # k projection
                pltpu.VMEM((S, D), jnp.bfloat16),   # v projection
                pltpu.VMEM((S, D), jnp.bfloat16),   # repacked x tile for Wo matmul
                pltpu.VMEM((S, dk), jnp.float32),   # per-head attention staging
            ],
        ),
        compiler_params=pltpu.CompilerParams(
            dimension_semantics=("parallel",),      # B=2 steps -> both v7x TCs busy
            vmem_limit_bytes=32 * 1024 * 1024,
        ),
    )(qb, kb, vb,
      packed["wq"], packed["wk"], packed["wv"], packed["wo"],
      packed["bq"], packed["bk"], packed["bv"], packed["bo"])


# ---------------------------------------------------------------------------
# Parameter init (f32, shapes follow the nn.Module) + one-time packing:
# fold 1/sqrt(dk) into Wq/bq, cast weights to bf16, reshape biases to (1, D).
# ---------------------------------------------------------------------------
def init_params(key):
    keys = jax.random.split(key, 8)
    scale = 0.02

    def lin(kw, kb, d_in, d_out):
        w = jax.random.normal(kw, (d_in, d_out), jnp.float32) * scale
        b = jax.random.normal(kb, (d_out,), jnp.float32) * scale
        return w, b

    p = {}
    p["wq_w"], p["wq_b"] = lin(keys[0], keys[1], d_model, d_model)
    p["wk_w"], p["wk_b"] = lin(keys[2], keys[3], d_model, d_model)
    p["wv_w"], p["wv_b"] = lin(keys[4], keys[5], d_model, d_model)
    p["wo_w"], p["wo_b"] = lin(keys[6], keys[7], d_model, d_model)
    # layer_norm / FeedForward / dropout params exist in the module but are unused
    # in forward(), so they are intentionally not materialized here.
    return p


def pack_params(params):
    bf = jnp.bfloat16
    return {
        "wq": (params["wq_w"] * SM_SCALE).astype(bf),
        "wk": params["wk_w"].astype(bf),
        "wv": params["wv_w"].astype(bf),
        "wo": params["wo_w"].astype(bf),
        "bq": (params["wq_b"] * SM_SCALE).reshape(1, d_model),   # f32
        "bk": params["wk_b"].reshape(1, d_model),
        "bv": params["wv_b"].reshape(1, d_model),
        "bo": params["wo_b"].reshape(1, d_model),
    }


# ---------------------------------------------------------------------------
# Pure-JAX reference (same quirky non-transposed head reshape) for a sanity check
# ---------------------------------------------------------------------------
def reference_forward(q, k, v, params):
    B, S, _ = q.shape
    with jax.default_matmul_precision("highest"):
        qp = q @ params["wq_w"] + params["wq_b"]
        kp = k @ params["wk_w"] + params["wk_b"]
        vp = v @ params["wv_w"] + params["wv_b"]
        qh = qp.reshape(B, S, h, dk).transpose(0, 2, 1, 3)
        kh = kp.reshape(B, S, h, dk).transpose(0, 2, 1, 3)
        vh = vp.reshape(B, S, h, dv).transpose(0, 2, 1, 3)
        s = jnp.einsum("bhqd,bhkd->bhqk", qh, kh) / (dk ** 0.5)
        p = jax.nn.softmax(s, axis=-1)
        x = jnp.einsum("bhqk,bhkd->bhqd", p, vh)
        x = x.reshape(B, S, h * dv)          # same quirky reshape as the module
        out = x @ params["wo_w"] + params["wo_b"]
    return out


if __name__ == "__main__":
    key = jax.random.PRNGKey(0)
    kq, kk, kv, kp = jax.random.split(key, 4)

    B = 2
    q = jax.random.normal(kq, (B, max_seq_len, d_model), jnp.float32)
    k = jax.random.normal(kk, (B, max_seq_len, d_model), jnp.float32)
    v = jax.random.normal(kv, (B, max_seq_len, d_model), jnp.float32)

    params = init_params(kp)
    packed = pack_params(params)           # one-time weight packing (bf16, scale fold)

    out = multi_head_attention_forward(q, k, v, packed)
    out = jax.block_until_ready(out)

    assert out.shape == (B, max_seq_len, d_model)
    assert bool(jnp.all(jnp.isfinite(out)))

    ref = jax.block_until_ready(reference_forward(q, k, v, params))
    max_diff = float(jnp.max(jnp.abs(out - ref)))
    assert max_diff < 5e-2, f"max abs diff vs reference too large: {max_diff}"

    print("KERNEL_OK")
</pallas_src>

<mosaic_0001>
module attributes {stable_mosaic.version = 11 : i64} {
  func.func @_mha_kernel(%arg0: i32, %arg1: memref<1x128x512xbf16, #tpu.memory_space<vmem>>, %arg2: memref<1x128x512xbf16, #tpu.memory_space<vmem>>, %arg3: memref<1x128x512xbf16, #tpu.memory_space<vmem>>, %arg4: memref<512x512xbf16, #tpu.memory_space<vmem>>, %arg5: memref<512x512xbf16, #tpu.memory_space<vmem>>, %arg6: memref<512x512xbf16, #tpu.memory_space<vmem>>, %arg7: memref<512x512xbf16, #tpu.memory_space<vmem>>, %arg8: memref<1x512xf32, #tpu.memory_space<vmem>>, %arg9: memref<1x512xf32, #tpu.memory_space<vmem>>, %arg10: memref<1x512xf32, #tpu.memory_space<vmem>>, %arg11: memref<1x512xf32, #tpu.memory_space<vmem>>, %arg12: memref<1x128x512xf32, #tpu.memory_space<vmem>>, %arg13: memref<128x512xbf16, #tpu.memory_space<vmem>>, %arg14: memref<128x512xbf16, #tpu.memory_space<vmem>>, %arg15: memref<128x512xbf16, #tpu.memory_space<vmem>>, %arg16: memref<128x512xbf16, #tpu.memory_space<vmem>>, %arg17: memref<128x64xf32, #tpu.memory_space<vmem>>) attributes {dimension_semantics = [#tpu.dimension_semantics<parallel>], iteration_bounds = array<i64: 2>, scalar_prefetch = 0 : i64, scratch_operands = 5 : i64, tpu.core_type = #tpu.core_type<tc>, window_params = [{transform_indices = @transform_0, window_bounds = array<i64: 1, 128, 512>}, {transform_indices = @transform_1, window_bounds = array<i64: 1, 128, 512>}, {transform_indices = @transform_2, window_bounds = array<i64: 1, 128, 512>}, {pipeline_mode = #tpu.pipeline_mode<synchronous>, transform_indices = @transform_3, window_bounds = array<i64: 512, 512>}, {pipeline_mode = #tpu.pipeline_mode<synchronous>, transform_indices = @transform_4, window_bounds = array<i64: 512, 512>}, {pipeline_mode = #tpu.pipeline_mode<synchronous>, transform_indices = @transform_5, window_bounds = array<i64: 512, 512>}, {pipeline_mode = #tpu.pipeline_mode<synchronous>, transform_indices = @transform_6, window_bounds = array<i64: 512, 512>}, {pipeline_mode = #tpu.pipeline_mode<synchronous>, transform_indices = @transform_7, window_bounds = array<i64: 1, 512>}, {pipeline_mode = #tpu.pipeline_mode<synchronous>, transform_indices = @transform_8, window_bounds = array<i64: 1, 512>}, {pipeline_mode = #tpu.pipeline_mode<synchronous>, transform_indices = @transform_9, window_bounds = array<i64: 1, 512>}, {pipeline_mode = #tpu.pipeline_mode<synchronous>, transform_indices = @transform_10, window_bounds = array<i64: 1, 512>}, {transform_indices = @transform_11, window_bounds = array<i64: 1, 128, 512>}]} {
    %c0 = arith.constant 0 : index
    %c0_0 = arith.constant 0 : index
    %c0_1 = arith.constant 0 : index
    %0 = vector.load %arg1[%c0, %c0_0, %c0_1] : memref<1x128x512xbf16, #tpu.memory_space<vmem>>, vector<1x128x512xbf16>
    %1 = vector.shape_cast %0 : vector<1x128x512xbf16> to vector<128x512xbf16>
    %c0_2 = arith.constant 0 : index
    %c0_3 = arith.constant 0 : index
    %2 = vector.load %arg4[%c0_2, %c0_3] : memref<512x512xbf16, #tpu.memory_space<vmem>>, vector<512x512xbf16>
    %cst = arith.constant dense<0.000000e+00> : vector<128x512xf32>
    %3 = tpu.matmul %1, %2, %cst {dimension_numbers = #tpu.dot_dimension_numbers<[1], [0], [0], [1], [0, 0, 1, 1], [], []>} : vector<128x512xbf16>, vector<512x512xbf16>, vector<128x512xf32> -> vector<128x512xf32>
    %c0_4 = arith.constant 0 : index
    %c0_5 = arith.constant 0 : index
    %4 = vector.load %arg8[%c0_4, %c0_5] : memref<1x512xf32, #tpu.memory_space<vmem>>, vector<1x512xf32>
    %5 = vector.broadcast %4 : vector<1x512xf32> to vector<128x512xf32>
    %6 = arith.addf %3, %5 : vector<128x512xf32>
    %7 = arith.truncf %6 : vector<128x512xf32> to vector<128x512xbf16>
    %c0_6 = arith.constant 0 : index
    %c0_7 = arith.constant 0 : index
    %8 = vector.load %arg13[%c0_6, %c0_7] : memref<128x512xbf16, #tpu.memory_space<vmem>>, vector<128x512xbf16>
    tpu.vector_store %arg13[%c0_6, %c0_7], %7 {strides = array<i32>} : memref<128x512xbf16, #tpu.memory_space<vmem>>, vector<128x512xbf16>,
    %c0_8 = arith.constant 0 : index
    %c0_9 = arith.constant 0 : index
    %c0_10 = arith.constant 0 : index
    %9 = vector.load %arg2[%c0_8, %c0_9, %c0_10] : memref<1x128x512xbf16, #tpu.memory_space<vmem>>, vector<1x128x512xbf16>
    %10 = vector.shape_cast %9 : vector<1x128x512xbf16> to vector<128x512xbf16>
    %c0_11 = arith.constant 0 : index
    %c0_12 = arith.constant 0 : index
    %11 = vector.load %arg5[%c0_11, %c0_12] : memref<512x512xbf16, #tpu.memory_space<vmem>>, vector<512x512xbf16>
    %cst_13 = arith.constant dense<0.000000e+00> : vector<128x512xf32>
    %12 = tpu.matmul %10, %11, %cst_13 {dimension_numbers = #tpu.dot_dimension_numbers<[1], [0], [0], [1], [0, 0, 1, 1], [], []>} : vector<128x512xbf16>, vector<512x512xbf16>, vector<128x512xf32> -> vector<128x512xf32>
    %c0_14 = arith.constant 0 : index
    %c0_15 = arith.constant 0 : index
    %13 = vector.load %arg9[%c0_14, %c0_15] : memref<1x512xf32, #tpu.memory_space<vmem>>, vector<1x512xf32>
    %14 = vector.broadcast %13 : vector<1x512xf32> to vector<128x512xf32>
    %15 = arith.addf %12, %14 : vector<128x512xf32>
    %16 = arith.truncf %15 : vector<128x512xf32> to vector<128x512xbf16>
    %c0_16 = arith.constant 0 : index
    %c0_17 = arith.constant 0 : index
    %17 = vector.load %arg14[%c0_16, %c0_17] : memref<128x512xbf16, #tpu.memory_space<vmem>>, vector<128x512xbf16>
    tpu.vector_store %arg14[%c0_16, %c0_17], %16 {strides = array<i32>} : memref<128x512xbf16, #tpu.memory_space<vmem>>, vector<128x512xbf16>,
    %c0_18 = arith.constant 0 : index
    %c0_19 = arith.constant 0 : index
    %c0_20 = arith.constant 0 : index
    %18 = vector.load %arg3[%c0_18, %c0_19, %c0_20] : memref<1x128x512xbf16, #tpu.memory_space<vmem>>, vector<1x128x512xbf16>
    %19 = vector.shape_cast %18 : vector<1x128x512xbf16> to vector<128x512xbf16>
    %c0_21 = arith.constant 0 : index
    %c0_22 = arith.constant 0 : index
    %20 = vector.load %arg6[%c0_21, %c0_22] : memref<512x512xbf16, #tpu.memory_space<vmem>>, vector<512x512xbf16>
    %cst_23 = arith.constant dense<0.000000e+00> : vector<128x512xf32>
    %21 = tpu.matmul %19, %20, %cst_23 {dimension_numbers = #tpu.dot_dimension_numbers<[1], [0], [0], [1], [0, 0, 1, 1], [], []>} : vector<128x512xbf16>, vector<512x512xbf16>, vector<128x512xf32> -> vector<128x512xf32>
    %c0_24 = arith.constant 0 : index
    %c0_25 = arith.constant 0 : index
    %22 = vector.load %arg10[%c0_24, %c0_25] : memref<1x512xf32, #tpu.memory_space<vmem>>, vector<1x512xf32>
    %23 = vector.broadcast %22 : vector<1x512xf32> to vector<128x512xf32>
    %24 = arith.addf %21, %23 : vector<128x512xf32>
    %25 = arith.truncf %24 : vector<128x512xf32> to vector<128x512xbf16>
    %c0_26 = arith.constant 0 : index
    %c0_27 = arith.constant 0 : index
    %26 = vector.load %arg15[%c0_26, %c0_27] : memref<128x512xbf16, #tpu.memory_space<vmem>>, vector<128x512xbf16>
    tpu.vector_store %arg15[%c0_26, %c0_27], %25 {strides = array<i32>} : memref<128x512xbf16, #tpu.memory_space<vmem>>, vector<128x512xbf16>,
    %c0_28 = arith.constant 0 : index
    %c0_29 = arith.constant 0 : index
    %27 = vector.load %arg13[%c0_28, %c0_29] : memref<128x512xbf16, #tpu.memory_space<vmem>>, vector<128x64xbf16>
    %c0_30 = arith.constant 0 : index
    %c0_31 = arith.constant 0 : index
    %28 = vector.load %arg14[%c0_30, %c0_31] : memref<128x512xbf16, #tpu.memory_space<vmem>>, vector<128x64xbf16>
    %c0_32 = arith.constant 0 : index
    %c0_33 = arith.constant 0 : index
    %29 = vector.load %arg15[%c0_32, %c0_33] : memref<128x512xbf16, #tpu.memory_space<vmem>>, vector<128x64xbf16>
    %cst_34 = arith.constant dense<0.000000e+00> : vector<128x128xf32>
    %30 = tpu.matmul %27, %28, %cst_34 {dimension_numbers = #tpu.dot_dimension_numbers<[1], [1], [0], [0], [0, 0, 1, 0], [], []>} : vector<128x64xbf16>, vector<128x64xbf16>, vector<128x128xf32> -> vector<128x128xf32>
    %cst_35 = arith.constant dense<0xFF800000> : vector<128xf32>
    %31 = vector.multi_reduction <maximumf>, %30, %cst_35 [1] : vector<128x128xf32> to vector<128xf32>
    %32 = vector.shape_cast %31 : vector<128xf32> to vector<128x1xf32>
    %33 = vector.broadcast %32 : vector<128x1xf32> to vector<128x128xf32>
    %34 = arith.subf %30, %33 : vector<128x128xf32>
    %35 = math.exp %34 : vector<128x128xf32>
    %cst_36 = arith.constant dense<0.000000e+00> : vector<128xf32>
    %36 = vector.multi_reduction <add>, %35, %cst_36 [1] : vector<128x128xf32> to vector<128xf32>
    %37 = vector.shape_cast %36 : vector<128xf32> to vector<128x1xf32>
    %38 = arith.truncf %35 : vector<128x128xf32> to vector<128x128xbf16>
    %cst_37 = arith.constant dense<0.000000e+00> : vector<128x64xf32>
    %39 = tpu.matmul %38, %29, %cst_37 {dimension_numbers = #tpu.dot_dimension_numbers<[1], [0], [0], [1], [0, 0, 1, 1], [], []>} : vector<128x128xbf16>, vector<128x64xbf16>, vector<128x64xf32> -> vector<128x64xf32>
    %40 = tpu.reciprocal %37 {approx = true} : vector<128x1xf32> -> vector<128x1xf32>
    %41 = vector.broadcast %40 : vector<128x1xf32> to vector<128x64xf32>
    %42 = arith.mulf %39, %41 : vector<128x64xf32>
    %c0_38 = arith.constant 0 : index
    %c0_39 = arith.constant 0 : index
    %43 = vector.load %arg17[%c0_38, %c0_39] : memref<128x64xf32, #tpu.memory_space<vmem>>, vector<128x64xf32>
    tpu.vector_store %arg17[%c0_38, %c0_39], %42 {strides = array<i32>} : memref<128x64xf32, #tpu.memory_space<vmem>>, vector<128x64xf32>,
    %c0_40 = arith.constant 0 : index
    %c0_41 = arith.constant 0 : index
    %44 = tpu.strided_load %arg17[%c0_40, %c0_41] {strides = array<i32: 8, 1>} : memref<128x64xf32, #tpu.memory_space<vmem>>, vector<16x64xf32>
    %c1 = arith.constant 1 : index
    %c0_42 = arith.constant 0 : index
    %45 = tpu.strided_load %arg17[%c1, %c0_42] {strides = array<i32: 8, 1>} : memref<128x64xf32, #tpu.memory_space<vmem>>, vector<16x64xf32>
    %c2 = arith.constant 2 : index
    %c0_43 = arith.constant 0 : index
    %46 = tpu.strided_load %arg17[%c2, %c0_43] {strides = array<i32: 8, 1>} : memref<128x64xf32, #tpu.memory_space<vmem>>, vector<16x64xf32>
    %c3 = arith.constant 3 : index
    %c0_44 = arith.constant 0 : index
    %47 = tpu.strided_load %arg17[%c3, %c0_44] {strides = array<i32: 8, 1>} : memref<128x64xf32, #tpu.memory_space<vmem>>, vector<16x64xf32>
    %c4 = arith.constant 4 : index
    %c0_45 = arith.constant 0 : index
    %48 = tpu.strided_load %arg17[%c4, %c0_45] {strides = array<i32: 8, 1>} : memref<128x64xf32, #tpu.memory_space<vmem>>, vector<16x64xf32>
    %c5 = arith.constant 5 : index
    %c0_46 = arith.constant 0 : index
    %49 = tpu.strided_load %arg17[%c5, %c0_46] {strides = array<i32: 8, 1>} : memref<128x64xf32, #tpu.memory_space<vmem>>, vector<16x64xf32>
    %c6 = arith.constant 6 : index
    %c0_47 = arith.constant 0 : index
    %50 = tpu.strided_load %arg17[%c6, %c0_47] {strides = array<i32: 8, 1>} : memref<128x64xf32, #tpu.memory_space<vmem>>, vector<16x64xf32>
    %c7 = arith.constant 7 : index
    %c0_48 = arith.constant 0 : index
    %51 = tpu.strided_load %arg17[%c7, %c0_48] {strides = array<i32: 8, 1>} : memref<128x64xf32, #tpu.memory_space<vmem>>, vector<16x64xf32>
    %52 = tpu.concatenate %44, %45, %46, %47, %48, %49, %50, %51 in 1 : vector<16x64xf32>, vector<16x64xf32>, vector<16x64xf32>, vector<16x64xf32>, vector<16x64xf32>, vector<16x64xf32>, vector<16x64xf32>, vector<16x64xf32> -> vector<16x512xf32>
    %53 = arith.truncf %52 : vector<16x512xf32> to vector<16x512xbf16>
    %c0_49 = arith.constant 0 : index
    %c0_50 = arith.constant 0 : index
    %54 = vector.load %arg16[%c0_49, %c0_50] : memref<128x512xbf16, #tpu.memory_space<vmem>>, vector<16x512xbf16>
    tpu.vector_store %arg16[%c0_49, %c0_50], %53 {strides = array<i32>} : memref<128x512xbf16, #tpu.memory_space<vmem>>, vector<16x512xbf16>,
    %c0_51 = arith.constant 0 : index
    %c64 = arith.constant 64 : index
    %55 = vector.load %arg13[%c0_51, %c64] : memref<128x512xbf16, #tpu.memory_space<vmem>>, vector<128x64xbf16>
    %c0_52 = arith.constant 0 : index
    %c64_53 = arith.constant 64 : index
    %56 = vector.load %arg14[%c0_52, %c64_53] : memref<128x512xbf16, #tpu.memory_space<vmem>>, vector<128x64xbf16>
    %c0_54 = arith.constant 0 : index
    %c64_55 = arith.constant 64 : index
    %57 = vector.load %arg15[%c0_54, %c64_55] : memref<128x512xbf16, #tpu.memory_space<vmem>>, vector<128x64xbf16>
    %cst_56 = arith.constant dense<0.000000e+00> : vector<128x128xf32>
    %58 = tpu.matmul %55, %56, %cst_56 {dimension_numbers = #tpu.dot_dimension_numbers<[1], [1], [0], [0], [0, 0, 1, 0], [], []>} : vector<128x64xbf16>, vector<128x64xbf16>, vector<128x128xf32> -> vector<128x128xf32>
    %cst_57 = arith.constant dense<0xFF800000> : vector<128xf32>
    %59 = vector.multi_reduction <maximumf>, %58, %cst_57 [1] : vector<128x128xf32> to vector<128xf32>
    %60 = vector.shape_cast %59 : vector<128xf32> to vector<128x1xf32>
    %61 = vector.broadcast %60 : vector<128x1xf32> to vector<128x128xf32>
    %62 = arith.subf %58, %61 : vector<128x128xf32>
    %63 = math.exp %62 : vector<128x128xf32>
    %cst_58 = arith.constant dense<0.000000e+00> : vector<128xf32>
    %64 = vector.multi_reduction <add>, %63, %cst_58 [1] : vector<128x128xf32> to vector<128xf32>
    %65 = vector.shape_cast %64 : vector<128xf32> to vector<128x1xf32>
    %66 = arith.truncf %63 : vector<128x128xf32> to vector<128x128xbf16>
    %cst_59 = arith.constant dense<0.000000e+00> : vector<128x64xf32>
    %67 = tpu.matmul %66, %57, %cst_59 {dimension_numbers = #tpu.dot_dimension_numbers<[1], [0], [0], [1], [0, 0, 1, 1], [], []>} : vector<128x128xbf16>, vector<128x64xbf16>, vector<128x64xf32> -> vector<128x64xf32>
    %68 = tpu.reciprocal %65 {approx = true} : vector<128x1xf32> -> vector<128x1xf32>
    %69 = vector.broadcast %68 : vector<128x1xf32> to vector<128x64xf32>
    %70 = arith.mulf %67, %69 : vector<128x64xf32>
    %c0_60 = arith.constant 0 : index
    %c0_61 = arith.constant 0 : index
    %71 = vector.load %arg17[%c0_60, %c0_61] : memref<128x64xf32, #tpu.memory_space<vmem>>, vector<128x64xf32>
    tpu.vector_store %arg17[%c0_60, %c0_61], %70 {strides = array<i32>} : memref<128x64xf32, #tpu.memory_space<vmem>>, vector<128x64xf32>,
    %c0_62 = arith.constant 0 : index
    %c0_63 = arith.constant 0 : index
    %72 = tpu.strided_load %arg17[%c0_62, %c0_63] {strides = array<i32: 8, 1>} : memref<128x64xf32, #tpu.memory_space<vmem>>, vector<16x64xf32>
    %c1_64 = arith.constant 1 : index
    %c0_65 = arith.constant 0 : index
    %73 = tpu.strided_load %arg17[%c1_64, %c0_65] {strides = array<i32: 8, 1>} : memref<128x64xf32, #tpu.memory_space<vmem>>, vector<16x64xf32>
    %c2_66 = arith.constant 2 : index
    %c0_67 = arith.constant 0 : index
    %74 = tpu.strided_load %arg17[%c2_66, %c0_67] {strides = array<i32: 8, 1>} : memref<128x64xf32, #tpu.memory_space<vmem>>, vector<16x64xf32>
    %c3_68 = arith.constant 3 : index
    %c0_69 = arith.constant 0 : index
    %75 = tpu.strided_load %arg17[%c3_68, %c0_69] {strides = array<i32: 8, 1>} : memref<128x64xf32, #tpu.memory_space<vmem>>, vector<16x64xf32>
    %c4_70 = arith.constant 4 : index
    %c0_71 = arith.constant 0 : index
    %76 = tpu.strided_load %arg17[%c4_70, %c0_71] {strides = array<i32: 8, 1>} : memref<128x64xf32, #tpu.memory_space<vmem>>, vector<16x64xf32>
    %c5_72 = arith.constant 5 : index
    %c0_73 = arith.constant 0 : index
    %77 = tpu.strided_load %arg17[%c5_72, %c0_73] {strides = array<i32: 8, 1>} : memref<128x64xf32, #tpu.memory_space<vmem>>, vector<16x64xf32>
    %c6_74 = arith.constant 6 : index
    %c0_75 = arith.constant 0 : index
    %78 = tpu.strided_load %arg17[%c6_74, %c0_75] {strides = array<i32: 8, 1>} : memref<128x64xf32, #tpu.memory_space<vmem>>, vector<16x64xf32>
    %c7_76 = arith.constant 7 : index
    %c0_77 = arith.constant 0 : index
    %79 = tpu.strided_load %arg17[%c7_76, %c0_77] {strides = array<i32: 8, 1>} : memref<128x64xf32, #tpu.memory_space<vmem>>, vector<16x64xf32>
    %80 = tpu.concatenate %72, %73, %74, %75, %76, %77, %78, %79 in 1 : vector<16x64xf32>, vector<16x64xf32>, vector<16x64xf32>, vector<16x64xf32>, vector<16x64xf32>, vector<16x64xf32>, vector<16x64xf32>, vector<16x64xf32> -> vector<16x512xf32>
    %81 = arith.truncf %80 : vector<16x512xf32> to vector<16x512xbf16>
    %c16 = arith.constant 16 : index
    %c0_78 = arith.constant 0 : index
    %82 = vector.load %arg16[%c16, %c0_78] : memref<128x512xbf16, #tpu.memory_space<vmem>>, vector<16x512xbf16>
    tpu.vector_store %arg16[%c16, %c0_78], %81 {strides = array<i32>} : memref<128x512xbf16, #tpu.memory_space<vmem>>, vector<16x512xbf16>,
    %c0_79 = arith.constant 0 : index
    %c128 = arith.constant 128 : index
    %83 = vector.load %arg13[%c0_79, %c128] : memref<128x512xbf16, #tpu.memory_space<vmem>>, vector<128x64xbf16>
    %c0_80 = arith.constant 0 : index
    %c128_81 = arith.constant 128 : index
    %84 = vector.load %arg14[%c0_80, %c128_81] : memref<128x512xbf16, #tpu.memory_space<vmem>>, vector<128x64xbf16>
    %c0_82 = arith.constant 0 : index
    %c128_83 = arith.constant 128 : index
    %85 = vector.load %arg15[%c0_82, %c128_83] : memref<128x512xbf16, #tpu.memory_space<vmem>>, vector<128x64xbf16>
    %cst_84 = arith.constant dense<0.000000e+00> : vector<128x128xf32>
    %86 = tpu.matmul %83, %84, %cst_84 {dimension_numbers = #tpu.dot_dimension_numbers<[1], [1], [0], [0], [0, 0, 1, 0], [], []>} : vector<128x64xbf16>, vector<128x64xbf16>, vector<128x128xf32> -> vector<128x128xf32>
    %cst_85 = arith.constant dense<0xFF800000> : vector<128xf32>
    %87 = vector.multi_reduction <maximumf>, %86, %cst_85 [1] : vector<128x128xf32> to vector<128xf32>
    %88 = vector.shape_cast %87 : vector<128xf32> to vector<128x1xf32>
    %89 = vector.broadcast %88 : vector<128x1xf32> to vector<128x128xf32>
    %90 = arith.subf %86, %89 : vector<128x128xf32>
    %91 = math.exp %90 : vector<128x128xf32>
    %cst_86 = arith.constant dense<0.000000e+00> : vector<128xf32>
    %92 = vector.multi_reduction <add>, %91, %cst_86 [1] : vector<128x128xf32> to vector<128xf32>
    %93 = vector.shape_cast %92 : vector<128xf32> to vector<128x1xf32>
    %94 = arith.truncf %91 : vector<128x128xf32> to vector<128x128xbf16>
    %cst_87 = arith.constant dense<0.000000e+00> : vector<128x64xf32>
    %95 = tpu.matmul %94, %85, %cst_87 {dimension_numbers = #tpu.dot_dimension_numbers<[1], [0], [0], [1], [0, 0, 1, 1], [], []>} : vector<128x128xbf16>, vector<128x64xbf16>, vector<128x64xf32> -> vector<128x64xf32>
    %96 = tpu.reciprocal %93 {approx = true} : vector<128x1xf32> -> vector<128x1xf32>
    %97 = vector.broadcast %96 : vector<128x1xf32> to vector<128x64xf32>
    %98 = arith.mulf %95, %97 : vector<128x64xf32>
    %c0_88 = arith.constant 0 : index
    %c0_89 = arith.constant 0 : index
    %99 = vector.load %arg17[%c0_88, %c0_89] : memref<128x64xf32, #tpu.memory_space<vmem>>, vector<128x64xf32>
    tpu.vector_store %arg17[%c0_88, %c0_89], %98 {strides = array<i32>} : memref<128x64xf32, #tpu.memory_space<vmem>>, vector<128x64xf32>,
    %c0_90 = arith.constant 0 : index
    %c0_91 = arith.constant 0 : index
    %100 = tpu.strided_load %arg17[%c0_90, %c0_91] {strides = array<i32: 8, 1>} : memref<128x64xf32, #tpu.memory_space<vmem>>, vector<16x64xf32>
    %c1_92 = arith.constant 1 : index
    %c0_93 = arith.constant 0 : index
    %101 = tpu.strided_load %arg17[%c1_92, %c0_93] {strides = array<i32: 8, 1>} : memref<128x64xf32, #tpu.memory_space<vmem>>, vector<16x64xf32>
    %c2_94 = arith.constant 2 : index
    %c0_95 = arith.constant 0 : index
    %102 = tpu.strided_load %arg17[%c2_94, %c0_95] {strides = array<i32: 8, 1>} : memref<128x64xf32, #tpu.memory_space<vmem>>, vector<16x64xf32>
    %c3_96 = arith.constant 3 : index
    %c0_97 = arith.constant 0 : index
    %103 = tpu.strided_load %arg17[%c3_96, %c0_97] {strides = array<i32: 8, 1>} : memref<128x64xf32, #tpu.memory_space<vmem>>, vector<16x64xf32>
    %c4_98 = arith.constant 4 : index
    %c0_99 = arith.constant 0 : index
    %104 = tpu.strided_load %arg17[%c4_98, %c0_99] {strides = array<i32: 8, 1>} : memref<128x64xf32, #tpu.memory_space<vmem>>, vector<16x64xf32>
    %c5_100 = arith.constant 5 : index
    %c0_101 = arith.constant 0 : index
    %105 = tpu.strided_load %arg17[%c5_100, %c0_101] {strides = array<i32: 8, 1>} : memref<128x64xf32, #tpu.memory_space<vmem>>, vector<16x64xf32>
    %c6_102 = arith.constant 6 : index
    %c0_103 = arith.constant 0 : index
    %106 = tpu.strided_load %arg17[%c6_102, %c0_103] {strides = array<i32: 8, 1>} : memref<128x64xf32, #tpu.memory_space<vmem>>, vector<16x64xf32>
    %c7_104 = arith.constant 7 : index
    %c0_105 = arith.constant 0 : index
    %107 = tpu.strided_load %arg17[%c7_104, %c0_105] {strides = array<i32: 8, 1>} : memref<128x64xf32, #tpu.memory_space<vmem>>, vector<16x64xf32>
    %108 = tpu.concatenate %100, %101, %102, %103, %104, %105, %106, %107 in 1 : vector<16x64xf32>, vector<16x64xf32>, vector<16x64xf32>, vector<16x64xf32>, vector<16x64xf32>, vector<16x64xf32>, vector<16x64xf32>, vector<16x64xf32> -> vector<16x512xf32>
    %109 = arith.truncf %108 : vector<16x512xf32> to vector<16x512xbf16>
    %c32 = arith.constant 32 : index
    %c0_106 = arith.constant 0 : index
    %110 = vector.load %arg16[%c32, %c0_106] : memref<128x512xbf16, #tpu.memory_space<vmem>>, vector<16x512xbf16>
    tpu.vector_store %arg16[%c32, %c0_106], %109 {strides = array<i32>} : memref<128x512xbf16, #tpu.memory_space<vmem>>, vector<16x512xbf16>,
    %c0_107 = arith.constant 0 : index
    %c192 = arith.constant 192 : index
    %111 = vector.load %arg13[%c0_107, %c192] : memref<128x512xbf16, #tpu.memory_space<vmem>>, vector<128x64xbf16>
    %c0_108 = arith.constant 0 : index
    %c192_109 = arith.constant 192 : index
    %112 = vector.load %arg14[%c0_108, %c192_109] : memref<128x512xbf16, #tpu.memory_space<vmem>>, vector<128x64xbf16>
    %c0_110 = arith.constant 0 : index
    %c192_111 = arith.constant 192 : index
    %113 = vector.load %arg15[%c0_110, %c192_111] : memref<128x512xbf16, #tpu.memory_space<vmem>>, vector<128x64xbf16>
    %cst_112 = arith.constant dense<0.000000e+00> : vector<128x128xf32>
    %114 = tpu.matmul %111, %112, %cst_112 {dimension_numbers = #tpu.dot_dimension_numbers<[1], [1], [0], [0], [0, 0, 1, 0], [], []>} : vector<128x64xbf16>, vector<128x64xbf16>, vector<128x128xf32> -> vector<128x128xf32>
    %cst_113 = arith.constant dense<0xFF800000> : vector<128xf32>
    %115 = vector.multi_reduction <maximumf>, %114, %cst_113 [1] : vector<128x128xf32> to vector<128xf32>
    %116 = vector.shape_cast %115 : vector<128xf32> to vector<128x1xf32>
    %117 = vector.broadcast %116 : vector<128x1xf32> to vector<128x128xf32>
    %118 = arith.subf %114, %117 : vector<128x128xf32>
    %119 = math.exp %118 : vector<128x128xf32>
    %cst_114 = arith.constant dense<0.000000e+00> : vector<128xf32>
    %120 = vector.multi_reduction <add>, %119, %cst_114 [1] : vector<128x128xf32> to vector<128xf32>
    %121 = vector.shape_cast %120 : vector<128xf32> to vector<128x1xf32>
    %122 = arith.truncf %119 : vector<128x128xf32> to vector<128x128xbf16>
    %cst_115 = arith.constant dense<0.000000e+00> : vector<128x64xf32>
    %123 = tpu.matmul %122, %113, %cst_115 {dimension_numbers = #tpu.dot_dimension_numbers<[1], [0], [0], [1], [0, 0, 1, 1], [], []>} : vector<128x128xbf16>, vector<128x64xbf16>, vector<128x64xf32> -> vector<128x64xf32>
    %124 = tpu.reciprocal %121 {approx = true} : vector<128x1xf32> -> vector<128x1xf32>
    %125 = vector.broadcast %124 : vector<128x1xf32> to vector<128x64xf32>
    %126 = arith.mulf %123, %125 : vector<128x64xf32>
    %c0_116 = arith.constant 0 : index
    %c0_117 = arith.constant 0 : index
    %127 = vector.load %arg17[%c0_116, %c0_117] : memref<128x64xf32, #tpu.memory_space<vmem>>, vector<128x64xf32>
    tpu.vector_store %arg17[%c0_116, %c0_117], %126 {strides = array<i32>} : memref<128x64xf32, #tpu.memory_space<vmem>>, vector<128x64xf32>,
    %c0_118 = arith.constant 0 : index
    %c0_119 = arith.constant 0 : index
    %128 = tpu.strided_load %arg17[%c0_118, %c0_119] {strides = array<i32: 8, 1>} : memref<128x64xf32, #tpu.memory_space<vmem>>, vector<16x64xf32>
    %c1_120 = arith.constant 1 : index
    %c0_121 = arith.constant 0 : index
    %129 = tpu.strided_load %arg17[%c1_120, %c0_121] {strides = array<i32: 8, 1>} : memref<128x64xf32, #tpu.memory_space<vmem>>, vector<16x64xf32>
    %c2_122 = arith.constant 2 : index
    %c0_123 = arith.constant 0 : index
    %130 = tpu.strided_load %arg17[%c2_122, %c0_123] {strides = array<i32: 8, 1>} : memref<128x64xf32, #tpu.memory_space<vmem>>, vector<16x64xf32>
    %c3_124 = arith.constant 3 : index
    %c0_125 = arith.constant 0 : index
    %131 = tpu.strided_load %arg17[%c3_124, %c0_125] {strides = array<i32: 8, 1>} : memref<128x64xf32, #tpu.memory_space<vmem>>, vector<16x64xf32>
    %c4_126 = arith.constant 4 : index
    %c0_127 = arith.constant 0 : index
    %132 = tpu.strided_load %arg17[%c4_126, %c0_127] {strides = array<i32: 8, 1>} : memref<128x64xf32, #tpu.memory_space<vmem>>, vector<16x64xf32>
    %c5_128 = arith.constant 5 : index
    %c0_129 = arith.constant 0 : index
    %133 = tpu.strided_load %arg17[%c5_128, %c0_129] {strides = array<i32: 8, 1>} : memref<128x64xf32, #tpu.memory_space<vmem>>, vector<16x64xf32>
    %c6_130 = arith.constant 6 : index
    %c0_131 = arith.constant 0 : index
    %134 = tpu.strided_load %arg17[%c6_130, %c0_131] {strides = array<i32: 8, 1>} : memref<128x64xf32, #tpu.memory_space<vmem>>, vector<16x64xf32>
    %c7_132 = arith.constant 7 : index
    %c0_133 = arith.constant 0 : index
    %135 = tpu.strided_load %arg17[%c7_132, %c0_133] {strides = array<i32: 8, 1>} : memref<128x64xf32, #tpu.memory_space<vmem>>, vector<16x64xf32>
    %136 = tpu.concatenate %128, %129, %130, %131, %132, %133, %134, %135 in 1 : vector<16x64xf32>, vector<16x64xf32>, vector<16x64xf32>, vector<16x64xf32>, vector<16x64xf32>, vector<16x64xf32>, vector<16x64xf32>, vector<16x64xf32> -> vector<16x512xf32>
    %137 = arith.truncf %136 : vector<16x512xf32> to vector<16x512xbf16>
    %c48 = arith.constant 48 : index
    %c0_134 = arith.constant 0 : index
    %138 = vector.load %arg16[%c48, %c0_134] : memref<128x512xbf16, #tpu.memory_space<vmem>>, vector<16x512xbf16>
    tpu.vector_store %arg16[%c48, %c0_134], %137 {strides = array<i32>} : memref<128x512xbf16, #tpu.memory_space<vmem>>, vector<16x512xbf16>,
    %c0_135 = arith.constant 0 : index
    %c256 = arith.constant 256 : index
    %139 = vector.load %arg13[%c0_135, %c256] : memref<128x512xbf16, #tpu.memory_space<vmem>>, vector<128x64xbf16>
    %c0_136 = arith.constant 0 : index
    %c256_137 = arith.constant 256 : index
    %140 = vector.load %arg14[%c0_136, %c256_137] : memref<128x512xbf16, #tpu.memory_space<vmem>>, vector<128x64xbf16>
    %c0_138 = arith.constant 0 : index
    %c256_139 = arith.constant 256 : index
    %141 = vector.load %arg15[%c0_138, %c256_139] : memref<128x512xbf16, #tpu.memory_space<vmem>>, vector<128x64xbf16>
    %cst_140 = arith.constant dense<0.000000e+00> : vector<128x128xf32>
    %142 = tpu.matmul %139, %140, %cst_140 {dimension_numbers = #tpu.dot_dimension_numbers<[1], [1], [0], [0], [0, 0, 1, 0], [], []>} : vector<128x64xbf16>, vector<128x64xbf16>, vector<128x128xf32> -> vector<128x128xf32>
    %cst_141 = arith.constant dense<0xFF800000> : vector<128xf32>
    %143 = vector.multi_reduction <maximumf>, %142, %cst_141 [1] : vector<128x128xf32> to vector<128xf32>
    %144 = vector.shape_cast %143 : vector<128xf32> to vector<128x1xf32>
    %145 = vector.broadcast %144 : vector<128x1xf32> to vector<128x128xf32>
    %146 = arith.subf %142, %145 : vector<128x128xf32>
    %147 = math.exp %146 : vector<128x128xf32>
    %cst_142 = arith.constant dense<0.000000e+00> : vector<128xf32>
    %148 = vector.multi_reduction <add>, %147, %cst_142 [1] : vector<128x128xf32> to vector<128xf32>
    %149 = vector.shape_cast %148 : vector<128xf32> to vector<128x1xf32>
    %150 = arith.truncf %147 : vector<128x128xf32> to vector<128x128xbf16>
    %cst_143 = arith.constant dense<0.000000e+00> : vector<128x64xf32>
    %151 = tpu.matmul %150, %141, %cst_143 {dimension_numbers = #tpu.dot_dimension_numbers<[1], [0], [0], [1], [0, 0, 1, 1], [], []>} : vector<128x128xbf16>, vector<128x64xbf16>, vector<128x64xf32> -> vector<128x64xf32>
    %152 = tpu.reciprocal %149 {approx = true} : vector<128x1xf32> -> vector<128x1xf32>
    %153 = vector.broadcast %152 : vector<128x1xf32> to vector<128x64xf32>
    %154 = arith.mulf %151, %153 : vector<128x64xf32>
    %c0_144 = arith.constant 0 : index
    %c0_145 = arith.constant 0 : index
    %155 = vector.load %arg17[%c0_144, %c0_145] : memref<128x64xf32, #tpu.memory_space<vmem>>, vector<128x64xf32>
    tpu.vector_store %arg17[%c0_144, %c0_145], %154 {strides = array<i32>} : memref<128x64xf32, #tpu.memory_space<vmem>>, vector<128x64xf32>,
    %c0_146 = arith.constant 0 : index
    %c0_147 = arith.constant 0 : index
    %156 = tpu.strided_load %arg17[%c0_146, %c0_147] {strides = array<i32: 8, 1>} : memref<128x64xf32, #tpu.memory_space<vmem>>, vector<16x64xf32>
    %c1_148 = arith.constant 1 : index
    %c0_149 = arith.constant 0 : index
    %157 = tpu.strided_load %arg17[%c1_148, %c0_149] {strides = array<i32: 8, 1>} : memref<128x64xf32, #tpu.memory_space<vmem>>, vector<16x64xf32>
    %c2_150 = arith.constant 2 : index
    %c0_151 = arith.constant 0 : index
    %158 = tpu.strided_load %arg17[%c2_150, %c0_151] {strides = array<i32: 8, 1>} : memref<128x64xf32, #tpu.memory_space<vmem>>, vector<16x64xf32>
    %c3_152 = arith.constant 3 : index
    %c0_153 = arith.constant 0 : index
    %159 = tpu.strided_load %arg17[%c3_152, %c0_153] {strides = array<i32: 8, 1>} : memref<128x64xf32, #tpu.memory_space<vmem>>, vector<16x64xf32>
    %c4_154 = arith.constant 4 : index
    %c0_155 = arith.constant 0 : index
    %160 = tpu.strided_load %arg17[%c4_154, %c0_155] {strides = array<i32: 8, 1>} : memref<128x64xf32, #tpu.memory_space<vmem>>, vector<16x64xf32>
    %c5_156 = arith.constant 5 : index
    %c0_157 = arith.constant 0 : index
    %161 = tpu.strided_load %arg17[%c5_156, %c0_157] {strides = array<i32: 8, 1>} : memref<128x64xf32, #tpu.memory_space<vmem>>, vector<16x64xf32>
    %c6_158 = arith.constant 6 : index
    %c0_159 = arith.constant 0 : index
    %162 = tpu.strided_load %arg17[%c6_158, %c0_159] {strides = array<i32: 8, 1>} : memref<128x64xf32, #tpu.memory_space<vmem>>, vector<16x64xf32>
    %c7_160 = arith.constant 7 : index
    %c0_161 = arith.constant 0 : index
    %163 = tpu.strided_load %arg17[%c7_160, %c0_161] {strides = array<i32: 8, 1>} : memref<128x64xf32, #tpu.memory_space<vmem>>, vector<16x64xf32>
    %164 = tpu.concatenate %156, %157, %158, %159, %160, %161, %162, %163 in 1 : vector<16x64xf32>, vector<16x64xf32>, vector<16x64xf32>, vector<16x64xf32>, vector<16x64xf32>, vector<16x64xf32>, vector<16x64xf32>, vector<16x64xf32> -> vector<16x512xf32>
    %165 = arith.truncf %164 : vector<16x512xf32> to vector<16x512xbf16>
    %c64_162 = arith.constant 64 : index
    %c0_163 = arith.constant 0 : index
    %166 = vector.load %arg16[%c64_162, %c0_163] : memref<128x512xbf16, #tpu.memory_space<vmem>>, vector<16x512xbf16>
    tpu.vector_store %arg16[%c64_162, %c0_163], %165 {strides = array<i32>} : memref<128x512xbf16, #tpu.memory_space<vmem>>, vector<16x512xbf16>,
    %c0_164 = arith.constant 0 : index
    %c320 = arith.constant 320 : index
    %167 = vector.load %arg13[%c0_164, %c320] : memref<128x512xbf16, #tpu.memory_space<vmem>>, vector<128x64xbf16>
    %c0_165 = arith.constant 0 : index
    %c320_166 = arith.constant 320 : index
    %168 = vector.load %arg14[%c0_165, %c320_166] : memref<128x512xbf16, #tpu.memory_space<vmem>>, vector<128x64xbf16>
    %c0_167 = arith.constant 0 : index
    %c320_168 = arith.constant 320 : index
    %169 = vector.load %arg15[%c0_167, %c320_168] : memref<128x512xbf16, #tpu.memory_space<vmem>>, vector<128x64xbf16>
    %cst_169 = arith.constant dense<0.000000e+00> : vector<128x128xf32>
    %170 = tpu.matmul %167, %168, %cst_169 {dimension_numbers = #tpu.dot_dimension_numbers<[1], [1], [0], [0], [0, 0, 1, 0], [], []>} : vector<128x64xbf16>, vector<128x64xbf16>, vector<128x128xf32> -> vector<128x128xf32>
    %cst_170 = arith.constant dense<0xFF800000> : vector<128xf32>
    %171 = vector.multi_reduction <maximumf>, %170, %cst_170 [1] : vector<128x128xf32> to vector<128xf32>
    %172 = vector.shape_cast %171 : vector<128xf32> to vector<128x1xf32>
    %173 = vector.broadcast %172 : vector<128x1xf32> to vector<128x128xf32>
    %174 = arith.subf %170, %173 : vector<128x128xf32>
    %175 = math.exp %174 : vector<128x128xf32>
    %cst_171 = arith.constant dense<0.000000e+00> : vector<128xf32>
    %176 = vector.multi_reduction <add>, %175, %cst_171 [1] : vector<128x128xf32> to vector<128xf32>
    %177 = vector.shape_cast %176 : vector<128xf32> to vector<128x1xf32>
    %178 = arith.truncf %175 : vector<128x128xf32> to vector<128x128xbf16>
    %cst_172 = arith.constant dense<0.000000e+00> : vector<128x64xf32>
    %179 = tpu.matmul %178, %169, %cst_172 {dimension_numbers = #tpu.dot_dimension_numbers<[1], [0], [0], [1], [0, 0, 1, 1], [], []>} : vector<128x128xbf16>, vector<128x64xbf16>, vector<128x64xf32> -> vector<128x64xf32>
    %180 = tpu.reciprocal %177 {approx = true} : vector<128x1xf32> -> vector<128x1xf32>
    %181 = vector.broadcast %180 : vector<128x1xf32> to vector<128x64xf32>
    %182 = arith.mulf %179, %181 : vector<128x64xf32>
    %c0_173 = arith.constant 0 : index
    %c0_174 = arith.constant 0 : index
    %183 = vector.load %arg17[%c0_173, %c0_174] : memref<128x64xf32, #tpu.memory_space<vmem>>, vector<128x64xf32>
    tpu.vector_store %arg17[%c0_173, %c0_174], %182 {strides = array<i32>} : memref<128x64xf32, #tpu.memory_space<vmem>>, vector<128x64xf32>,
    %c0_175 = arith.constant 0 : index
    %c0_176 = arith.constant 0 : index
    %184 = tpu.strided_load %arg17[%c0_175, %c0_176] {strides = array<i32: 8, 1>} : memref<128x64xf32, #tpu.memory_space<vmem>>, vector<16x64xf32>
    %c1_177 = arith.constant 1 : index
    %c0_178 = arith.constant 0 : index
    %185 = tpu.strided_load %arg17[%c1_177, %c0_178] {strides = array<i32: 8, 1>} : memref<128x64xf32, #tpu.memory_space<vmem>>, vector<16x64xf32>
    %c2_179 = arith.constant 2 : index
    %c0_180 = arith.constant 0 : index
    %186 = tpu.strided_load %arg17[%c2_179, %c0_180] {strides = array<i32: 8, 1>} : memref<128x64xf32, #tpu.memory_space<vmem>>, vector<16x64xf32>
    %c3_181 = arith.constant 3 : index
    %c0_182 = arith.constant 0 : index
    %187 = tpu.strided_load %arg17[%c3_181, %c0_182] {strides = array<i32: 8, 1>} : memref<128x64xf32, #tpu.memory_space<vmem>>, vector<16x64xf32>
    %c4_183 = arith.constant 4 : index
    %c0_184 = arith.constant 0 : index
    %188 = tpu.strided_load %arg17[%c4_183, %c0_184] {strides = array<i32: 8, 1>} : memref<128x64xf32, #tpu.memory_space<vmem>>, vector<16x64xf32>
    %c5_185 = arith.constant 5 : index
    %c0_186 = arith.constant 0 : index
    %189 = tpu.strided_load %arg17[%c5_185, %c0_186] {strides = array<i32: 8, 1>} : memref<128x64xf32, #tpu.memory_space<vmem>>, vector<16x64xf32>
    %c6_187 = arith.constant 6 : index
    %c0_188 = arith.constant 0 : index
    %190 = tpu.strided_load %arg17[%c6_187, %c0_188] {strides = array<i32: 8, 1>} : memref<128x64xf32, #tpu.memory_space<vmem>>, vector<16x64xf32>
    %c7_189 = arith.constant 7 : index
    %c0_190 = arith.constant 0 : index
    %191 = tpu.strided_load %arg17[%c7_189, %c0_190] {strides = array<i32: 8, 1>} : memref<128x64xf32, #tpu.memory_space<vmem>>, vector<16x64xf32>
    %192 = tpu.concatenate %184, %185, %186, %187, %188, %189, %190, %191 in 1 : vector<16x64xf32>, vector<16x64xf32>, vector<16x64xf32>, vector<16x64xf32>, vector<16x64xf32>, vector<16x64xf32>, vector<16x64xf32>, vector<16x64xf32> -> vector<16x512xf32>
    %193 = arith.truncf %192 : vector<16x512xf32> to vector<16x512xbf16>
    %c80 = arith.constant 80 : index
    %c0_191 = arith.constant 0 : index
    %194 = vector.load %arg16[%c80, %c0_191] : memref<128x512xbf16, #tpu.memory_space<vmem>>, vector<16x512xbf16>
    tpu.vector_store %arg16[%c80, %c0_191], %193 {strides = array<i32>} : memref<128x512xbf16, #tpu.memory_space<vmem>>, vector<16x512xbf16>,
    %c0_192 = arith.constant 0 : index
    %c384 = arith.constant 384 : index
    %195 = vector.load %arg13[%c0_192, %c384] : memref<128x512xbf16, #tpu.memory_space<vmem>>, vector<128x64xbf16>
    %c0_193 = arith.constant 0 : index
    %c384_194 = arith.constant 384 : index
    %196 = vector.load %arg14[%c0_193, %c384_194] : memref<128x512xbf16, #tpu.memory_space<vmem>>, vector<128x64xbf16>
    %c0_195 = arith.constant 0 : index
    %c384_196 = arith.constant 384 : index
    %197 = vector.load %arg15[%c0_195, %c384_196] : memref<128x512xbf16, #tpu.memory_space<vmem>>, vector<128x64xbf16>
    %cst_197 = arith.constant dense<0.000000e+00> : vector<128x128xf32>
    %198 = tpu.matmul %195, %196, %cst_197 {dimension_numbers = #tpu.dot_dimension_numbers<[1], [1], [0], [0], [0, 0, 1, 0], [], []>} : vector<128x64xbf16>, vector<128x64xbf16>, vector<128x128xf32> -> vector<128x128xf32>
    %cst_198 = arith.constant dense<0xFF800000> : vector<128xf32>
    %199 = vector.multi_reduction <maximumf>, %198, %cst_198 [1] : vector<128x128xf32> to vector<128xf32>
    %200 = vector.shape_cast %199 : vector<128xf32> to vector<128x1xf32>
    %201 = vector.broadcast %200 : vector<128x1xf32> to vector<128x128xf32>
    %202 = arith.subf %198, %201 : vector<128x128xf32>
    %203 = math.exp %202 : vector<128x128xf32>
    %cst_199 = arith.constant dense<0.000000e+00> : vector<128xf32>
    %204 = vector.multi_reduction <add>, %203, %cst_199 [1] : vector<128x128xf32> to vector<128xf32>
    %205 = vector.shape_cast %204 : vector<128xf32> to vector<128x1xf32>
    %206 = arith.truncf %203 : vector<128x128xf32> to vector<128x128xbf16>
    %cst_200 = arith.constant dense<0.000000e+00> : vector<128x64xf32>
    %207 = tpu.matmul %206, %197, %cst_200 {dimension_numbers = #tpu.dot_dimension_numbers<[1], [0], [0], [1], [0, 0, 1, 1], [], []>} : vector<128x128xbf16>, vector<128x64xbf16>, vector<128x64xf32> -> vector<128x64xf32>
    %208 = tpu.reciprocal %205 {approx = true} : vector<128x1xf32> -> vector<128x1xf32>
    %209 = vector.broadcast %208 : vector<128x1xf32> to vector<128x64xf32>
    %210 = arith.mulf %207, %209 : vector<128x64xf32>
    %c0_201 = arith.constant 0 : index
    %c0_202 = arith.constant 0 : index
    %211 = vector.load %arg17[%c0_201, %c0_202] : memref<128x64xf32, #tpu.memory_space<vmem>>, vector<128x64xf32>
    tpu.vector_store %arg17[%c0_201, %c0_202], %210 {strides = array<i32>} : memref<128x64xf32, #tpu.memory_space<vmem>>, vector<128x64xf32>,
    %c0_203 = arith.constant 0 : index
    %c0_204 = arith.constant 0 : index
    %212 = tpu.strided_load %arg17[%c0_203, %c0_204] {strides = array<i32: 8, 1>} : memref<128x64xf32, #tpu.memory_space<vmem>>, vector<16x64xf32>
    %c1_205 = arith.constant 1 : index
    %c0_206 = arith.constant 0 : index
    %213 = tpu.strided_load %arg17[%c1_205, %c0_206] {strides = array<i32: 8, 1>} : memref<128x64xf32, #tpu.memory_space<vmem>>, vector<16x64xf32>
    %c2_207 = arith.constant 2 : index
    %c0_208 = arith.constant 0 : index
    %214 = tpu.strided_load %arg17[%c2_207, %c0_208] {strides = array<i32: 8, 1>} : memref<128x64xf32, #tpu.memory_space<vmem>>, vector<16x64xf32>
    %c3_209 = arith.constant 3 : index
    %c0_210 = arith.constant 0 : index
    %215 = tpu.strided_load %arg17[%c3_209, %c0_210] {strides = array<i32: 8, 1>} : memref<128x64xf32, #tpu.memory_space<vmem>>, vector<16x64xf32>
    %c4_211 = arith.constant 4 : index
    %c0_212 = arith.constant 0 : index
    %216 = tpu.strided_load %arg17[%c4_211, %c0_212] {strides = array<i32: 8, 1>} : memref<128x64xf32, #tpu.memory_space<vmem>>, vector<16x64xf32>
    %c5_213 = arith.constant 5 : index
    %c0_214 = arith.constant 0 : index
    %217 = tpu.strided_load %arg17[%c5_213, %c0_214] {strides = array<i32: 8, 1>} : memref<128x64xf32, #tpu.memory_space<vmem>>, vector<16x64xf32>
    %c6_215 = arith.constant 6 : index
    %c0_216 = arith.constant 0 : index
    %218 = tpu.strided_load %arg17[%c6_215, %c0_216] {strides = array<i32: 8, 1>} : memref<128x64xf32, #tpu.memory_space<vmem>>, vector<16x64xf32>
    %c7_217 = arith.constant 7 : index
    %c0_218 = arith.constant 0 : index
    %219 = tpu.strided_load %arg17[%c7_217, %c0_218] {strides = array<i32: 8, 1>} : memref<128x64xf32, #tpu.memory_space<vmem>>, vector<16x64xf32>
    %220 = tpu.concatenate %212, %213, %214, %215, %216, %217, %218, %219 in 1 : vector<16x64xf32>, vector<16x64xf32>, vector<16x64xf32>, vector<16x64xf32>, vector<16x64xf32>, vector<16x64xf32>, vector<16x64xf32>, vector<16x64xf32> -> vector<16x512xf32>
    %221 = arith.truncf %220 : vector<16x512xf32> to vector<16x512xbf16>
    %c96 = arith.constant 96 : index
    %c0_219 = arith.constant 0 : index
    %222 = vector.load %arg16[%c96, %c0_219] : memref<128x512xbf16, #tpu.memory_space<vmem>>, vector<16x512xbf16>
    tpu.vector_store %arg16[%c96, %c0_219], %221 {strides = array<i32>} : memref<128x512xbf16, #tpu.memory_space<vmem>>, vector<16x512xbf16>,
    %c0_220 = arith.constant 0 : index
    %c448 = arith.constant 448 : index
    %223 = vector.load %arg13[%c0_220, %c448] : memref<128x512xbf16, #tpu.memory_space<vmem>>, vector<128x64xbf16>
    %c0_221 = arith.constant 0 : index
    %c448_222 = arith.constant 448 : index
    %224 = vector.load %arg14[%c0_221, %c448_222] : memref<128x512xbf16, #tpu.memory_space<vmem>>, vector<128x64xbf16>
    %c0_223 = arith.constant 0 : index
    %c448_224 = arith.constant 448 : index
    %225 = vector.load %arg15[%c0_223, %c448_224] : memref<128x512xbf16, #tpu.memory_space<vmem>>, vector<128x64xbf16>
    %cst_225 = arith.constant dense<0.000000e+00> : vector<128x128xf32>
    %226 = tpu.matmul %223, %224, %cst_225 {dimension_numbers = #tpu.dot_dimension_numbers<[1], [1], [0], [0], [0, 0, 1, 0], [], []>} : vector<128x64xbf16>, vector<128x64xbf16>, vector<128x128xf32> -> vector<128x128xf32>
    %cst_226 = arith.constant dense<0xFF800000> : vector<128xf32>
    %227 = vector.multi_reduction <maximumf>, %226, %cst_226 [1] : vector<128x128xf32> to vector<128xf32>
    %228 = vector.shape_cast %227 : vector<128xf32> to vector<128x1xf32>
    %229 = vector.broadcast %228 : vector<128x1xf32> to vector<128x128xf32>
    %230 = arith.subf %226, %229 : vector<128x128xf32>
    %231 = math.exp %230 : vector<128x128xf32>
    %cst_227 = arith.constant dense<0.000000e+00> : vector<128xf32>
    %232 = vector.multi_reduction <add>, %231, %cst_227 [1] : vector<128x128xf32> to vector<128xf32>
    %233 = vector.shape_cast %232 : vector<128xf32> to vector<128x1xf32>
    %234 = arith.truncf %231 : vector<128x128xf32> to vector<128x128xbf16>
    %cst_228 = arith.constant dense<0.000000e+00> : vector<128x64xf32>
    %235 = tpu.matmul %234, %225, %cst_228 {dimension_numbers = #tpu.dot_dimension_numbers<[1], [0], [0], [1], [0, 0, 1, 1], [], []>} : vector<128x128xbf16>, vector<128x64xbf16>, vector<128x64xf32> -> vector<128x64xf32>
    %236 = tpu.reciprocal %233 {approx = true} : vector<128x1xf32> -> vector<128x1xf32>
    %237 = vector.broadcast %236 : vector<128x1xf32> to vector<128x64xf32>
    %238 = arith.mulf %235, %237 : vector<128x64xf32>
    %c0_229 = arith.constant 0 : index
    %c0_230 = arith.constant 0 : index
    %239 = vector.load %arg17[%c0_229, %c0_230] : memref<128x64xf32, #tpu.memory_space<vmem>>, vector<128x64xf32>
    tpu.vector_store %arg17[%c0_229, %c0_230], %238 {strides = array<i32>} : memref<128x64xf32, #tpu.memory_space<vmem>>, vector<128x64xf32>,
    %c0_231 = arith.constant 0 : index
    %c0_232 = arith.constant 0 : index
    %240 = tpu.strided_load %arg17[%c0_231, %c0_232] {strides = array<i32: 8, 1>} : memref<128x64xf32, #tpu.memory_space<vmem>>, vector<16x64xf32>
    %c1_233 = arith.constant 1 : index
    %c0_234 = arith.constant 0 : index
    %241 = tpu.strided_load %arg17[%c1_233, %c0_234] {strides = array<i32: 8, 1>} : memref<128x64xf32, #tpu.memory_space<vmem>>, vector<16x64xf32>
    %c2_235 = arith.constant 2 : index
    %c0_236 = arith.constant 0 : index
    %242 = tpu.strided_load %arg17[%c2_235, %c0_236] {strides = array<i32: 8, 1>} : memref<128x64xf32, #tpu.memory_space<vmem>>, vector<16x64xf32>
    %c3_237 = arith.constant 3 : index
    %c0_238 = arith.constant 0 : index
    %243 = tpu.strided_load %arg17[%c3_237, %c0_238] {strides = array<i32: 8, 1>} : memref<128x64xf32, #tpu.memory_space<vmem>>, vector<16x64xf32>
    %c4_239 = arith.constant 4 : index
    %c0_240 = arith.constant 0 : index
    %244 = tpu.strided_load %arg17[%c4_239, %c0_240] {strides = array<i32: 8, 1>} : memref<128x64xf32, #tpu.memory_space<vmem>>, vector<16x64xf32>
    %c5_241 = arith.constant 5 : index
    %c0_242 = arith.constant 0 : index
    %245 = tpu.strided_load %arg17[%c5_241, %c0_242] {strides = array<i32: 8, 1>} : memref<128x64xf32, #tpu.memory_space<vmem>>, vector<16x64xf32>
    %c6_243 = arith.constant 6 : index
    %c0_244 = arith.constant 0 : index
    %246 = tpu.strided_load %arg17[%c6_243, %c0_244] {strides = array<i32: 8, 1>} : memref<128x64xf32, #tpu.memory_space<vmem>>, vector<16x64xf32>
    %c7_245 = arith.constant 7 : index
    %c0_246 = arith.constant 0 : index
    %247 = tpu.strided_load %arg17[%c7_245, %c0_246] {strides = array<i32: 8, 1>} : memref<128x64xf32, #tpu.memory_space<vmem>>, vector<16x64xf32>
    %248 = tpu.concatenate %240, %241, %242, %243, %244, %245, %246, %247 in 1 : vector<16x64xf32>, vector<16x64xf32>, vector<16x64xf32>, vector<16x64xf32>, vector<16x64xf32>, vector<16x64xf32>, vector<16x64xf32>, vector<16x64xf32> -> vector<16x512xf32>
    %249 = arith.truncf %248 : vector<16x512xf32> to vector<16x512xbf16>
    %c112 = arith.constant 112 : index
    %c0_247 = arith.constant 0 : index
    %250 = vector.load %arg16[%c112, %c0_247] : memref<128x512xbf16, #tpu.memory_space<vmem>>, vector<16x512xbf16>
    tpu.vector_store %arg16[%c112, %c0_247], %249 {strides = array<i32>} : memref<128x512xbf16, #tpu.memory_space<vmem>>, vector<16x512xbf16>,
    %c0_248 = arith.constant 0 : index
    %c0_249 = arith.constant 0 : index
    %251 = vector.load %arg16[%c0_248, %c0_249] : memref<128x512xbf16, #tpu.memory_space<vmem>>, vector<128x512xbf16>
    %c0_250 = arith.constant 0 : index
    %c0_251 = arith.constant 0 : index
    %252 = vector.load %arg7[%c0_250, %c0_251] : memref<512x512xbf16, #tpu.memory_space<vmem>>, vector<512x512xbf16>
    %cst_252 = arith.constant dense<0.000000e+00> : vector<128x512xf32>
    %253 = tpu.matmul %251, %252, %cst_252 {dimension_numbers = #tpu.dot_dimension_numbers<[1], [0], [0], [1], [0, 0, 1, 1], [], []>} : vector<128x512xbf16>, vector<512x512xbf16>, vector<128x512xf32> -> vector<128x512xf32>
    %c0_253 = arith.constant 0 : index
    %c0_254 = arith.constant 0 : index
    %254 = vector.load %arg11[%c0_253, %c0_254] : memref<1x512xf32, #tpu.memory_space<vmem>>, vector<1x512xf32>
    %255 = vector.broadcast %254 : vector<1x512xf32> to vector<128x512xf32>
    %256 = arith.addf %253, %255 : vector<128x512xf32>
    %c0_255 = arith.constant 0 : index
    %c0_256 = arith.constant 0 : index
    %c0_257 = arith.constant 0 : index
    %257 = vector.load %arg12[%c0_255, %c0_256, %c0_257] : memref<1x128x512xf32, #tpu.memory_space<vmem>>, vector<1x128x512xf32>
    %258 = vector.shape_cast %257 : vector<1x128x512xf32> to vector<128x512xf32>
    %259 = vector.shape_cast %256 : vector<128x512xf32> to vector<1x128x512xf32>
    tpu.vector_store %arg12[%c0_255, %c0_256, %c0_257], %259 {strides = array<i32>} : memref<1x128x512xf32, #tpu.memory_space<vmem>>, vector<1x128x512xf32>,
    return
  }
  func.func @transform_0(%arg0: i32) -> (i32, i32, i32) {
    %c0_i32 = arith.constant 0 : i32
    %c0_i32_0 = arith.constant 0 : i32
    %c0_i32_1 = arith.constant 0 : i32
    return %arg0, %c0_i32, %c0_i32_0 : i32, i32, i32
  }
  func.func @transform_1(%arg0: i32) -> (i32, i32, i32) {
    %c0_i32 = arith.constant 0 : i32
    %c0_i32_0 = arith.constant 0 : i32
    %c0_i32_1 = arith.constant 0 : i32
    return %arg0, %c0_i32, %c0_i32_0 : i32, i32, i32
  }
  func.func @transform_2(%arg0: i32) -> (i32, i32, i32) {
    %c0_i32 = arith.constant 0 : i32
    %c0_i32_0 = arith.constant 0 : i32
    %c0_i32_1 = arith.constant 0 : i32
    return %arg0, %c0_i32, %c0_i32_0 : i32, i32, i32
  }
  func.func @transform_3(%arg0: i32) -> (i32, i32) {
    %c0_i32 = arith.constant 0 : i32
    %c0_i32_0 = arith.constant 0 : i32
    %c0_i32_1 = arith.constant 0 : i32
    return %c0_i32, %c0_i32_0 : i32, i32
  }
  func.func @transform_4(%arg0: i32) -> (i32, i32) {
    %c0_i32 = arith.constant 0 : i32
    %c0_i32_0 = arith.constant 0 : i32
    %c0_i32_1 = arith.constant 0 : i32
    return %c0_i32, %c0_i32_0 : i32, i32
  }
  func.func @transform_5(%arg0: i32) -> (i32, i32) {
    %c0_i32 = arith.constant 0 : i32
    %c0_i32_0 = arith.constant 0 : i32
    %c0_i32_1 = arith.constant 0 : i32
    return %c0_i32, %c0_i32_0 : i32, i32
  }
  func.func @transform_6(%arg0: i32) -> (i32, i32) {
    %c0_i32 = arith.constant 0 : i32
    %c0_i32_0 = arith.constant 0 : i32
    %c0_i32_1 = arith.constant 0 : i32
    return %c0_i32, %c0_i32_0 : i32, i32
  }
  func.func @transform_7(%arg0: i32) -> (i32, i32) {
    %c0_i32 = arith.constant 0 : i32
    %c0_i32_0 = arith.constant 0 : i32
    %c0_i32_1 = arith.constant 0 : i32
    return %c0_i32, %c0_i32_0 : i32, i32
  }
  func.func @transform_8(%arg0: i32) -> (i32, i32) {
    %c0_i32 = arith.constant 0 : i32
    %c0_i32_0 = arith.constant 0 : i32
    %c0_i32_1 = arith.constant 0 : i32
    return %c0_i32, %c0_i32_0 : i32, i32
  }
  func.func @transform_9(%arg0: i32) -> (i32, i32) {
    %c0_i32 = arith.constant 0 : i32
    %c0_i32_0 = arith.constant 0 : i32
    %c0_i32_1 = arith.constant 0 : i32
    return %c0_i32, %c0_i32_0 : i32, i32
  }
  func.func @transform_10(%arg0: i32) -> (i32, i32) {
    %c0_i32 = arith.constant 0 : i32
    %c0_i32_0 = arith.constant 0 : i32
    %c0_i32_1 = arith.constant 0 : i32
    return %c0_i32, %c0_i32_0 : i32, i32
  }
  func.func @transform_11(%arg0: i32) -> (i32, i32, i32) {
    %c0_i32 = arith.constant 0 : i32
    %c0_i32_0 = arith.constant 0 : i32
    %c0_i32_1 = arith.constant 0 : i32
    return %arg0, %c0_i32, %c0_i32_0 : i32, i32, i32
  }
}

</mosaic_0001>

<bundles_post_ra>
// kernel: tpu_custom_call.1
= control target key start
LH: loop header
LB: loop body
LE: loop exit
PB: predicated region body
PF: predicated region fallthrough
CT: control target
= control target key end

     0   :  { %s19477_s0 = inlined_call_operand.hbm [shape: bf16[2,128,512], index: 0, kind: input, shape index: {}]   ;;  %s19478_s1 = inlined_call_operand.hbm [shape: bf16[2,128,512], index: 1, kind: input, shape index: {}]   ;;  %s19479_s2 = inlined_call_operand.hbm [shape: bf16[2,128,512], index: 2, kind: input, shape index: {}]   ;;  %s19480_s3 = inlined_call_operand.hbm [shape: bf16[512,512], index: 3, kind: input, shape index: {}]   ;;  %s19481_s4 = inlined_call_operand.hbm [shape: bf16[512,512], index: 4, kind: input, shape index: {}]   ;;  %s19482_s5 = inlined_call_operand.hbm [shape: bf16[512,512], index: 5, kind: input, shape index: {}]   ;;  %s19483_s6 = inlined_call_operand.hbm [shape: bf16[512,512], index: 6, kind: input, shape index: {}]   ;;  %s19484_s7 = inlined_call_operand.vmem [shape: f32[1,512], index: 7, kind: input, shape index: {}]   ;;  %s19485_s8 = inlined_call_operand.vmem [shape: f32[1,512], index: 8, kind: input, shape index: {}]   ;;  %s19486_s9 = inlined_call_operand.vmem [shape: f32[1,512], index: 9, kind: input, shape index: {}]   ;;  %s19487_s10 = inlined_call_operand.vmem [shape: f32[1,512], index: 10, kind: input, shape index: {}]   ;;  %s19488_s11 = inlined_call_operand.hbm [shape: f32[2,128,512], index: 11, kind: output, shape index: {}]  }
   0x1   :  { %19670 = sst [smem:[#allocation201_spill]] %s19478_s1 }
   0x2   :  { %19671 = sst [smem:[#allocation202_spill]] %s19480_s3 }
   0x3   :  { %19672 = sst [smem:[#allocation203_spill]] %s19482_s5 }
   0x4   :  { %19673 = sst [smem:[#allocation204_spill]] %s19485_s8 }
   0x5   :  { %19674 = sst [smem:[#allocation205_spill]] %s19486_s9 }
   0x6   :  { %19675 = sst [smem:[#allocation206_spill]] %s19487_s10 }
   0x7   :  { %19676 = sst [smem:[#allocation207_spill]] %s19488_s11 }
   0x8   :  { %16 = vsyncpa [#allocation8], 0 }
   0x9   :  { %18 = vsyncpa [#allocation8 + $0x1], 0 }
   0xa   :  { %19 = vsyncpa [#allocation11], 0 }
   0xb   :  { %21 = vsyncpa [#allocation11 + $0x1], 0 }
   0xc   :  { %22 = vsyncpa [#allocation14], 0 }
   0xd   :  { %23 = vsyncpa [#allocation17], 0 }
   0xe   :  { %24 = vsyncpa [#allocation9], 0 }
   0xf   :  { %26 = vsyncpa [#allocation9 + $0x1], 0  ;;  %s15306_s17 = smov 0   ;;  %s15308_s18 = smov 0  }
  0x10   :  { %s15310_s19 = smov 0   ;;  %s15312_s20 = smov 0  }
  0x11 LB: > { %19677 = sst [smem:[#allocation25_spill]] %s15219_s17  ;;  %s15327_s21 = sadd.s32 4294967295, %s15231_s20   ;;  %s15231_s20 = sphi %s15312_s20, %s20428_s20   ;;  %s15227_s19 = sphi %s15310_s19, %s20432_s19   ;;  %s15223_s18 = sphi %s15308_s18, %s20431_s18   ;;  %s15219_s17 = sphi %s15306_s17, %s20430_s17  }
  0x12   : > { %19678 = sst [smem:[#allocation26_spill]] %s15231_s20  ;;  %s11117_s22 = sadd.s32 4294967294, %s15231_s20  }
  0x13   : > { %p52_p0 = scmp.ne.s32.totalorder %s15223_s18, %s15219_s17  ;;  %p19489_p1 = scmp.eq.s32.totalorder %s15327_s21, 0 }
  0x14   : > { %p302_p3 = scmp.eq.s32.totalorder %s11117_s22, 1  ;;  %p11118_p5 = scmp.ge.s32.totalorder %s15231_s20, 1 }
  0x15   : > { %p15336_p4 = por %p19489_p1, %p52_p0  ;;  %p309_p7 = scmp.lt.s32.totalorder %s15231_s20, 3 }
  0x16   : > { %p15341_p6 = por %p302_p3, %p52_p0  ;;  %s15233_s26 = smov [#allocation13]  }
  0x17   : > { %s19679_s23 = scalar_select %p15336_p4, 1, 0 }
  0x18   : > { %s19680_s24 = scalar_select %p15341_p6, 1, 0 }
  0x19   : > { %p15346_p8 = pnand %p11118_p5, %p309_p7  ;;  %s321_s27 = sshll.u32 %s15233_s26, 4  ;;  %s15350_s27 = int_to_ptr.vmem [resolvable:$true] %s321_s27 }
  0x1a   : > { %19681 = sst [smem:[#allocation27_spill]] %s19680_s24  ;;  %s15234_s29 = smov [#allocation16]  }
  0x1b   : > { %s19682_s25 = scalar_select %p15346_p8, 1, 0 }
  0x1c   : > { %p13223_p9 = pneg %p15346_p8  ;;  %s347_s30 = sshll.u32 %s15234_s29, 4  ;;  %s15361_s30 = int_to_ptr.vmem [resolvable:$true] %s347_s30 }
  0x1d   : > { %s19684_s3 = sld [smem:[#allocation202_spill]] }
  0x1e   : > { %p15357_p11 = pnand %p13223_p9, %p19489_p1 }
  0x20   : > { %s19683_s28 = scalar_select %p15357_p11, 1, 0 }
  0x21   : > { %p15371_p13 = pneg %p15357_p11 }
  0x23   : > { %s14951_s14 = scalar_lea.hbm %s19684_s3, 16384 }
  0x24   : > { %p14952_p12 = scmp.ne.s32.totalorder %s19684_s3, %s14951_s14  ;;  %p14958_p5 = scmp.lt.u32.totalorder %s14951_s14, %s19684_s3 }
  0x25   : > { %s19685_s22 = scalar_select %p15371_p13, 1, 0 }
  0x26   : > { %p14954_p0 = pnand %p15371_p13, %p14952_p12 }
  0x28   : > { %p14955_p3 = pneg %p14954_p0 }
  0x2a   : > { %p14960_p7 = pnand %p14958_p5, %p14955_p3 }
  0x2c   : > { %14963 = shalt.err (!%p14960_p7)
}
  0x2d   : > { %s14964_s12 = scalar_lea.vmem %s15350_s27, 16384  ;;  %p14972_p2 = scmp.lt.s32.totalorder %s15350_s27, %s15350_s27 }
  0x2e   : > { %p14965_p9 = scmp.ne.s32.totalorder %s15350_s27, %s14964_s12  ;;  %p14973_p6 = scmp.lt.s32.totalorder %s14964_s12, %s14964_s12 }
  0x30   : > { %p14967_p10 = pnand %p14965_p9, %p15371_p13  ;;  %p14974_p12 = por %p14973_p6, %p14972_p2 }
  0x32   : > { %p14968_p1 = pneg %p14967_p10 }
  0x34   : > { %p14975_p0 = pnand %p14974_p12, %p14968_p1 }
  0x36   : > { %14978 = shalt.err (!%p14975_p0)
}
  0x37   : > { %s19494_s13 = smov 256   ;;  %s19496_s14 = smov 16  }
  0x38   : > { %13226 = dma.hbm_to_vmem [thread:$0]  (!%p15357_p11), %s19684_s3, 16384, %s15350_s27, [#allocation14], %s19494_s13, %s19494_s13, %s19496_s14  }
  0x39   : > { %s19686_s5 = sld [smem:[#allocation203_spill]] }
  0x3f   : > { %s14979_s12 = scalar_lea.hbm %s19686_s5, 16384 }
  0x40   : > { %p14980_p1 = scmp.ne.s32.totalorder %s19686_s5, %s14979_s12  ;;  %p14986_p10 = scmp.lt.u32.totalorder %s14979_s12, %s19686_s5 }
  0x42   : > { %p14982_p2 = pnand %p14980_p1, %p15371_p13 }
  0x44   : > { %p14983_p6 = pneg %p14982_p2 }
  0x46   : > { %p14988_p3 = pnand %p14986_p10, %p14983_p6 }
  0x48   : > { %14991 = shalt.err (!%p14988_p3)
}
  0x49   : > { %s14992_s27 = scalar_lea.vmem %s15361_s30, 16384  ;;  %p15000_p12 = scmp.lt.s32.totalorder %s15361_s30, %s15361_s30 }
  0x4a   : > { %p14993_p5 = scmp.ne.s32.totalorder %s15361_s30, %s14992_s27  ;;  %p15001_p0 = scmp.lt.s32.totalorder %s14992_s27, %s14992_s27 }
  0x4c   : > { %p14995_p7 = pnand %p14993_p5, %p15371_p13  ;;  %p15002_p1 = por %p15001_p0, %p15000_p12 }
  0x4e   : > { %p14996_p9 = pneg %p14995_p7 }
  0x50   : > { %p15003_p2 = pnand %p15002_p1, %p14996_p9 }
  0x52   : > { %15006 = shalt.err (!%p15003_p2)
}
  0x53   : > { %13232 = dma.hbm_to_vmem [thread:$0]  (!%p15357_p11), %s19686_s5, 16384, %s15361_s30, [#allocation17], %s19494_s13, %s19494_s13, %s19496_s14  }
  0x54   : > { %s15422_s17 = sadd.s32 1, %s15231_s20   ;;  %s39_s24 = sadd.s32 1, %s15227_s19 }
  0x55   : > { %19687 = sst [smem:[#allocation28_spill]] %s15422_s17  ;;  %s36_s15 = ssub.s32 %s15231_s20, %s15422_s17 }
  0x56   : > { %p46_p6 = scmp.ne.s32.totalorder %s15227_s19, %s15223_s18  ;;  %p37_p10 = scmp.eq.s32.totalorder %s36_s15, 0 }
  0x57   : > { %p47_p3 = scmp.eq.s32.totalorder %s15231_s20, 0  ;;  %p19688_p5 = scmp.eq.s32.totalorder %s15327_s21, 1 }
  0x58   : > { %p13254_p9 = scmp.lt.s32.totalorder %s15231_s20, 2  ;;  %s19493_s29 = sand.u32 1, %s15227_s19  }
  0x59   : > { %p15432_p7 = por %p19688_p5, %p46_p6  ;;  %p48_p12 = por %p47_p3, %p46_p6 }
  0x5a   : > { %s15438_s26 = scalar_select %p37_p10, %s15227_s19, %s39_s24  }
  0x5b   : > { %s19689_s16 = scalar_select %p15432_p7, 1, 0 }
  0x5c   : > { %19691 = sst [smem:[#allocation30_spill]] %s15438_s26  ;;  %s15443_s30 = sshll.u32 %s19493_s29, 8 }
  0x5d   : > { %19690 = sst [smem:[#allocation29_spill]] %s19689_s16  ;;  %s15446_s12 = sshll.u32 %s15231_s20, 12 }
  0x5e   : > { %p15448_p0 = pnand %p13254_p9, %p48_p12  ;;  %s407_s10 = sand.u32 1, %s15231_s20  }
  0x5f   : > { %s19693_s1 = sld [smem:[#allocation201_spill]]  ;;  %s411_s29 = scalar_lea.vmem [#allocation10], %s15443_s30 }
  0x60   : > { %s19692_s27 = scalar_select %p15448_p0, 1, 0 }
  0x61   : > { %s418_s13 = sshll.u32 %s411_s29, 4  ;;  %s15237_s14 = smov [#allocation15]   ;;  %s15460_s13 = int_to_ptr.vmem [resolvable:$true] %s418_s13 }
  0x62   : > { %s15462_s3 = sshll.u32 %s15237_s14, 4  ;;  %s15464_s5 = scalar_lea.sflag [#allocation11], %s407_s10  ;;  %s335_s3 = int_to_ptr.vmem [resolvable:$true] %s15462_s3 }
  0x63   : > { %p15470_p2 = pneg %p15448_p0 }
  0x65   : > { %s15457_s24 = scalar_lea.hbm %s19693_s1, %s15446_s12  ;;  %s15012_s17 = scalar_lea.hbm %s19693_s1, 8192 }
  0x66   : > { %s15007_s26 = scalar_lea.hbm %s15457_s24, 4096  ;;  %p15013_p3 = scmp.lt.u32.totalorder %s15457_s24, %s19693_s1 }
  0x67   : > { %p15008_p1 = scmp.ne.s32.totalorder %s15457_s24, %s15007_s26  ;;  %p15014_p5 = scmp.lt.u32.totalorder %s15012_s17, %s15007_s26 }
  0x68   : > { %s19694_s11 = scalar_select %p15470_p2, 1, 0 }
  0x69   : > { %p15010_p6 = pnand %p15470_p2, %p15008_p1  ;;  %p15015_p9 = por %p15014_p5, %p15013_p3 }
  0x6a   : > { %p15016_p12 = scmp.lt.u32.totalorder %s15007_s26, %s15457_s24 }
  0x6b   : > { %p15011_p10 = pneg %p15010_p6 }
  0x6c   : > { %p15017_p7 = por %p15016_p12, %p15015_p9 }
  0x6e   : > { %p15018_p4 = pnand %p15017_p7, %p15011_p10 }
  0x70   : > { %15021 = shalt.err (!%p15018_p4)
}
  0x71   : > { %s15022_s10 = scalar_lea.vmem %s15460_s13, 4096  ;;  %s15238_s15 = smov [#allocation10]  }
  0x72   : > { %p15023_p1 = scmp.ne.s32.totalorder %s15460_s13, %s15022_s10  ;;  %s15027_s29 = sshll.u32 %s15238_s15, 4  ;;  %s15028_s29 = int_to_ptr.vmem [resolvable:$false] %s15027_s29 }
  0x73   : > { %s15029_s20 = scalar_lea.vmem %s15028_s29, 8192  ;;  %p15030_p11 = scmp.lt.s32.totalorder %s15460_s13, %s15028_s29 }
  0x74   : > { %p15025_p6 = pnand %p15023_p1, %p15470_p2  ;;  %p15031_p13 = scmp.lt.s32.totalorder %s15029_s20, %s15022_s10 }
  0x76   : > { %p15026_p8 = pneg %p15025_p6  ;;  %p15032_p3 = por %p15031_p13, %p15030_p11 }
  0x78   : > { %p15033_p5 = pnand %p15032_p3, %p15026_p8 }
  0x7a   : > { %15036 = shalt.err (!%p15033_p5)
}
  0x7b   : > { %s19695_s17 = smov 16   ;;  %s19696_s26 = smov 256  }
  0x7c   : > { %13242 = dma.hbm_to_vmem [thread:$0]  (!%p15448_p0), %s15457_s24, 4096, %s15460_s13, %s15464_s5, %s19696_s26, %s19696_s26, %s19695_s17  }
  0x7d   : > { %s15037_s29 = scalar_lea.hbm %s19481_s4, 16384  ;;  %p19697_p8 = scmp.ne.s32.totalorder %s19685_s22, 0 }
  0x7e   : > { %p15038_p4 = scmp.ne.s32.totalorder %s19481_s4, %s15037_s29  ;;  %p15044_p7 = scmp.lt.u32.totalorder %s15037_s29, %s19481_s4 }
  0x80   : > { %p15040_p11 = pnand %p15038_p4, %p19697_p8 }
  0x82   : > { %p15041_p13 = pneg %p15040_p11 }
  0x84   : > { %p15046_p10 = pnand %p15044_p7, %p15041_p13 }
  0x86   : > { %15049 = shalt.err (!%p15046_p10)
}
  0x87   : > { %s15050_s9 = scalar_lea.vmem %s335_s3, 16384  ;;  %p15058_p6 = scmp.lt.s32.totalorder %s335_s3, %s335_s3 }
  0x88   : > { %p15051_p9 = scmp.ne.s32.totalorder %s335_s3, %s15050_s9  ;;  %p15059_p3 = scmp.lt.s32.totalorder %s15050_s9, %s15050_s9 }
  0x8a   : > { %p15053_p12 = pnand %p15051_p9, %p19697_p8  ;;  %p15060_p5 = por %p15059_p3, %p15058_p6 }
  0x8c   : > { %p15054_p1 = pneg %p15053_p12 }
  0x8e   : > { %p15061_p0 = pnand %p15060_p5, %p15054_p1 }
  0x90   : > { %15064 = shalt.err (!%p15061_p0)
}
  0x91   : > { %p19698_p4 = scmp.ne.s32.totalorder %s19683_s28, 0  ;;  %s15239_s16 = smov [#allocation18]  }
  0x92   : > { %s360_s24 = sshll.u32 %s15239_s16, 4  ;;  %s15065_s9 = scalar_lea.hbm %s19483_s6, 16384  ;;  %s361_s24 = int_to_ptr.vmem [resolvable:$true] %s360_s24 }
  0x93   : > { %13229 = dma.hbm_to_vmem [thread:$0]  (!%p19698_p4), %s19481_s4, 16384, %s335_s3, [#allocation14], %s19696_s26, %s19696_s26, %s19695_s17  }
  0x94   : > { %p15066_p0 = scmp.ne.s32.totalorder %s19483_s6, %s15065_s9  ;;  %p15072_p7 = scmp.lt.u32.totalorder %s15065_s9, %s19483_s6 }
  0x96   : > { %p15068_p11 = pnand %p15066_p0, %p19697_p8 }
  0x98   : > { %p15069_p13 = pneg %p15068_p11 }
  0x9a   : > { %p15074_p10 = pnand %p15072_p7, %p15069_p13 }
  0x9c   : > { %15077 = shalt.err (!%p15074_p10)
}
  0x9d   : > { %s15078_s3 = scalar_lea.vmem %s361_s24, 16384  ;;  %p15086_p6 = scmp.lt.s32.totalorder %s361_s24, %s361_s24 }
  0x9e   : > { %p15079_p9 = scmp.ne.s32.totalorder %s361_s24, %s15078_s3  ;;  %p15087_p3 = scmp.lt.s32.totalorder %s15078_s3, %s15078_s3 }
  0xa0   : > { %p15081_p12 = pnand %p15079_p9, %p19697_p8  ;;  %p15088_p5 = por %p15087_p3, %p15086_p6 }
  0xa2   : > { %p15082_p1 = pneg %p15081_p12 }
  0xa4   : > { %p15089_p2 = pnand %p15088_p5, %p15082_p1 }
  0xa6   : > { %15092 = shalt.err (!%p15089_p2)
}
  0xa7   : > { %13235 = dma.hbm_to_vmem [thread:$0]  (!%p19698_p4), %s19483_s6, 16384, %s361_s24, [#allocation17], %s19696_s26, %s19696_s26, %s19695_s17  }
  0xa8   : > { %s15544_s16 = scalar_lea.hbm %s19477_s0, %s15446_s12  ;;  %s390_s28 = scalar_lea.vmem [#allocation7], %s15443_s30 }
  0xa9   : > { %s397_s14 = sshll.u32 %s390_s28, 4  ;;  %s19699_s15 = sand.u32 1, %s15227_s19   ;;  %s15547_s14 = int_to_ptr.vmem [resolvable:$true] %s397_s14 }
  0xaa   : > { %s15551_s9 = scalar_lea.sflag [#allocation8], %s19699_s15  ;;  %s15093_s29 = scalar_lea.hbm %s15544_s16, 4096 }
  0xab   : > { %p15094_p2 = scmp.ne.s32.totalorder %s15544_s16, %s15093_s29  ;;  %p19700_p8 = scmp.ne.s32.totalorder %s19694_s11, 0 }
  0xac   : > { %s15098_s20 = scalar_lea.hbm %s19477_s0, 8192  ;;  %p15099_p11 = scmp.lt.u32.totalorder %s15544_s16, %s19477_s0 }
  0xad   : > { %p15096_p4 = pnand %p15094_p2, %p19700_p8  ;;  %p15100_p13 = scmp.lt.u32.totalorder %s15098_s20, %s15093_s29 }
  0xae   : > { %p15102_p10 = scmp.lt.u32.totalorder %s15093_s29, %s15544_s16 }
  0xaf   : > { %p15097_p0 = pneg %p15096_p4  ;;  %p15101_p7 = por %p15100_p13, %p15099_p11 }
  0xb1   : > { %p15103_p9 = por %p15102_p10, %p15101_p7 }
  0xb3   : > { %p15104_p12 = pnand %p15103_p9, %p15097_p0 }
  0xb5   : > { %15107 = shalt.err (!%p15104_p12)
}
  0xb6   : > { %s15108_s1 = scalar_lea.vmem %s15547_s14, 4096  ;;  %s15240_s22 = smov [#allocation7]  }
  0xb7   : > { %p15109_p1 = scmp.ne.s32.totalorder %s15547_s14, %s15108_s1  ;;  %s15113_s13 = sshll.u32 %s15240_s22, 4  ;;  %s15114_s13 = int_to_ptr.vmem [resolvable:$false] %s15113_s13 }
  0xb8   : > { %s15115_s28 = scalar_lea.vmem %s15114_s13, 8192  ;;  %p15116_p5 = scmp.lt.s32.totalorder %s15547_s14, %s15114_s13 }
  0xb9   : > { %p15111_p6 = pnand %p15109_p1, %p19700_p8  ;;  %p15117_p2 = scmp.lt.s32.totalorder %s15115_s28, %s15108_s1 }
  0xbb   : > { %p15112_p3 = pneg %p15111_p6  ;;  %p15118_p4 = por %p15117_p2, %p15116_p5 }
  0xbd   : > { %p15119_p11 = pnand %p15118_p4, %p15112_p3 }
  0xbf   : > { %15122 = shalt.err (!%p15119_p11)
}
  0xc0   : > { %p19701_p0 = scmp.ne.s32.totalorder %s19692_s27, 0  ;;  %s15582_s24 = scalar_lea.hbm %s19479_s2, %s15446_s12 }
  0xc1   : > { %s432_s10 = scalar_lea.vmem [#allocation12], %s15443_s30  ;;  %s15123_s3 = scalar_lea.hbm %s15582_s24, 4096 }
  0xc2   : > { %13239 = dma.hbm_to_vmem [thread:$0]  (!%p19701_p0), %s15544_s16, 4096, %s15547_s14, %s15551_s9, %s19696_s26, %s19696_s26, %s19695_s17  }
  0xc3   : > { %s439_s20 = sshll.u32 %s432_s10, 4  ;;  %p15124_p13 = scmp.ne.s32.totalorder %s15582_s24, %s15123_s3  ;;  %s15585_s20 = int_to_ptr.vmem [resolvable:$true] %s439_s20 }
  0xc4   : > { %s15128_s14 = scalar_lea.hbm %s19479_s2, 8192  ;;  %p15129_p9 = scmp.lt.u32.totalorder %s15582_s24, %s19479_s2 }
  0xc5   : > { %p15126_p7 = pnand %p15124_p13, %p19700_p8  ;;  %p15130_p12 = scmp.lt.u32.totalorder %s15128_s14, %s15123_s3 }
  0xc6   : > { %p15132_p6 = scmp.lt.u32.totalorder %s15123_s3, %s15582_s24 }
  0xc7   : > { %p15127_p10 = pneg %p15126_p7  ;;  %p15131_p1 = por %p15130_p12, %p15129_p9 }
  0xc9   : > { %p15133_p3 = por %p15132_p6, %p15131_p1 }
  0xcb   : > { %p15134_p5 = pnand %p15133_p3, %p15127_p10 }
  0xcd   : > { %15137 = shalt.err (!%p15134_p5)
}
  0xce   : > { %s15138_s30 = scalar_lea.vmem %s15585_s20, 4096  ;;  %s15241_s1 = smov [#allocation12]  }
  0xcf   : > { %p15139_p2 = scmp.ne.s32.totalorder %s15585_s20, %s15138_s30  ;;  %s15143_s22 = sshll.u32 %s15241_s1, 4  ;;  %s15144_s22 = int_to_ptr.vmem [resolvable:$false] %s15143_s22 }
  0xd0   : > { %s15145_s13 = scalar_lea.vmem %s15144_s22, 8192  ;;  %p15146_p13 = scmp.lt.s32.totalorder %s15585_s20, %s15144_s22 }
  0xd1   : > { %p15141_p4 = pnand %p15139_p2, %p19700_p8  ;;  %p15147_p7 = scmp.lt.s32.totalorder %s15145_s13, %s15138_s30 }
  0xd3   : > { %p15142_p11 = pneg %p15141_p4  ;;  %p15148_p9 = por %p15147_p7, %p15146_p13 }
  0xd5   : > { %p15149_p12 = pnand %p15148_p9, %p15142_p11 }
  0xd7   : > { %15152 = shalt.err (!%p15149_p12)
}
  0xd8   : > { %13245 = dma.hbm_to_vmem [thread:$0]  (!%p19701_p0), %s15582_s24, 4096, %s15585_s20, %s15464_s5, %s19696_s26, %s19696_s26, %s19695_s17  }
  0xd9   : > { %p19702_p8 = scmp.ne.s32.totalorder %s19682_s25, 0 }
  0xdb   : > { %451 = sbr.rel (%p19702_p8) target bundleno = 4769 (0x12a1), region = 64 }
  0xe2   : > { %s15615_s11 = sand.u32 1, %s15223_s18   ;;  %p19703_p10 = scmp.ne.s32.totalorder %s19679_s23, 0 }
  0xe3   : > { %s11134_s28 = sshll.u32 %s15615_s11, 8  ;;  %s454_s15 = scalar_lea.sflag [#allocation8], %s15615_s11 }
  0xe4   : > { %s15619_s29 = scalar_lea.vmem [#allocation7], %s11134_s28 }
  0xe5   : > { %15198 = dma.done.wait (%p19703_p10), %s454_s15, 4096  }
  0xe6   : > { %15200 = vsyncadd (%p19703_p10), %s454_s15, 4294963200  ;;  %s462_s5 = sand.u32 1, %s15327_s21   ;;  %s15626_s27 = scalar_lea.vmem [#allocation10], %s11134_s28 }
  0xe7   : > { %s463_s25 = scalar_lea.sflag [#allocation11], %s462_s5 }
  0xe8   : > { %15202 = dma.done.wait (%p19703_p10), %s463_s25, 8192  }
  0xe9   : > { %15204 = vsyncadd (%p19703_p10), %s463_s25, 4294959104  ;;  %s15632_s17 = scalar_lea.vmem [#allocation12], %s11134_s28  ;;  %p19704_p0 = scmp.eq.s32.totalorder %s15327_s21, 0 }
  0xeb   : > { %15206 = dma.done.wait (%p19704_p0), [#allocation14], 32768   ;;  %p19705_p1 = pmov %p19704_p0 }
  0xec   : > { %p19706_p6 = pmov %p19704_p0 }
  0xed   : > { %15208 = vsyncadd (%p19705_p1), [#allocation14], 4294934528 }
  0xee   : > { %15210 = dma.done.wait (%p19706_p6), [#allocation17], 32768   ;;  %p19707_p3 = pmov %p19704_p0 }
  0xef   : > { %v13461_v0 = vld [vmem:[#allocation13 + $0x4] ss:$16 sps:$4 sm:$0xff]   ;;  %v13463_v1 = vld [vmem:[#allocation13] ss:$16 sps:$4 sm:$0xff]   ;;  %vm5059_vm0 = vcmask 523264   ;;  %s19718_s20 = sld [smem:[#allocation204_spill]] }
  0xf0   : > { %15212 = vsyncadd (%p19707_p3), [#allocation17], 4294934528  ;;  %1523 = vmatprep.subr.bf16.mxu0 %v13461_v0  ;;  %v13464_v2 = vld [vmem:[#allocation13 + $0x24] ss:$16 sps:$4 sm:$0xff]   ;;  %v13466_v3 = vld [vmem:[#allocation13 + $0x20] ss:$16 sps:$4 sm:$0xff]  }
  0xf1   : > { %1524 = vmatpush1.bf16.msra.mxu0 %v13463_v1  ;;  %v13467_v4 = vld [vmem:[#allocation13 + $0x44] ss:$16 sps:$4 sm:$0xff]   ;;  %v13469_v5 = vld [vmem:[#allocation13 + $0x40] ss:$16 sps:$4 sm:$0xff]   ;;  %s15242_s8 = smov 64   ;;  %s19724_s9 = sld [smem:[#allocation205_spill]] }
  0xf2   : > { %1525 = vmatprep.subr.bf16.mxu0 %v13464_v2  ;;  %v13470_v6 = vld [vmem:[#allocation13 + $0x64] ss:$16 sps:$4 sm:$0xff]   ;;  %v13472_v7 = vld [vmem:[#allocation13 + $0x60] ss:$16 sps:$4 sm:$0xff]   ;;  %s20415_s5 = sld [smem:[#allocation206_spill]]  ;;  %s11141_s25 = sshll.u32 %s15615_s11, 9 }
  0xf3   : > { %v13473_v8 = vld [vmem:[#allocation13 + $0x84] ss:$16 sps:$4 sm:$0xff]   ;;  %v13475_v9 = vld [vmem:[#allocation13 + $0x80] ss:$16 sps:$4 sm:$0xff]   ;;  %s20420_s26 = sld [smem:[#allocation29_spill]]  ;;  %s15243_s14 = smov [#allocation19]  }
  0xf4   : > { %v13476_v10 = vld [vmem:[#allocation13 + $0xa4] ss:$16 sps:$4 sm:$0xff]   ;;  %v13478_v11 = vld [vmem:[#allocation13 + $0xa0] ss:$16 sps:$4 sm:$0xff]   ;;  %s15157_s12 = sshll.u32 %s15243_s14, 4  ;;  %s15158_s12 = int_to_ptr.vmem [resolvable:$false] %s15157_s12 }
  0xf5   : > { %1526 = vmatpush1.bf16.msra.mxu0 %v13466_v3  ;;  %v13479_v12 = vld [vmem:[#allocation13 + $0xc4] ss:$16 sps:$4 sm:$0xff]   ;;  %v13481_v14 = vld [vmem:[#allocation13 + $0xc0] ss:$16 sps:$4 sm:$0xff]   ;;  %s19719_s3 = smov %s19718_s20  ;;  %s15159_s30 = scalar_lea.vmem %s15158_s12, 16384 }
  0xf6   : > { %1527 = vmatprep.subr.bf16.mxu0 %v13467_v4  ;;  %v13511_v13 = vld [vmem:[%s15619_s29 + $0x4] ss:$16 sps:$4 sm:$0xff]   ;;  %v13484_v16 = vld [vmem:[#allocation13 + $0xe0] ss:$16 sps:$4 sm:$0xff]  }
  0xf7   : > { %v13482_v15 = vld [vmem:[#allocation13 + $0xe4] ss:$16 sps:$4 sm:$0xff]   ;;  %1555 = vmatprep.mubr.bf16.mxu0 %v13511_v13  ;;  %1781 = vmatprep.mubr.bf16.mxu1 %v13511_v13  ;;  %v13487_v18 = vld [vmem:[#allocation13 + $0x100] ss:$16 sps:$4 sm:$0xff]  }
  0xf8   : > { %v13485_v17 = vld [vmem:[#allocation13 + $0x104] ss:$16 sps:$4 sm:$0xff]   ;;  %v13490_v20 = vld [vmem:[#allocation13 + $0x120] ss:$16 sps:$4 sm:$0xff]  }
  0xf9   : > { %1528 = vmatpush1.bf16.msra.mxu0 %v13469_v5  ;;  %v13488_v19 = vld [vmem:[#allocation13 + $0x124] ss:$16 sps:$4 sm:$0xff]   ;;  %v13493_v22 = vld [vmem:[#allocation13 + $0x140] ss:$16 sps:$4 sm:$0xff]   ;;  %p20422_p2 = scmp.ne.s32.totalorder %s20420_s26, 0 }
  0xfa   : > { %1529 = vmatprep.subr.bf16.mxu0 %v13470_v6  ;;  %v13491_v21 = vld [vmem:[#allocation13 + $0x144] ss:$16 sps:$4 sm:$0xff]   ;;  %v13496_v24 = vld [vmem:[#allocation13 + $0x160] ss:$16 sps:$4 sm:$0xff]  }
  0xfb   : > { %v13494_v23 = vld [vmem:[#allocation13 + $0x164] ss:$16 sps:$4 sm:$0xff]   ;;  %v13499_v26 = vld [vmem:[#allocation13 + $0x180] ss:$16 sps:$4 sm:$0xff]  }
  0xfc   : > { %v13497_v25 = vld [vmem:[#allocation13 + $0x184] ss:$16 sps:$4 sm:$0xff]   ;;  %v13502_v28 = vld [vmem:[#allocation13 + $0x1a0] ss:$16 sps:$4 sm:$0xff]  }
  0xfd   : > { %1530 = vmatpush1.bf16.msra.mxu0 %v13472_v7  ;;  %v13500_v27 = vld [vmem:[#allocation13 + $0x1a4] ss:$16 sps:$4 sm:$0xff]   ;;  %v13505_v30 = vld [vmem:[#allocation13 + $0x1c0] ss:$16 sps:$4 sm:$0xff]  }
  0xfe   : > { %1531 = vmatprep.subr.bf16.mxu0 %v13473_v8  ;;  %v13503_v29 = vld [vmem:[#allocation13 + $0x1c4] ss:$16 sps:$4 sm:$0xff]   ;;  %v13508_v32 = vld [vmem:[#allocation13 + $0x1e0] ss:$16 sps:$4 sm:$0xff]  }
  0xff   : > { %v13506_v31 = vld [vmem:[#allocation13 + $0x1e4] ss:$16 sps:$4 sm:$0xff]   ;;  %v13509_v34 = vld [vmem:[%s15619_s29] ss:$16 sps:$4 sm:$0xff]  }
 0x100   : > { %v13514_v33 = vld [vmem:[#allocation13 + $0x204] ss:$16 sps:$4 sm:$0xff]   ;;  %v13512_v35 = vld [vmem:[#allocation13 + $0x200] ss:$16 sps:$4 sm:$0xff]  }
 0x101   : > { %1532 = vmatpush1.bf16.msra.mxu0 %v13475_v9  ;;  %v13518_v36 = vld [vmem:[%s15619_s29 + $0x24] ss:$16 sps:$4 sm:$0xff]   ;;  %v13515_v38 = vld [vmem:[#allocation13 + $0x220] ss:$16 sps:$4 sm:$0xff]  }
 0x102   : > { %1533 = vmatprep.subr.bf16.mxu0 %v13476_v10  ;;  %v13517_v37 = vld [vmem:[#allocation13 + $0x224] ss:$16 sps:$4 sm:$0xff]   ;;  %v13520_v40 = vld [vmem:[%s15619_s29 + $0x20] ss:$16 sps:$4 sm:$0xff]  }
 0x103   : > { %v13523_v39 = vld [vmem:[#allocation13 + $0x244] ss:$16 sps:$4 sm:$0xff]   ;;  %v13521_v41 = vld [vmem:[#allocation13 + $0x240] ss:$16 sps:$4 sm:$0xff]  }
 0x104   : > { %v13527_v42 = vld [vmem:[%s15619_s29 + $0x44] ss:$16 sps:$4 sm:$0xff]   ;;  %v13524_v44 = vld [vmem:[#allocation13 + $0x260] ss:$16 sps:$4 sm:$0xff]  }
 0x105   : > { %1534 = vmatpush1.bf16.msra.mxu0 %v13478_v11  ;;  %v13526_v43 = vld [vmem:[#allocation13 + $0x264] ss:$16 sps:$4 sm:$0xff]   ;;  %v13529_v46 = vld [vmem:[%s15619_s29 + $0x40] ss:$16 sps:$4 sm:$0xff]  }
 0x106   : > { %1535 = vmatprep.subr.bf16.mxu0 %v13479_v12  ;;  %v13532_v45 = vld [vmem:[#allocation13 + $0x284] ss:$16 sps:$4 sm:$0xff]   ;;  %v13530_v47 = vld [vmem:[#allocation13 + $0x280] ss:$16 sps:$4 sm:$0xff]  }
 0x107   : > { %v13536_v48 = vld [vmem:[%s15619_s29 + $0x64] ss:$16 sps:$4 sm:$0xff]   ;;  %v13533_v50 = vld [vmem:[#allocation13 + $0x2a0] ss:$16 sps:$4 sm:$0xff]  }
 0x108   : > { %v13535_v49 = vld [vmem:[#allocation13 + $0x2a4] ss:$16 sps:$4 sm:$0xff]   ;;  %v13538_v52 = vld [vmem:[%s15619_s29 + $0x60] ss:$16 sps:$4 sm:$0xff]  }
 0x109   : > { %1536 = vmatpush1.bf16.msra.mxu0 %v13481_v14  ;;  %v13541_v51 = vld [vmem:[#allocation13 + $0x2c4] ss:$16 sps:$4 sm:$0xff]   ;;  %v13539_v53 = vld [vmem:[#allocation13 + $0x2c0] ss:$16 sps:$4 sm:$0xff]   ;;  %v13583_v14 = vld [vmem:[%s15619_s29 + $0xc] ss:$16 sps:$4 sm:$0xff]  }
 0x10a   : > { %1537 = vmatprep.subr.bf16.mxu0 %v13482_v15  ;;  %v13545_v54 = vld [vmem:[%s15619_s29 + $0x84] ss:$16 sps:$4 sm:$0xff]   ;;  %v13542_v56 = vld [vmem:[#allocation13 + $0x2e0] ss:$16 sps:$4 sm:$0xff]  }
 0x10b   : > { %v13544_v55 = vld [vmem:[#allocation13 + $0x2e4] ss:$16 sps:$4 sm:$0xff]   ;;  %v13547_v58 = vld [vmem:[%s15619_s29 + $0x80] ss:$16 sps:$4 sm:$0xff]  }
 0x10c   : > { %v13550_v57 = vld [vmem:[#allocation13 + $0x304] ss:$16 sps:$4 sm:$0xff]   ;;  %v13548_v59 = vld [vmem:[#allocation13 + $0x300] ss:$16 sps:$4 sm:$0xff]  }
 0x10d   : > { %1538 = vmatpush1.bf16.msra.mxu0 %v13484_v16  ;;  %v13554_v60 = vld [vmem:[%s15619_s29 + $0xa4] ss:$16 sps:$4 sm:$0xff]   ;;  %v13551_v62 = vld [vmem:[#allocation13 + $0x320] ss:$16 sps:$4 sm:$0xff]  }
 0x10e   : > { %1539 = vmatprep.subr.bf16.mxu0 %v13485_v17  ;;  %v13553_v61 = vld [vmem:[#allocation13 + $0x324] ss:$16 sps:$4 sm:$0xff]   ;;  %v13556_v0 = vld [vmem:[%s15619_s29 + $0xa0] ss:$16 sps:$4 sm:$0xff]  }
 0x10f   : > { %v13559_v63 = vld [vmem:[#allocation13 + $0x344] ss:$16 sps:$4 sm:$0xff]   ;;  %v13557_v1 = vld [vmem:[#allocation13 + $0x340] ss:$16 sps:$4 sm:$0xff]  }
 0x110   : > { %v13563_v2 = vld [vmem:[%s15619_s29 + $0xc4] ss:$16 sps:$4 sm:$0xff]   ;;  %v13560_v4 = vld [vmem:[#allocation13 + $0x360] ss:$16 sps:$4 sm:$0xff]  }
 0x111   : > { %1540 = vmatpush1.bf16.msra.mxu0 %v13487_v18  ;;  %v13562_v3 = vld [vmem:[#allocation13 + $0x364] ss:$16 sps:$4 sm:$0xff]   ;;  %v13565_v6 = vld [vmem:[%s15619_s29 + $0xc0] ss:$16 sps:$4 sm:$0xff]   ;;  %v13581_v18 = vld [vmem:[%s15619_s29 + $0x8] ss:$16 sps:$4 sm:$0xff]  }
 0x112   : > { %1541 = vmatprep.subr.bf16.mxu0 %v13488_v19  ;;  %v13568_v5 = vld [vmem:[#allocation13 + $0x384] ss:$16 sps:$4 sm:$0xff]   ;;  %v13566_v7 = vld [vmem:[#allocation13 + $0x380] ss:$16 sps:$4 sm:$0xff]  }
 0x113   : > { %v13572_v8 = vld [vmem:[%s15619_s29 + $0xe4] ss:$16 sps:$4 sm:$0xff]   ;;  %v13569_v10 = vld [vmem:[#allocation13 + $0x3a0] ss:$16 sps:$4 sm:$0xff]  }
 0x114   : > { %v13571_v9 = vld [vmem:[#allocation13 + $0x3a4] ss:$16 sps:$4 sm:$0xff]   ;;  %v13574_v12 = vld [vmem:[%s15619_s29 + $0xe0] ss:$16 sps:$4 sm:$0xff]  }
 0x115   : > { %1542 = vmatpush1.bf16.msra.mxu0 %v13490_v20  ;;  %v13577_v11 = vld [vmem:[#allocation13 + $0x3c4] ss:$16 sps:$4 sm:$0xff]   ;;  %v13575_v13 = vld [vmem:[#allocation13 + $0x3c0] ss:$16 sps:$4 sm:$0xff]   ;;  %v13590_v20 = vld [vmem:[%s15619_s29 + $0x2c] ss:$16 sps:$4 sm:$0xff]  }
 0x116   : > { %1543 = vmatprep.subr.bf16.mxu0 %v13491_v21  ;;  %v13580_v15 = vld [vmem:[#allocation13 + $0x3e4] ss:$16 sps:$4 sm:$0xff]   ;;  %v13578_v16 = vld [vmem:[#allocation13 + $0x3e0] ss:$16 sps:$4 sm:$0xff]  }
 0x117   : > { %v13586_v17 = vld [vmem:[#allocation15 + $0x4] ss:$16 sps:$4 sm:$0xff]   ;;  %v13584_v19 = vld [vmem:[#allocation15] ss:$16 sps:$4 sm:$0xff]  }
 0x118   : > { %v13589_v21 = vld [vmem:[#allocation15 + $0x24] ss:$16 sps:$4 sm:$0xff]  }
 0x119   : > { %1544 = vmatpush1.bf16.msra.mxu0 %v13493_v22  ;;  %v13587_v22 = vld [vmem:[#allocation15 + $0x20] ss:$16 sps:$4 sm:$0xff]  }
 0x11a   : > { %1545 = vmatprep.subr.bf16.mxu0 %v13494_v23  ;;  %v13595_v23 = vld [vmem:[#allocation15 + $0x44] ss:$16 sps:$4 sm:$0xff]  }
 0x11d   : > { %1546 = vmatpush1.bf16.msra.mxu0 %v13496_v24  ;;  %v13592_v24 = vld [vmem:[%s15619_s29 + $0x28] ss:$16 sps:$4 sm:$0xff]  }
 0x11e   : > { %1547 = vmatprep.subr.bf16.mxu0 %v13497_v25  ;;  %v13593_v25 = vld [vmem:[#allocation15 + $0x40] ss:$16 sps:$4 sm:$0xff]  }
 0x121   : > { %1548 = vmatpush1.bf16.msra.mxu0 %v13499_v26  ;;  %v13599_v26 = vld [vmem:[%s15619_s29 + $0x4c] ss:$16 sps:$4 sm:$0xff]  }
 0x122   : > { %1549 = vmatprep.subr.bf16.mxu0 %v13500_v27  ;;  %v13598_v27 = vld [vmem:[#allocation15 + $0x64] ss:$16 sps:$4 sm:$0xff]  }
 0x125   : > { %1550 = vmatpush1.bf16.msra.mxu0 %v13502_v28  ;;  %v13596_v28 = vld [vmem:[#allocation15 + $0x60] ss:$16 sps:$4 sm:$0xff]  }
 0x126   : > { %1551 = vmatprep.subr.bf16.mxu0 %v13503_v29  ;;  %v13604_v29 = vld [vmem:[#allocation15 + $0x84] ss:$16 sps:$4 sm:$0xff]  }
 0x129   : > { %1552 = vmatpush1.bf16.msra.mxu0 %v13505_v30  ;;  %v13601_v30 = vld [vmem:[%s15619_s29 + $0x48] ss:$16 sps:$4 sm:$0xff]  }
 0x12a   : > { %1553 = vmatprep.subr.bf16.mxu0 %v13506_v31  ;;  %v13602_v31 = vld [vmem:[#allocation15 + $0x80] ss:$16 sps:$4 sm:$0xff]  }
 0x12d   : > { %1554 = vmatpush1.bf16.msra.mxu0 %v13508_v32  ;;  %v13608_v32 = vld [vmem:[%s15619_s29 + $0x6c] ss:$16 sps:$4 sm:$0xff]  }
 0x12e   : > { %1636 = vmatprep.subr.bf16.mxu0 %v13514_v33  ;;  %v13607_v33 = vld [vmem:[#allocation15 + $0xa4] ss:$16 sps:$4 sm:$0xff]  }
 0x130   : > { %1556 = vmatmul.mubr.bf16.vlgmr.msra.gmra.mrb[0].mxu0 %v13509_v34  ;;  %v13605_v34 = vld [vmem:[#allocation15 + $0xa0] ss:$16 sps:$4 sm:$0xff]  }
 0x131   : > { %1637 = vmatpush1.bf16.msra.mxu0 %v13512_v35  ;;  %1565 = vmatprep.mubr.bf16.mxu0 %v13518_v36  ;;  %v13613_v35 = vld [vmem:[#allocation15 + $0xc4] ss:$16 sps:$4 sm:$0xff]   ;;  %v13610_v36 = vld [vmem:[%s15619_s29 + $0x68] ss:$16 sps:$4 sm:$0xff]  }
 0x132   : > { %1638 = vmatprep.subr.bf16.mxu0 %v13517_v37  ;;  %v13611_v37 = vld [vmem:[#allocation15 + $0xc0] ss:$16 sps:$4 sm:$0xff]  }
 0x135   : > { %1639 = vmatpush1.bf16.msra.mxu0 %v13515_v38  ;;  %v13617_v38 = vld [vmem:[%s15619_s29 + $0x8c] ss:$16 sps:$4 sm:$0xff]  }
 0x136   : > { %1640 = vmatprep.subr.bf16.mxu0 %v13523_v39  ;;  %v13616_v39 = vld [vmem:[#allocation15 + $0xe4] ss:$16 sps:$4 sm:$0xff]  }
 0x138   : > { %1566 = vmatmul.mubr.bf16.gmra.mrb[4].mxu0 %v13520_v40  ;;  %v13614_v40 = vld [vmem:[#allocation15 + $0xe0] ss:$16 sps:$4 sm:$0xff]  }
 0x139   : > { %1641 = vmatpush1.bf16.msra.mxu0 %v13521_v41  ;;  %1575 = vmatprep.mubr.bf16.mxu0 %v13527_v42  ;;  %v13622_v41 = vld [vmem:[#allocation15 + $0x104] ss:$16 sps:$4 sm:$0xff]   ;;  %v13619_v42 = vld [vmem:[%s15619_s29 + $0x88] ss:$16 sps:$4 sm:$0xff]  }
 0x13a   : > { %1642 = vmatprep.subr.bf16.mxu0 %v13526_v43  ;;  %v13620_v43 = vld [vmem:[#allocation15 + $0x100] ss:$16 sps:$4 sm:$0xff]  }
 0x13d   : > { %1643 = vmatpush1.bf16.msra.mxu0 %v13524_v44  ;;  %v13626_v44 = vld [vmem:[%s15619_s29 + $0xac] ss:$16 sps:$4 sm:$0xff]  }
 0x13e   : > { %1644 = vmatprep.subr.bf16.mxu0 %v13532_v45  ;;  %v13625_v45 = vld [vmem:[#allocation15 + $0x124] ss:$16 sps:$4 sm:$0xff]  }
 0x140   : > { %1576 = vmatmul.mubr.bf16.gmra.mrb[8].mxu0 %v13529_v46  ;;  %v13767_v46 = vld [vmem:[#allocation13 + $0xc] ss:$16 sps:$4 sm:$0xff]  }
 0x141   : > { %1645 = vmatpush1.bf16.msra.mxu0 %v13530_v47  ;;  %1585 = vmatprep.mubr.bf16.mxu0 %v13536_v48  ;;  %v13769_v47 = vld [vmem:[#allocation13 + $0x8] ss:$16 sps:$4 sm:$0xff]   ;;  %v13623_v48 = vld [vmem:[#allocation15 + $0x120] ss:$16 sps:$4 sm:$0xff]  }
 0x142   : > { %1646 = vmatprep.subr.bf16.mxu0 %v13535_v49  ;;  %1749 = vmatprep.subr.bf16.mxu1 %v13767_v46  ;;  %v13631_v49 = vld [vmem:[#allocation15 + $0x144] ss:$16 sps:$4 sm:$0xff]  }
 0x143   : > { %1750 = vmatpush1.bf16.msra.mxu1 %v13769_v47  ;;  %v13685_v46 = vld [vmem:[#allocation15 + $0x2c4] ss:$16 sps:$4 sm:$0xff]   ;;  %v13863_v47 = vld [vmem:[#allocation13 + $0x1ac] ss:$16 sps:$4 sm:$0xff]  }
 0x145   : > { %1647 = vmatpush1.bf16.msra.mxu0 %v13533_v50  ;;  %v13628_v50 = vld [vmem:[%s15619_s29 + $0xa8] ss:$16 sps:$4 sm:$0xff]  }
 0x146   : > { %1648 = vmatprep.subr.bf16.mxu0 %v13541_v51  ;;  %v13773_v51 = vld [vmem:[#allocation13 + $0x2c] ss:$16 sps:$4 sm:$0xff]  }
 0x147   : > { %1751 = vmatprep.subr.bf16.mxu1 %v13773_v51  ;;  %v13688_v51 = vld [vmem:[#allocation15 + $0x2e4] ss:$16 sps:$4 sm:$0xff]  }
 0x148   : > { %1586 = vmatmul.mubr.bf16.gmra.mrb[12].mxu0 %v13538_v52  ;;  %v13775_v52 = vld [vmem:[#allocation13 + $0x28] ss:$16 sps:$4 sm:$0xff]  }
 0x149   : > { %1649 = vmatpush1.bf16.msra.mxu0 %v13539_v53  ;;  %1595 = vmatprep.mubr.bf16.mxu0 %v13545_v54  ;;  %v13629_v53 = vld [vmem:[#allocation15 + $0x140] ss:$16 sps:$4 sm:$0xff]   ;;  %v13635_v54 = vld [vmem:[%s15619_s29 + $0xcc] ss:$16 sps:$4 sm:$0xff]  }
 0x14a   : > { %1650 = vmatprep.subr.bf16.mxu0 %v13544_v55  ;;  %v13634_v55 = vld [vmem:[#allocation15 + $0x164] ss:$16 sps:$4 sm:$0xff]   ;;  %1752 = vmatpush1.bf16.msra.mxu1 %v13775_v52  ;;  %v13872_v52 = vld [vmem:[#allocation13 + $0x1cc] ss:$16 sps:$4 sm:$0xff]  }
 0x14d   : > { %1651 = vmatpush1.bf16.msra.mxu0 %v13542_v56  ;;  %v13782_v56 = vld [vmem:[#allocation13 + $0x4c] ss:$16 sps:$4 sm:$0xff]  }
 0x14e   : > { %1652 = vmatprep.subr.bf16.mxu0 %v13550_v57  ;;  %v13784_v57 = vld [vmem:[#allocation13 + $0x48] ss:$16 sps:$4 sm:$0xff]   ;;  %1753 = vmatprep.subr.bf16.mxu1 %v13782_v56  ;;  %v13694_v56 = vld [vmem:[#allocation15 + $0x304] ss:$16 sps:$4 sm:$0xff]  }
 0x14f   : > { %1754 = vmatpush1.bf16.msra.mxu1 %v13784_v57  ;;  %v13878_v57 = vld [vmem:[#allocation13 + $0x1ec] ss:$16 sps:$4 sm:$0xff]  }
 0x150   : > { %1596 = vmatmul.mubr.bf16.gmra.mrb[16].mxu0 %v13547_v58  ;;  %v13632_v58 = vld [vmem:[#allocation15 + $0x160] ss:$16 sps:$4 sm:$0xff]  }
 0x151   : > { %1653 = vmatpush1.bf16.msra.mxu0 %v13548_v59  ;;  %1605 = vmatprep.mubr.bf16.mxu0 %v13554_v60  ;;  %v13640_v59 = vld [vmem:[#allocation15 + $0x184] ss:$16 sps:$4 sm:$0xff]   ;;  %v13637_v60 = vld [vmem:[%s15619_s29 + $0xc8] ss:$16 sps:$4 sm:$0xff]  }
 0x152   : > { %1654 = vmatprep.subr.bf16.mxu0 %v13553_v61  ;;  %v13788_v61 = vld [vmem:[#allocation13 + $0x6c] ss:$16 sps:$4 sm:$0xff]  }
 0x153   : > { %1755 = vmatprep.subr.bf16.mxu1 %v13788_v61  ;;  %v13697_v61 = vld [vmem:[#allocation15 + $0x324] ss:$16 sps:$4 sm:$0xff]  }
 0x155   : > { %1655 = vmatpush1.bf16.msra.mxu0 %v13551_v62  ;;  %v13790_v62 = vld [vmem:[#allocation13 + $0x68] ss:$16 sps:$4 sm:$0xff]  }
 0x156   : > { %1656 = vmatprep.subr.bf16.mxu0 %v13559_v63  ;;  %v13638_v63 = vld [vmem:[#allocation15 + $0x180] ss:$16 sps:$4 sm:$0xff]   ;;  %1756 = vmatpush1.bf16.msra.mxu1 %v13790_v62  ;;  %v13889_v62 = vld [vmem:[#allocation13 + $0x20c] ss:$16 sps:$4 sm:$0xff]  }
 0x158   : > { %1606 = vmatmul.mubr.bf16.gmra.mrb[20].mxu0 %v13556_v0  ;;  %v13644_v0 = vld [vmem:[%s15619_s29 + $0xec] ss:$16 sps:$4 sm:$0xff]  }
 0x159   : > { %1657 = vmatpush1.bf16.msra.mxu0 %v13557_v1  ;;  %1615 = vmatprep.mubr.bf16.mxu0 %v13563_v2  ;;  %v13643_v1 = vld [vmem:[#allocation15 + $0x1a4] ss:$16 sps:$4 sm:$0xff]   ;;  %v13797_v2 = vld [vmem:[#allocation13 + $0x8c] ss:$16 sps:$4 sm:$0xff]  }
 0x15a   : > { %1658 = vmatprep.subr.bf16.mxu0 %v13562_v3  ;;  %v13799_v3 = vld [vmem:[#allocation13 + $0x88] ss:$16 sps:$4 sm:$0xff]   ;;  %1757 = vmatprep.subr.bf16.mxu1 %v13797_v2  ;;  %v13703_v2 = vld [vmem:[#allocation15 + $0x344] ss:$16 sps:$4 sm:$0xff]  }
 0x15b   : > { %1758 = vmatpush1.bf16.msra.mxu1 %v13799_v3  ;;  %v14885_v3 = vld [vmem:[%s15619_s29] ss:$16 sps:$4 sm:$0xff]  }
 0x15d   : > { %1659 = vmatpush1.bf16.msra.mxu0 %v13560_v4  ;;  %v13641_v4 = vld [vmem:[#allocation15 + $0x1a0] ss:$16 sps:$4 sm:$0xff]  }
 0x15e   : > { %1660 = vmatprep.subr.bf16.mxu0 %v13568_v5  ;;  %v13649_v5 = vld [vmem:[#allocation15 + $0x1c4] ss:$16 sps:$4 sm:$0xff]  }
 0x160   : > { %1616 = vmatmul.mubr.bf16.gmra.mrb[24].mxu0 %v13565_v6  ;;  %v13646_v6 = vld [vmem:[%s15619_s29 + $0xe8] ss:$16 sps:$4 sm:$0xff]  }
 0x161   : > { %1661 = vmatpush1.bf16.msra.mxu0 %v13566_v7  ;;  %1625 = vmatprep.mubr.bf16.mxu0 %v13572_v8  ;;  %v13803_v7 = vld [vmem:[#allocation13 + $0xac] ss:$16 sps:$4 sm:$0xff]   ;;  %v13805_v8 = vld [vmem:[#allocation13 + $0xa8] ss:$16 sps:$4 sm:$0xff]  }
 0x162   : > { %1662 = vmatprep.subr.bf16.mxu0 %v13571_v9  ;;  %1759 = vmatprep.subr.bf16.mxu1 %v13803_v7  ;;  %v13647_v9 = vld [vmem:[#allocation15 + $0x1c0] ss:$16 sps:$4 sm:$0xff]   ;;  %v14886_v7 = vld [vmem:[%s15619_s29 + $0x24] ss:$16 sps:$4 sm:$0xff]  }
 0x163   : > { %1760 = vmatpush1.bf16.msra.mxu1 %v13805_v8  ;;  %v13707_v8 = vld [vmem:[%s15626_s27 + $0xc4] ss:$16 sps:$4 sm:$0xff]  }
 0x165   : > { %1663 = vmatpush1.bf16.msra.mxu0 %v13569_v10  ;;  %v13655_v10 = vld [vmem:[%s15626_s27 + $0x4] ss:$16 sps:$4 sm:$0xff]  }
 0x166   : > { %1664 = vmatprep.subr.bf16.mxu0 %v13577_v11  ;;  %v13652_v11 = vld [vmem:[#allocation15 + $0x1e4] ss:$16 sps:$4 sm:$0xff]  }
 0x168   : > { %1626 = vmatmul.mubr.bf16.gmra.mrb[28].mxu0 %v13574_v12  ;;  %v13812_v12 = vld [vmem:[#allocation13 + $0xcc] ss:$16 sps:$4 sm:$0xff]  }
 0x169   : > { %1665 = vmatpush1.bf16.msra.mxu0 %v13575_v13  ;;  %1668 = vmatprep.mubr.bf16.mxu0 %v13583_v14  ;;  %v13814_v13 = vld [vmem:[#allocation13 + $0xc8] ss:$16 sps:$4 sm:$0xff]   ;;  %v13650_v14 = vld [vmem:[#allocation15 + $0x1e0] ss:$16 sps:$4 sm:$0xff]  }
 0x16a   : > { %1666 = vmatprep.subr.bf16.mxu0 %v13580_v15  ;;  %1761 = vmatprep.subr.bf16.mxu1 %v13812_v12  ;;  %v13658_v15 = vld [vmem:[#allocation15 + $0x204] ss:$16 sps:$4 sm:$0xff]   ;;  %v13902_v12 = vld [vmem:[#allocation13 + $0x248] ss:$16 sps:$4 sm:$0xff]  }
 0x16b   : > { %1762 = vmatpush1.bf16.msra.mxu1 %v13814_v13  ;;  %v13709_v13 = vld [vmem:[%s15626_s27 + $0xc0] ss:$16 sps:$4 sm:$0xff]  }
 0x16d   : > { %1667 = vmatpush1.bf16.msra.mxu0 %v13578_v16  ;;  %v13653_v16 = vld [vmem:[%s15626_s27] ss:$16 sps:$4 sm:$0xff]  }
 0x16e   : > { %3021 = vmatprep.subr.bf16.mxu0 %v13586_v17  ;;  %v13818_v17 = vld [vmem:[#allocation13 + $0xec] ss:$16 sps:$4 sm:$0xff]  }
 0x16f   : > { %1763 = vmatprep.subr.bf16.mxu1 %v13818_v17  ;;  %v13710_v17 = vld [vmem:[#allocation15 + $0x380] ss:$16 sps:$4 sm:$0xff]  }
 0x170   : > { %1669 = vmatmul.mubr.bf16.vlgmr.msra.gmra.mrb[0].mxu0 %v13581_v18  ;;  %v13820_v18 = vld [vmem:[#allocation13 + $0xe8] ss:$16 sps:$4 sm:$0xff]  }
 0x171   : > { %3022 = vmatpush1.bf16.msra.mxu0 %v13584_v19  ;;  %1678 = vmatprep.mubr.bf16.mxu0 %v13590_v20  ;;  %v13656_v19 = vld [vmem:[#allocation15 + $0x200] ss:$16 sps:$4 sm:$0xff]   ;;  %v13662_v20 = vld [vmem:[%s15626_s27 + $0x24] ss:$16 sps:$4 sm:$0xff]  }
 0x172   : > { %3023 = vmatprep.subr.bf16.mxu0 %v13589_v21  ;;  %v13661_v21 = vld [vmem:[#allocation15 + $0x224] ss:$16 sps:$4 sm:$0xff]   ;;  %1764 = vmatpush1.bf16.msra.mxu1 %v13820_v18  ;;  %v13908_v18 = vld [vmem:[#allocation13 + $0x268] ss:$16 sps:$4 sm:$0xff]  }
 0x175   : > { %3024 = vmatpush1.bf16.msra.mxu0 %v13587_v22  ;;  %v13827_v22 = vld [vmem:[#allocation13 + $0x10c] ss:$16 sps:$4 sm:$0xff]  }
 0x176   : > { %3025 = vmatprep.subr.bf16.mxu0 %v13595_v23  ;;  %v13829_v23 = vld [vmem:[#allocation13 + $0x108] ss:$16 sps:$4 sm:$0xff]   ;;  %1765 = vmatprep.subr.bf16.mxu1 %v13827_v22  ;;  %v13919_v22 = vld [vmem:[#allocation13 + $0x28c] ss:$16 sps:$4 sm:$0xff]  }
 0x177   : > { %1766 = vmatpush1.bf16.msra.mxu1 %v13829_v23  ;;  %v13713_v23 = vld [vmem:[#allocation15 + $0x3a0] ss:$16 sps:$4 sm:$0xff]  }
 0x178   : > { %1679 = vmatmul.mubr.bf16.gmra.mrb[4].mxu0 %v13592_v24  ;;  %v13659_v24 = vld [vmem:[#allocation15 + $0x220] ss:$16 sps:$4 sm:$0xff]  }
 0x179   : > { %3026 = vmatpush1.bf16.msra.mxu0 %v13593_v25  ;;  %1688 = vmatprep.mubr.bf16.mxu0 %v13599_v26  ;;  %v13667_v25 = vld [vmem:[#allocation15 + $0x244] ss:$16 sps:$4 sm:$0xff]   ;;  %v13664_v26 = vld [vmem:[%s15626_s27 + $0x20] ss:$16 sps:$4 sm:$0xff]  }
 0x17a   : > { %3027 = vmatprep.subr.bf16.mxu0 %v13598_v27  ;;  %v13833_v27 = vld [vmem:[#allocation13 + $0x12c] ss:$16 sps:$4 sm:$0xff]  }
 0x17b   : > { %1767 = vmatprep.subr.bf16.mxu1 %v13833_v27  ;;  %v14889_v27 = vld [vmem:[%s15619_s29 + $0x40] ss:$16 sps:$4 sm:$0xff]  }
 0x17d   : > { %3028 = vmatpush1.bf16.msra.mxu0 %v13596_v28  ;;  %v13835_v28 = vld [vmem:[#allocation13 + $0x128] ss:$16 sps:$4 sm:$0xff]  }
 0x17e   : > { %3029 = vmatprep.subr.bf16.mxu0 %v13604_v29  ;;  %v13665_v29 = vld [vmem:[#allocation15 + $0x240] ss:$16 sps:$4 sm:$0xff]   ;;  %1768 = vmatpush1.bf16.msra.mxu1 %v13835_v28  ;;  %v13925_v28 = vld [vmem:[#allocation13 + $0x2ac] ss:$16 sps:$4 sm:$0xff]  }
 0x180   : > { %1689 = vmatmul.mubr.bf16.gmra.mrb[8].mxu0 %v13601_v30  ;;  %v13671_v30 = vld [vmem:[%s15626_s27 + $0x44] ss:$16 sps:$4 sm:$0xff]  }
 0x181   : > { %3030 = vmatpush1.bf16.msra.mxu0 %v13602_v31  ;;  %1698 = vmatprep.mubr.bf16.mxu0 %v13608_v32  ;;  %v13670_v31 = vld [vmem:[#allocation15 + $0x264] ss:$16 sps:$4 sm:$0xff]   ;;  %v13842_v32 = vld [vmem:[#allocation13 + $0x14c] ss:$16 sps:$4 sm:$0xff]  }
 0x182   : > { %3031 = vmatprep.subr.bf16.mxu0 %v13607_v33  ;;  %v13844_v33 = vld [vmem:[#allocation13 + $0x148] ss:$16 sps:$4 sm:$0xff]   ;;  %1769 = vmatprep.subr.bf16.mxu1 %v13842_v32  ;;  %v13727_v32 = vld [vmem:[%s15626_s27 + $0xc] ss:$16 sps:$4 sm:$0xff]  }
 0x183   : > { %1770 = vmatpush1.bf16.msra.mxu1 %v13844_v33  ;;  %v13724_v33 = vld [vmem:[#allocation15 + $0x3e4] ss:$16 sps:$4 sm:$0xff]  }
 0x185   : > { %3032 = vmatpush1.bf16.msra.mxu0 %v13605_v34  ;;  %v13668_v34 = vld [vmem:[#allocation15 + $0x260] ss:$16 sps:$4 sm:$0xff]  }
 0x186   : > { %3033 = vmatprep.subr.bf16.mxu0 %v13613_v35  ;;  %v13676_v35 = vld [vmem:[#allocation15 + $0x284] ss:$16 sps:$4 sm:$0xff]  }
 0x188   : > { %1699 = vmatmul.mubr.bf16.gmra.mrb[12].mxu0 %v13610_v36  ;;  %v13673_v36 = vld [vmem:[%s15626_s27 + $0x40] ss:$16 sps:$4 sm:$0xff]  }
 0x189   : > { %3034 = vmatpush1.bf16.msra.mxu0 %v13611_v37  ;;  %1708 = vmatprep.mubr.bf16.mxu0 %v13617_v38  ;;  %v13848_v37 = vld [vmem:[#allocation13 + $0x16c] ss:$16 sps:$4 sm:$0xff]   ;;  %v13850_v38 = vld [vmem:[#allocation13 + $0x168] ss:$16 sps:$4 sm:$0xff]  }
 0x18a   : > { %3035 = vmatprep.subr.bf16.mxu0 %v13616_v39  ;;  %1771 = vmatprep.subr.bf16.mxu1 %v13848_v37  ;;  %v13674_v39 = vld [vmem:[#allocation15 + $0x280] ss:$16 sps:$4 sm:$0xff]   ;;  %v13725_v37 = vld [vmem:[%s15626_s27 + $0x8] ss:$16 sps:$4 sm:$0xff]  }
 0x18b   : > { %1772 = vmatpush1.bf16.msra.mxu1 %v13850_v38  ;;  %v13730_v38 = vld [vmem:[#allocation16 + $0x4] ss:$16 sps:$4 sm:$0xff]  }
 0x18d   : > { %3036 = vmatpush1.bf16.msra.mxu0 %v13614_v40  ;;  %v13680_v40 = vld [vmem:[%s15626_s27 + $0x64] ss:$16 sps:$4 sm:$0xff]  }
 0x18e   : > { %3037 = vmatprep.subr.bf16.mxu0 %v13622_v41  ;;  %v13679_v41 = vld [vmem:[#allocation15 + $0x2a4] ss:$16 sps:$4 sm:$0xff]  }
 0x190   : > { %1709 = vmatmul.mubr.bf16.gmra.mrb[16].mxu0 %v13619_v42  ;;  %v13857_v42 = vld [vmem:[#allocation13 + $0x18c] ss:$16 sps:$4 sm:$0xff]  }
 0x191   : > { %3038 = vmatpush1.bf16.msra.mxu0 %v13620_v43  ;;  %1718 = vmatprep.mubr.bf16.mxu0 %v13626_v44  ;;  %v13859_v43 = vld [vmem:[#allocation13 + $0x188] ss:$16 sps:$4 sm:$0xff]   ;;  %v13677_v44 = vld [vmem:[#allocation15 + $0x2a0] ss:$16 sps:$4 sm:$0xff]  }
 0x192   : > { %3039 = vmatprep.subr.bf16.mxu0 %v13625_v45  ;;  %1773 = vmatprep.subr.bf16.mxu1 %v13857_v42  ;;  %v13682_v45 = vld [vmem:[%s15626_s27 + $0x60] ss:$16 sps:$4 sm:$0xff]   ;;  %v13938_v42 = vld [vmem:[#allocation13 + $0x2e8] ss:$16 sps:$4 sm:$0xff]  }
 0x193   : > { %1774 = vmatpush1.bf16.msra.mxu1 %v13859_v43  ;;  %v14892_v43 = vld [vmem:[%s15619_s29 + $0x84] ss:$16 sps:$4 sm:$0xff]  }
 0x194   : > { %1775 = vmatprep.subr.bf16.mxu1 %v13863_v47  ;;  %v13731_v47 = vld [vmem:[#allocation16 + $0x20] ss:$16 sps:$4 sm:$0xff]  }
 0x195   : > { %3040 = vmatpush1.bf16.msra.mxu0 %v13623_v48  ;;  %v13683_v48 = vld [vmem:[#allocation15 + $0x2c0] ss:$16 sps:$4 sm:$0xff]  }
 0x196   : > { %3041 = vmatprep.subr.bf16.mxu0 %v13631_v49  ;;  %v13865_v49 = vld [vmem:[#allocation13 + $0x1a8] ss:$16 sps:$4 sm:$0xff]  }
 0x197   : > { %1776 = vmatpush1.bf16.msra.mxu1 %v13865_v49  ;;  %v13739_v49 = vld [vmem:[#allocation16 + $0x44] ss:$16 sps:$4 sm:$0xff]  }
 0x198   : > { %1719 = vmatmul.mubr.bf16.gmra.mrb[20].mxu0 %v13628_v50  ;;  %v13689_v50 = vld [vmem:[%s15626_s27 + $0x84] ss:$16 sps:$4 sm:$0xff]   ;;  %1777 = vmatprep.subr.bf16.mxu1 %v13872_v52  ;;  %v13949_v52 = vld [vmem:[#allocation13 + $0x32c] ss:$16 sps:$4 sm:$0xff]  }
 0x199   : > { %3042 = vmatpush1.bf16.msra.mxu0 %v13629_v53  ;;  %1728 = vmatprep.mubr.bf16.mxu0 %v13635_v54  ;;  %v13686_v53 = vld [vmem:[#allocation15 + $0x2e0] ss:$16 sps:$4 sm:$0xff]   ;;  %v13874_v54 = vld [vmem:[#allocation13 + $0x1c8] ss:$16 sps:$4 sm:$0xff]  }
 0x19a   : > { %3043 = vmatprep.subr.bf16.mxu0 %v13634_v55  ;;  %v13691_v55 = vld [vmem:[%s15626_s27 + $0x80] ss:$16 sps:$4 sm:$0xff]  }
 0x19b   : > { %1778 = vmatpush1.bf16.msra.mxu1 %v13874_v54  ;;  %v13947_v54 = vld [vmem:[#allocation13 + $0x328] ss:$16 sps:$4 sm:$0xff]  }
 0x19c   : > { %1779 = vmatprep.subr.bf16.mxu1 %v13878_v57  ;;  %v13742_v57 = vld [vmem:[#allocation16 + $0x64] ss:$16 sps:$4 sm:$0xff]  }
 0x19d   : > { %3044 = vmatpush1.bf16.msra.mxu0 %v13632_v58  ;;  %v13692_v58 = vld [vmem:[#allocation15 + $0x300] ss:$16 sps:$4 sm:$0xff]  }
 0x19e   : > { %3045 = vmatprep.subr.bf16.mxu0 %v13640_v59  ;;  %v13880_v59 = vld [vmem:[#allocation13 + $0x1e8] ss:$16 sps:$4 sm:$0xff]  }
 0x19f   : > { %1780 = vmatpush1.bf16.msra.mxu1 %v13880_v59  ;;  %v13740_v59 = vld [vmem:[#allocation16 + $0x60] ss:$16 sps:$4 sm:$0xff]  }
 0x1a0   : > { %1729 = vmatmul.mubr.bf16.gmra.mrb[24].mxu0 %v13637_v60  ;;  %v13698_v60 = vld [vmem:[%s15626_s27 + $0xa4] ss:$16 sps:$4 sm:$0xff]   ;;  %1862 = vmatprep.subr.bf16.mxu1 %v13889_v62  ;;  %v13745_v62 = vld [vmem:[%s15626_s27 + $0x48] ss:$16 sps:$4 sm:$0xff]  }
 0x1a1   : > { %3046 = vmatpush1.bf16.msra.mxu0 %v13638_v63  ;;  %1738 = vmatprep.mubr.bf16.mxu0 %v13644_v0  ;;  %v13695_v63 = vld [vmem:[#allocation15 + $0x320] ss:$16 sps:$4 sm:$0xff]   ;;  %v13887_v0 = vld [vmem:[#allocation13 + $0x208] ss:$16 sps:$4 sm:$0xff]  }
 0x1a2   : > { %3047 = vmatprep.subr.bf16.mxu0 %v13643_v1  ;;  %v13700_v1 = vld [vmem:[%s15626_s27 + $0xa0] ss:$16 sps:$4 sm:$0xff]   ;;  %1782 = vmatmul.mubr.bf16.vlgmr.msra.gmra.mrb[0].mxu1 %v14885_v3  ;;  %v14896_v3 = vld [vmem:[%s15619_s29 + $0xc4] ss:$16 sps:$4 sm:$0xff]  }
 0x1a3   : > { %1863 = vmatpush1.bf16.msra.mxu1 %v13887_v0  ;;  %1791 = vmatprep.mubr.bf16.mxu1 %v14886_v7  ;;  %v13958_v0 = vld [vmem:[#allocation13 + $0x36c] ss:$16 sps:$4 sm:$0xff]   ;;  %v13962_v7 = vld [vmem:[#allocation13 + $0x388] ss:$16 sps:$4 sm:$0xff]  }
 0x1a5   : > { %3048 = vmatpush1.bf16.msra.mxu0 %v13641_v4  ;;  %v13895_v4 = vld [vmem:[#allocation13 + $0x22c] ss:$16 sps:$4 sm:$0xff]  }
 0x1a6   : > { %3049 = vmatprep.subr.bf16.mxu0 %v13649_v5  ;;  %v13701_v5 = vld [vmem:[#allocation15 + $0x340] ss:$16 sps:$4 sm:$0xff]   ;;  %1864 = vmatprep.subr.bf16.mxu1 %v13895_v4  ;;  %v13752_v4 = vld [vmem:[%s15626_s27 + $0x6c] ss:$16 sps:$4 sm:$0xff]  }
 0x1a8   : > { %1739 = vmatmul.mubr.bf16.gmra.mrb[28].mxu0 %v13646_v6  ;;  %v13893_v6 = vld [vmem:[#allocation13 + $0x228] ss:$16 sps:$4 sm:$0xff]  }
 0x1a9   : > { %3050 = vmatpush1.bf16.msra.mxu0 %v13647_v9  ;;  %3053 = vmatprep.mubr.bf16.mxu0 %v13655_v10  ;;  %v13706_v9 = vld [vmem:[#allocation15 + $0x364] ss:$16 sps:$4 sm:$0xff]   ;;  %v13904_v10 = vld [vmem:[#allocation13 + $0x24c] ss:$16 sps:$4 sm:$0xff]  }
 0x1aa   : > { %3051 = vmatprep.subr.bf16.mxu0 %v13652_v11  ;;  %v13704_v11 = vld [vmem:[#allocation15 + $0x360] ss:$16 sps:$4 sm:$0xff]   ;;  %1865 = vmatpush1.bf16.msra.mxu1 %v13893_v6  ;;  %v13964_v6 = vld [vmem:[#allocation13 + $0x38c] ss:$16 sps:$4 sm:$0xff]  }
 0x1ab   : > { %1866 = vmatprep.subr.bf16.mxu1 %v13904_v10  ;;  %v13967_v10 = vld [vmem:[#allocation13 + $0x3ac] ss:$16 sps:$4 sm:$0xff]  }
 0x1ad   : > { %3052 = vmatpush1.bf16.msra.mxu0 %v13650_v14  ;;  %v13712_v14 = vld [vmem:[#allocation15 + $0x384] ss:$16 sps:$4 sm:$0xff]  }
 0x1ae   : > { %3134 = vmatprep.subr.bf16.mxu0 %v13658_v15  ;;  %v14887_v15 = vld [vmem:[%s15619_s29 + $0x20] ss:$16 sps:$4 sm:$0xff]   ;;  %1867 = vmatpush1.bf16.msra.mxu1 %v13902_v12 }
 0x1af   : > { %1792 = vmatmul.mubr.bf16.gmra.mrb[4].mxu1 %v14887_v15  ;;  %v14897_v12 = vld [vmem:[%s15619_s29 + $0xc0] ss:$16 sps:$4 sm:$0xff]   ;;  %v13761_v15 = vld [vmem:[%s15626_s27 + $0x8c] ss:$16 sps:$4 sm:$0xff]  }
 0x1b0   : > { %3054 = vmatmul.mubr.bf16.vlgmr.msra.gmra.mrb[32].mxu0 %v13653_v16  ;;  %v13910_v16 = vld [vmem:[#allocation13 + $0x26c] ss:$16 sps:$4 sm:$0xff]  }
 0x1b1   : > { %3135 = vmatpush1.bf16.msra.mxu0 %v13656_v19  ;;  %3063 = vmatprep.mubr.bf16.mxu0 %v13662_v20  ;;  %v14888_v19 = vld [vmem:[%s15619_s29 + $0x44] ss:$16 sps:$4 sm:$0xff]  }
 0x1b2   : > { %3136 = vmatprep.subr.bf16.mxu0 %v13661_v21  ;;  %1801 = vmatprep.mubr.bf16.mxu1 %v14888_v19  ;;  %v13716_v20 = vld [vmem:[%s15626_s27 + $0xe4] ss:$16 sps:$4 sm:$0xff]   ;;  %v13971_v19 = vld [vmem:[#allocation13 + $0x3c8] ss:$16 sps:$4 sm:$0xff]  }
 0x1b3   : > { %1868 = vmatprep.subr.bf16.mxu1 %v13910_v16  ;;  %v13715_v21 = vld [vmem:[#allocation15 + $0x3a4] ss:$16 sps:$4 sm:$0xff]  }
 0x1b4   : > { %1869 = vmatpush1.bf16.msra.mxu1 %v13908_v18  ;;  %v14898_v16 = vld [vmem:[%s15619_s29 + $0xe4] ss:$16 sps:$4 sm:$0xff]   ;;  %v13973_v18 = vld [vmem:[#allocation13 + $0x3cc] ss:$16 sps:$4 sm:$0xff]  }
 0x1b5   : > { %3137 = vmatpush1.bf16.msra.mxu0 %v13659_v24  ;;  %v13917_v24 = vld [vmem:[#allocation13 + $0x288] ss:$16 sps:$4 sm:$0xff]   ;;  %1870 = vmatprep.subr.bf16.mxu1 %v13919_v22  ;;  %v13976_v22 = vld [vmem:[#allocation13 + $0x3ec] ss:$16 sps:$4 sm:$0xff]  }
 0x1b6   : > { %3138 = vmatprep.subr.bf16.mxu0 %v13667_v25  ;;  %v13718_v25 = vld [vmem:[%s15626_s27 + $0xe0] ss:$16 sps:$4 sm:$0xff]  }
 0x1b7   : > { %1802 = vmatmul.mubr.bf16.gmra.mrb[8].mxu1 %v14889_v27  ;;  %v13776_v27 = vld [vmem:[%s15626_s27 + $0xac] ss:$16 sps:$4 sm:$0xff]  }
 0x1b8   : > { %3064 = vmatmul.mubr.bf16.gmra.mrb[36].mxu0 %v13664_v26  ;;  %v13721_v26 = vld [vmem:[#allocation15 + $0x3c4] ss:$16 sps:$4 sm:$0xff]   ;;  %1871 = vmatpush1.bf16.msra.mxu1 %v13917_v24  ;;  %v13763_v24 = vld [vmem:[%s15626_s27 + $0x88] ss:$16 sps:$4 sm:$0xff]  }
 0x1b9   : > { %3139 = vmatpush1.bf16.msra.mxu0 %v13665_v29  ;;  %3073 = vmatprep.mubr.bf16.mxu0 %v13671_v30  ;;  %v13719_v29 = vld [vmem:[#allocation15 + $0x3c0] ss:$16 sps:$4 sm:$0xff]   ;;  %v13923_v30 = vld [vmem:[#allocation13 + $0x2a8] ss:$16 sps:$4 sm:$0xff]  }
 0x1ba   : > { %3140 = vmatprep.subr.bf16.mxu0 %v13670_v31  ;;  %v14890_v31 = vld [vmem:[%s15619_s29 + $0x64] ss:$16 sps:$4 sm:$0xff]   ;;  %1872 = vmatprep.subr.bf16.mxu1 %v13925_v28  ;;  %v14900_v28 = vld [vmem:[%s15619_s29 + $0xc] ss:$16 sps:$4 sm:$0xff]  }
 0x1bb   : > { %1811 = vmatprep.mubr.bf16.mxu1 %v14890_v31  ;;  %v13980_v31 = vld [vmem:[#allocation15 + $0x8] ss:$16 sps:$4 sm:$0xff]  }
 0x1bc   : > { %1873 = vmatpush1.bf16.msra.mxu1 %v13923_v30  ;;  %v13982_v30 = vld [vmem:[#allocation15 + $0xc] ss:$16 sps:$4 sm:$0xff]  }
 0x1bd   : > { %3141 = vmatpush1.bf16.msra.mxu0 %v13668_v34  ;;  %v13934_v34 = vld [vmem:[#allocation13 + $0x2cc] ss:$16 sps:$4 sm:$0xff]  }
 0x1be   : > { %3142 = vmatprep.subr.bf16.mxu0 %v13676_v35  ;;  %v13722_v35 = vld [vmem:[#allocation15 + $0x3e0] ss:$16 sps:$4 sm:$0xff]   ;;  %1874 = vmatprep.subr.bf16.mxu1 %v13934_v34  ;;  %v13985_v34 = vld [vmem:[#allocation15 + $0x2c] ss:$16 sps:$4 sm:$0xff]  }
 0x1c0   : > { %3074 = vmatmul.mubr.bf16.gmra.mrb[40].mxu0 %v13673_v36  ;;  %v13932_v36 = vld [vmem:[#allocation13 + $0x2c8] ss:$16 sps:$4 sm:$0xff]  }
 0x1c1   : > { %3143 = vmatpush1.bf16.msra.mxu0 %v13674_v39  ;;  %3083 = vmatprep.mubr.bf16.mxu0 %v13680_v40  ;;  %v14891_v39 = vld [vmem:[%s15619_s29 + $0x60] ss:$16 sps:$4 sm:$0xff]   ;;  %v13940_v40 = vld [vmem:[#allocation13 + $0x2ec] ss:$16 sps:$4 sm:$0xff]  }
 0x1c2   : > { %3144 = vmatprep.subr.bf16.mxu0 %v13679_v41  ;;  %1812 = vmatmul.mubr.bf16.gmra.mrb[12].mxu1 %v14891_v39  ;;  %v13728_v41 = vld [vmem:[#allocation16] ss:$16 sps:$4 sm:$0xff]   ;;  %v13791_v39 = vld [vmem:[%s15626_s27 + $0xcc] ss:$16 sps:$4 sm:$0xff]  }
 0x1c3   : > { %1875 = vmatpush1.bf16.msra.mxu1 %v13932_v36  ;;  %1821 = vmatprep.mubr.bf16.mxu1 %v14892_v43  ;;  %v13778_v36 = vld [vmem:[%s15626_s27 + $0xa8] ss:$16 sps:$4 sm:$0xff]  }
 0x1c4   : > { %1876 = vmatprep.subr.bf16.mxu1 %v13940_v40  ;;  %v14902_v40 = vld [vmem:[%s15619_s29 + $0x2c] ss:$16 sps:$4 sm:$0xff]   ;;  %v13989_v43 = vld [vmem:[#allocation15 + $0x48] ss:$16 sps:$4 sm:$0xff]  }
 0x1c5   : > { %3145 = vmatpush1.bf16.msra.mxu0 %v13677_v44  ;;  %v13734_v44 = vld [vmem:[%s15626_s27 + $0x2c] ss:$16 sps:$4 sm:$0xff]  }
 0x1c6   : > { %3146 = vmatprep.subr.bf16.mxu0 %v13685_v46  ;;  %v13946_v46 = vld [vmem:[#allocation13 + $0x30c] ss:$16 sps:$4 sm:$0xff]  }
 0x1c7   : > { %1877 = vmatpush1.bf16.msra.mxu1 %v13938_v42  ;;  %v13991_v42 = vld [vmem:[#allocation15 + $0x4c] ss:$16 sps:$4 sm:$0xff]  }
 0x1c8   : > { %3084 = vmatmul.mubr.bf16.gmra.mrb[44].mxu0 %v13682_v45  ;;  %v13733_v45 = vld [vmem:[#allocation16 + $0x24] ss:$16 sps:$4 sm:$0xff]   ;;  %1878 = vmatprep.subr.bf16.mxu1 %v13946_v46  ;;  %v13994_v46 = vld [vmem:[#allocation15 + $0x6c] ss:$16 sps:$4 sm:$0xff]  }
 0x1c9   : > { %3147 = vmatpush1.bf16.msra.mxu0 %v13683_v48  ;;  %3093 = vmatprep.mubr.bf16.mxu0 %v13689_v50  ;;  %v13944_v48 = vld [vmem:[#allocation13 + $0x308] ss:$16 sps:$4 sm:$0xff]  }
 0x1ca   : > { %3148 = vmatprep.subr.bf16.mxu0 %v13688_v51  ;;  %v13736_v50 = vld [vmem:[%s15626_s27 + $0x28] ss:$16 sps:$4 sm:$0xff]   ;;  %v14893_v51 = vld [vmem:[%s15619_s29 + $0x80] ss:$16 sps:$4 sm:$0xff]  }
 0x1cb   : > { %1822 = vmatmul.mubr.bf16.gmra.mrb[16].mxu1 %v14893_v51  ;;  %v13806_v51 = vld [vmem:[%s15626_s27 + $0xec] ss:$16 sps:$4 sm:$0xff]  }
 0x1cc   : > { %1879 = vmatpush1.bf16.msra.mxu1 %v13944_v48  ;;  %v13793_v48 = vld [vmem:[%s15626_s27 + $0xc8] ss:$16 sps:$4 sm:$0xff]  }
 0x1cd   : > { %3149 = vmatpush1.bf16.msra.mxu0 %v13686_v53  ;;  %v13737_v53 = vld [vmem:[#allocation16 + $0x40] ss:$16 sps:$4 sm:$0xff]   ;;  %1880 = vmatprep.subr.bf16.mxu1 %v13949_v52  ;;  %v14904_v52 = vld [vmem:[%s15619_s29 + $0x4c] ss:$16 sps:$4 sm:$0xff]  }
 0x1ce   : > { %3150 = vmatprep.subr.bf16.mxu0 %v13694_v56  ;;  %v13743_v56 = vld [vmem:[%s15626_s27 + $0x4c] ss:$16 sps:$4 sm:$0xff]  }
 0x1d0   : > { %3094 = vmatmul.mubr.bf16.gmra.mrb[48].mxu0 %v13691_v55  ;;  %v14894_v55 = vld [vmem:[%s15619_s29 + $0xa4] ss:$16 sps:$4 sm:$0xff]   ;;  %1881 = vmatpush1.bf16.msra.mxu1 %v13947_v54  ;;  %v14000_v54 = vld [vmem:[#allocation15 + $0x8c] ss:$16 sps:$4 sm:$0xff]  }
 0x1d1   : > { %3151 = vmatpush1.bf16.msra.mxu0 %v13692_v58  ;;  %3103 = vmatprep.mubr.bf16.mxu0 %v13698_v60  ;;  %v13955_v58 = vld [vmem:[#allocation13 + $0x34c] ss:$16 sps:$4 sm:$0xff]   ;;  %v13953_v60 = vld [vmem:[#allocation13 + $0x348] ss:$16 sps:$4 sm:$0xff]  }
 0x1d2   : > { %3152 = vmatprep.subr.bf16.mxu0 %v13697_v61  ;;  %1831 = vmatprep.mubr.bf16.mxu1 %v14894_v55  ;;  %v13748_v61 = vld [vmem:[#allocation16 + $0x84] ss:$16 sps:$4 sm:$0xff]   ;;  %v13998_v55 = vld [vmem:[#allocation15 + $0x88] ss:$16 sps:$4 sm:$0xff]  }
 0x1d3   : > { %1882 = vmatprep.subr.bf16.mxu1 %v13955_v58  ;;  %v14003_v58 = vld [vmem:[#allocation15 + $0xac] ss:$16 sps:$4 sm:$0xff]  }
 0x1d4   : > { %1883 = vmatpush1.bf16.msra.mxu1 %v13953_v60  ;;  %v15726_v60 = vld [vmem:[%s15626_s27 + $0xe8] ss:$16 sps:$4 sm:$0xff]  }
 0x1d5   : > { %3153 = vmatpush1.bf16.msra.mxu0 %v13695_v63  ;;  %v14895_v63 = vld [vmem:[%s15619_s29 + $0xa0] ss:$16 sps:$4 sm:$0xff]   ;;  %1884 = vmatprep.subr.bf16.mxu1 %v13958_v0  ;;  %v14906_v0 = vld [vmem:[%s15619_s29 + $0x6c] ss:$16 sps:$4 sm:$0xff]  }
 0x1d6   : > { %3154 = vmatprep.subr.bf16.mxu0 %v13703_v2  ;;  %1832 = vmatmul.mubr.bf16.gmra.mrb[20].mxu1 %v14895_v63  ;;  %v13956_v2 = vld [vmem:[#allocation13 + $0x368] ss:$16 sps:$4 sm:$0xff]   ;;  %v15730_v63 = vld [vmem:[%s15632_s17 + $0x4] ss:$16 sps:$4 sm:$0xff]  }
 0x1d7   : > { %1841 = vmatprep.mubr.bf16.mxu1 %v14896_v3  ;;  %v14007_v3 = vld [vmem:[#allocation15 + $0xc8] ss:$16 sps:$4 sm:$0xff]  }
 0x1d8   : > { %3104 = vmatmul.mubr.bf16.gmra.mrb[52].mxu0 %v13700_v1  ;;  %v13746_v1 = vld [vmem:[#allocation16 + $0x80] ss:$16 sps:$4 sm:$0xff]   ;;  %1885 = vmatpush1.bf16.msra.mxu1 %v13956_v2  ;;  %v14009_v2 = vld [vmem:[#allocation15 + $0xcc] ss:$16 sps:$4 sm:$0xff]  }
 0x1d9   : > { %3155 = vmatpush1.bf16.msra.mxu0 %v13701_v5  ;;  %3113 = vmatprep.mubr.bf16.mxu0 %v13707_v8  ;;  %v13751_v5 = vld [vmem:[#allocation16 + $0xa4] ss:$16 sps:$4 sm:$0xff]   ;;  %v13749_v8 = vld [vmem:[#allocation16 + $0xa0] ss:$16 sps:$4 sm:$0xff]  }
 0x1da   : > { %3156 = vmatprep.subr.bf16.mxu0 %v13706_v9  ;;  %1886 = vmatprep.subr.bf16.mxu1 %v13964_v6  ;;  %v13757_v9 = vld [vmem:[#allocation16 + $0xc4] ss:$16 sps:$4 sm:$0xff]  }
 0x1db   : > { %v13826_v6 = vld [vmem:[#allocation16 + $0x204] ss:$16 sps:$4 sm:$0xff]  }
 0x1dc   : > { %1887 = vmatpush1.bf16.msra.mxu1 %v13962_v7  ;;  %v14907_v7 = vld [vmem:[%s15619_s29 + $0x68] ss:$16 sps:$4 sm:$0xff]  }
 0x1dd   : > { %3157 = vmatpush1.bf16.msra.mxu0 %v13704_v11  ;;  %v13754_v11 = vld [vmem:[%s15626_s27 + $0x68] ss:$16 sps:$4 sm:$0xff]   ;;  %1888 = vmatprep.subr.bf16.mxu1 %v13967_v10 }
 0x1de   : > { %3158 = vmatprep.subr.bf16.mxu0 %v13712_v14  ;;  %1842 = vmatmul.mubr.bf16.gmra.mrb[24].mxu1 %v14897_v12  ;;  %v13755_v14 = vld [vmem:[#allocation16 + $0xc0] ss:$16 sps:$4 sm:$0xff]   ;;  %v14010_v10 = vld [vmem:[#allocation15 + $0xe8] ss:$16 sps:$4 sm:$0xff]   ;;  %v13832_v12 = vld [vmem:[#allocation16 + $0x224] ss:$16 sps:$4 sm:$0xff]  }
 0x1df   : > { %1851 = vmatprep.mubr.bf16.mxu1 %v14898_v16  ;;  %v14018_v16 = vld [vmem:[#allocation15 + $0x12c] ss:$16 sps:$4 sm:$0xff]  }
 0x1e0   : > { %3114 = vmatmul.mubr.bf16.gmra.mrb[56].mxu0 %v13709_v13  ;;  %v13965_v13 = vld [vmem:[#allocation13 + $0x3a8] ss:$16 sps:$4 sm:$0xff]  }
 0x1e1   : > { %3159 = vmatpush1.bf16.msra.mxu0 %v13710_v17  ;;  %3123 = vmatprep.mubr.bf16.mxu0 %v13716_v20  ;;  %v13760_v17 = vld [vmem:[#allocation16 + $0xe4] ss:$16 sps:$4 sm:$0xff]   ;;  %v13758_v20 = vld [vmem:[#allocation16 + $0xe0] ss:$16 sps:$4 sm:$0xff]  }
 0x1e2   : > { %3160 = vmatprep.subr.bf16.mxu0 %v13715_v21  ;;  %1889 = vmatpush1.bf16.msra.mxu1 %v13965_v13  ;;  %v13766_v21 = vld [vmem:[#allocation16 + $0x104] ss:$16 sps:$4 sm:$0xff]  }
 0x1e3   : > { %1890 = vmatprep.subr.bf16.mxu1 %v13973_v18  ;;  %v15741_v13 = vld [vmem:[%s15632_s17 + $0x24] ss:$16 sps:$4 sm:$0xff]  }
 0x1e4   : > { %v13841_v18 = vld [vmem:[#allocation16 + $0x244] ss:$16 sps:$4 sm:$0xff]  }
 0x1e5   : > { %3161 = vmatpush1.bf16.msra.mxu0 %v13713_v23  ;;  %v13974_v23 = vld [vmem:[#allocation13 + $0x3e8] ss:$16 sps:$4 sm:$0xff]  }
 0x1e6   : > { %3162 = vmatprep.subr.bf16.mxu0 %v13721_v26  ;;  %v13764_v26 = vld [vmem:[#allocation16 + $0x100] ss:$16 sps:$4 sm:$0xff]   ;;  %1891 = vmatpush1.bf16.msra.mxu1 %v13971_v19  ;;  %v14016_v19 = vld [vmem:[#allocation15 + $0x128] ss:$16 sps:$4 sm:$0xff]  }
 0x1e7   : > { %1892 = vmatprep.subr.bf16.mxu1 %v13976_v22  ;;  %v14021_v22 = vld [vmem:[#allocation15 + $0x14c] ss:$16 sps:$4 sm:$0xff]  }
 0x1e8   : > { %3124 = vmatmul.mubr.bf16.gmra.mrb[60].mxu0 %v13718_v25  ;;  %v14899_v25 = vld [vmem:[%s15619_s29 + $0xe0] ss:$16 sps:$4 sm:$0xff]  }
 0x1e9   : > { %3163 = vmatpush1.bf16.msra.mxu0 %v13719_v29  ;;  %3166 = vmatprep.mubr.bf16.mxu0 %v13727_v32  ;;  %v13772_v29 = vld [vmem:[#allocation16 + $0x124] ss:$16 sps:$4 sm:$0xff]   ;;  %v13770_v32 = vld [vmem:[#allocation16 + $0x120] ss:$16 sps:$4 sm:$0xff]  }
 0x1ea   : > { %3164 = vmatprep.subr.bf16.mxu0 %v13724_v33  ;;  %1852 = vmatmul.mubr.bf16.gmra.mrb[28].mxu1 %v14899_v25  ;;  %v13781_v33 = vld [vmem:[#allocation16 + $0x144] ss:$16 sps:$4 sm:$0xff]   ;;  %v14910_v25 = vld [vmem:[%s15619_s29 + $0xac] ss:$16 sps:$4 sm:$0xff]  }
 0x1eb   : > { %1894 = vmatprep.mubr.bf16.mxu1 %v14900_v28  ;;  %1893 = vmatpush1.bf16.msra.mxu1 %v13974_v23  ;;  %v13839_v23 = vld [vmem:[#allocation16 + $0x240] ss:$16 sps:$4 sm:$0xff]   ;;  %v14019_v28 = vld [vmem:[#allocation15 + $0x148] ss:$16 sps:$4 sm:$0xff]  }
 0x1ec   : > { %3247 = vmatprep.subr.bf16.mxu1 %v13982_v30  ;;  %v13845_v30 = vld [vmem:[#allocation16 + $0x260] ss:$16 sps:$4 sm:$0xff]  }
 0x1ed   : > { %3165 = vmatpush1.bf16.msra.mxu0 %v13722_v35  ;;  %v13983_v35 = vld [vmem:[#allocation15 + $0x28] ss:$16 sps:$4 sm:$0xff]  }
 0x1ee   : > { %4519 = vmatprep.subr.bf16.mxu0 %v13730_v38  ;;  %v13779_v38 = vld [vmem:[#allocation16 + $0x140] ss:$16 sps:$4 sm:$0xff]  }
 0x1f0   : > { %3167 = vmatmul.mubr.bf16.vlgmr.msra.gmra.mrb[32].mxu0 %v13725_v37  ;;  %v14901_v37 = vld [vmem:[%s15619_s29 + $0x8] ss:$16 sps:$4 sm:$0xff]  }
 0x1f1   : > { %4520 = vmatpush1.bf16.msra.mxu0 %v13728_v41  ;;  %3176 = vmatprep.mubr.bf16.mxu0 %v13734_v44  ;;  %v13787_v41 = vld [vmem:[#allocation16 + $0x164] ss:$16 sps:$4 sm:$0xff]   ;;  %v13785_v44 = vld [vmem:[#allocation16 + $0x160] ss:$16 sps:$4 sm:$0xff]  }
 0x1f2   : > { %4521 = vmatprep.subr.bf16.mxu0 %v13733_v45  ;;  %1895 = vmatmul.mubr.bf16.vlgmr.msra.gmra.mrb[0].mxu1 %v14901_v37  ;;  %v13796_v45 = vld [vmem:[#allocation16 + $0x184] ss:$16 sps:$4 sm:$0xff]   ;;  %v14027_v37 = vld [vmem:[#allocation15 + $0x18c] ss:$16 sps:$4 sm:$0xff]  }
 0x1f3   : > { %3248 = vmatpush1.bf16.msra.mxu1 %v13980_v31  ;;  %1904 = vmatprep.mubr.bf16.mxu1 %v14902_v40  ;;  %v13856_v31 = vld [vmem:[#allocation16 + $0x284] ss:$16 sps:$4 sm:$0xff]  }
 0x1f4   : > { %3249 = vmatprep.subr.bf16.mxu1 %v13985_v34  ;;  %v14022_v34 = vld [vmem:[#allocation15 + $0x168] ss:$16 sps:$4 sm:$0xff]  }
 0x1f5   : > { %4522 = vmatpush1.bf16.msra.mxu0 %v13731_v47  ;;  %v13992_v47 = vld [vmem:[#allocation15 + $0x68] ss:$16 sps:$4 sm:$0xff]  }
 0x1f6   : > { %4523 = vmatprep.subr.bf16.mxu0 %v13739_v49  ;;  %v14903_v49 = vld [vmem:[%s15619_s29 + $0x28] ss:$16 sps:$4 sm:$0xff]  }
 0x1f7   : > { %3250 = vmatpush1.bf16.msra.mxu1 %v13983_v35  ;;  %v14912_v35 = vld [vmem:[%s15619_s29 + $0xcc] ss:$16 sps:$4 sm:$0xff]  }
 0x1f8   : > { %3177 = vmatmul.mubr.bf16.gmra.mrb[36].mxu0 %v13736_v50  ;;  %3251 = vmatprep.subr.bf16.mxu1 %v13991_v42  ;;  %v13794_v50 = vld [vmem:[#allocation16 + $0x180] ss:$16 sps:$4 sm:$0xff]  }
 0x1f9   : > { %4524 = vmatpush1.bf16.msra.mxu0 %v13737_v53  ;;  %3186 = vmatprep.mubr.bf16.mxu0 %v13743_v56  ;;  %v13802_v53 = vld [vmem:[#allocation16 + $0x1a4] ss:$16 sps:$4 sm:$0xff]   ;;  %v13800_v56 = vld [vmem:[#allocation16 + $0x1a0] ss:$16 sps:$4 sm:$0xff]  }
 0x1fa   : > { %4525 = vmatprep.subr.bf16.mxu0 %v13742_v57  ;;  %1905 = vmatmul.mubr.bf16.gmra.mrb[4].mxu1 %v14903_v49  ;;  %v13811_v57 = vld [vmem:[#allocation16 + $0x1c4] ss:$16 sps:$4 sm:$0xff]   ;;  %v701_v42 = vld [vmem:[%s19484_s7] sm:$0xf]  ;;  %v14030_v49 = vld [vmem:[#allocation15 + $0x1ac] ss:$16 sps:$4 sm:$0xff]  }
 0x1fb   : > { %3252 = vmatpush1.bf16.msra.mxu1 %v13989_v43  ;;  %1914 = vmatprep.mubr.bf16.mxu1 %v14904_v52  ;;  %v14028_v52 = vld [vmem:[#allocation15 + $0x1a8] ss:$16 sps:$4 sm:$0xff]  }
 0x1fc   : > { %3253 = vmatprep.subr.bf16.mxu1 %v13994_v46 }
 0x1fd   : > { %4526 = vmatpush1.bf16.msra.mxu0 %v13740_v59  ;;  %v14001_v59 = vld [vmem:[#allocation15 + $0xa8] ss:$16 sps:$4 sm:$0xff]  }
 0x1fe   : > { %4527 = vmatprep.subr.bf16.mxu0 %v13748_v61  ;;  %v14905_v61 = vld [vmem:[%s15619_s29 + $0x48] ss:$16 sps:$4 sm:$0xff]  }
 0x1ff   : > { %3254 = vmatpush1.bf16.msra.mxu1 %v13992_v47  ;;  %v13871_v47 = vld [vmem:[#allocation16 + $0x2c4] ss:$16 sps:$4 sm:$0xff]  }
 0x200   : > { %3187 = vmatmul.mubr.bf16.gmra.mrb[40].mxu0 %v13745_v62  ;;  %3255 = vmatprep.subr.bf16.mxu1 %v14000_v54  ;;  %v13809_v62 = vld [vmem:[#allocation16 + $0x1c0] ss:$16 sps:$4 sm:$0xff]  }
 0x201   : > { %4528 = vmatpush1.bf16.msra.mxu0 %v13746_v1  ;;  %3196 = vmatprep.mubr.bf16.mxu0 %v13752_v4  ;;  %v13817_v1 = vld [vmem:[#allocation16 + $0x1e4] ss:$16 sps:$4 sm:$0xff]   ;;  %v13815_v4 = vld [vmem:[#allocation16 + $0x1e0] ss:$16 sps:$4 sm:$0xff]  }
 0x202   : > { %4529 = vmatprep.subr.bf16.mxu0 %v13751_v5  ;;  %1915 = vmatmul.mubr.bf16.gmra.mrb[8].mxu1 %v14905_v61  ;;  %v14012_v5 = vld [vmem:[#allocation15 + $0xec] ss:$16 sps:$4 sm:$0xff]  }
 0x203   : > { %3256 = vmatpush1.bf16.msra.mxu1 %v13998_v55  ;;  %1924 = vmatprep.mubr.bf16.mxu1 %v14906_v0  ;;  %v15785_v55 = vld [vmem:[%s15632_s17 + $0x60] ss:$16 sps:$4 sm:$0xff]   ;;  %v13877_v0 = vld [vmem:[#allocation16 + $0x2e4] ss:$16 sps:$4 sm:$0xff]  }
 0x204   : > { %3257 = vmatprep.subr.bf16.mxu1 %v14003_v58  ;;  %v15788_v58 = vld [vmem:[%s15632_s17 + $0x84] ss:$16 sps:$4 sm:$0xff]  }
 0x205   : > { %4530 = vmatpush1.bf16.msra.mxu0 %v13749_v8  ;;  %v15737_v8 = vld [vmem:[%s15632_s17] ss:$16 sps:$4 sm:$0xff]  }
 0x206   : > { %4531 = vmatprep.subr.bf16.mxu0 %v13757_v9  ;;  %v13824_v9 = vld [vmem:[#allocation16 + $0x200] ss:$16 sps:$4 sm:$0xff]  }
 0x207   : > { %3258 = vmatpush1.bf16.msra.mxu1 %v14001_v59 }
 0x208   : > { %3197 = vmatmul.mubr.bf16.gmra.mrb[44].mxu0 %v13754_v11  ;;  %3259 = vmatprep.subr.bf16.mxu1 %v14009_v2  ;;  %v14908_v11 = vld [vmem:[%s15619_s29 + $0x8c] ss:$16 sps:$4 sm:$0xff]  }
 0x209   : > { %4532 = vmatpush1.bf16.msra.mxu0 %v13755_v14  ;;  %3206 = vmatprep.mubr.bf16.mxu0 %v13761_v15  ;;  %v14015_v14 = vld [vmem:[#allocation15 + $0x10c] ss:$16 sps:$4 sm:$0xff]   ;;  %v14013_v15 = vld [vmem:[#allocation15 + $0x108] ss:$16 sps:$4 sm:$0xff]  }
 0x20a   : > { %4533 = vmatprep.subr.bf16.mxu0 %v13760_v17  ;;  %1925 = vmatmul.mubr.bf16.gmra.mrb[12].mxu1 %v14907_v7  ;;  %v13830_v17 = vld [vmem:[#allocation16 + $0x220] ss:$16 sps:$4 sm:$0xff]  }
 0x20b   : > { %3260 = vmatpush1.bf16.msra.mxu1 %v14007_v3  ;;  %1934 = vmatprep.mubr.bf16.mxu1 %v14908_v11  ;;  %v13875_v7 = vld [vmem:[#allocation16 + $0x2e0] ss:$16 sps:$4 sm:$0xff]   ;;  %v14036_v11 = vld [vmem:[#allocation15 + $0x1ec] ss:$16 sps:$4 sm:$0xff]  }
 0x20c   : > { %3261 = vmatprep.subr.bf16.mxu1 %v14012_v5 }
 0x20d   : > { %4534 = vmatpush1.bf16.msra.mxu0 %v13758_v20  ;;  %v15746_v20 = vld [vmem:[%s15632_s17 + $0x20] ss:$16 sps:$4 sm:$0xff]  }
 0x20e   : > { %4535 = vmatprep.subr.bf16.mxu0 %v13766_v21  ;;  %v14909_v21 = vld [vmem:[%s15619_s29 + $0x88] ss:$16 sps:$4 sm:$0xff]  }
 0x20f   : > { %3262 = vmatpush1.bf16.msra.mxu1 %v14010_v10  ;;  %v14915_v10 = vld [vmem:[%s15619_s29 + $0xe8] ss:$16 sps:$4 sm:$0xff]  }
 0x210   : > { %3207 = vmatmul.mubr.bf16.gmra.mrb[48].mxu0 %v13763_v24  ;;  %3263 = vmatprep.subr.bf16.mxu1 %v14015_v14  ;;  %v15750_v24 = vld [vmem:[%s15632_s17 + $0x44] ss:$16 sps:$4 sm:$0xff]   ;;  %v14034_v14 = vld [vmem:[#allocation15 + $0x1e8] ss:$16 sps:$4 sm:$0xff]  }
 0x211   : > { %4536 = vmatpush1.bf16.msra.mxu0 %v13764_v26  ;;  %3216 = vmatprep.mubr.bf16.mxu0 %v13776_v27  ;;  %v13847_v26 = vld [vmem:[#allocation16 + $0x264] ss:$16 sps:$4 sm:$0xff]   ;;  %v703_v27 = vlaneseq }
 0x212   : > { %4537 = vmatprep.subr.bf16.mxu0 %v13772_v29  ;;  %1935 = vmatmul.mubr.bf16.gmra.mrb[16].mxu1 %v14909_v21  ;;  %v14024_v29 = vld [vmem:[#allocation15 + $0x16c] ss:$16 sps:$4 sm:$0xff]   ;;  %v13884_v21 = vld [vmem:[#allocation16 + $0x300] ss:$16 sps:$4 sm:$0xff]  }
 0x213   : > { %3264 = vmatpush1.bf16.msra.mxu1 %v14013_v15  ;;  %1944 = vmatprep.mubr.bf16.mxu1 %v14910_v25  ;;  %v14916_v15 = vld [vmem:[%s15626_s27 + $0x4] ss:$16 sps:$4 sm:$0xff]  }
 0x214   : > { %3265 = vmatprep.subr.bf16.mxu1 %v14018_v16 }
 0x215   : > { %4538 = vmatpush1.bf16.msra.mxu0 %v13770_v32  ;;  %v15755_v32 = vshrl.u32 %v703_v27, 7  ;;  %v14039_v27 = vld [vmem:[#allocation15 + $0x20c] ss:$16 sps:$4 sm:$0xff]  }
 0x216   : > { %4539 = vmatprep.subr.bf16.mxu0 %v13781_v33  ;;  %v14911_v33 = vld [vmem:[%s15619_s29 + $0xa8] ss:$16 sps:$4 sm:$0xff]  }
 0x217   : > { %3266 = vmatpush1.bf16.msra.mxu1 %v14016_v19  ;;  %v15766_v40 = vsub.s32 0, %v15755_v32  ;;  %v15772_v43 = vsub.s32 1, %v15755_v32 }
 0x218   : > { %3217 = vmatmul.mubr.bf16.gmra.mrb[52].mxu0 %v13778_v36  ;;  %3267 = vmatprep.subr.bf16.mxu1 %v14021_v22  ;;  %v15760_v36 = vld [vmem:[%s15632_s17 + $0x40] ss:$16 sps:$4 sm:$0xff]   ;;  %v15807_v22 = vld [vmem:[%s15632_s17 + $0xa4] ss:$16 sps:$4 sm:$0xff]  }
 0x219   : > { %4540 = vmatpush1.bf16.msra.mxu0 %v13779_v38  ;;  %3226 = vmatprep.mubr.bf16.mxu0 %v13791_v39  ;;  %v13854_v38 = vld [vmem:[#allocation16 + $0x280] ss:$16 sps:$4 sm:$0xff]   ;;  %v15763_v39 = vld [vmem:[%s15632_s17 + $0x64] ss:$16 sps:$4 sm:$0xff]   ;;  %19708 = vst [vmem:[#allocation31_spill] sm:$0xff] %v15766_v40  ;;  %19709 = vst [vmem:[#allocation32_spill] sm:$0xff] %v15772_v43  ;;  %v15777_v46 = vrot.slane %v701_v42, %v15766_v40 }
 0x21a   : > { %4541 = vmatprep.subr.bf16.mxu0 %v13787_v41  ;;  %1945 = vmatmul.mubr.bf16.gmra.mrb[20].mxu1 %v14911_v33  ;;  %v13862_v41 = vld [vmem:[#allocation16 + $0x2a4] ss:$16 sps:$4 sm:$0xff]  }
 0x21b   : > { %3268 = vmatpush1.bf16.msra.mxu1 %v14019_v28  ;;  %1954 = vmatprep.mubr.bf16.mxu1 %v14912_v35  ;;  %v13901_v35 = vld [vmem:[#allocation16 + $0x344] ss:$16 sps:$4 sm:$0xff]  }
 0x21c   : > { %3269 = vmatprep.subr.bf16.mxu1 %v14024_v29 }
 0x21d   : > { %4542 = vmatpush1.bf16.msra.mxu0 %v13785_v44  ;;  %v14025_v44 = vld [vmem:[#allocation15 + $0x188] ss:$16 sps:$4 sm:$0xff]  }
 0x21e   : > { %4543 = vmatprep.subr.bf16.mxu0 %v13796_v45  ;;  %v13860_v45 = vld [vmem:[#allocation16 + $0x2a0] ss:$16 sps:$4 sm:$0xff]  }
 0x21f   : > { %3270 = vmatpush1.bf16.msra.mxu1 %v14022_v34  ;;  %v13890_v34 = vld [vmem:[#allocation16 + $0x320] ss:$16 sps:$4 sm:$0xff]  }
 0x220   : > { %3227 = vmatmul.mubr.bf16.gmra.mrb[56].mxu0 %v13793_v48  ;;  %3271 = vmatprep.subr.bf16.mxu1 %v14027_v37  ;;  %v14913_v48 = vld [vmem:[%s15619_s29 + $0xc8] ss:$16 sps:$4 sm:$0xff]   ;;  %v14917_v37 = vld [vmem:[%s15626_s27] ss:$16 sps:$4 sm:$0xff]  }
 0x221   : > { %4544 = vmatpush1.bf16.msra.mxu0 %v13794_v50  ;;  %3236 = vmatprep.mubr.bf16.mxu0 %v13806_v51  ;;  %v15781_v51 = vrot.slane %v701_v42, %v15772_v43  ;;  %v14040_v42 = vld [vmem:[#allocation15 + $0x228] ss:$16 sps:$4 sm:$0xff]  }
 0x222   : > { %4545 = vmatprep.subr.bf16.mxu0 %v13802_v53  ;;  %1955 = vmatmul.mubr.bf16.gmra.mrb[24].mxu1 %v14913_v48  ;;  %v14914_v53 = vld [vmem:[%s15619_s29 + $0xec] ss:$16 sps:$4 sm:$0xff]   ;;  %v15822_v48 = vld [vmem:[%s15632_s17 + $0xa0] ss:$16 sps:$4 sm:$0xff]  }
 0x223   : > { %3272 = vmatpush1.bf16.msra.mxu1 %v14025_v44  ;;  %1964 = vmatprep.mubr.bf16.mxu1 %v14914_v53  ;;  %v14918_v44 = vld [vmem:[%s15626_s27 + $0x24] ss:$16 sps:$4 sm:$0xff]  }
 0x224   : > { %3273 = vmatprep.subr.bf16.mxu1 %v14030_v49 }
 0x225   : > { %4546 = vmatpush1.bf16.msra.mxu0 %v13800_v56 }
 0x226   : > { %4547 = vmatprep.subr.bf16.mxu0 %v13811_v57  ;;  %v13869_v57 = vld [vmem:[#allocation16 + $0x2c0] ss:$16 sps:$4 sm:$0xff]  }
 0x227   : > { %3274 = vmatpush1.bf16.msra.mxu1 %v14028_v52  ;;  %v15825_v52 = vld [vmem:[%s15632_s17 + $0xc4] ss:$16 sps:$4 sm:$0xff]  }
 0x228   : > { %3237 = vmatmul.mubr.bf16.gmra.mrb[60].mxu0 %v15726_v60 }
 0x229   : > { %4548 = vmatpush1.bf16.msra.mxu0 %v13809_v62  ;;  %4551 = vmatprep.mubr.bf16.mxu0 %v15730_v63 }
 0x22a   : > { %4549 = vmatprep.subr.bf16.mxu0 %v13817_v1  ;;  %v14033_v1 = vld [vmem:[#allocation15 + $0x1cc] ss:$16 sps:$4 sm:$0xff]   ;;  %1965 = vmatmul.mubr.bf16.gmra.mrb[28].mxu1 %v14915_v10  ;;  %v14046_v10 = vld [vmem:[#allocation15 + $0x268] ss:$16 sps:$4 sm:$0xff]  }
 0x22b   : > { %3275 = vmatprep.subr.bf16.mxu1 %v14033_v1  ;;  %3279 = vmatprep.mubr.bf16.mxu1 %v14916_v15  ;;  %v15840_v15 = vld [vmem:[%s15632_s17 + $0xc0] ss:$16 sps:$4 sm:$0xff]  }
 0x22d   : > { %4550 = vmatpush1.bf16.msra.mxu0 %v13815_v4  ;;  %v14031_v4 = vld [vmem:[#allocation15 + $0x1c8] ss:$16 sps:$4 sm:$0xff]  }
 0x22e   : > { %4632 = vmatprep.subr.bf16.mxu0 %v13826_v6  ;;  %3276 = vmatpush1.bf16.msra.mxu1 %v14031_v4  ;;  %v14919_v4 = vld [vmem:[%s15626_s27 + $0x20] ss:$16 sps:$4 sm:$0xff]  }
 0x22f   : > { %3277 = vmatprep.subr.bf16.mxu1 %v14036_v11  ;;  %v14920_v11 = vld [vmem:[%s15626_s27 + $0x44] ss:$16 sps:$4 sm:$0xff]  }
 0x230   : > { %4552 = vmatmul.mubr.bf16.vlgmr.msra.gmra.mrb[64].mxu0 %v15737_v8 }
 0x231   : > { %4633 = vmatpush1.bf16.msra.mxu0 %v13824_v9  ;;  %4561 = vmatprep.mubr.bf16.mxu0 %v15741_v13  ;;  %v13886_v9 = vld [vmem:[#allocation16 + $0x304] ss:$16 sps:$4 sm:$0xff]  }
 0x232   : > { %4634 = vmatprep.subr.bf16.mxu0 %v13832_v12  ;;  %3278 = vmatpush1.bf16.msra.mxu1 %v14034_v14 }
 0x233   : > { %3360 = vmatprep.subr.bf16.mxu1 %v14039_v27 }
 0x235   : > { %4635 = vmatpush1.bf16.msra.mxu0 %v13830_v17  ;;  %3280 = vmatmul.mubr.bf16.vlgmr.msra.gmra.mrb[32].mxu1 %v14917_v37  ;;  %v13931_v37 = vld [vmem:[#allocation16 + $0x3c4] ss:$16 sps:$4 sm:$0xff]  }
 0x236   : > { %4636 = vmatprep.subr.bf16.mxu0 %v13841_v18  ;;  %v15804_v18 = vld [vmem:[%s15632_s17 + $0x80] ss:$16 sps:$4 sm:$0xff]   ;;  %3289 = vmatprep.mubr.bf16.mxu1 %v14918_v44  ;;  %v14052_v44 = vld [vmem:[#allocation15 + $0x2a8] ss:$16 sps:$4 sm:$0xff]  }
 0x238   : > { %4562 = vmatmul.mubr.bf16.gmra.mrb[68].mxu0 %v15746_v20 }
 0x239   : > { %4637 = vmatpush1.bf16.msra.mxu0 %v13839_v23  ;;  %4571 = vmatprep.mubr.bf16.mxu0 %v15750_v24 }
 0x23a   : > { %4638 = vmatprep.subr.bf16.mxu0 %v13847_v26  ;;  %v13892_v26 = vld [vmem:[#allocation16 + $0x324] ss:$16 sps:$4 sm:$0xff]  }
 0x23d   : > { %4639 = vmatpush1.bf16.msra.mxu0 %v13845_v30  ;;  %v14037_v30 = vld [vmem:[#allocation15 + $0x208] ss:$16 sps:$4 sm:$0xff]   ;;  %3290 = vmatmul.mubr.bf16.gmra.mrb[36].mxu1 %v14919_v4 }
 0x23e   : > { %4640 = vmatprep.subr.bf16.mxu0 %v13856_v31  ;;  %3361 = vmatpush1.bf16.msra.mxu1 %v14037_v30  ;;  %v14055_v4 = vld [vmem:[#allocation15 + $0x2c8] ss:$16 sps:$4 sm:$0xff]  }
 0x23f   : > { %3299 = vmatprep.mubr.bf16.mxu1 %v14920_v11  ;;  %v14923_v11 = vld [vmem:[%s15626_s27 + $0x60] ss:$16 sps:$4 sm:$0xff]  }
 0x240   : > { %4572 = vmatmul.mubr.bf16.gmra.mrb[72].mxu0 %v15760_v36 }
 0x241   : > { %4641 = vmatpush1.bf16.msra.mxu0 %v13854_v38  ;;  %4581 = vmatprep.mubr.bf16.mxu0 %v15763_v39  ;;  %v14042_v38 = vld [vmem:[#allocation15 + $0x22c] ss:$16 sps:$4 sm:$0xff]  }
 0x242   : > { %4642 = vmatprep.subr.bf16.mxu0 %v13862_v41  ;;  %3362 = vmatprep.subr.bf16.mxu1 %v14042_v38  ;;  %v14921_v38 = vld [vmem:[%s15626_s27 + $0x40] ss:$16 sps:$4 sm:$0xff]  }
 0x243   : > { %v1670_v50 = vpop.f32.mrb[0].mxu0  ;;  %3363 = vmatpush1.bf16.msra.mxu1 %v14040_v42 }
 0x244   : > { %v1672_v54 = vpop.f32.mrb[1].mxu0  ;;  %v12623_v59 = vadd.f32 %v1670_v50, %v15777_v46  ;;  %v13899_v50 = vld [vmem:[#allocation16 + $0x340] ss:$16 sps:$4 sm:$0xff]  }
 0x245   : > { %v1674_v56 = vpop.f32.mrb[2].mxu0  ;;  %4643 = vmatpush1.bf16.msra.mxu0 %v13860_v45  ;;  %v12624_v2 = vadd.f32 %v1672_v54, %v15781_v51  ;;  %3300 = vmatmul.mubr.bf16.gmra.mrb[40].mxu1 %v14921_v38 }
 0x246   : > { %v12625_v61 = vadd.f32 %v1674_v56, %v15777_v46  ;;  %v1676_v62 = vpop.f32.mrb[3].mxu0  ;;  %4644 = vmatprep.subr.bf16.mxu0 %v13871_v47  ;;  %v13907_v56 = vld [vmem:[#allocation16 + $0x364] ss:$16 sps:$4 sm:$0xff]  }
 0x247   : > { %v12626_v3 = vadd.f32 %v1676_v62, %v15781_v51  ;;  %v14043_v62 = vld [vmem:[#allocation15 + $0x248] ss:$16 sps:$4 sm:$0xff]  }
 0x248   : > { %v15794_v5 = vpack.c.bf16 %v12625_v61, %v12623_v59  ;;  %4582 = vmatmul.mubr.bf16.gmra.mrb[76].mxu0 %v15785_v55 }
 0x249   : > { %v15797_v6 = vpack.c.bf16 %v12626_v3, %v12624_v2  ;;  %4645 = vmatpush1.bf16.msra.mxu0 %v13869_v57  ;;  %4591 = vmatprep.mubr.bf16.mxu0 %v15788_v58  ;;  %v14045_v57 = vld [vmem:[#allocation15 + $0x24c] ss:$16 sps:$4 sm:$0xff]   ;;  %v13905_v2 = vld [vmem:[#allocation16 + $0x360] ss:$16 sps:$4 sm:$0xff]   ;;  %v13916_v3 = vld [vmem:[#allocation16 + $0x384] ss:$16 sps:$4 sm:$0xff]  }
 0x24a   : > { %4646 = vmatprep.subr.bf16.mxu0 %v13877_v0  ;;  %3364 = vmatprep.subr.bf16.mxu1 %v14045_v57 }
 0x24b   : > { %19710 = vst [vmem:[#allocation33_spill] sm:$0xff] %v15797_v6  ;;  %v1680_v12 = vpop.f32.mrb[4].mxu0  ;;  %3365 = vmatpush1.bf16.msra.mxu1 %v14043_v62  ;;  %v14057_v62 = vld [vmem:[#allocation15 + $0x2cc] ss:$16 sps:$4 sm:$0xff]  }
 0x24c   : > { %v12627_v16 = vadd.f32 %v1680_v12, %v15777_v46  ;;  %v1682_v17 = vpop.f32.mrb[5].mxu0 }
 0x24d   : > { %v1684_v19 = vpop.f32.mrb[6].mxu0  ;;  %4647 = vmatpush1.bf16.msra.mxu0 %v13875_v7  ;;  %v12628_v28 = vadd.f32 %v1682_v17, %v15781_v51  ;;  %v14048_v7 = vld [vmem:[#allocation15 + $0x26c] ss:$16 sps:$4 sm:$0xff]   ;;  %v13914_v17 = vld [vmem:[#allocation16 + $0x380] ss:$16 sps:$4 sm:$0xff]  }
 0x24e   : > { %v12629_v23 = vadd.f32 %v1684_v19, %v15777_v46  ;;  %v1686_v25 = vpop.f32.mrb[7].mxu0  ;;  %4648 = vmatprep.subr.bf16.mxu0 %v13886_v9  ;;  %3366 = vmatprep.subr.bf16.mxu1 %v14048_v7  ;;  %v15843_v19 = vld [vmem:[%s15632_s17 + $0xe4] ss:$16 sps:$4 sm:$0xff]  }
 0x24f   : > { %v12630_v29 = vadd.f32 %v1686_v25, %v15781_v51  ;;  %v13922_v25 = vld [vmem:[#allocation16 + $0x3a4] ss:$16 sps:$4 sm:$0xff]   ;;  %3367 = vmatpush1.bf16.msra.mxu1 %v14046_v10  ;;  %v13935_v10 = vld [vmem:[#allocation16 + $0x3e0] ss:$16 sps:$4 sm:$0xff]  }
 0x250   : > { %v15812_v31 = vpack.c.bf16 %v12629_v23, %v12627_v16  ;;  %4592 = vmatmul.mubr.bf16.gmra.mrb[80].mxu0 %v15804_v18 }
 0x251   : > { %v15815_v33 = vpack.c.bf16 %v12630_v29, %v12628_v28  ;;  %4649 = vmatpush1.bf16.msra.mxu0 %v13884_v21  ;;  %4601 = vmatprep.mubr.bf16.mxu0 %v15807_v22  ;;  %v14049_v29 = vld [vmem:[#allocation15 + $0x288] ss:$16 sps:$4 sm:$0xff]  }
 0x252   : > { %4650 = vmatprep.subr.bf16.mxu0 %v13892_v26  ;;  %v14051_v26 = vld [vmem:[#allocation15 + $0x28c] ss:$16 sps:$4 sm:$0xff]  }
 0x253   : > { %19711 = vst [vmem:[#allocation34_spill] sm:$0xff] %v15815_v33  ;;  %v1690_v41 = vpop.f32.mrb[8].mxu0  ;;  %3368 = vmatprep.subr.bf16.mxu1 %v14051_v26 }
 0x254   : > { %v12631_v45 = vadd.f32 %v1690_v41, %v15777_v46  ;;  %v1692_v47 = vpop.f32.mrb[9].mxu0  ;;  %v14054_v41 = vld [vmem:[#allocation15 + $0x2ac] ss:$16 sps:$4 sm:$0xff]   ;;  %3369 = vmatpush1.bf16.msra.mxu1 %v14049_v29 }
 0x255   : > { %v1694_v49 = vpop.f32.mrb[10].mxu0  ;;  %4651 = vmatpush1.bf16.msra.mxu0 %v13890_v34  ;;  %v12632_v59 = vadd.f32 %v1692_v47, %v15781_v51  ;;  %3370 = vmatprep.subr.bf16.mxu1 %v14054_v41  ;;  %v14061_v41 = vld [vmem:[#allocation15 + $0x308] ss:$16 sps:$4 sm:$0xff]  }
 0x256   : > { %v12633_v53 = vadd.f32 %v1694_v49, %v15777_v46  ;;  %v1696_v54 = vpop.f32.mrb[11].mxu0  ;;  %4652 = vmatprep.subr.bf16.mxu0 %v13901_v35  ;;  %v13920_v35 = vld [vmem:[#allocation16 + $0x3a0] ss:$16 sps:$4 sm:$0xff]  }
 0x257   : > { %v12634_v61 = vadd.f32 %v1696_v54, %v15781_v51  ;;  %v13929_v54 = vld [vmem:[#allocation16 + $0x3c0] ss:$16 sps:$4 sm:$0xff]  }
 0x258   : > { %v15830_v0 = vpack.c.bf16 %v12633_v53, %v12631_v45  ;;  %4602 = vmatmul.mubr.bf16.gmra.mrb[84].mxu0 %v15822_v48  ;;  %v14922_v45 = vld [vmem:[%s15626_s27 + $0x64] ss:$16 sps:$4 sm:$0xff]   ;;  %3371 = vmatpush1.bf16.msra.mxu1 %v14052_v44 }
 0x259   : > { %v15833_v1 = vpack.c.bf16 %v12634_v61, %v12632_v59  ;;  %4653 = vmatpush1.bf16.msra.mxu0 %v13899_v50  ;;  %4611 = vmatprep.mubr.bf16.mxu0 %v15825_v52  ;;  %v15858_v50 = vld [vmem:[%s15632_s17 + $0xe0] ss:$16 sps:$4 sm:$0xff]   ;;  %v13937_v61 = vld [vmem:[#allocation16 + $0x3e4] ss:$16 sps:$4 sm:$0xff]  }
 0x25a   : > { %4654 = vmatprep.subr.bf16.mxu0 %v13907_v56  ;;  %3309 = vmatprep.mubr.bf16.mxu1 %v14922_v45  ;;  %v15861_v56 = vld [vmem:[%s15632_s17 + $0xc] ss:$16 sps:$4 sm:$0xff]   ;;  %v14925_v45 = vld [vmem:[%s15626_s27 + $0x80] ss:$16 sps:$4 sm:$0xff]  }
 0x25b   : > { %19712 = vst [vmem:[#allocation35_spill] sm:$0xff] %v15833_v1  ;;  %v1700_v9 = vpop.f32.mrb[12].mxu0  ;;  %3372 = vmatprep.subr.bf16.mxu1 %v14057_v62  ;;  %3310 = vmatmul.mubr.bf16.gmra.mrb[44].mxu1 %v14923_v11 }
 0x25c   : > { %v12635_v12 = vadd.f32 %v1700_v9, %v15777_v46  ;;  %v1702_v14 = vpop.f32.mrb[13].mxu0  ;;  %3373 = vmatpush1.bf16.msra.mxu1 %v14055_v4 }
 0x25d   : > { %v1704_v16 = vpop.f32.mrb[14].mxu0  ;;  %4655 = vmatpush1.bf16.msra.mxu0 %v13905_v2  ;;  %v12636_v27 = vadd.f32 %v1702_v14, %v15781_v51 }
 0x25e   : > { %v12637_v21 = vadd.f32 %v1704_v16, %v15777_v46  ;;  %v1706_v23 = vpop.f32.mrb[15].mxu0  ;;  %4656 = vmatprep.subr.bf16.mxu0 %v13916_v3  ;;  %v14058_v16 = vld [vmem:[#allocation15 + $0x2e8] ss:$16 sps:$4 sm:$0xff]  }
 0x25f   : > { %v12638_v28 = vadd.f32 %v1706_v23, %v15781_v51 }
 0x260   : > { %v15848_v30 = vpack.c.bf16 %v12637_v21, %v12635_v12  ;;  %4612 = vmatmul.mubr.bf16.gmra.mrb[88].mxu0 %v15840_v15  ;;  %v14060_v12 = vld [vmem:[#allocation15 + $0x2ec] ss:$16 sps:$4 sm:$0xff]  }
 0x261   : > { %v15851_v34 = vpack.c.bf16 %v12638_v28, %v12636_v27  ;;  %4657 = vmatpush1.bf16.msra.mxu0 %v13914_v17  ;;  %4621 = vmatprep.mubr.bf16.mxu0 %v15843_v19  ;;  %v14924_v17 = vld [vmem:[%s15626_s27 + $0x84] ss:$16 sps:$4 sm:$0xff]   ;;  %v15879_v27 = vld [vmem:[%s15632_s17 + $0x2c] ss:$16 sps:$4 sm:$0xff]  }
 0x262   : > { %4658 = vmatprep.subr.bf16.mxu0 %v13922_v25  ;;  %3319 = vmatprep.mubr.bf16.mxu1 %v14924_v17  ;;  %v15876_v25 = vld [vmem:[%s15632_s17 + $0x8] ss:$16 sps:$4 sm:$0xff]  }
 0x263   : > { %19713 = vst [vmem:[#allocation36_spill] sm:$0xff] %v15851_v34  ;;  %v1710_v42 = vpop.f32.mrb[16].mxu0  ;;  %3374 = vmatprep.subr.bf16.mxu1 %v14060_v12  ;;  %3320 = vmatmul.mubr.bf16.gmra.mrb[48].mxu1 %v14925_v45  ;;  %v15915_v45 = vld [vmem:[%s15632_s17 + $0x6c] ss:$16 sps:$4 sm:$0xff]  }
 0x264   : > { %v12639_v47 = vadd.f32 %v1710_v42, %v15777_v46  ;;  %v1712_v49 = vpop.f32.mrb[17].mxu0  ;;  %3375 = vmatpush1.bf16.msra.mxu1 %v14058_v16 }
 0x265   : > { %v1714_v53 = vpop.f32.mrb[18].mxu0  ;;  %4659 = vmatpush1.bf16.msra.mxu0 %v13920_v35  ;;  %v12640_v2 = vadd.f32 %v1712_v49, %v15781_v51  ;;  %v14063_v35 = vld [vmem:[#allocation15 + $0x30c] ss:$16 sps:$4 sm:$0xff]  }
 0x266   : > { %v12641_v57 = vadd.f32 %v1714_v53, %v15777_v46  ;;  %v1716_v59 = vpop.f32.mrb[19].mxu0  ;;  %4660 = vmatprep.subr.bf16.mxu0 %v13931_v37  ;;  %3376 = vmatprep.subr.bf16.mxu1 %v14063_v35  ;;  %v14064_v53 = vld [vmem:[#allocation15 + $0x328] ss:$16 sps:$4 sm:$0xff]  }
 0x267   : > { %v12642_v3 = vadd.f32 %v1716_v59, %v15781_v51 }
 0x268   : > { %v15866_v7 = vpack.c.bf16 %v12641_v57, %v12639_v47  ;;  %4622 = vmatmul.mubr.bf16.gmra.mrb[92].mxu0 %v15858_v50  ;;  %v14066_v47 = vld [vmem:[#allocation15 + $0x32c] ss:$16 sps:$4 sm:$0xff]   ;;  %3377 = vmatpush1.bf16.msra.mxu1 %v14061_v41 }
 0x269   : > { %v15869_v9 = vpack.c.bf16 %v12642_v3, %v12640_v2  ;;  %4661 = vmatpush1.bf16.msra.mxu0 %v13929_v54  ;;  %4664 = vmatprep.mubr.bf16.mxu0 %v15861_v56  ;;  %v14926_v54 = vld [vmem:[%s15626_s27 + $0xa4] ss:$16 sps:$4 sm:$0xff]   ;;  %v15897_v2 = vld [vmem:[%s15632_s17 + $0x4c] ss:$16 sps:$4 sm:$0xff]  }
 0x26a   : > { %4662 = vmatprep.subr.bf16.mxu0 %v13937_v61  ;;  %3329 = vmatprep.mubr.bf16.mxu1 %v14926_v54  ;;  %v15894_v61 = vld [vmem:[%s15632_s17 + $0x28] ss:$16 sps:$4 sm:$0xff]  }
 0x26b   : > { %19714 = vst [vmem:[#allocation37_spill] sm:$0xff] %v15869_v9  ;;  %v1720_v14 = vpop.f32.mrb[20].mxu0  ;;  %3378 = vmatprep.subr.bf16.mxu1 %v14066_v47 }
 0x26c   : > { %v12643_v21 = vadd.f32 %v1720_v14, %v15777_v46  ;;  %v1722_v23 = vpop.f32.mrb[21].mxu0  ;;  %3379 = vmatpush1.bf16.msra.mxu1 %v14064_v53  ;;  %v14067_v14 = vld [vmem:[#allocation15 + $0x348] ss:$16 sps:$4 sm:$0xff]   ;;  %v14075_v53 = vld [vmem:[#allocation15 + $0x38c] ss:$16 sps:$4 sm:$0xff]  }
 0x26d   : > { %v1724_v26 = vpop.f32.mrb[22].mxu0  ;;  %4663 = vmatpush1.bf16.msra.mxu0 %v13935_v10  ;;  %v12644_v37 = vadd.f32 %v1722_v23, %v15781_v51  ;;  %v14069_v10 = vld [vmem:[#allocation15 + $0x34c] ss:$16 sps:$4 sm:$0xff]  }
 0x26e   : > { %v12645_v28 = vadd.f32 %v1724_v26, %v15777_v46  ;;  %v1726_v29 = vpop.f32.mrb[23].mxu0  ;;  %3380 = vmatprep.subr.bf16.mxu1 %v14069_v10  ;;  %v14072_v23 = vld [vmem:[#allocation15 + $0x36c] ss:$16 sps:$4 sm:$0xff]  }
 0x26f   : > { %v12646_v38 = vadd.f32 %v1726_v29, %v15781_v51  ;;  %v14928_v29 = vld [vmem:[%s15626_s27 + $0xc4] ss:$16 sps:$4 sm:$0xff]   ;;  %v14078_v10 = vld [vmem:[#allocation15 + $0x3ac] ss:$16 sps:$4 sm:$0xff]  }
 0x270   : > { %v15884_v42 = vpack.c.bf16 %v12645_v28, %v12643_v21  ;;  %4665 = vmatmul.mubr.bf16.vlgmr.msra.gmra.mrb[64].mxu0 %v15876_v25  ;;  %v14927_v21 = vld [vmem:[%s15626_s27 + $0xa0] ss:$16 sps:$4 sm:$0xff]   ;;  %3381 = vmatpush1.bf16.msra.mxu1 %v14067_v14  ;;  %v14070_v28 = vld [vmem:[#allocation15 + $0x368] ss:$16 sps:$4 sm:$0xff]  }
 0x271   : > { %v15887_v44 = vpack.c.bf16 %v12646_v38, %v12644_v37  ;;  %4674 = vmatprep.mubr.bf16.mxu0 %v15879_v27  ;;  %3330 = vmatmul.mubr.bf16.gmra.mrb[52].mxu1 %v14927_v21  ;;  %v15912_v38 = vld [vmem:[%s15632_s17 + $0x48] ss:$16 sps:$4 sm:$0xff]   ;;  %v14081_v21 = vld [vmem:[#allocation15 + $0x3cc] ss:$16 sps:$4 sm:$0xff]  }
 0x272   : > { %3339 = vmatprep.mubr.bf16.mxu1 %v14928_v29  ;;  %3382 = vmatprep.subr.bf16.mxu1 %v14072_v23  ;;  %v14079_v14 = vld [vmem:[#allocation15 + $0x3c8] ss:$16 sps:$4 sm:$0xff]   ;;  %v14931_v23 = vld [vmem:[%s15626_s27 + $0xe0] ss:$16 sps:$4 sm:$0xff]   ;;  %v14932_v29 = vld [vmem:[%s15626_s27 + $0xc] ss:$16 sps:$4 sm:$0xff]  }
 0x273   : > { %19715 = vst [vmem:[#allocation38_spill] sm:$0xff] %v15887_v44  ;;  %v1730_v49 = vpop.f32.mrb[24].mxu0  ;;  %v14129_v44 = vld [vmem:[#allocation16 + $0x1cc] ss:$16 sps:$4 sm:$0xff]  }
 0x274   : > { %v12647_v57 = vadd.f32 %v1730_v49, %v15777_v46  ;;  %v1732_v59 = vpop.f32.mrb[25].mxu0  ;;  %3383 = vmatpush1.bf16.msra.mxu1 %v14070_v28  ;;  %v14084_v28 = vld [vmem:[#allocation15 + $0x3ec] ss:$16 sps:$4 sm:$0xff]  }
 0x275   : > { %v1734_v62 = vpop.f32.mrb[26].mxu0  ;;  %v12648_v11 = vadd.f32 %v1732_v59, %v15781_v51  ;;  %v14073_v59 = vld [vmem:[#allocation15 + $0x388] ss:$16 sps:$4 sm:$0xff]   ;;  %3384 = vmatprep.subr.bf16.mxu1 %v14075_v53 }
 0x276   : > { %v12649_v3 = vadd.f32 %v1734_v62, %v15777_v46  ;;  %v1736_v4 = vpop.f32.mrb[27].mxu0  ;;  %v14088_v53 = vld [vmem:[#allocation16 + $0x28] ss:$16 sps:$4 sm:$0xff]  }
 0x277   : > { %v12650_v12 = vadd.f32 %v1736_v4, %v15781_v51  ;;  %v14076_v4 = vld [vmem:[#allocation15 + $0x3a8] ss:$16 sps:$4 sm:$0xff]  }
 0x278   : > { %v15902_v16 = vpack.c.bf16 %v12649_v3, %v12647_v57  ;;  %4675 = vmatmul.mubr.bf16.gmra.mrb[68].mxu0 %v15894_v61  ;;  %3385 = vmatpush1.bf16.msra.mxu1 %v14073_v59  ;;  %v15949_v59 = vld [vmem:[%s15632_s17 + $0xa8] ss:$16 sps:$4 sm:$0xff]  }
 0x279   : > { %v15905_v17 = vpack.c.bf16 %v12650_v12, %v12648_v11  ;;  %4684 = vmatprep.mubr.bf16.mxu0 %v15897_v2  ;;  %v14930_v11 = vld [vmem:[%s15626_s27 + $0xe4] ss:$16 sps:$4 sm:$0xff]   ;;  %v15932_v12 = vld [vmem:[%s15632_s17 + $0x8c] ss:$16 sps:$4 sm:$0xff]   ;;  %3386 = vmatprep.subr.bf16.mxu1 %v14078_v10  ;;  %v14091_v10 = vld [vmem:[#allocation16 + $0x48] ss:$16 sps:$4 sm:$0xff]  }
 0x27b   : > { %19716 = vst [vmem:[#allocation39_spill] sm:$0xff] %v15905_v17  ;;  %v1740_v26 = vpop.f32.mrb[28].mxu0 }
 0x27c   : > { %v12651_v35 = vadd.f32 %v1740_v26, %v15777_v46  ;;  %v1742_v37 = vpop.f32.mrb[29].mxu0  ;;  %3387 = vmatpush1.bf16.msra.mxu1 %v14076_v4  ;;  %v14082_v26 = vld [vmem:[#allocation15 + $0x3e8] ss:$16 sps:$4 sm:$0xff]   ;;  %v15952_v4 = vld [vmem:[%s15632_s17 + $0xcc] ss:$16 sps:$4 sm:$0xff]  }
 0x27d   : > { %v1744_v41 = vpop.f32.mrb[30].mxu0  ;;  %v12652_v54 = vadd.f32 %v1742_v37, %v15781_v51  ;;  %3388 = vmatprep.subr.bf16.mxu1 %v14081_v21  ;;  %v15942_v37 = vld [vmem:[%s15632_s17 + $0xac] ss:$16 sps:$4 sm:$0xff]  }
 0x27e   : > { %v12653_v47 = vadd.f32 %v1744_v41, %v15777_v46  ;;  %v1746_v49 = vpop.f32.mrb[31].mxu0  ;;  %v14929_v46 = vld [vmem:[%s15626_s27 + $0xc0] ss:$16 sps:$4 sm:$0xff]   ;;  %v14087_v41 = vld [vmem:[#allocation16 + $0xc] ss:$16 sps:$4 sm:$0xff]  }
 0x27f   : > { %v12654_v57 = vadd.f32 %v1746_v49, %v15781_v51  ;;  %3340 = vmatmul.mubr.bf16.gmra.mrb[56].mxu1 %v14929_v46  ;;  %v15929_v51 = vld [vmem:[%s15632_s17 + $0x68] ss:$16 sps:$4 sm:$0xff]   ;;  %v14093_v46 = vld [vmem:[#allocation16 + $0x4c] ss:$16 sps:$4 sm:$0xff]  }
 0x280   : > { %v15920_v62 = vpack.c.bf16 %v12653_v47, %v12651_v35  ;;  %4685 = vmatmul.mubr.bf16.gmra.mrb[72].mxu0 %v15912_v38  ;;  %3349 = vmatprep.mubr.bf16.mxu1 %v14930_v11  ;;  %v15939_v35 = vld [vmem:[%s15632_s17 + $0x88] ss:$16 sps:$4 sm:$0xff]   ;;  %v14096_v21 = vld [vmem:[#allocation16 + $0x6c] ss:$16 sps:$4 sm:$0xff]  }
 0x281   : > { %v15923_v3 = vpack.c.bf16 %v12654_v57, %v12652_v54  ;;  %4694 = vmatprep.mubr.bf16.mxu0 %v15915_v45  ;;  %3389 = vmatpush1.bf16.msra.mxu1 %v14079_v14  ;;  %v14085_v47 = vld [vmem:[#allocation16 + $0x8] ss:$16 sps:$4 sm:$0xff]   ;;  %v14090_v54 = vld [vmem:[#allocation16 + $0x2c] ss:$16 sps:$4 sm:$0xff]  }
 0x282   : > { %3390 = vmatprep.subr.bf16.mxu1 %v14084_v28  ;;  %v14933_v49 = vld [vmem:[%s15626_s27 + $0x8] ss:$16 sps:$4 sm:$0xff]   ;;  %v14934_v57 = vld [vmem:[%s15626_s27 + $0x2c] ss:$16 sps:$4 sm:$0xff]  }
 0x283   : > { %19717 = vst [vmem:[#allocation40_spill] sm:$0xff] %v15923_v3  ;;  %v14935_v11 = vld [vmem:[%s15626_s27 + $0x28] ss:$16 sps:$4 sm:$0xff]   ;;  %v14099_v28 = vld [vmem:[#allocation16 + $0x8c] ss:$16 sps:$4 sm:$0xff]  }
 0x284   : > { %v14094_v14 = vld [vmem:[#allocation16 + $0x68] ss:$16 sps:$4 sm:$0xff]  }
 0x285   : > { %3391 = vmatpush1.bf16.msra.mxu1 %v14082_v26  ;;  %v15959_v26 = vld [vmem:[%s15632_s17 + $0xc8] ss:$16 sps:$4 sm:$0xff]  }
 0x286   : > { %4745 = vmatprep.subr.bf16.mxu1 %v14087_v41  ;;  %v14097_v41 = vld [vmem:[#allocation16 + $0x88] ss:$16 sps:$4 sm:$0xff]  }
 0x287   : > { %3350 = vmatmul.mubr.bf16.gmra.mrb[60].mxu1 %v14931_v23  ;;  %v14936_v23 = vld [vmem:[%s15626_s27 + $0x4c] ss:$16 sps:$4 sm:$0xff]  }
 0x288   : > { %4695 = vmatmul.mubr.bf16.gmra.mrb[76].mxu0 %v15929_v51  ;;  %3392 = vmatprep.mubr.bf16.mxu1 %v14932_v29  ;;  %v15962_v29 = vld [vmem:[%s15632_s17 + $0xec] ss:$16 sps:$4 sm:$0xff]  }
 0x289   : > { %4704 = vmatprep.mubr.bf16.mxu0 %v15932_v12 }
 0x28f   : > { %3393 = vmatmul.mubr.bf16.vlgmr.msra.gmra.mrb[32].mxu1 %v14933_v49  ;;  %v14102_v49 = vld [vmem:[#allocation16 + $0xac] ss:$16 sps:$4 sm:$0xff]  }
 0x290   : > { %4705 = vmatmul.mubr.bf16.gmra.mrb[80].mxu0 %v15939_v35  ;;  %4746 = vmatpush1.bf16.msra.mxu1 %v14085_v47  ;;  %v14937_v47 = vld [vmem:[%s15626_s27 + $0x48] ss:$16 sps:$4 sm:$0xff]  }
 0x291   : > { %4714 = vmatprep.mubr.bf16.mxu0 %v15942_v37  ;;  %3402 = vmatprep.mubr.bf16.mxu1 %v14934_v57  ;;  %v15969_v57 = vld [vmem:[%s15632_s17 + $0xe8] ss:$16 sps:$4 sm:$0xff]   ;;  %s11822_s17 = sshll.u32 %s15327_s21, 13  ;;  %s20421_s21 = sld [smem:[#allocation207_spill]] }
 0x292   : > { %4747 = vmatprep.subr.bf16.mxu1 %v14090_v54  ;;  %v14938_v54 = vld [vmem:[%s15626_s27 + $0x6c] ss:$16 sps:$4 sm:$0xff]  }
 0x294   : > { %4748 = vmatpush1.bf16.msra.mxu1 %v14088_v53  ;;  %v14100_v53 = vld [vmem:[#allocation16 + $0xa8] ss:$16 sps:$4 sm:$0xff]  }
 0x295   : > { %4749 = vmatprep.subr.bf16.mxu1 %v14093_v46  ;;  %v14105_v46 = vld [vmem:[#allocation16 + $0xcc] ss:$16 sps:$4 sm:$0xff]  }
 0x297   : > { %3403 = vmatmul.mubr.bf16.gmra.mrb[36].mxu1 %v14935_v11  ;;  %v14108_v11 = vld [vmem:[#allocation16 + $0xec] ss:$16 sps:$4 sm:$0xff]  }
 0x298   : > { %4715 = vmatmul.mubr.bf16.gmra.mrb[84].mxu0 %v15949_v59  ;;  %4750 = vmatpush1.bf16.msra.mxu1 %v14091_v10  ;;  %v14103_v10 = vld [vmem:[#allocation16 + $0xc8] ss:$16 sps:$4 sm:$0xff]  }
 0x299   : > { %4724 = vmatprep.mubr.bf16.mxu0 %v15952_v4  ;;  %3412 = vmatprep.mubr.bf16.mxu1 %v14936_v23  ;;  %v14940_v23 = vld [vmem:[%s15626_s27 + $0x8c] ss:$16 sps:$4 sm:$0xff]  }
 0x29a   : > { %4751 = vmatprep.subr.bf16.mxu1 %v14096_v21  ;;  %v14106_v21 = vld [vmem:[#allocation16 + $0xe8] ss:$16 sps:$4 sm:$0xff]  }
 0x29c   : > { %4752 = vmatpush1.bf16.msra.mxu1 %v14094_v14  ;;  %v14939_v14 = vld [vmem:[%s15626_s27 + $0x68] ss:$16 sps:$4 sm:$0xff]  }
 0x29d   : > { %4753 = vmatprep.subr.bf16.mxu1 %v14099_v28  ;;  %v14111_v28 = vld [vmem:[#allocation16 + $0x10c] ss:$16 sps:$4 sm:$0xff]  }
 0x29f   : > { %3413 = vmatmul.mubr.bf16.gmra.mrb[40].mxu1 %v14937_v47  ;;  %v14114_v47 = vld [vmem:[#allocation16 + $0x12c] ss:$16 sps:$4 sm:$0xff]  }
 0x2a0   : > { %4725 = vmatmul.mubr.bf16.gmra.mrb[88].mxu0 %v15959_v26  ;;  %4754 = vmatpush1.bf16.msra.mxu1 %v14097_v41  ;;  %v14109_v41 = vld [vmem:[#allocation16 + $0x108] ss:$16 sps:$4 sm:$0xff]  }
 0x2a1   : > { %4734 = vmatprep.mubr.bf16.mxu0 %v15962_v29  ;;  %3422 = vmatprep.mubr.bf16.mxu1 %v14938_v54  ;;  %v14942_v54 = vld [vmem:[%s15626_s27 + $0xac] ss:$16 sps:$4 sm:$0xff]  }
 0x2a2   : > { %4755 = vmatprep.subr.bf16.mxu1 %v14102_v49  ;;  %v14941_v49 = vld [vmem:[%s15626_s27 + $0x88] ss:$16 sps:$4 sm:$0xff]  }
 0x2a4   : > { %4756 = vmatpush1.bf16.msra.mxu1 %v14100_v53  ;;  %v14112_v53 = vld [vmem:[#allocation16 + $0x128] ss:$16 sps:$4 sm:$0xff]  }
 0x2a5   : > { %4757 = vmatprep.subr.bf16.mxu1 %v14105_v46  ;;  %v14117_v46 = vld [vmem:[#allocation16 + $0x14c] ss:$16 sps:$4 sm:$0xff]  }
 0x2a7   : > { %3423 = vmatmul.mubr.bf16.gmra.mrb[44].mxu1 %v14939_v14  ;;  %v14120_v14 = vld [vmem:[#allocation16 + $0x16c] ss:$16 sps:$4 sm:$0xff]  }
 0x2a8   : > { %4735 = vmatmul.mubr.bf16.gmra.mrb[92].mxu0 %v15969_v57  ;;  %4758 = vmatpush1.bf16.msra.mxu1 %v14103_v10  ;;  %v14115_v10 = vld [vmem:[#allocation16 + $0x148] ss:$16 sps:$4 sm:$0xff]  }
 0x2a9   : > { %12095 = vmatprep.mubr.msk.bf16.mxu0 %vm5059_vm0, %v15794_v5  ;;  %3432 = vmatprep.mubr.bf16.mxu1 %v14940_v23  ;;  %v14118_v23 = vld [vmem:[#allocation16 + $0x168] ss:$16 sps:$4 sm:$0xff]  }
 0x2aa   : > { %4759 = vmatprep.subr.bf16.mxu1 %v14108_v11  ;;  %v14943_v11 = vld [vmem:[%s15626_s27 + $0xa8] ss:$16 sps:$4 sm:$0xff]  }
 0x2ac   : > { %4760 = vmatpush1.bf16.msra.mxu1 %v14106_v21  ;;  %v14944_v21 = vld [vmem:[%s15626_s27 + $0xcc] ss:$16 sps:$4 sm:$0xff]  }
 0x2ad   : > { %4761 = vmatprep.subr.bf16.mxu1 %v14111_v28  ;;  %v14123_v28 = vld [vmem:[#allocation16 + $0x18c] ss:$16 sps:$4 sm:$0xff]  }
 0x2af   : > { %3433 = vmatmul.mubr.bf16.gmra.mrb[48].mxu1 %v14941_v49 }
 0x2b0   : > { %4762 = vmatpush1.bf16.msra.mxu1 %v14109_v41  ;;  %3442 = vmatprep.mubr.bf16.mxu1 %v14942_v54  ;;  %v2199_v41 = vld [vmem:[%s19718_s20] sm:$0xf]  ;;  %s19428_s20 = scalar_lea.hbm %s20421_s21, %s11822_s17 }
 0x2b1   : > { %4763 = vmatprep.subr.bf16.mxu1 %v14114_v47  ;;  %v14121_v47 = vld [vmem:[#allocation16 + $0x188] ss:$16 sps:$4 sm:$0xff]   ;;  %v15984_v49 = vrot.slane %v2199_v41, %v15766_v40 }
 0x2b4   : > { %4764 = vmatpush1.bf16.msra.mxu1 %v14112_v53  ;;  %v14945_v53 = vld [vmem:[%s15626_s27 + $0xc8] ss:$16 sps:$4 sm:$0xff]  }
 0x2b5   : > { %4765 = vmatprep.subr.bf16.mxu1 %v14117_v46  ;;  %v15988_v46 = vrot.slane %v2199_v41, %v15772_v43 }
 0x2b7   : > { %3443 = vmatmul.mubr.bf16.gmra.mrb[52].mxu1 %v14943_v11  ;;  %v14946_v11 = vld [vmem:[%s15626_s27 + $0xec] ss:$16 sps:$4 sm:$0xff]   ;;  %s19292_s27 = scalar_lea.vmem [#allocation19], %s11141_s25 }
 0x2b8   : > { %4766 = vmatpush1.bf16.msra.mxu1 %v14115_v10  ;;  %3452 = vmatprep.mubr.bf16.mxu1 %v14944_v21  ;;  %v14126_v10 = vld [vmem:[#allocation16 + $0x1ac] ss:$16 sps:$4 sm:$0xff]   ;;  %v14124_v21 = vld [vmem:[#allocation16 + $0x1a8] ss:$16 sps:$4 sm:$0xff]   ;;  %s10963_s23 = sshll.u32 %s19292_s27, 4  ;;  %s19430_s23 = int_to_ptr.vmem [resolvable:$true] %s10963_s23 }
 0x2b9   : > { %4767 = vmatprep.subr.bf16.mxu1 %v14120_v14  ;;  %s15153_s16 = scalar_lea.vmem %s19430_s23, 8192  ;;  %p15160_p13 = scmp.lt.s32.totalorder %s19430_s23, %s15158_s12 }
 0x2ba   : > { %p15154_p5 = scmp.ne.s32.totalorder %s19430_s23, %s15153_s16  ;;  %p15161_p7 = scmp.lt.s32.totalorder %s15159_s30, %s15153_s16 }
 0x2bc   : > { %4768 = vmatpush1.bf16.msra.mxu1 %v14118_v23  ;;  %p15155_p4 = pnand %p15154_p5, %p20422_p2  ;;  %p15162_p9 = por %p15161_p7, %p15160_p13 }
 0x2bd   : > { %4769 = vmatprep.subr.bf16.mxu1 %v14123_v28 }
 0x2be   : > { %p15156_p11 = pneg %p15155_p4 }
 0x2bf   : > { %3453 = vmatmul.mubr.bf16.gmra.mrb[56].mxu1 %v14945_v53 }
 0x2c0   : > { %4770 = vmatpush1.bf16.msra.mxu1 %v14121_v47  ;;  %3462 = vmatprep.mubr.bf16.mxu1 %v14946_v11  ;;  %v14127_v47 = vld [vmem:[#allocation16 + $0x1c8] ss:$16 sps:$4 sm:$0xff]   ;;  %p15163_p12 = pnand %p15162_p9, %p15156_p11 }
 0x2c1   : > { %4771 = vmatprep.subr.bf16.mxu1 %v14126_v10  ;;  %v14132_v10 = vld [vmem:[#allocation16 + $0x1ec] ss:$16 sps:$4 sm:$0xff]  }
 0x2c3   : > { %v3168_v54 = vpop.f32.mrb[32].mxu0 }
 0x2c4   : > { %v3170_v14 = vpop.f32.mrb[33].mxu0  ;;  %v12687_v23 = vadd.f32 %v3168_v54, %v15984_v49  ;;  %4772 = vmatpush1.bf16.msra.mxu1 %v14124_v21 }
 0x2c5   : > { %v3172_v3 = vpop.f32.mrb[34].mxu0  ;;  %v12688_v53 = vadd.f32 %v3170_v14, %v15988_v46  ;;  %4773 = vmatprep.subr.bf16.mxu1 %v14129_v44 }
 0x2c6   : > { %v12689_v28 = vadd.f32 %v3172_v3, %v15984_v49  ;;  %v3174_v17 = vpop.f32.mrb[35].mxu0 }
 0x2c7   : > { %v12690_v9 = vadd.f32 %v3174_v17, %v15988_v46  ;;  %3463 = vmatmul.mubr.bf16.gmra.mrb[60].mxu1 %v15726_v60  ;;  %v14130_v17 = vld [vmem:[#allocation16 + $0x1e8] ss:$16 sps:$4 sm:$0xff]  }
 0x2c8   : > { %v3473_v41 = vpack.c.bf16 %v12689_v28, %v12687_v23  ;;  %4774 = vmatpush1.bf16.msra.mxu1 %v14127_v47  ;;  %4777 = vmatprep.mubr.bf16.mxu1 %v15730_v63  ;;  %v14135_v23 = vld [vmem:[#allocation16 + $0x20c] ss:$16 sps:$4 sm:$0xff]   ;;  %v14133_v60 = vld [vmem:[#allocation16 + $0x208] ss:$16 sps:$4 sm:$0xff]  }
 0x2c9   : > { %v15995_v34 = vpack.c.bf16 %v12690_v9, %v12688_v53  ;;  %4775 = vmatprep.subr.bf16.mxu1 %v14132_v10 }
 0x2ca   : > { %5637 = vrot.lane.b32.xlu0 %v3473_v41, %s15242_s8  ;;  %13135 = vmatprep.subr.msk.bf16.mxu0 %vm5059_vm0, %v3473_v41  ;;  %v5085_v54 = vsel %vm5059_vm0, %v3473_v41, 0 }
 0x2cb   : > { %v3178_v3 = vpop.f32.mrb[36].mxu0  ;;  %12080 = vmatpush3.bf16.xpose.msra.mxu0 %v5085_v54 }
 0x2cc   : > { %v3180_v11 = vpop.f32.mrb[37].mxu0  ;;  %v12691_v9 = vadd.f32 %v3178_v3, %v15984_v49  ;;  %4776 = vmatpush1.bf16.msra.mxu1 %v14130_v17  ;;  %v14138_v3 = vld [vmem:[#allocation16 + $0x22c] ss:$16 sps:$4 sm:$0xff]  }
 0x2cd   : > { %v3182_v44 = vpop.f32.mrb[38].mxu0  ;;  %v12692_v28 = vadd.f32 %v3180_v11, %v15988_v46  ;;  %4858 = vmatprep.subr.bf16.mxu1 %v14135_v23  ;;  %v14136_v11 = vld [vmem:[#allocation16 + $0x228] ss:$16 sps:$4 sm:$0xff]  }
 0x2ce   : > { %v12693_v14 = vadd.f32 %v3182_v44, %v15984_v49  ;;  %v3184_v21 = vpop.f32.mrb[39].mxu0 }
 0x2cf   : > { %v12694_v53 = vadd.f32 %v3184_v21, %v15988_v46  ;;  %4778 = vmatmul.mubr.bf16.vlgmr.msra.gmra.mrb[64].mxu1 %v15737_v8  ;;  %v14141_v21 = vld [vmem:[#allocation16 + $0x24c] ss:$16 sps:$4 sm:$0xff]   ;;  %v14139_v8 = vld [vmem:[#allocation16 + $0x248] ss:$16 sps:$4 sm:$0xff]  }
 0x2d0   : > { %v3477_v41 = vpack.c.bf16 %v12693_v14, %v12691_v9  ;;  %4859 = vmatpush1.bf16.msra.mxu1 %v14133_v60  ;;  %4787 = vmatprep.mubr.bf16.mxu1 %v15741_v13 }
 0x2d1   : > { %v16006_v54 = vpack.c.bf16 %v12694_v53, %v12692_v28  ;;  %4860 = vmatprep.subr.bf16.mxu1 %v14138_v3  ;;  %v14142_v3 = vld [vmem:[#allocation16 + $0x268] ss:$16 sps:$4 sm:$0xff]  }
 0x2d2   : > { %5639 = vrot.lane.b32.xlu0 %v3477_v41, %s15242_s8  ;;  %13136 = vmatprep.subr.msk.bf16.mxu0 %vm5059_vm0, %v3477_v41  ;;  %v5088_v63 = vsel %vm5059_vm0, %v3477_v41, 0 }
 0x2d3   : > { %v3188_v47 = vpop.f32.mrb[40].mxu0  ;;  %12082 = vmatpush3.bf16.xpose.msra.mxu0 %v5088_v63  ;;  %v14144_v63 = vld [vmem:[#allocation16 + $0x26c] ss:$16 sps:$4 sm:$0xff]  }
 0x2d4   : > { %v3190_v10 = vpop.f32.mrb[41].mxu0  ;;  %v12695_v44 = vadd.f32 %v3188_v47, %v15984_v49  ;;  %4861 = vmatpush1.bf16.msra.mxu1 %v14136_v11 }
 0x2d5   : > { %v3192_v17 = vpop.f32.mrb[42].mxu0  ;;  %v12696_v23 = vadd.f32 %v3190_v10, %v15988_v46  ;;  %4862 = vmatprep.subr.bf16.mxu1 %v14141_v21 }
 0x2d6   : > { %v12697_v9 = vadd.f32 %v3192_v17, %v15984_v49  ;;  %v3194_v14 = vpop.f32.mrb[43].mxu0 }
 0x2d7   : > { %v12698_v28 = vadd.f32 %v3194_v14, %v15988_v46  ;;  %4788 = vmatmul.mubr.bf16.gmra.mrb[68].mxu1 %v15746_v20  ;;  %v14147_v14 = vld [vmem:[#allocation16 + $0x28c] ss:$16 sps:$4 sm:$0xff]   ;;  %v14145_v20 = vld [vmem:[#allocation16 + $0x288] ss:$16 sps:$4 sm:$0xff]  }
 0x2d8   : > { %v3481_v53 = vpack.c.bf16 %v12697_v9, %v12695_v44  ;;  %4863 = vmatpush1.bf16.msra.mxu1 %v14139_v8  ;;  %4797 = vmatprep.mubr.bf16.mxu1 %v15750_v24  ;;  %v14150_v8 = vld [vmem:[#allocation16 + $0x2ac] ss:$16 sps:$4 sm:$0xff]  }
 0x2d9   : > { %v16017_v41 = vpack.c.bf16 %v12698_v28, %v12696_v23  ;;  %4864 = vmatprep.subr.bf16.mxu1 %v14144_v63 }
 0x2da   : > { %5641 = vrot.lane.b32.xlu1 %v3481_v53, %s15242_s8  ;;  %13137 = vmatprep.subr.msk.bf16.mxu0 %vm5059_vm0, %v3481_v53  ;;  %v5091_v13 = vsel %vm5059_vm0, %v3481_v53, 0 }
 0x2db   : > { %v3198_v60 = vpop.f32.mrb[44].mxu0  ;;  %12084 = vmatpush3.bf16.xpose.msra.mxu0 %v5091_v13 }
 0x2dc   : > { %v3200_v47 = vpop.f32.mrb[45].mxu0  ;;  %v12699_v17 = vadd.f32 %v3198_v60, %v15984_v49  ;;  %4865 = vmatpush1.bf16.msra.mxu1 %v14142_v3  ;;  %v14148_v60 = vld [vmem:[#allocation16 + $0x2a8] ss:$16 sps:$4 sm:$0xff]  }
 0x2dd   : > { %v12700_v10 = vadd.f32 %v3200_v47, %v15988_v46  ;;  %v3202_v11 = vpop.f32.mrb[46].mxu0  ;;  %4866 = vmatprep.subr.bf16.mxu1 %v14147_v14 }
 0x2de   : > { %v12701_v44 = vadd.f32 %v3202_v11, %v15984_v49  ;;  %v3204_v9 = vpop.f32.mrb[47].mxu0 }
 0x2df   : > { %v12702_v21 = vadd.f32 %v3204_v9, %v15988_v46  ;;  %4798 = vmatmul.mubr.bf16.gmra.mrb[72].mxu1 %v15760_v36  ;;  %v14151_v36 = vld [vmem:[#allocation16 + $0x2c8] ss:$16 sps:$4 sm:$0xff]  }
 0x2e0   : > { %v3485_v23 = vpack.c.bf16 %v12701_v44, %v12699_v17  ;;  %4867 = vmatpush1.bf16.msra.mxu1 %v14145_v20  ;;  %4807 = vmatprep.mubr.bf16.mxu1 %v15763_v39  ;;  %v14153_v17 = vld [vmem:[#allocation16 + $0x2cc] ss:$16 sps:$4 sm:$0xff]  }
 0x2e1   : > { %v16028_v28 = vpack.c.bf16 %v12702_v21, %v12700_v10  ;;  %4868 = vmatprep.subr.bf16.mxu1 %v14150_v8 }
 0x2e2   : > { %5643 = vrot.lane.b32.xlu1 %v3485_v23, %s15242_s8  ;;  %13138 = vmatprep.subr.msk.bf16.mxu0 %vm5059_vm0, %v3485_v23  ;;  %v5094_v24 = vsel %vm5059_vm0, %v3485_v23, 0  ;;  %v14156_v23 = vld [vmem:[#allocation16 + $0x2ec] ss:$16 sps:$4 sm:$0xff]  }
 0x2e3   : > { %v3208_v53 = vpop.f32.mrb[48].mxu0  ;;  %12086 = vmatpush3.bf16.xpose.msra.mxu0 %v5094_v24  ;;  %v14154_v24 = vld [vmem:[#allocation16 + $0x2e8] ss:$16 sps:$4 sm:$0xff]  }
 0x2e4   : > { %v3210_v13 = vpop.f32.mrb[49].mxu0  ;;  %v12703_v3 = vadd.f32 %v3208_v53, %v15984_v49  ;;  %4869 = vmatpush1.bf16.msra.mxu1 %v14148_v60 }
 0x2e5   : > { %v12704_v63 = vadd.f32 %v3210_v13, %v15988_v46  ;;  %v3212_v47 = vpop.f32.mrb[50].mxu0  ;;  %4870 = vmatprep.subr.bf16.mxu1 %v14153_v17 }
 0x2e6   : > { %v12705_v10 = vadd.f32 %v3212_v47, %v15984_v49  ;;  %v3214_v11 = vpop.f32.mrb[51].mxu0 }
 0x2e7   : > { %v12706_v44 = vadd.f32 %v3214_v11, %v15988_v46  ;;  %4808 = vmatmul.mubr.bf16.gmra.mrb[76].mxu1 %v15785_v55  ;;  %v14157_v55 = vld [vmem:[#allocation16 + $0x308] ss:$16 sps:$4 sm:$0xff]  }
 0x2e8   : > { %v3489_v9 = vpack.c.bf16 %v12705_v10, %v12703_v3  ;;  %4871 = vmatpush1.bf16.msra.mxu1 %v14151_v36  ;;  %4817 = vmatprep.mubr.bf16.mxu1 %v15788_v58  ;;  %v14159_v3 = vld [vmem:[#allocation16 + $0x30c] ss:$16 sps:$4 sm:$0xff]   ;;  %v14160_v36 = vld [vmem:[#allocation16 + $0x328] ss:$16 sps:$4 sm:$0xff]  }
 0x2e9   : > { %v16039_v14 = vpack.c.bf16 %v12706_v44, %v12704_v63  ;;  %4872 = vmatprep.subr.bf16.mxu1 %v14156_v23  ;;  %v14162_v44 = vld [vmem:[#allocation16 + $0x32c] ss:$16 sps:$4 sm:$0xff]  }
 0x2ea   : > { %5645 = vrot.lane.b32.xlu0 %v3489_v9, %s15242_s8  ;;  %13139 = vmatprep.subr.msk.bf16.mxu0 %vm5059_vm0, %v3489_v9  ;;  %v5097_v39 = vsel %vm5059_vm0, %v3489_v9, 0 }
 0x2eb   : > { %19720 = vst [vmem:[#allocation41_spill] sm:$0xff] %v16039_v14  ;;  %v3218_v21 = vpop.f32.mrb[52].mxu0  ;;  %12088 = vmatpush3.bf16.xpose.msra.mxu0 %v5097_v39 }
 0x2ec   : > { %v3220_v20 = vpop.f32.mrb[53].mxu0  ;;  %v12707_v13 = vadd.f32 %v3218_v21, %v15984_v49  ;;  %4873 = vmatpush1.bf16.msra.mxu1 %v14154_v24 }
 0x2ed   : > { %v12708_v53 = vadd.f32 %v3220_v20, %v15988_v46  ;;  %v3222_v8 = vpop.f32.mrb[54].mxu0  ;;  %4874 = vmatprep.subr.bf16.mxu1 %v14159_v3 }
 0x2ee   : > { %v12709_v60 = vadd.f32 %v3222_v8, %v15984_v49  ;;  %v3224_v63 = vpop.f32.mrb[55].mxu0  ;;  %v14165_v8 = vld [vmem:[#allocation16 + $0x34c] ss:$16 sps:$4 sm:$0xff]  }
 0x2ef   : > { %v12710_v47 = vadd.f32 %v3224_v63, %v15988_v46  ;;  %4818 = vmatmul.mubr.bf16.gmra.mrb[80].mxu1 %v15804_v18  ;;  %v14163_v18 = vld [vmem:[#allocation16 + $0x348] ss:$16 sps:$4 sm:$0xff]  }
 0x2f0   : > { %v3493_v10 = vpack.c.bf16 %v12709_v60, %v12707_v13  ;;  %4875 = vmatpush1.bf16.msra.mxu1 %v14157_v55  ;;  %4827 = vmatprep.mubr.bf16.mxu1 %v15807_v22 }
 0x2f1   : > { %v16050_v11 = vpack.c.bf16 %v12710_v47, %v12708_v53  ;;  %4876 = vmatprep.subr.bf16.mxu1 %v14162_v44  ;;  %v14168_v47 = vld [vmem:[#allocation16 + $0x36c] ss:$16 sps:$4 sm:$0xff]  }
 0x2f2   : > { %5647 = vrot.lane.b32.xlu1 %v3493_v10, %s15242_s8  ;;  %13140 = vmatprep.subr.msk.bf16.mxu0 %vm5059_vm0, %v3493_v10  ;;  %v5100_v58 = vsel %vm5059_vm0, %v3493_v10, 0  ;;  %v14166_v10 = vld [vmem:[#allocation16 + $0x368] ss:$16 sps:$4 sm:$0xff]  }
 0x2f3   : > { %19721 = vst [vmem:[#allocation42_spill] sm:$0xff] %v16050_v11  ;;  %v3228_v17 = vpop.f32.mrb[56].mxu0  ;;  %12090 = vmatpush3.bf16.xpose.msra.mxu0 %v5100_v58 }
 0x2f4   : > { %v3230_v9 = vpop.f32.mrb[57].mxu0  ;;  %v12711_v23 = vadd.f32 %v3228_v17, %v15984_v49  ;;  %4877 = vmatpush1.bf16.msra.mxu1 %v14160_v36  ;;  %v14171_v36 = vld [vmem:[#allocation16 + $0x38c] ss:$16 sps:$4 sm:$0xff]  }
 0x2f5   : > { %v12712_v39 = vadd.f32 %v3230_v9, %v15988_v46  ;;  %v3232_v21 = vpop.f32.mrb[58].mxu0  ;;  %4878 = vmatprep.subr.bf16.mxu1 %v14165_v8 }
 0x2f6   : > { %v12713_v20 = vadd.f32 %v3232_v21, %v15984_v49  ;;  %v3234_v24 = vpop.f32.mrb[59].mxu0 }
 0x2f7   : > { %v12714_v53 = vadd.f32 %v3234_v24, %v15988_v46  ;;  %4828 = vmatmul.mubr.bf16.gmra.mrb[84].mxu1 %v15822_v48 }
 0x2f8   : > { %v3497_v13 = vpack.c.bf16 %v12713_v20, %v12711_v23  ;;  %4879 = vmatpush1.bf16.msra.mxu1 %v14163_v18  ;;  %4837 = vmatprep.mubr.bf16.mxu1 %v15825_v52  ;;  %v14169_v52 = vld [vmem:[#allocation16 + $0x388] ss:$16 sps:$4 sm:$0xff]  }
 0x2f9   : > { %v16061_v60 = vpack.c.bf16 %v12714_v53, %v12712_v39  ;;  %4880 = vmatprep.subr.bf16.mxu1 %v14168_v47  ;;  %v14175_v20 = vld [vmem:[#allocation16 + $0x3c8] ss:$16 sps:$4 sm:$0xff]  }
 0x2fa   : > { %5649 = vrot.lane.b32.xlu0 %v3497_v13, %s15242_s8  ;;  %13141 = vmatprep.subr.msk.bf16.mxu0 %vm5059_vm0, %v3497_v13  ;;  %v5103_v22 = vsel %vm5059_vm0, %v3497_v13, 0 }
 0x2fb   : > { %19722 = vst [vmem:[#allocation43_spill] sm:$0xff] %v16061_v60  ;;  %v3238_v63 = vpop.f32.mrb[60].mxu0  ;;  %12092 = vmatpush3.bf16.xpose.msra.mxu0 %v5103_v22 }
 0x2fc   : > { %v3240_v3 = vpop.f32.mrb[61].mxu0  ;;  %v12715_v17 = vadd.f32 %v3238_v63, %v15984_v49  ;;  %4881 = vmatpush1.bf16.msra.mxu1 %v14166_v10 }
 0x2fd   : > { %v12716_v55 = vadd.f32 %v3240_v3, %v15988_v46  ;;  %v3242_v58 = vpop.f32.mrb[62].mxu0  ;;  %4882 = vmatprep.subr.bf16.mxu1 %v14171_v36 }
 0x2fe   : > { %v12717_v44 = vadd.f32 %v3242_v58, %v15984_v49  ;;  %v3244_v9 = vpop.f32.mrb[63].mxu0  ;;  %5613 = vrot.lane.b32.xlu0 %v15794_v5, %s15242_s8  ;;  %v14174_v5 = vld [vmem:[#allocation16 + $0x3ac] ss:$16 sps:$4 sm:$0xff]   ;;  %v14172_v49 = vld [vmem:[#allocation16 + $0x3a8] ss:$16 sps:$4 sm:$0xff]  }
 0x2ff   : > { %v12718_v48 = vadd.f32 %v3244_v9, %v15988_v46  ;;  %4838 = vmatmul.mubr.bf16.gmra.mrb[88].mxu1 %v15840_v15  ;;  %v14177_v46 = vld [vmem:[#allocation16 + $0x3cc] ss:$16 sps:$4 sm:$0xff]  }
 0x300   : > { %v3501_v39 = vpack.c.bf16 %v12717_v44, %v12715_v17  ;;  %4883 = vmatpush1.bf16.msra.mxu1 %v14169_v52  ;;  %4847 = vmatprep.mubr.bf16.mxu1 %v15843_v19  ;;  %v14180_v15 = vld [vmem:[#allocation16 + $0x3ec] ss:$16 sps:$4 sm:$0xff]   ;;  %v14178_v19 = vld [vmem:[#allocation16 + $0x3e8] ss:$16 sps:$4 sm:$0xff]  }
 0x301   : > { %v16074_v21 = vpack.c.bf16 %v12718_v48, %v12716_v55  ;;  %4884 = vmatprep.subr.bf16.mxu1 %v14174_v5 }
 0x302   : > { %5651 = vrot.lane.b32.xlu1 %v3501_v39, %s15242_s8  ;;  %13142 = vmatprep.subr.msk.bf16.mxu0 %vm5059_vm0, %v3501_v39  ;;  %v5106_v23 = vsel %vm5059_vm0, %v3501_v39, 0 }
 0x303   : > { %19723 = vst [vmem:[#allocation44_spill] sm:$0xff] %v16074_v21  ;;  %5617 = vrot.lane.b32.xlu0 %v15830_v0, %s15242_s8  ;;  %12094 = vmatpush3.bf16.xpose.msra.mxu0 %v5106_v23 }
 0x304   : > { %4885 = vmatpush1.bf16.msra.mxu1 %v14172_v49 }
 0x305   : > { %4886 = vmatprep.subr.bf16.mxu1 %v14177_v46 }
 0x306   : > { %5615 = vrot.lane.b32.xlu1 %v15812_v31, %s15242_s8 }
 0x307   : > { %5621 = vrot.lane.b32.xlu0 %v15866_v7, %s15242_s8  ;;  %4848 = vmatmul.mubr.bf16.gmra.mrb[92].mxu1 %v15858_v50 }
 0x308   : > { %4887 = vmatpush1.bf16.msra.mxu1 %v14175_v20  ;;  %4890 = vmatprep.mubr.bf16.mxu1 %v15861_v56 }
 0x309   : > { %4888 = vmatprep.subr.bf16.mxu1 %v14180_v15 }
 0x30a   : > { %5619 = vrot.lane.b32.xlu1 %v15848_v30, %s15242_s8  ;;  %12096 = vmatmul.mubr.msk.bf16.vlgmr.msra.gmra.mrb[96].mxu0 %vm5059_vm0, %v15812_v31 }
 0x30b   : > { %5625 = vrot.lane.b32.xlu0 %v15902_v16, %s15242_s8  ;;  %12099 = vmatprep.mubr.msk.bf16.mxu0 %vm5059_vm0, %v15830_v0 }
 0x30c   : > { %4889 = vmatpush1.bf16.msra.mxu1 %v14178_v19 }
 0x30e   : > { %5623 = vrot.lane.b32.xlu1 %v15884_v42, %s15242_s8 }
 0x30f   : > { %4891 = vmatmul.mubr.bf16.vlgmr.msra.gmra.mrb[64].mxu1 %v15876_v25 }
 0x310   : > { %4900 = vmatprep.mubr.bf16.mxu1 %v15879_v27 }
 0x312   : > { %5627 = vrot.lane.b32.xlu1 %v15920_v62, %s15242_s8  ;;  %12100 = vmatmul.mubr.msk.bf16.gmra.mrb[100].mxu0 %vm5059_vm0, %v15848_v30  ;;  %v3697_v30 = vld [vmem:[%s19724_s9] sm:$0xf] }
 0x313   : > { %12103 = vmatprep.mubr.msk.bf16.mxu0 %vm5059_vm0, %v15866_v7  ;;  %v16129_v50 = vrot.slane %v3697_v30, %v15766_v40  ;;  %v16132_v56 = vrot.slane %v3697_v30, %v15772_v43 }
 0x317   : > { %4901 = vmatmul.mubr.bf16.gmra.mrb[68].mxu1 %v15894_v61 }
 0x318   : > { %4910 = vmatprep.mubr.bf16.mxu1 %v15897_v2 }
 0x31a   : > { %12104 = vmatmul.mubr.msk.bf16.gmra.mrb[104].mxu0 %vm5059_vm0, %v15884_v42 }
 0x31b   : > { %12107 = vmatprep.mubr.msk.bf16.mxu0 %vm5059_vm0, %v15902_v16 }
 0x31f   : > { %4911 = vmatmul.mubr.bf16.gmra.mrb[72].mxu1 %v15912_v38 }
 0x320   : > { %4920 = vmatprep.mubr.bf16.mxu1 %v15915_v45 }
 0x322   : > { %12108 = vmatmul.mubr.msk.bf16.gmra.mrb[108].mxu0 %vm5059_vm0, %v15920_v62 }
 0x327   : > { %4921 = vmatmul.mubr.bf16.gmra.mrb[76].mxu1 %v15929_v51 }
 0x328   : > { %4930 = vmatprep.mubr.bf16.mxu1 %v15932_v12 }
 0x32f   : > { %4931 = vmatmul.mubr.bf16.gmra.mrb[80].mxu1 %v15939_v35 }
 0x330   : > { %4940 = vmatprep.mubr.bf16.mxu1 %v15942_v37 }
 0x337   : > { %4941 = vmatmul.mubr.bf16.gmra.mrb[84].mxu1 %v15949_v59 }
 0x338   : > { %4950 = vmatprep.mubr.bf16.mxu1 %v15952_v4 }
 0x33c   : > { %v5638_v31 = vpop.permute.xlu0 %5637 }
 0x33d   : > { %13143 = vmatprep.subr.msk.bf16.mxu0 %vm5059_vm0, %v5638_v31  ;;  %v5678_v0 = vsel %vm5059_vm0, %v5638_v31, 0 }
 0x33e   : > { %12144 = vmatpush3.bf16.xpose.msra.mxu0 %v5678_v0 }
 0x33f   : > { %4951 = vmatmul.mubr.bf16.gmra.mrb[88].mxu1 %v15959_v26 }
 0x340   : > { %4960 = vmatprep.mubr.bf16.mxu1 %v15962_v29 }
 0x343   : > { %v4666_v7 = vpop.f32.mrb[64].mxu0 }
 0x344   : > { %v5640_v25 = vpop.permute.xlu0 %5639  ;;  %v12751_v27 = vadd.f32 %v4666_v7, %v16129_v50  ;;  %v4668_v42 = vpop.f32.mrb[65].mxu0 }
 0x345   : > { %13144 = vmatprep.subr.msk.bf16.mxu0 %vm5059_vm0, %v5640_v25  ;;  %v5681_v61 = vsel %vm5059_vm0, %v5640_v25, 0  ;;  %v12752_v2 = vadd.f32 %v4668_v42, %v16132_v56  ;;  %v4670_v16 = vpop.f32.mrb[66].mxu0 }
 0x346   : > { %12146 = vmatpush3.bf16.xpose.msra.mxu0 %v5681_v61  ;;  %v12753_v38 = vadd.f32 %v4670_v16, %v16129_v50  ;;  %v4672_v45 = vpop.f32.mrb[67].mxu0 }
 0x347   : > { %v12754_v62 = vadd.f32 %v4672_v45, %v16132_v56  ;;  %4961 = vmatmul.mubr.bf16.gmra.mrb[92].mxu1 %v15969_v57 }
 0x348   : > { %v4971_v51 = vpack.c.bf16 %v12753_v38, %v12751_v27 }
 0x349   : > { %v16142_v12 = vpack.c.bf16 %v12754_v62, %v12752_v2 }
 0x34a   : > { %12111 = vmatprep.subr.bf16.mxu1 %v4971_v51  ;;  %5926 = vrot.lane.b32.xlu1 %v4971_v51, %s15242_s8 }
 0x34b   : > { %19725 = vst [vmem:[#allocation45_spill] sm:$0xff] %v16142_v12  ;;  %12112 = vmatpush3.bf16.msra.mxu1 %v4971_v51  ;;  %v4676_v35 = vpop.f32.mrb[68].mxu0 }
 0x34c   : > { %v5642_v37 = vpop.permute.xlu1 %5641  ;;  %v12755_v59 = vadd.f32 %v4676_v35, %v16129_v50  ;;  %v4678_v4 = vpop.f32.mrb[69].mxu0 }
 0x34d   : > { %13145 = vmatprep.subr.msk.bf16.mxu0 %vm5059_vm0, %v5642_v37  ;;  %v5684_v26 = vsel %vm5059_vm0, %v5642_v37, 0  ;;  %v12756_v29 = vadd.f32 %v4678_v4, %v16132_v56  ;;  %v4680_v24 = vpop.f32.mrb[70].mxu0 }
 0x34e   : > { %12148 = vmatpush3.bf16.xpose.msra.mxu0 %v5684_v26  ;;  %v12757_v53 = vadd.f32 %v4680_v24, %v16129_v50  ;;  %v4682_v8 = vpop.f32.mrb[71].mxu0 }
 0x34f   : > { %v12758_v13 = vadd.f32 %v4682_v8, %v16132_v56 }
 0x350   : > { %v4975_v18 = vpack.c.bf16 %v12757_v53, %v12755_v59 }
 0x351   : > { %v16152_v22 = vpack.c.bf16 %v12758_v13, %v12756_v29 }
 0x352   : > { %12113 = vmatprep.subr.bf16.mxu1 %v4975_v18  ;;  %5928 = vrot.lane.b32.xlu0 %v4975_v18, %s15242_s8 }
 0x353   : > { %19726 = vst [vmem:[#allocation46_spill] sm:$0xff] %v16152_v22  ;;  %v4686_v57 = vpop.f32.mrb[72].mxu0  ;;  %12114 = vmatpush3.bf16.msra.mxu1 %v4975_v18 }
 0x354   : > { %v5644_v63 = vpop.permute.xlu1 %5643  ;;  %v12759_v47 = vadd.f32 %v4686_v57, %v16129_v50  ;;  %v4688_v3 = vpop.f32.mrb[73].mxu0 }
 0x355   : > { %13146 = vmatprep.subr.msk.bf16.mxu0 %vm5059_vm0, %v5644_v63  ;;  %v5687_v10 = vsel %vm5059_vm0, %v5644_v63, 0  ;;  %v12760_v55 = vadd.f32 %v4688_v3, %v16132_v56  ;;  %v4690_v58 = vpop.f32.mrb[74].mxu0 }
 0x356   : > { %12150 = vmatpush3.bf16.xpose.msra.mxu0 %v5687_v10  ;;  %v12761_v17 = vadd.f32 %v4690_v58, %v16129_v50  ;;  %v4692_v44 = vpop.f32.mrb[75].mxu0 }
 0x357   : > { %v12762_v9 = vadd.f32 %v4692_v44, %v16132_v56 }
 0x358   : > { %v4979_v48 = vpack.c.bf16 %v12761_v17, %v12759_v47 }
 0x359   : > { %v16161_v36 = vpack.c.bf16 %v12762_v9, %v12760_v55 }
 0x35a   : > { %12115 = vmatprep.subr.bf16.mxu1 %v4979_v48  ;;  %5930 = vrot.lane.b32.xlu1 %v4979_v48, %s15242_s8 }
 0x35b   : > { %19727 = vst [vmem:[#allocation47_spill] sm:$0xff] %v16161_v36  ;;  %v4696_v39 = vpop.f32.mrb[76].mxu0  ;;  %12116 = vmatpush3.bf16.msra.mxu1 %v4979_v48 }
 0x35c   : > { %v5646_v52 = vpop.permute.xlu0 %5645  ;;  %v12763_v23 = vadd.f32 %v4696_v39, %v16129_v50  ;;  %v4698_v5 = vpop.f32.mrb[77].mxu0 }
 0x35d   : > { %13147 = vmatprep.subr.msk.bf16.mxu0 %vm5059_vm0, %v5646_v52  ;;  %v5690_v49 = vsel %vm5059_vm0, %v5646_v52, 0  ;;  %v12764_v46 = vadd.f32 %v4698_v5, %v16132_v56  ;;  %v4700_v20 = vpop.f32.mrb[78].mxu0 }
 0x35e   : > { %12152 = vmatpush3.bf16.xpose.msra.mxu0 %v5690_v49  ;;  %v12765_v15 = vadd.f32 %v4700_v20, %v16129_v50  ;;  %v4702_v19 = vpop.f32.mrb[79].mxu0 }
 0x35f   : > { %v12766_v31 = vadd.f32 %v4702_v19, %v16132_v56 }
 0x360   : > { %v4983_v0 = vpack.c.bf16 %v12765_v15, %v12763_v23 }
 0x361   : > { %v16170_v30 = vpack.c.bf16 %v12766_v31, %v12764_v46 }
 0x362   : > { %12117 = vmatprep.subr.bf16.mxu1 %v4983_v0  ;;  %5932 = vrot.lane.b32.xlu0 %v4983_v0, %s15242_s8 }
 0x363   : > { %19728 = vst [vmem:[#allocation48_spill] sm:$0xff] %v16170_v30  ;;  %v4706_v7 = vpop.f32.mrb[80].mxu0  ;;  %12118 = vmatpush3.bf16.msra.mxu1 %v4983_v0 }
 0x364   : > { %v5648_v25 = vpop.permute.xlu1 %5647  ;;  %v12767_v27 = vadd.f32 %v4706_v7, %v16129_v50  ;;  %v4708_v42 = vpop.f32.mrb[81].mxu0 }
 0x365   : > { %13148 = vmatprep.subr.msk.bf16.mxu0 %vm5059_vm0, %v5648_v25  ;;  %v5693_v61 = vsel %vm5059_vm0, %v5648_v25, 0  ;;  %v12768_v2 = vadd.f32 %v4708_v42, %v16132_v56  ;;  %v4710_v16 = vpop.f32.mrb[82].mxu0  ;;  %v1896_v42 = vpop.f32.mrb[0].mxu1 }
 0x366   : > { %12154 = vmatpush3.bf16.xpose.msra.mxu0 %v5693_v61  ;;  %v12769_v38 = vadd.f32 %v4710_v16, %v16129_v50  ;;  %v4712_v45 = vpop.f32.mrb[83].mxu0  ;;  %v16215_v61 = vsub.s32 3, %v15755_v32  ;;  %v1898_v16 = vpop.f32.mrb[1].mxu1 }
 0x367   : > { %v12770_v62 = vadd.f32 %v4712_v45, %v16132_v56  ;;  %v14947_v45 = vld [vmem:[%s19484_s7] sm:$0xf] }
 0x368   : > { %v4987_v51 = vpack.c.bf16 %v12769_v38, %v12767_v27  ;;  %v16212_v27 = vsub.s32 2, %v15755_v32  ;;  %19733 = vst [vmem:[#allocation53_spill] sm:$0xff] %v16215_v61 }
 0x369   : > { %v16179_v35 = vpack.c.bf16 %v12770_v62, %v12768_v2  ;;  %v16228_v62 = vrot.slane %v14947_v45, %v16215_v61 }
 0x36a   : > { %12119 = vmatprep.subr.bf16.mxu1 %v4987_v51  ;;  %5934 = vrot.lane.b32.xlu1 %v4987_v51, %s15242_s8  ;;  %19732 = vst [vmem:[#allocation52_spill] sm:$0xff] %v16212_v27 }
 0x36b   : > { %19729 = vst [vmem:[#allocation49_spill] sm:$0xff] %v16179_v35  ;;  %v4716_v37 = vpop.f32.mrb[84].mxu0  ;;  %12120 = vmatpush3.bf16.msra.mxu1 %v4987_v51  ;;  %v1900_v51 = vpop.f32.mrb[2].mxu1 }
 0x36c   : > { %v5650_v59 = vpop.permute.xlu0 %5649  ;;  %v12771_v4 = vadd.f32 %v4716_v37, %v16129_v50  ;;  %v4718_v26 = vpop.f32.mrb[85].mxu0 }
 0x36d   : > { %13149 = vmatprep.subr.msk.bf16.mxu0 %vm5059_vm0, %v5650_v59  ;;  %v5696_v29 = vsel %vm5059_vm0, %v5650_v59, 0  ;;  %v12772_v24 = vadd.f32 %v4718_v26, %v16132_v56  ;;  %v4720_v53 = vpop.f32.mrb[86].mxu0  ;;  %v1902_v37 = vpop.f32.mrb[3].mxu1  ;;  %v12656_v59 = vadd.f32 %v1898_v16, %v16228_v62 }
 0x36e   : > { %12156 = vmatpush3.bf16.xpose.msra.mxu0 %v5696_v29  ;;  %v12773_v8 = vadd.f32 %v4720_v53, %v16129_v50  ;;  %v4722_v13 = vpop.f32.mrb[87].mxu0  ;;  %v1906_v26 = vpop.f32.mrb[4].mxu1  ;;  %v12658_v29 = vadd.f32 %v1902_v37, %v16228_v62 }
 0x36f   : > { %v12774_v18 = vadd.f32 %v4722_v13, %v16132_v56  ;;  %v1908_v53 = vpop.f32.mrb[5].mxu1 }
 0x370   : > { %v5614_v57 = vpop.permute.xlu0 %5613  ;;  %v4991_v63 = vpack.c.bf16 %v12773_v8, %v12771_v4 }
 0x371   : > { %12159 = vmatprep.mubr.msk.bf16.mxu0 %vm5059_vm0, %v5614_v57  ;;  %v16189_v47 = vpack.c.bf16 %v12774_v18, %v12772_v24  ;;  %v12660_v18 = vadd.f32 %v1908_v53, %v16228_v62  ;;  %v1910_v57 = vpop.f32.mrb[6].mxu1 }
 0x372   : > { %5936 = vrot.lane.b32.xlu1 %v4991_v63, %s15242_s8  ;;  %12121 = vmatprep.subr.bf16.mxu1 %v4991_v63 }
 0x373   : > { %19730 = vst [vmem:[#allocation50_spill] sm:$0xff] %v16189_v47  ;;  %v4726_v3 = vpop.f32.mrb[88].mxu0  ;;  %12122 = vmatpush3.bf16.msra.mxu1 %v4991_v63 }
 0x374   : > { %v5652_v10 = vpop.permute.xlu1 %5651  ;;  %v12775_v55 = vadd.f32 %v4726_v3, %v16129_v50  ;;  %v4728_v58 = vpop.f32.mrb[89].mxu0  ;;  %v16245_v3 = vpack.c.bf16 %v12658_v29, %v12656_v59 }
 0x375   : > { %13150 = vmatprep.subr.msk.bf16.mxu0 %vm5059_vm0, %v5652_v10  ;;  %v5699_v17 = vsel %vm5059_vm0, %v5652_v10, 0  ;;  %v12776_v44 = vadd.f32 %v4728_v58, %v16132_v56  ;;  %v4730_v9 = vpop.f32.mrb[90].mxu0  ;;  %v5618_v19 = vpop.permute.xlu0 %5617 }
 0x376   : > { %12158 = vmatpush3.bf16.xpose.msra.mxu0 %v5699_v17  ;;  %v12777_v48 = vadd.f32 %v4730_v9, %v16129_v50  ;;  %v4732_v39 = vpop.f32.mrb[91].mxu0  ;;  %19736 = vst [vmem:[#allocation56_spill] sm:$0xff] %v16245_v3 }
 0x377   : > { %12239 = vmatprep.subr.bf16.mxu0 %v16142_v12  ;;  %v12778_v52 = vadd.f32 %v4732_v39, %v16132_v56 }
 0x378   : > { %v16199_v23 = vpack.c.bf16 %v12777_v48, %v12775_v55  ;;  %v5616_v46 = vpop.permute.xlu1 %5615  ;;  %v1912_v55 = vpop.f32.mrb[7].mxu1 }
 0x379   : > { %v16201_v5 = vpack.c.bf16 %v12778_v52, %v12776_v44  ;;  %v5622_v63 = vpop.permute.xlu0 %5621  ;;  %v12662_v58 = vadd.f32 %v1912_v55, %v16228_v62  ;;  %v1916_v17 = vpop.f32.mrb[8].mxu1 }
 0x37a   : > { %12123 = vmatprep.subr.bf16.mxu1 %v16199_v23  ;;  %v1918_v48 = vpop.f32.mrb[9].mxu1 }
 0x37b   : > { %19731 = vst [vmem:[#allocation51_spill] sm:$0xff] %v16201_v5  ;;  %v4736_v49 = vpop.f32.mrb[92].mxu0  ;;  %12124 = vmatpush3.bf16.msra.mxu1 %v16199_v23  ;;  %v16255_v39 = vpack.c.bf16 %v12662_v58, %v12660_v18  ;;  %v12664_v52 = vadd.f32 %v1918_v48, %v16228_v62 }
 0x37c   : > { %v12779_v20 = vadd.f32 %v4736_v49, %v16129_v50  ;;  %v4738_v15 = vpop.f32.mrb[93].mxu0  ;;  %v5620_v8 = vpop.permute.xlu1 %5619 }
 0x37d   : > { %12160 = vmatmul.mubr.msk.bf16.vlgmr.msra.gmra.mrb[112].mxu0 %vm5059_vm0, %v5616_v46  ;;  %v12780_v31 = vadd.f32 %v4738_v15, %v16132_v56  ;;  %v4740_v0 = vpop.f32.mrb[94].mxu0  ;;  %19738 = vst [vmem:[#allocation58_spill] sm:$0xff] %v16255_v39  ;;  %v1920_v49 = vpop.f32.mrb[10].mxu1 }
 0x37e   : > { %12163 = vmatprep.mubr.msk.bf16.mxu0 %vm5059_vm0, %v5618_v19  ;;  %12240 = vmatpush3.bf16.msra.mxu0 %v16142_v12  ;;  %v12781_v7 = vadd.f32 %v4740_v0, %v16129_v50  ;;  %v4742_v25 = vpop.f32.mrb[95].mxu0  ;;  %v16225_v50 = vrot.slane %v14947_v45, %v16212_v27 }
 0x37f   : > { %12241 = vmatprep.subr.bf16.mxu0 %v16152_v22  ;;  %v12782_v2 = vadd.f32 %v4742_v25, %v16132_v56  ;;  %v5626_v25 = vpop.permute.xlu0 %5625 }
 0x380   : > { %v16219_v38 = vpack.c.bf16 %v12781_v7, %v12779_v20  ;;  %v12655_v56 = vadd.f32 %v1896_v42, %v16225_v50  ;;  %v12657_v4 = vadd.f32 %v1900_v51, %v16225_v50  ;;  %v12659_v24 = vadd.f32 %v1906_v26, %v16225_v50  ;;  %v1922_v20 = vpop.f32.mrb[11].mxu1  ;;  %v5624_v0 = vpop.permute.xlu1 %5623 }
 0x381   : > { %v16230_v32 = vpack.c.bf16 %v12782_v2, %v12780_v31  ;;  %v12661_v10 = vadd.f32 %v1910_v57, %v16225_v50  ;;  %v12663_v9 = vadd.f32 %v1916_v17, %v16225_v50  ;;  %v12665_v46 = vadd.f32 %v1920_v49, %v16225_v50  ;;  %v1926_v19 = vpop.f32.mrb[12].mxu1 }
 0x382   : > { %12242 = vmatpush3.bf16.msra.mxu0 %v16152_v22  ;;  %12125 = vmatprep.subr.bf16.mxu1 %v16219_v38  ;;  %v16241_v13 = vpack.c.bf16 %v12657_v4, %v12655_v56  ;;  %v12666_v15 = vadd.f32 %v1922_v20, %v16228_v62  ;;  %v12667_v16 = vadd.f32 %v1926_v19, %v16225_v50  ;;  %v1928_v45 = vpop.f32.mrb[13].mxu1 }
 0x383   : > { %19734 = vst [vmem:[#allocation54_spill] sm:$0xff] %v16230_v32  ;;  %12243 = vmatprep.subr.bf16.mxu0 %v16161_v36  ;;  %12126 = vmatpush3.bf16.msra.mxu1 %v16219_v38  ;;  %v16252_v44 = vpack.c.bf16 %v12661_v10, %v12659_v24  ;;  %v16262_v31 = vpack.c.bf16 %v12665_v46, %v12663_v9  ;;  %v1930_v37 = vpop.f32.mrb[14].mxu1 }
 0x384   : > { %19735 = vst [vmem:[#allocation55_spill] sm:$0xff] %v16241_v13  ;;  %v16264_v7 = vpack.c.bf16 %v12666_v15, %v12664_v52  ;;  %v5628_v42 = vpop.permute.xlu1 %5627  ;;  %v12668_v51 = vadd.f32 %v1928_v45, %v16228_v62  ;;  %v12669_v56 = vadd.f32 %v1930_v37, %v16225_v50  ;;  %v1932_v59 = vpop.f32.mrb[15].mxu1 }
 0x385   : > { %12164 = vmatmul.mubr.msk.bf16.gmra.mrb[116].mxu0 %vm5059_vm0, %v5620_v8  ;;  %19737 = vst [vmem:[#allocation57_spill] sm:$0xff] %v16252_v44  ;;  %19739 = vst [vmem:[#allocation59_spill] sm:$0xff] %v16262_v31  ;;  %v12670_v4 = vadd.f32 %v1932_v59, %v16228_v62  ;;  %v1936_v24 = vpop.f32.mrb[16].mxu1 }
 0x386   : > { %12167 = vmatprep.mubr.msk.bf16.mxu0 %vm5059_vm0, %v5622_v63  ;;  %12244 = vmatpush3.bf16.msra.mxu0 %v16161_v36  ;;  %19740 = vst [vmem:[#allocation60_spill] sm:$0xff] %v16264_v7  ;;  %v16283_v26 = vpack.c.bf16 %v12669_v56, %v12667_v16  ;;  %v12671_v53 = vadd.f32 %v1936_v24, %v16225_v50  ;;  %v1938_v8 = vpop.f32.mrb[17].mxu1 }
 0x387   : > { %12245 = vmatprep.subr.bf16.mxu0 %v16170_v30  ;;  %v16285_v29 = vpack.c.bf16 %v12670_v4, %v12668_v51  ;;  %v12672_v18 = vadd.f32 %v1938_v8, %v16228_v62  ;;  %v1940_v57 = vpop.f32.mrb[18].mxu1 }
 0x388   : > { %19741 = vst [vmem:[#allocation61_spill] sm:$0xff] %v16283_v26  ;;  %v12673_v63 = vadd.f32 %v1940_v57, %v16225_v50  ;;  %v1942_v10 = vpop.f32.mrb[19].mxu1 }
 0x389   : > { %19742 = vst [vmem:[#allocation62_spill] sm:$0xff] %v16285_v29  ;;  %v12674_v55 = vadd.f32 %v1942_v10, %v16228_v62  ;;  %v1946_v58 = vpop.f32.mrb[20].mxu1 }
 0x38a   : > { %12246 = vmatpush3.bf16.msra.mxu0 %v16170_v30  ;;  %v16291_v17 = vpack.c.bf16 %v12673_v63, %v12671_v53  ;;  %v12675_v20 = vadd.f32 %v1946_v58, %v16225_v50  ;;  %v1948_v15 = vpop.f32.mrb[21].mxu1 }
 0x38b   : > { %12247 = vmatprep.subr.bf16.mxu0 %v16179_v35  ;;  %v16295_v48 = vpack.c.bf16 %v12674_v55, %v12672_v18  ;;  %v12676_v19 = vadd.f32 %v1948_v15, %v16228_v62 }
 0x38c   : > { %19743 = vst [vmem:[#allocation63_spill] sm:$0xff] %v16291_v17 }
 0x38d   : > { %12168 = vmatmul.mubr.msk.bf16.gmra.mrb[120].mxu0 %vm5059_vm0, %v5624_v0  ;;  %19744 = vst [vmem:[#allocation64_spill] sm:$0xff] %v16295_v48  ;;  %v1950_v0 = vpop.f32.mrb[22].mxu1 }
 0x38e   : > { %12171 = vmatprep.mubr.msk.bf16.mxu0 %vm5059_vm0, %v5626_v25  ;;  %12248 = vmatpush3.bf16.msra.mxu0 %v16179_v35  ;;  %v12677_v25 = vadd.f32 %v1950_v0, %v16225_v50 }
 0x38f   : > { %12249 = vmatprep.subr.bf16.mxu0 %v16189_v47 }
 0x390   : > { %v16310_v45 = vpack.c.bf16 %v12677_v25, %v12675_v20 }
 0x392   : > { %12250 = vmatpush3.bf16.msra.mxu0 %v16189_v47  ;;  %19745 = vst [vmem:[#allocation65_spill] sm:$0xff] %v16310_v45 }
 0x393   : > { %12251 = vmatprep.subr.bf16.mxu0 %v16201_v5 }
 0x395   : > { %12172 = vmatmul.mubr.msk.bf16.gmra.mrb[124].mxu0 %vm5059_vm0, %v5628_v42  ;;  %v1952_v42 = vpop.f32.mrb[23].mxu1 }
 0x396   : > { %12252 = vmatpush3.bf16.msra.mxu0 %v16201_v5  ;;  %v12678_v16 = vadd.f32 %v1952_v42, %v16228_v62  ;;  %v1956_v59 = vpop.f32.mrb[24].mxu1 }
 0x397   : > { %12253 = vmatprep.subr.bf16.mxu0 %v16230_v32  ;;  %v12679_v53 = vadd.f32 %v1956_v59, %v16225_v50  ;;  %v1958_v8 = vpop.f32.mrb[25].mxu1 }
 0x398   : > { %v16314_v37 = vpack.c.bf16 %v12678_v16, %v12676_v19  ;;  %v12680_v18 = vadd.f32 %v1958_v8, %v16228_v62  ;;  %v1960_v57 = vpop.f32.mrb[26].mxu1 }
 0x399   : > { %v12681_v63 = vadd.f32 %v1960_v57, %v16225_v50  ;;  %v1962_v10 = vpop.f32.mrb[27].mxu1 }
 0x39a   : > { %12254 = vmatpush3.bf16.msra.mxu0 %v16230_v32  ;;  %19746 = vst [vmem:[#allocation66_spill] sm:$0xff] %v16314_v37  ;;  %v12682_v55 = vadd.f32 %v1962_v10, %v16228_v62  ;;  %v1966_v42 = vpop.f32.mrb[28].mxu1 }
 0x39b   : > { %v16330_v58 = vpack.c.bf16 %v12681_v63, %v12679_v53  ;;  %v1968_v16 = vpop.f32.mrb[29].mxu1  ;;  %v12683_v8 = vadd.f32 %v1966_v42, %v16225_v50 }
 0x39c   : > { %v16334_v15 = vpack.c.bf16 %v12682_v55, %v12680_v18  ;;  %v1970_v59 = vpop.f32.mrb[30].mxu1  ;;  %v12684_v18 = vadd.f32 %v1968_v16, %v16228_v62 }
 0x39d   : > { %19747 = vst [vmem:[#allocation67_spill] sm:$0xff] %v16330_v58  ;;  %v1972_v53 = vpop.f32.mrb[31].mxu1  ;;  %v12685_v57 = vadd.f32 %v1970_v59, %v16225_v50  ;;  %v14948_v50 = vld [vmem:[%s19719_s3] sm:$0xf] }
 0x39e   : > { %19748 = vst [vmem:[#allocation68_spill] sm:$0xff] %v16334_v15  ;;  %v12686_v63 = vadd.f32 %v1972_v53, %v16228_v62  ;;  %v16371_v62 = vrot.slane %v14948_v50, %v16212_v27  ;;  %v3394_v16 = vpop.f32.mrb[32].mxu1 }
 0x39f   : > { %v16356_v43 = vpack.c.bf16 %v12685_v57, %v12683_v8  ;;  %v3396_v59 = vpop.f32.mrb[33].mxu1 }
 0x3a0   : > { %v16358_v40 = vpack.c.bf16 %v12686_v63, %v12684_v18  ;;  %v12719_v53 = vadd.f32 %v3394_v16, %v16371_v62  ;;  %v3398_v8 = vpop.f32.mrb[34].mxu1  ;;  %v16378_v63 = vrot.slane %v14948_v50, %v16215_v61 }
 0x3a1   : > { %19749 = vst [vmem:[#allocation69_spill] sm:$0xff] %v16356_v43  ;;  %v12721_v18 = vadd.f32 %v3398_v8, %v16371_v62  ;;  %v3400_v37 = vpop.f32.mrb[35].mxu1 }
 0x3a2   : > { %19750 = vst [vmem:[#allocation70_spill] sm:$0xff] %v16358_v40  ;;  %v12720_v40 = vadd.f32 %v3396_v59, %v16378_v63  ;;  %v12722_v48 = vadd.f32 %v3400_v37, %v16378_v63  ;;  %v3404_v29 = vpop.f32.mrb[36].mxu1 }
 0x3a3   : > { %v16375_v57 = vpack.c.bf16 %v12721_v18, %v12719_v53  ;;  %v12723_v7 = vadd.f32 %v3404_v29, %v16371_v62  ;;  %v3406_v39 = vpop.f32.mrb[37].mxu1 }
 0x3a4   : > { %v16383_v3 = vpack.c.bf16 %v12722_v48, %v12720_v40  ;;  %v12724_v16 = vadd.f32 %v3406_v39, %v16378_v63  ;;  %v3408_v43 = vpop.f32.mrb[38].mxu1 }
 0x3a5   : > { %19751 = vst [vmem:[#allocation71_spill] sm:$0xff] %v16375_v57  ;;  %v12725_v53 = vadd.f32 %v3408_v43, %v16371_v62  ;;  %v3410_v8 = vpop.f32.mrb[39].mxu1 }
 0x3a6   : > { %19752 = vst [vmem:[#allocation72_spill] sm:$0xff] %v16383_v3  ;;  %v12726_v50 = vadd.f32 %v3410_v8, %v16378_v63  ;;  %v3414_v18 = vpop.f32.mrb[40].mxu1 }
 0x3a7   : > { %v16388_v58 = vpack.c.bf16 %v12725_v53, %v12723_v7  ;;  %v12727_v59 = vadd.f32 %v3414_v18, %v16371_v62  ;;  %v3416_v37 = vpop.f32.mrb[41].mxu1 }
 0x3a8   : > { %v16391_v45 = vpack.c.bf16 %v12726_v50, %v12724_v16  ;;  %v12728_v29 = vadd.f32 %v3416_v37, %v16378_v63  ;;  %v3418_v40 = vpop.f32.mrb[42].mxu1 }
 0x3a9   : > { %19753 = vst [vmem:[#allocation73_spill] sm:$0xff] %v16388_v58  ;;  %v12729_v48 = vadd.f32 %v3418_v40, %v16371_v62  ;;  %v3420_v39 = vpop.f32.mrb[43].mxu1 }
 0x3aa   : > { %19754 = vst [vmem:[#allocation74_spill] sm:$0xff] %v16391_v45  ;;  %v12730_v3 = vadd.f32 %v3420_v39, %v16378_v63  ;;  %v3424_v43 = vpop.f32.mrb[44].mxu1 }
 0x3ab   : > { %v16396_v17 = vpack.c.bf16 %v12729_v48, %v12727_v59  ;;  %v12731_v8 = vadd.f32 %v3424_v43, %v16371_v62  ;;  %v3426_v7 = vpop.f32.mrb[45].mxu1 }
 0x3ac   : > { %v16399_v53 = vpack.c.bf16 %v12730_v3, %v12728_v29  ;;  %v12732_v18 = vadd.f32 %v3426_v7, %v16378_v63  ;;  %v3428_v16 = vpop.f32.mrb[46].mxu1 }
 0x3ad   : > { %19755 = vst [vmem:[#allocation75_spill] sm:$0xff] %v16396_v17  ;;  %v12733_v50 = vadd.f32 %v3428_v16, %v16371_v62  ;;  %v3430_v37 = vpop.f32.mrb[47].mxu1 }
 0x3ae   : > { %19756 = vst [vmem:[#allocation76_spill] sm:$0xff] %v16399_v53  ;;  %v12734_v45 = vadd.f32 %v3430_v37, %v16378_v63  ;;  %v3434_v40 = vpop.f32.mrb[48].mxu1 }
 0x3af   : > { %v16404_v26 = vpack.c.bf16 %v12733_v50, %v12731_v8  ;;  %v12735_v39 = vadd.f32 %v3434_v40, %v16371_v62  ;;  %v3436_v59 = vpop.f32.mrb[49].mxu1 }
 0x3b0   : > { %v16407_v48 = vpack.c.bf16 %v12734_v45, %v12732_v18  ;;  %v12736_v43 = vadd.f32 %v3436_v59, %v16378_v63  ;;  %v3438_v3 = vpop.f32.mrb[50].mxu1 }
 0x3b1   : > { %19757 = vst [vmem:[#allocation77_spill] sm:$0xff] %v16404_v26  ;;  %v12737_v29 = vadd.f32 %v3438_v3, %v16371_v62  ;;  %v3440_v7 = vpop.f32.mrb[51].mxu1 }
 0x3b2   : > { %19758 = vst [vmem:[#allocation78_spill] sm:$0xff] %v16407_v48  ;;  %v12738_v53 = vadd.f32 %v3440_v7, %v16378_v63  ;;  %v3444_v7 = vpop.f32.mrb[52].mxu1 }
 0x3b3   : > { %v16412_v16 = vpack.c.bf16 %v12737_v29, %v12735_v39  ;;  %v3446_v48 = vpop.f32.mrb[53].mxu1  ;;  %v12739_v26 = vadd.f32 %v3444_v7, %v16371_v62 }
 0x3b4   : > { %v16414_v31 = vpack.c.bf16 %v12738_v53, %v12736_v43  ;;  %v3448_v13 = vpop.f32.mrb[54].mxu1  ;;  %v12740_v57 = vadd.f32 %v3446_v48, %v16378_v63 }
 0x3b5   : > { %19759 = vst [vmem:[#allocation79_spill] sm:$0xff] %v16412_v16  ;;  %v3450_v17 = vpop.f32.mrb[55].mxu1  ;;  %v12741_v58 = vadd.f32 %v3448_v13, %v16371_v62 }
 0x3b6   : > { %19760 = vst [vmem:[#allocation80_spill] sm:$0xff] %v16414_v31  ;;  %v12742_v32 = vadd.f32 %v3450_v17, %v16378_v63  ;;  %v3454_v7 = vpop.f32.mrb[56].mxu1 }
 0x3b7   : > { %v16456_v5 = vpack.c.bf16 %v12741_v58, %v12739_v26  ;;  %v12743_v13 = vadd.f32 %v3454_v7, %v16371_v62  ;;  %v3456_v48 = vpop.f32.mrb[57].mxu1 }
 0x3b8   : > { %v16458_v47 = vpack.c.bf16 %v12742_v32, %v12740_v57  ;;  %v3458_v12 = vpop.f32.mrb[58].mxu1  ;;  %v12744_v32 = vadd.f32 %v3456_v48, %v16378_v63 }
 0x3b9   : > { %19761 = vst [vmem:[#allocation81_spill] sm:$0xff] %v16456_v5  ;;  %v12745_v58 = vadd.f32 %v3458_v12, %v16371_v62  ;;  %v3460_v57 = vpop.f32.mrb[59].mxu1 }
 0x3ba   : > { %19762 = vst [vmem:[#allocation82_spill] sm:$0xff] %v16458_v47  ;;  %v12746_v5 = vadd.f32 %v3460_v57, %v16378_v63  ;;  %v3464_v60 = vpop.f32.mrb[60].mxu1 }
 0x3bb   : > { %v16477_v47 = vpack.c.bf16 %v12745_v58, %v12743_v13  ;;  %v12747_v12 = vadd.f32 %v3464_v60, %v16371_v62  ;;  %v3466_v11 = vpop.f32.mrb[61].mxu1 }
 0x3bc   : > { %v16276_v2 = vpop.permute.xlu1 %5926  ;;  %v16482_v21 = vpack.c.bf16 %v12746_v5, %v12744_v32  ;;  %v3468_v13 = vpop.f32.mrb[62].mxu1 }
 0x3bd   : > { %12175 = vmatprep.subr.bf16.mxu1 %v16276_v2  ;;  %19763 = vst [vmem:[#allocation83_spill] sm:$0xff] %v16477_v47  ;;  %v12749_v57 = vadd.f32 %v3468_v13, %v16371_v62  ;;  %v3470_v47 = vpop.f32.mrb[63].mxu1 }
 0x3be   : > { %v12750_v5 = vadd.f32 %v3470_v47, %v16378_v63 }
 0x3c4   : > { %v16438_v43 = vpop.permute.xlu0 %5928 }
 0x3cc   : > { %v16434_v39 = vpop.permute.xlu1 %5930 }
 0x3d4   : > { %v16460_v36 = vpop.permute.xlu0 %5932 }
 0x3dc   : > { %v16440_v3 = vpop.permute.xlu1 %5934 }
 0x3dd   : > { %v16293_v9 = vpop.f32.mrb[96].mxu0 }
 0x3de   : > { %5209 = vmax.xlane.f32.xlu0 %v16293_v9  ;;  %v16298_v52 = vpop.f32.mrb[97].mxu0 }
 0x3df   : > { %v16300_v49 = vpop.f32.mrb[98].mxu0 }
 0x3e0   : > { %v16302_v46 = vpop.f32.mrb[99].mxu0 }
 0x3e1   : > { %5207 = vmax.xlane.f32.xlu1 %v16302_v46 }
 0x3e2   : > { %5205 = vmax.xlane.f32.xlu0 %v16298_v52 }
 0x3e4   : > { %v16462_v22 = vpop.permute.xlu1 %5936 }
 0x3e5   : > { %v16312_v51 = vpop.f32.mrb[100].mxu0 }
 0x3e6   : > { %5211 = vmax.xlane.f32.xlu0 %v16300_v49  ;;  %5217 = vmax.xlane.f32.xlu1 %v16312_v51  ;;  %v16318_v56 = vpop.f32.mrb[101].mxu0 }
 0x3e7   : > { %v16320_v4 = vpop.f32.mrb[102].mxu0 }
 0x3e8   : > { %v16322_v24 = vpop.f32.mrb[103].mxu0 }
 0x3ea   : > { %5213 = vmax.xlane.f32.xlu1 %v16318_v56  ;;  %5219 = vmax.xlane.f32.xlu0 %v16320_v4 }
 0x3ed   : > { %v16332_v20 = vpop.f32.mrb[104].mxu0 }
 0x3ee   : > { %5215 = vmax.xlane.f32.xlu0 %v16322_v24  ;;  %5225 = vmax.xlane.f32.xlu1 %v16332_v20  ;;  %v16338_v19 = vpop.f32.mrb[105].mxu0 }
 0x3ef   : > { %v16340_v0 = vpop.f32.mrb[106].mxu0 }
 0x3f0   : > { %v16342_v25 = vpop.f32.mrb[107].mxu0 }
 0x3f2   : > { %5221 = vmax.xlane.f32.xlu1 %v16338_v19  ;;  %5227 = vmax.xlane.f32.xlu0 %v16340_v0 }
 0x3f5   : > { %v16350_v10 = vpop.f32.mrb[108].mxu0 }
 0x3f6   : > { %5223 = vmax.xlane.f32.xlu0 %v16342_v25  ;;  %5233 = vmax.xlane.f32.xlu1 %v16350_v10  ;;  %v16354_v55 = vpop.f32.mrb[109].mxu0 }
 0x3f7   : > { %v16360_v15 = vpop.f32.mrb[110].mxu0 }
 0x3f8   : > { %v16362_v42 = vpop.f32.mrb[111].mxu0 }
 0x3fa   : > { %5229 = vmax.xlane.f32.xlu1 %v16354_v55  ;;  %5235 = vmax.xlane.f32.xlu0 %v16360_v15 }
 0x3fe   : > { %5231 = vmax.xlane.f32.xlu0 %v16362_v42 }
 0x450   : > { %v16416_v37 = vpop.f32.mrb[112].mxu0 }
 0x451   : > { %5802 = vmax.xlane.f32.xlu1 %v16416_v37  ;;  %v16419_v8 = vpop.f32.mrb[113].mxu0 }
 0x452   : > { %v16421_v45 = vpop.f32.mrb[114].mxu0 }
 0x453   : > { %5804 = vmax.xlane.f32.xlu0 %v16421_v45  ;;  %v16424_v18 = vpop.f32.mrb[115].mxu0 }
 0x455   : > { %5798 = vmax.xlane.f32.xlu1 %v16419_v8 }
 0x457   : > { %5800 = vmax.xlane.f32.xlu0 %v16424_v18 }
 0x458   : > { %v16428_v50 = vpop.f32.mrb[116].mxu0 }
 0x459   : > { %v16430_v53 = vpop.f32.mrb[117].mxu0 }
 0x45a   : > { %v16432_v40 = vpop.f32.mrb[118].mxu0 }
 0x45b   : > { %v16436_v59 = vpop.f32.mrb[119].mxu0 }
 0x460   : > { %v16442_v29 = vpop.f32.mrb[120].mxu0 }
 0x461   : > { %v16444_v31 = vpop.f32.mrb[121].mxu0 }
 0x462   : > { %v16446_v44 = vpop.f32.mrb[122].mxu0 }
 0x463   : > { %v16448_v16 = vpop.f32.mrb[123].mxu0 }
 0x466   : > { %5940 = vrot.lane.b32.xlu1 %v16219_v38, %s15242_s8 }
 0x468   : > { %v16464_v35 = vpop.f32.mrb[124].mxu0 }
 0x469   : > { %v16466_v30 = vpop.f32.mrb[125].mxu0 }
 0x46a   : > { %v16469_v17 = vpop.f32.mrb[126].mxu0 }
 0x46b   : > { %v5210_v38 = vpop.xlane.xlu0 %5209  ;;  %v16471_v26 = vpop.f32.mrb[127].mxu0 }
 0x46c   : > { %v5239_v1 = vsub.f32 %v16293_v9, %v5210_v38 }
 0x46d   : > { %5938 = vrot.lane.b32.xlu0 %v16199_v23, %s15242_s8  ;;  %v12748_v23 = vadd.f32 %v3466_v11, %v16378_v63 }
 0x46e   : > { %v5208_v7 = vpop.xlane.xlu1 %5207  ;;  %v5257_v9 = vmul.f32 1.442695, %v5239_v1 }
 0x46f   : > { %v5238_v33 = vsub.f32 %v16302_v46, %v5208_v7  ;;  %v5206_v6 = vpop.xlane.xlu0 %5205  ;;  %v16492_v60 = vpack.c.bf16 %v12750_v5, %v12748_v23 }
 0x470   : > { %v5237_v48 = vsub.f32 %v16298_v52, %v5206_v6  ;;  %v16490_v52 = vpack.c.bf16 %v12749_v57, %v12747_v12 }
 0x471   : > { %v5255_v14 = vmul.f32 1.442695, %v5238_v33 }
 0x472   : > { %v5253_v58 = vmul.f32 1.442695, %v5237_v48 }
 0x473   : > { %14373 = vpow2.f32 %v5255_v14  ;;  %v5212_v46 = vpop.xlane.xlu0 %5211  ;;  %v5218_v38 = vpop.xlane.xlu1 %5217 }
 0x474   : > { %14375 = vpow2.f32 %v5253_v58  ;;  %v5240_v6 = vsub.f32 %v16300_v49, %v5212_v46  ;;  %v5243_v14 = vsub.f32 %v16312_v51, %v5218_v38 }
 0x475   : > { %14377 = vpow2.f32 %v5257_v9 }
 0x476   : > { %v5259_v33 = vmul.f32 1.442695, %v5240_v6  ;;  %v5265_v13 = vmul.f32 1.442695, %v5243_v14 }
 0x477   : > { %v5214_v11 = vpop.xlane.xlu1 %5213  ;;  %v5220_v32 = vpop.xlane.xlu0 %5219 }
 0x478   : > { %14379 = vpow2.f32 %v5259_v33  ;;  %v5241_v62 = vsub.f32 %v16318_v56, %v5214_v11  ;;  %v5244_v1 = vsub.f32 %v16320_v4, %v5220_v32 }
 0x47a   : > { %v5261_v7 = vmul.f32 1.442695, %v5241_v62  ;;  %v5267_v47 = vmul.f32 1.442695, %v5244_v1 }
 0x47b   : > { %v5216_v63 = vpop.xlane.xlu0 %5215  ;;  %v5226_v48 = vpop.xlane.xlu1 %5225 }
 0x47c   : > { %v5242_v49 = vsub.f32 %v16322_v24, %v5216_v63  ;;  %14381 = vpow2.f32 %v5261_v7  ;;  %v5247_v38 = vsub.f32 %v16332_v20, %v5226_v48 }
 0x47d   : > { %v16498_v12 = vpop.eup %14373  ;;  %14383 = vpow2.f32 %v5267_v47 }
 0x47e   : > { %v16500_v23 = vpop.eup %14375  ;;  %v5263_v58 = vmul.f32 1.442695, %v5242_v49 }
 0x47f   : > { %v5222_v57 = vpop.xlane.xlu1 %5221  ;;  %v5228_v56 = vpop.xlane.xlu0 %5227  ;;  %v5317_v4 = vpack.c.bf16 %v16498_v12, %v16500_v23 }
 0x480   : > { %14385 = vpow2.f32 %v5263_v58  ;;  %v5245_v51 = vsub.f32 %v16338_v19, %v5222_v57  ;;  %v5248_v9 = vsub.f32 %v16340_v0, %v5228_v56  ;;  %v16506_v46 = vpop.eup %14377  ;;  %v5273_v19 = vmul.f32 1.442695, %v5247_v38 }
 0x481   : > { %12127 = vmatprep.mubr.bf16.mxu1 %v5317_v4  ;;  %14387 = vpow2.f32 %v5265_v13 }
 0x482   : > { %v16508_v24 = vpop.eup %14379  ;;  %v5269_v5 = vmul.f32 1.442695, %v5245_v51  ;;  %v5275_v6 = vmul.f32 1.442695, %v5248_v9 }
 0x483   : > { %v5224_v33 = vpop.xlane.xlu0 %5223  ;;  %v5234_v11 = vpop.xlane.xlu1 %5233  ;;  %v5318_v32 = vpack.c.bf16 %v16508_v24, %v16506_v46 }
 0x484   : > { %v5246_v62 = vsub.f32 %v16342_v25, %v5224_v33  ;;  %14389 = vpow2.f32 %v5269_v5  ;;  %v5251_v48 = vsub.f32 %v16350_v10, %v5234_v11 }
 0x485   : > { %12128 = vmatmul.mubr.bf16.vlgmr.msra.gmra.mrb[96].mxu1 %v5318_v32  ;;  %14391 = vpow2.f32 %v5275_v6  ;;  %v4892_v32 = vpop.f32.mrb[64].mxu1 }
 0x486   : > { %v5271_v0 = vmul.f32 1.442695, %v5246_v62  ;;  %12176 = vmatpush3.bf16.msra.mxu1 %v16276_v2  ;;  %v16516_v14 = vpop.eup %14381 }
 0x487   : > { %12177 = vmatprep.subr.bf16.mxu1 %v16438_v43  ;;  %v5230_v1 = vpop.xlane.xlu1 %5229  ;;  %v5236_v20 = vpop.xlane.xlu0 %5235 }
 0x488   : > { %14393 = vpow2.f32 %v5271_v0  ;;  %v5249_v7 = vsub.f32 %v16354_v55, %v5230_v1  ;;  %v5252_v47 = vsub.f32 %v16360_v15, %v5236_v20  ;;  %v16520_v63 = vpop.eup %14383 }
 0x489   : > { %14395 = vpow2.f32 %v5273_v19  ;;  %v4894_v19 = vpop.f32.mrb[65].mxu1 }
 0x48a   : > { %v16522_v25 = vpop.eup %14385  ;;  %v5277_v2 = vmul.f32 1.442695, %v5249_v7  ;;  %12178 = vmatpush3.bf16.msra.mxu1 %v16438_v43  ;;  %5808 = vmax.xlane.f32.xlu1 %v16436_v59  ;;  %v5283_v49 = vmul.f32 1.442695, %v5252_v47  ;;  %v5281_v43 = vmul.f32 1.442695, %v5251_v48 }
 0x48b   : > { %12179 = vmatprep.subr.bf16.mxu1 %v16434_v39  ;;  %v5232_v13 = vpop.xlane.xlu0 %5231  ;;  %v5319_v55 = vpack.c.bf16 %v16522_v25, %v16516_v14  ;;  %v16530_v15 = vpop.eup %14387 }
 0x48c   : > { %19764 = vst [vmem:[#allocation84_spill] sm:$0xff] %v16530_v15  ;;  %v5250_v58 = vsub.f32 %v16362_v42, %v5232_v13  ;;  %5806 = vmax.xlane.f32.xlu0 %v16430_v53  ;;  %v5320_v10 = vpack.c.bf16 %v16520_v63, %v16530_v15  ;;  %14397 = vpow2.f32 %v5277_v2  ;;  %v4896_v20 = vpop.f32.mrb[66].mxu1 }
 0x48d   : > { %12131 = vmatprep.mubr.bf16.mxu1 %v5319_v55  ;;  %14399 = vpow2.f32 %v5283_v49  ;;  %v4898_v47 = vpop.f32.mrb[67].mxu1 }
 0x48e   : > { %v5279_v57 = vmul.f32 1.442695, %v5250_v58  ;;  %12180 = vmatpush3.bf16.msra.mxu1 %v16434_v39  ;;  %5814 = vmax.xlane.f32.xlu1 %v16444_v31  ;;  %v16539_v56 = vpop.eup %14389  ;;  %v4902_v2 = vpop.f32.mrb[68].mxu1 }
 0x48f   : > { %12132 = vmatmul.mubr.bf16.gmra.mrb[100].mxu1 %v5320_v10  ;;  %12181 = vmatprep.subr.bf16.mxu1 %v16460_v36  ;;  %19765 = vst [vmem:[#allocation85_spill] sm:$0xff] %v16539_v56  ;;  %v16542_v42 = vpop.eup %14391  ;;  %v4904_v55 = vpop.f32.mrb[69].mxu1 }
 0x490   : > { %14401 = vpow2.f32 %v5279_v57  ;;  %5810 = vmax.xlane.f32.xlu0 %v16428_v50  ;;  %19766 = vst [vmem:[#allocation86_spill] sm:$0xff] %v16542_v42 }
 0x491   : > { %14403 = vpow2.f32 %v5281_v43  ;;  %v4906_v43 = vpop.f32.mrb[70].mxu1 }
 0x492   : > { %v16544_v4 = vpop.eup %14393  ;;  %12182 = vmatpush3.bf16.msra.mxu1 %v16460_v36  ;;  %5818 = vmax.xlane.f32.xlu1 %v16442_v29 }
 0x493   : > { %12183 = vmatprep.subr.bf16.mxu1 %v16440_v3  ;;  %v5321_v39 = vpack.c.bf16 %v16544_v4, %v16539_v56  ;;  %v16551_v51 = vpop.eup %14395 }
 0x494   : > { %19767 = vst [vmem:[#allocation87_spill] sm:$0xff] %v16551_v51  ;;  %5812 = vmax.xlane.f32.xlu0 %v16432_v40  ;;  %v5322_v9 = vpack.c.bf16 %v16542_v42, %v16551_v51 }
 0x495   : > { %12135 = vmatprep.mubr.bf16.mxu1 %v5321_v39  ;;  %v4908_v39 = vpop.f32.mrb[71].mxu1 }
 0x496   : > { %12184 = vmatpush3.bf16.msra.mxu1 %v16440_v3  ;;  %5822 = vmax.xlane.f32.xlu1 %v16466_v30  ;;  %v16559_v36 = vpop.eup %14397 }
 0x497   : > { %12136 = vmatmul.mubr.bf16.gmra.mrb[104].mxu1 %v5322_v9  ;;  %12185 = vmatprep.subr.bf16.mxu1 %v16462_v22  ;;  %19768 = vst [vmem:[#allocation88_spill] sm:$0xff] %v16559_v36  ;;  %v16562_v38 = vpop.eup %14399 }
 0x498   : > { %5816 = vmax.xlane.f32.xlu0 %v16448_v16  ;;  %19769 = vst [vmem:[#allocation89_spill] sm:$0xff] %v16562_v38 }
 0x49a   : > { %v16564_v5 = vpop.eup %14401  ;;  %12186 = vmatpush3.bf16.msra.mxu1 %v16462_v22  ;;  %5826 = vmax.xlane.f32.xlu1 %v16464_v35  ;;  %v14949_v22 = vld [vmem:[%s19724_s9] sm:$0xf] }
 0x49b   : > { %19770 = vst [vmem:[#allocation90_spill] sm:$0xff] %v16564_v5  ;;  %v5323_v3 = vpack.c.bf16 %v16564_v5, %v16559_v36  ;;  %v16570_v6 = vpop.eup %14403  ;;  %v16585_v11 = vrot.slane %v14949_v22, %v16212_v27  ;;  %v16588_v62 = vrot.slane %v14949_v22, %v16215_v61 }
 0x49c   : > { %19771 = vst [vmem:[#allocation91_spill] sm:$0xff] %v16570_v6  ;;  %5820 = vmax.xlane.f32.xlu0 %v16446_v44  ;;  %v5324_v33 = vpack.c.bf16 %v16562_v38, %v16570_v6 }
 0x49d   : > { %12139 = vmatprep.mubr.bf16.mxu1 %v5323_v3  ;;  %v12783_v0 = vadd.f32 %v4892_v32, %v16585_v11  ;;  %v12784_v1 = vadd.f32 %v4894_v19, %v16588_v62  ;;  %v12785_v7 = vadd.f32 %v4896_v20, %v16585_v11  ;;  %v12786_v48 = vadd.f32 %v4898_v47, %v16588_v62  ;;  %v4912_v3 = vpop.f32.mrb[72].mxu1 }
 0x49e   : > { %v12787_v13 = vadd.f32 %v4902_v2, %v16585_v11  ;;  %v12788_v10 = vadd.f32 %v4904_v55, %v16588_v62  ;;  %v12789_v57 = vadd.f32 %v4906_v43, %v16585_v11  ;;  %v12790_v9 = vadd.f32 %v4908_v39, %v16588_v62  ;;  %v4914_v32 = vpop.f32.mrb[73].mxu1 }
 0x49f   : > { %12140 = vmatmul.mubr.bf16.gmra.mrb[108].mxu1 %v5324_v33  ;;  %v16596_v49 = vpack.c.bf16 %v12785_v7, %v12783_v0  ;;  %v16599_v58 = vpack.c.bf16 %v12786_v48, %v12784_v1  ;;  %v12791_v22 = vadd.f32 %v4912_v3, %v16585_v11  ;;  %v12792_v0 = vadd.f32 %v4914_v32, %v16588_v62  ;;  %v4916_v1 = vpop.f32.mrb[74].mxu1 }
 0x4a0   : > { %5824 = vmax.xlane.f32.xlu0 %v16471_v26  ;;  %v16604_v33 = vpack.c.bf16 %v12789_v57, %v12787_v13  ;;  %v16607_v19 = vpack.c.bf16 %v12790_v9, %v12788_v10  ;;  %v12793_v20 = vadd.f32 %v4916_v1, %v16585_v11  ;;  %v4918_v7 = vpop.f32.mrb[75].mxu1 }
 0x4a1   : > { %v12794_v47 = vadd.f32 %v4918_v7, %v16588_v62  ;;  %v4922_v48 = vpop.f32.mrb[76].mxu1 }
 0x4a2   : > { %v16612_v2 = vpack.c.bf16 %v12793_v20, %v12791_v22  ;;  %v12795_v55 = vadd.f32 %v4922_v48, %v16585_v11  ;;  %v4924_v13 = vpop.f32.mrb[77].mxu1 }
 0x4a3   : > { %v16615_v43 = vpack.c.bf16 %v12794_v47, %v12792_v0  ;;  %v12796_v57 = vadd.f32 %v4924_v13, %v16588_v62  ;;  %v4926_v10 = vpop.f32.mrb[78].mxu1 }
 0x4a4   : > { %5828 = vmax.xlane.f32.xlu0 %v16469_v17  ;;  %v12797_v39 = vadd.f32 %v4926_v10, %v16585_v11  ;;  %v4928_v9 = vpop.f32.mrb[79].mxu1 }
 0x4a5   : > { %v12798_v3 = vadd.f32 %v4928_v9, %v16588_v62  ;;  %v4932_v32 = vpop.f32.mrb[80].mxu1 }
 0x4a6   : > { %v16620_v1 = vpack.c.bf16 %v12797_v39, %v12795_v55  ;;  %v12799_v7 = vadd.f32 %v4932_v32, %v16585_v11  ;;  %v4934_v22 = vpop.f32.mrb[81].mxu1 }
 0x4a7   : > { %v16623_v20 = vpack.c.bf16 %v12798_v3, %v12796_v57  ;;  %v12800_v48 = vadd.f32 %v4934_v22, %v16588_v62  ;;  %v4936_v0 = vpop.f32.mrb[82].mxu1 }
 0x4a8   : > { %v12801_v47 = vadd.f32 %v4936_v0, %v16585_v11  ;;  %v4938_v13 = vpop.f32.mrb[83].mxu1 }
 0x4a9   : > { %v12802_v61 = vadd.f32 %v4938_v13, %v16588_v62  ;;  %v4942_v10 = vpop.f32.mrb[84].mxu1 }
 0x4aa   : > { %v16628_v27 = vpack.c.bf16 %v12801_v47, %v12799_v7  ;;  %v12803_v9 = vadd.f32 %v4942_v10, %v16585_v11  ;;  %v4944_v55 = vpop.f32.mrb[85].mxu1 }
 0x4ab   : > { %6777 = vrot.lane.b32.xlu1 %v15995_v34, %s15242_s8  ;;  %v16631_v39 = vpack.c.bf16 %v12802_v61, %v12800_v48  ;;  %v12804_v32 = vadd.f32 %v4944_v55, %v16588_v62  ;;  %v4946_v57 = vpop.f32.mrb[86].mxu1 }
 0x4ac   : > { %v12805_v3 = vadd.f32 %v4946_v57, %v16585_v11  ;;  %v4948_v22 = vpop.f32.mrb[87].mxu1 }
 0x4ad   : > { %v12806_v38 = vadd.f32 %v4948_v22, %v16588_v62  ;;  %v4952_v0 = vpop.f32.mrb[88].mxu1 }
 0x4ae   : > { %v16636_v6 = vpack.c.bf16 %v12805_v3, %v12803_v9  ;;  %v12807_v13 = vadd.f32 %v4952_v0, %v16585_v11  ;;  %v4954_v7 = vpop.f32.mrb[89].mxu1 }
 0x4af   : > { %6781 = vrot.lane.b32.xlu1 %v16017_v41, %s15242_s8  ;;  %v16639_v47 = vpack.c.bf16 %v12806_v38, %v12804_v32  ;;  %v12808_v10 = vadd.f32 %v4954_v7, %v16588_v62  ;;  %v4956_v61 = vpop.f32.mrb[90].mxu1 }
 0x4b0   : > { %v12809_v48 = vadd.f32 %v4956_v61, %v16585_v11  ;;  %v4958_v55 = vpop.f32.mrb[91].mxu1 }
 0x4b1   : > { %v12810_v36 = vadd.f32 %v4958_v55, %v16588_v62  ;;  %v4962_v57 = vpop.f32.mrb[92].mxu1 }
 0x4b2   : > { %v16644_v51 = vpack.c.bf16 %v12809_v48, %v12807_v13  ;;  %v12811_v22 = vadd.f32 %v4962_v57, %v16585_v11  ;;  %v4964_v9 = vpop.f32.mrb[93].mxu1 }
 0x4b3   : > { %v16647_v3 = vpack.c.bf16 %v12810_v36, %v12808_v10  ;;  %v12812_v0 = vadd.f32 %v4964_v9, %v16588_v62  ;;  %v4966_v38 = vpop.f32.mrb[94].mxu1 }
 0x4b4   : > { %v12813_v32 = vadd.f32 %v4966_v38, %v16585_v11  ;;  %v4968_v7 = vpop.f32.mrb[95].mxu1 }
 0x4b5   : > { %v12814_v56 = vadd.f32 %v4968_v7, %v16588_v62  ;;  %v6246_v7 = vsel %vm5059_vm0, %v16017_v41, 0 }
 0x4b6   : > { %v16652_v61 = vpack.c.bf16 %v12813_v32, %v12811_v22  ;;  %v6243_v32 = vsel %vm5059_vm0, %v16006_v54, 0 }
 0x4b7   : > { %v16654_v5 = vpack.c.bf16 %v12814_v56, %v12812_v0  ;;  %v6240_v0 = vsel %vm5059_vm0, %v15995_v34, 0 }
 0x4ba   : > { %6779 = vrot.lane.b32.xlu0 %v16006_v54, %s15242_s8 }
 0x4de   : > { %v5803_v55 = vpop.xlane.xlu1 %5802 }
 0x4df   : > { %v5832_v57 = vsub.f32 %v16416_v37, %v5803_v55  ;;  %v19776_v55 = vld [vmem:[#allocation41_spill] sm:$0xff] }
 0x4e0   : > { %v5805_v13 = vpop.xlane.xlu0 %5804 }
 0x4e1   : > { %v5833_v48 = vsub.f32 %v16421_v45, %v5805_v13  ;;  %v5850_v38 = vmul.f32 1.442695, %v5832_v57  ;;  %v19777_v57 = vld [vmem:[#allocation42_spill] sm:$0xff] }
 0x4e2   : > { %v5799_v36 = vpop.xlane.xlu1 %5798 }
 0x4e3   : > { %v5852_v10 = vmul.f32 1.442695, %v5833_v48  ;;  %v5830_v9 = vsub.f32 %v16419_v8, %v5799_v36 }
 0x4e4   : > { %v5801_v15 = vpop.xlane.xlu0 %5800 }
 0x4e5   : > { %v5846_v42 = vmul.f32 1.442695, %v5830_v9  ;;  %v5831_v11 = vsub.f32 %v16424_v18, %v5801_v15  ;;  %14405 = vpow2.f32 %v5852_v10 }
 0x4e6   : > { %v5941_v22 = vpop.permute.xlu1 %5940 }
 0x4e7   : > { %v5848_v62 = vmul.f32 1.442695, %v5831_v11  ;;  %14407 = vpow2.f32 %v5846_v42 }
 0x4e8   : > { %v5939_v56 = vpop.permute.xlu0 %5938 }
 0x4e9   : > { %14409 = vpow2.f32 %v5848_v62  ;;  %12187 = vmatprep.subr.bf16.mxu1 %v5939_v56 }
 0x4ea   : > { %14411 = vpow2.f32 %v5850_v38  ;;  %12188 = vmatpush3.bf16.msra.mxu1 %v5939_v56  ;;  %v6255_v56 = vsel %vm5059_vm0, %v19777_v57, 0 }
 0x4eb   : > { %12189 = vmatprep.subr.bf16.mxu1 %v5941_v22 }
 0x4ee   : > { %12190 = vmatpush3.bf16.msra.mxu1 %v5941_v22 }
 0x4ef   : > { %13151 = vmatprep.subr.msk.bf16.mxu1 %vm5059_vm0, %v15995_v34  ;;  %v16662_v37 = vpop.eup %14405  ;;  %v6249_v34 = vsel %vm5059_vm0, %v16028_v28, 0 }
 0x4f0   : > { %19772 = vst [vmem:[#allocation92_spill] sm:$0xff] %v16662_v37 }
 0x4f1   : > { %v16664_v8 = vpop.eup %14407 }
 0x4f2   : > { %19773 = vst [vmem:[#allocation93_spill] sm:$0xff] %v16664_v8 }
 0x4f3   : > { %v16666_v45 = vpop.eup %14409 }
 0x4f4   : > { %19774 = vst [vmem:[#allocation94_spill] sm:$0xff] %v16666_v45  ;;  %v16668_v18 = vpop.eup %14411  ;;  %v5910_v15 = vpack.c.bf16 %v16666_v45, %v16664_v8 }
 0x4f5   : > { %19775 = vst [vmem:[#allocation95_spill] sm:$0xff] %v16668_v18  ;;  %v5911_v42 = vpack.c.bf16 %v16662_v37, %v16668_v18 }
 0x4f6   : > { %12191 = vmatprep.mubr.bf16.mxu1 %v5910_v15 }
 0x4f7   : > { %12192 = vmatmul.mubr.bf16.vlgmr.msra.gmra.mrb[112].mxu1 %v5911_v42  ;;  %v19778_v42 = vld [vmem:[#allocation43_spill] sm:$0xff] }
 0x4f8   : > { %12208 = vmatpush3.bf16.xpose.msra.mxu1 %v6240_v0 }
 0x4f9   : > { %13152 = vmatprep.subr.msk.bf16.mxu1 %vm5059_vm0, %v16006_v54  ;;  %v6252_v54 = vsel %vm5059_vm0, %v19776_v55, 0 }
 0x500   : > { %12210 = vmatpush3.bf16.xpose.msra.mxu1 %v6243_v32 }
 0x501   : > { %13153 = vmatprep.subr.msk.bf16.mxu1 %vm5059_vm0, %v16017_v41 }
 0x508   : > { %12212 = vmatpush3.bf16.xpose.msra.mxu1 %v6246_v7 }
 0x509   : > { %13154 = vmatprep.subr.msk.bf16.mxu1 %vm5059_vm0, %v16028_v28 }
 0x510   : > { %12214 = vmatpush3.bf16.xpose.msra.mxu1 %v6249_v34 }
 0x511   : > { %13155 = vmatprep.subr.msk.bf16.mxu1 %vm5059_vm0, %v19776_v55 }
 0x517   : > { %v5809_v13 = vpop.xlane.xlu1 %5808 }
 0x518   : > { %12216 = vmatpush3.bf16.xpose.msra.mxu1 %v6252_v54  ;;  %v5835_v48 = vsub.f32 %v16436_v59, %v5809_v13 }
 0x519   : > { %13156 = vmatprep.subr.msk.bf16.mxu1 %vm5059_vm0, %v19777_v57  ;;  %v5807_v41 = vpop.xlane.xlu0 %5806 }
 0x51a   : > { %v5856_v36 = vmul.f32 1.442695, %v5835_v48  ;;  %v5834_v10 = vsub.f32 %v16430_v53, %v5807_v41 }
 0x51b   : > { %v5815_v9 = vpop.xlane.xlu1 %5814 }
 0x51c   : > { %v5854_v11 = vmul.f32 1.442695, %v5834_v10  ;;  %14413 = vpow2.f32 %v5856_v36  ;;  %v5838_v59 = vsub.f32 %v16444_v31, %v5815_v9  ;;  %v6258_v31 = vsel %vm5059_vm0, %v19778_v42, 0 }
 0x51d   : > { %v5811_v38 = vpop.xlane.xlu0 %5810 }
 0x51e   : > { %14415 = vpow2.f32 %v5854_v11  ;;  %v5836_v62 = vsub.f32 %v16428_v50, %v5811_v38  ;;  %v5862_v34 = vmul.f32 1.442695, %v5838_v59  ;;  %v19781_v11 = vld [vmem:[#allocation44_spill] sm:$0xff] }
 0x51f   : > { %v5819_v22 = vpop.xlane.xlu1 %5818 }
 0x520   : > { %12218 = vmatpush3.bf16.xpose.msra.mxu1 %v6255_v56  ;;  %v5858_v15 = vmul.f32 1.442695, %v5836_v62  ;;  %v5840_v50 = vsub.f32 %v16442_v29, %v5819_v22 }
 0x521   : > { %13157 = vmatprep.subr.msk.bf16.mxu1 %vm5059_vm0, %v19778_v42  ;;  %v5813_v0 = vpop.xlane.xlu0 %5812 }
 0x522   : > { %v5837_v53 = vsub.f32 %v16432_v40, %v5813_v0  ;;  %14417 = vpow2.f32 %v5858_v15  ;;  %v5866_v40 = vmul.f32 1.442695, %v5840_v50 }
 0x523   : > { %v5823_v32 = vpop.xlane.xlu1 %5822 }
 0x524   : > { %v5860_v7 = vmul.f32 1.442695, %v5837_v53  ;;  %v5842_v9 = vsub.f32 %v16466_v30, %v5823_v32 }
 0x525   : > { %v5817_v54 = vpop.xlane.xlu0 %5816 }
 0x526   : > { %14419 = vpow2.f32 %v5860_v7  ;;  %v5839_v13 = vsub.f32 %v16448_v16, %v5817_v54  ;;  %v16705_v48 = vpop.eup %14413  ;;  %v5870_v22 = vmul.f32 1.442695, %v5842_v9 }
 0x527   : > { %19779 = vst [vmem:[#allocation41_spill] sm:$0xff] %v16705_v48  ;;  %v5827_v41 = vpop.xlane.xlu1 %5826  ;;  %14421 = vpow2.f32 %v5862_v34 }
 0x528   : > { %v16709_v36 = vpop.eup %14415  ;;  %v5864_v10 = vmul.f32 1.442695, %v5839_v13  ;;  %12220 = vmatpush3.bf16.xpose.msra.mxu1 %v6258_v31  ;;  %v5844_v30 = vsub.f32 %v16464_v35, %v5827_v41 }
 0x529   : > { %19780 = vst [vmem:[#allocation42_spill] sm:$0xff] %v16709_v36  ;;  %13158 = vmatprep.subr.msk.bf16.mxu1 %vm5059_vm0, %v19781_v11  ;;  %v5821_v29 = vpop.xlane.xlu0 %5820  ;;  %v5912_v16 = vpack.c.bf16 %v16705_v48, %v16709_v36 }
 0x52a   : > { %14423 = vpow2.f32 %v5864_v10  ;;  %v5841_v38 = vsub.f32 %v16446_v44, %v5821_v29  ;;  %v6261_v44 = vsel %vm5059_vm0, %v19781_v11, 0  ;;  %v5874_v7 = vmul.f32 1.442695, %v5844_v30  ;;  %v19793_v30 = vld [vmem:[#allocation34_spill] sm:$0xff] }
 0x52b   : > { %12195 = vmatprep.mubr.bf16.mxu1 %v5912_v16  ;;  %v16717_v62 = vpop.permute.xlu1 %6777  ;;  %14425 = vpow2.f32 %v5866_v40 }
 0x52c   : > { %v5868_v56 = vmul.f32 1.442695, %v5841_v38  ;;  %13159 = vmatprep.subr.msk.bf16.mxu0 %vm5059_vm0, %v16717_v62  ;;  %v16723_v0 = vpop.eup %14417 }
 0x52d   : > { %v5825_v59 = vpop.xlane.xlu0 %5824  ;;  %19782 = vst [vmem:[#allocation43_spill] sm:$0xff] %v16723_v0 }
 0x52e   : > { %14427 = vpow2.f32 %v5868_v56  ;;  %v5843_v15 = vsub.f32 %v16471_v26, %v5825_v59  ;;  %v19794_v59 = vld [vmem:[#allocation35_spill] sm:$0xff] }
 0x52f   : > { %14429 = vpow2.f32 %v5870_v22  ;;  %v19792_v22 = vld [vmem:[#allocation33_spill] sm:$0xff] }
 0x530   : > { %v16727_v53 = vpop.eup %14419  ;;  %v5872_v32 = vmul.f32 1.442695, %v5843_v15  ;;  %12222 = vmatpush3.bf16.xpose.msra.mxu1 %v6261_v44  ;;  %v19795_v15 = vld [vmem:[#allocation36_spill] sm:$0xff]  ;;  %v19796_v44 = vld [vmem:[#allocation37_spill] sm:$0xff] }
 0x531   : > { %19783 = vst [vmem:[#allocation44_spill] sm:$0xff] %v16727_v53  ;;  %v5829_v34 = vpop.xlane.xlu0 %5828  ;;  %v5913_v50 = vpack.c.bf16 %v16727_v53, %v16723_v0  ;;  %v16732_v54 = vpop.eup %14421 }
 0x532   : > { %14431 = vpow2.f32 %v5872_v32  ;;  %v5845_v35 = vsub.f32 %v16469_v17, %v5829_v34  ;;  %19784 = vst [vmem:[#allocation96_spill] sm:$0xff] %v16732_v54 }
 0x533   : > { %12196 = vmatmul.mubr.bf16.gmra.mrb[116].mxu1 %v5913_v50  ;;  %14433 = vpow2.f32 %v5874_v7 }
 0x534   : > { %v16734_v26 = vpop.eup %14423  ;;  %v5876_v13 = vmul.f32 1.442695, %v5845_v35  ;;  %v19798_v35 = vld [vmem:[#allocation38_spill] sm:$0xff] }
 0x535   : > { %19785 = vst [vmem:[#allocation97_spill] sm:$0xff] %v16734_v26  ;;  %v5914_v31 = vpack.c.bf16 %v16734_v26, %v16732_v54  ;;  %v16738_v41 = vpop.eup %14425 }
 0x536   : > { %14435 = vpow2.f32 %v5876_v13  ;;  %19786 = vst [vmem:[#allocation98_spill] sm:$0xff] %v16738_v41  ;;  %v19799_v13 = vld [vmem:[#allocation39_spill] sm:$0xff] }
 0x537   : > { %12199 = vmatprep.mubr.bf16.mxu1 %v5914_v31 }
 0x538   : > { %v16740_v10 = vpop.eup %14427 }
 0x539   : > { %19787 = vst [vmem:[#allocation99_spill] sm:$0xff] %v16740_v10  ;;  %v5915_v40 = vpack.c.bf16 %v16740_v10, %v16738_v41  ;;  %v16744_v17 = vpop.eup %14429 }
 0x53a   : > { %19788 = vst [vmem:[#allocation100_spill] sm:$0xff] %v16744_v17 }
 0x53b   : > { %12200 = vmatmul.mubr.bf16.gmra.mrb[120].mxu1 %v5915_v40 }
 0x53c   : > { %v16746_v9 = vpop.eup %14431 }
 0x53d   : > { %19789 = vst [vmem:[#allocation101_spill] sm:$0xff] %v16746_v9  ;;  %v5916_v29 = vpack.c.bf16 %v16746_v9, %v16744_v17  ;;  %v16750_v16 = vpop.eup %14433 }
 0x53e   : > { %19790 = vst [vmem:[#allocation102_spill] sm:$0xff] %v16750_v16 }
 0x53f   : > { %12203 = vmatprep.mubr.bf16.mxu1 %v5916_v29  ;;  %v19802_v29 = vld [vmem:[#allocation40_spill] sm:$0xff] }
 0x540   : > { %v16752_v38 = vpop.eup %14435 }
 0x541   : > { %19791 = vst [vmem:[#allocation103_spill] sm:$0xff] %v16752_v38  ;;  %v5917_v56 = vpack.c.bf16 %v16752_v38, %v16750_v16 }
 0x543   : > { %12204 = vmatmul.mubr.bf16.gmra.mrb[124].mxu1 %v5917_v56 }
 0x544   : > { %12223 = vmatprep.mubr.msk.bf16.mxu1 %vm5059_vm0, %v19792_v22 }
 0x54b   : > { %12224 = vmatmul.mubr.msk.bf16.vlgmr.msra.gmra.mrb[128].mxu1 %vm5059_vm0, %v19793_v30 }
 0x54c   : > { %12227 = vmatprep.mubr.msk.bf16.mxu1 %vm5059_vm0, %v19794_v59 }
 0x553   : > { %12228 = vmatmul.mubr.msk.bf16.gmra.mrb[132].mxu1 %vm5059_vm0, %v19795_v15 }
 0x554   : > { %12231 = vmatprep.mubr.msk.bf16.mxu1 %vm5059_vm0, %v19796_v44 }
 0x558   : > { %v16766_v32 = vpop.f32.mrb[96].mxu1 }
 0x559   : > { %v16768_v7 = vpop.f32.mrb[97].mxu1 }
 0x55a   : > { %v16770_v34 = vpop.f32.mrb[98].mxu1 }
 0x55b   : > { %19797 = vst [vmem:[#allocation33_spill] sm:$0xff] %v16770_v34  ;;  %v16772_v50 = vpop.f32.mrb[99].mxu1  ;;  %12232 = vmatmul.mubr.msk.bf16.gmra.mrb[136].mxu1 %vm5059_vm0, %v19798_v35 }
 0x55c   : > { %12235 = vmatprep.mubr.msk.bf16.mxu1 %vm5059_vm0, %v19799_v13 }
 0x562   : > { %v16778_v31 = vpop.f32.mrb[100].mxu1 }
 0x563   : > { %19800 = vst [vmem:[#allocation34_spill] sm:$0xff] %v16778_v31  ;;  %v16780_v40 = vpop.f32.mrb[101].mxu1  ;;  %12236 = vmatmul.mubr.msk.bf16.gmra.mrb[140].mxu1 %vm5059_vm0, %v19802_v29 }
 0x564   : > { %19801 = vst [vmem:[#allocation35_spill] sm:$0xff] %v16780_v40  ;;  %v16784_v56 = vpop.f32.mrb[102].mxu1 }
 0x565   : > { %19803 = vst [vmem:[#allocation36_spill] sm:$0xff] %v16784_v56  ;;  %v16786_v38 = vpop.f32.mrb[103].mxu1 }
 0x566   : > { %19804 = vst [vmem:[#allocation37_spill] sm:$0xff] %v16786_v38 }
 0x56a   : > { %v16788_v9 = vpop.f32.mrb[104].mxu1 }
 0x56b   : > { %19805 = vst [vmem:[#allocation38_spill] sm:$0xff] %v16788_v9  ;;  %v16790_v10 = vpop.f32.mrb[105].mxu1 }
 0x56c   : > { %19806 = vst [vmem:[#allocation39_spill] sm:$0xff] %v16790_v10  ;;  %v16792_v16 = vpop.f32.mrb[106].mxu1 }
 0x56d   : > { %19807 = vst [vmem:[#allocation40_spill] sm:$0xff] %v16792_v16  ;;  %v16794_v26 = vpop.f32.mrb[107].mxu1 }
 0x56e   : > { %19808 = vst [vmem:[#allocation104_spill] sm:$0xff] %v16794_v26  ;;  %v19829_v26 = vld [vmem:[#allocation45_spill] sm:$0xff] }
 0x572   : > { %v16796_v17 = vpop.f32.mrb[108].mxu1 }
 0x573   : > { %19809 = vst [vmem:[#allocation105_spill] sm:$0xff] %v16796_v17  ;;  %v16798_v53 = vpop.f32.mrb[109].mxu1 }
 0x574   : > { %19810 = vst [vmem:[#allocation106_spill] sm:$0xff] %v16798_v53  ;;  %v16800_v41 = vpop.f32.mrb[110].mxu1 }
 0x575   : > { %19811 = vst [vmem:[#allocation107_spill] sm:$0xff] %v16800_v41  ;;  %v16802_v48 = vpop.f32.mrb[111].mxu1 }
 0x576   : > { %19812 = vst [vmem:[#allocation108_spill] sm:$0xff] %v16802_v48 }
 0x5ca   : > { %v16804_v54 = vpop.f32.mrb[112].mxu1 }
 0x5cb   : > { %19813 = vst [vmem:[#allocation109_spill] sm:$0xff] %v16804_v54  ;;  %v16806_v37 = vpop.f32.mrb[113].mxu1 }
 0x5cc   : > { %19814 = vst [vmem:[#allocation110_spill] sm:$0xff] %v16806_v37  ;;  %v16808_v0 = vpop.f32.mrb[114].mxu1 }
 0x5cd   : > { %19815 = vst [vmem:[#allocation111_spill] sm:$0xff] %v16808_v0  ;;  %v16810_v45 = vpop.f32.mrb[115].mxu1 }
 0x5ce   : > { %19816 = vst [vmem:[#allocation112_spill] sm:$0xff] %v16810_v45 }
 0x606   : > { %v16812_v36 = vpop.f32.mrb[116].mxu1 }
 0x607   : > { %19817 = vst [vmem:[#allocation113_spill] sm:$0xff] %v16812_v36  ;;  %v16814_v18 = vpop.f32.mrb[117].mxu1 }
 0x608   : > { %19818 = vst [vmem:[#allocation114_spill] sm:$0xff] %v16814_v18  ;;  %v16816_v8 = vpop.f32.mrb[118].mxu1 }
 0x609   : > { %19819 = vst [vmem:[#allocation115_spill] sm:$0xff] %v16816_v8  ;;  %v16818_v17 = vpop.f32.mrb[119].mxu1 }
 0x60a   : > { %19820 = vst [vmem:[#allocation116_spill] sm:$0xff] %v16818_v17 }
 0x60e   : > { %v16820_v53 = vpop.f32.mrb[120].mxu1 }
 0x60f   : > { %19821 = vst [vmem:[#allocation117_spill] sm:$0xff] %v16820_v53  ;;  %v16822_v41 = vpop.f32.mrb[121].mxu1 }
 0x610   : > { %19822 = vst [vmem:[#allocation118_spill] sm:$0xff] %v16822_v41  ;;  %v16824_v9 = vpop.f32.mrb[122].mxu1 }
 0x611   : > { %19823 = vst [vmem:[#allocation119_spill] sm:$0xff] %v16824_v9  ;;  %v16826_v54 = vpop.f32.mrb[123].mxu1 }
 0x612   : > { %19824 = vst [vmem:[#allocation120_spill] sm:$0xff] %v16826_v54 }
 0x616   : > { %v16828_v37 = vpop.f32.mrb[124].mxu1 }
 0x617   : > { %19825 = vst [vmem:[#allocation121_spill] sm:$0xff] %v16828_v37  ;;  %v16830_v0 = vpop.f32.mrb[125].mxu1 }
 0x618   : > { %19826 = vst [vmem:[#allocation122_spill] sm:$0xff] %v16830_v0  ;;  %v16832_v45 = vpop.f32.mrb[126].mxu1 }
 0x619   : > { %19827 = vst [vmem:[#allocation123_spill] sm:$0xff] %v16832_v45  ;;  %v16834_v36 = vpop.f32.mrb[127].mxu1 }
 0x61a   : > { %19828 = vst [vmem:[#allocation124_spill] sm:$0xff] %v16834_v36 }
 0x61e   : > { %v12225_v18 = vpop.f32.mrb[128].mxu1 }
 0x61f   : > { %6364 = vmax.xlane.f32.xlu1 %v12225_v18  ;;  %v6297_v8 = vpop.f32.mrb[129].mxu1 }
 0x620   : > { %v12226_v17 = vpop.f32.mrb[130].mxu1 }
 0x621   : > { %6366 = vmax.xlane.f32.xlu0 %v12226_v17  ;;  %v6300_v53 = vpop.f32.mrb[131].mxu1 }
 0x623   : > { %6360 = vmax.xlane.f32.xlu1 %v6297_v8 }
 0x625   : > { %6362 = vmax.xlane.f32.xlu0 %v6300_v53 }
 0x626   : > { %v16836_v41 = vpop.f32.mrb[132].mxu1 }
 0x627   : > { %6372 = vmax.xlane.f32.xlu1 %v16836_v41  ;;  %v16839_v9 = vpop.f32.mrb[133].mxu1 }
 0x628   : > { %v16841_v37 = vpop.f32.mrb[134].mxu1 }
 0x629   : > { %6368 = vmax.xlane.f32.xlu0 %v16839_v9  ;;  %v16844_v45 = vpop.f32.mrb[135].mxu1 }
 0x62d   : > { %6374 = vmax.xlane.f32.xlu0 %v16841_v37 }
 0x62e   : > { %v16847_v36 = vpop.f32.mrb[136].mxu1 }
 0x62f   : > { %v16849_v54 = vpop.f32.mrb[137].mxu1 }
 0x630   : > { %6376 = vmax.xlane.f32.xlu1 %v16849_v54  ;;  %v16852_v0 = vpop.f32.mrb[138].mxu1 }
 0x631   : > { %6370 = vmax.xlane.f32.xlu0 %v16844_v45  ;;  %v16855_v10 = vpop.f32.mrb[139].mxu1 }
 0x634   : > { %6378 = vmax.xlane.f32.xlu1 %v16855_v10 }
 0x635   : > { %6380 = vmax.xlane.f32.xlu0 %v16847_v36 }
 0x636   : > { %v16859_v48 = vpop.f32.mrb[140].mxu1 }
 0x637   : > { %v16861_v31 = vpop.f32.mrb[141].mxu1 }
 0x638   : > { %v16863_v16 = vpop.f32.mrb[142].mxu1 }
 0x639   : > { %6382 = vmax.xlane.f32.xlu0 %v16852_v0  ;;  %v16866_v38 = vpop.f32.mrb[143].mxu1 }
 0x63d   : > { %6388 = vmax.xlane.f32.xlu0 %v16859_v48 }
 0x641   : > { %6384 = vmax.xlane.f32.xlu0 %v16861_v31 }
 0x645   : > { %6783 = vrot.lane.b32.xlu1 %v16028_v28, %s15242_s8  ;;  %v19830_v28 = vld [vmem:[#allocation48_spill] sm:$0xff] }
 0x657   : > { %6785 = vrot.lane.b32.xlu0 %v19776_v55, %s15242_s8  ;;  %v19831_v55 = vld [vmem:[#allocation49_spill] sm:$0xff] }
 0x65b   : > { %6787 = vrot.lane.b32.xlu0 %v19777_v57, %s15242_s8  ;;  %v16900_v57 = vpop.permute.xlu1 %6781 }
 0x669   : > { %6390 = vmax.xlane.f32.xlu1 %v16863_v16 }
 0x67a   : > { %6755 = vrot.lane.b32.xlu1 %v19793_v30, %s15242_s8  ;;  %6386 = vmax.xlane.f32.xlu0 %v16866_v38 }
 0x67e   : > { %6765 = vrot.lane.b32.xlu1 %v19799_v13, %s15242_s8 }
 0x682   : > { %7066 = vrot.lane.b32.xlu1 %v19829_v26, %s15242_s8 }
 0x686   : > { %7072 = vrot.lane.b32.xlu1 %v19830_v28, %s15242_s8 }
 0x68a   : > { %7074 = vrot.lane.b32.xlu1 %v19831_v55, %s15242_s8 }
 0x690   : > { %6789 = vrot.lane.b32.xlu0 %v19778_v42, %s15242_s8  ;;  %v16904_v42 = vpop.permute.xlu0 %6779 }
 0x694   : > { %6791 = vrot.lane.b32.xlu0 %v19781_v11, %s15242_s8 }
 0x698   : > { %6753 = vrot.lane.b32.xlu0 %v19792_v22, %s15242_s8 }
 0x69c   : > { %6757 = vrot.lane.b32.xlu0 %v19794_v59, %s15242_s8 }
 0x6a0   : > { %6759 = vrot.lane.b32.xlu0 %v19795_v15, %s15242_s8  ;;  %v19832_v15 = vld [vmem:[#allocation46_spill] sm:$0xff] }
 0x6a4   : > { %6761 = vrot.lane.b32.xlu0 %v19796_v44, %s15242_s8 }
 0x6a8   : > { %6763 = vrot.lane.b32.xlu0 %v19798_v35, %s15242_s8  ;;  %v19833_v35 = vld [vmem:[#allocation47_spill] sm:$0xff] }
 0x6ac   : > { %v6365_v11 = vpop.xlane.xlu1 %6364  ;;  %6767 = vrot.lane.b32.xlu0 %v19802_v29, %s15242_s8 }
 0x6ad   : > { %v6394_v30 = vsub.f32 %v12225_v18, %v6365_v11  ;;  %v19834_v18 = vld [vmem:[#allocation50_spill] sm:$0xff] }
 0x6ae   : > { %v6367_v26 = vpop.xlane.xlu0 %6366 }
 0x6af   : > { %v6395_v22 = vsub.f32 %v12226_v17, %v6367_v26  ;;  %v6412_v56 = vmul.f32 1.442695, %v6394_v30 }
 0x6b0   : > { %v6361_v59 = vpop.xlane.xlu1 %6360  ;;  %7068 = vrot.lane.b32.xlu0 %v19832_v15, %s15242_s8 }
 0x6b1   : > { %v6414_v13 = vmul.f32 1.442695, %v6395_v22  ;;  %v6392_v44 = vsub.f32 %v6297_v8, %v6361_v59 }
 0x6b2   : > { %v6363_v28 = vpop.xlane.xlu0 %6362 }
 0x6b3   : > { %v6408_v55 = vmul.f32 1.442695, %v6392_v44  ;;  %v6393_v40 = vsub.f32 %v6300_v53, %v6363_v28  ;;  %14437 = vpow2.f32 %v6414_v13 }
 0x6b4   : > { %7070 = vrot.lane.b32.xlu0 %v19833_v35, %s15242_s8  ;;  %v6373_v17 = vpop.xlane.xlu1 %6372 }
 0x6b5   : > { %v6410_v34 = vmul.f32 1.442695, %v6393_v40  ;;  %14439 = vpow2.f32 %v6408_v55  ;;  %v6398_v53 = vsub.f32 %v16836_v41, %v6373_v17 }
 0x6b6   : > { %v6369_v29 = vpop.xlane.xlu0 %6368 }
 0x6b7   : > { %14441 = vpow2.f32 %v6410_v34  ;;  %v6396_v11 = vsub.f32 %v16839_v9, %v6369_v29  ;;  %v6420_v44 = vmul.f32 1.442695, %v6398_v53 }
 0x6b8   : > { %14443 = vpow2.f32 %v6412_v56  ;;  %7076 = vrot.lane.b32.xlu0 %v19834_v18, %s15242_s8 }
 0x6b9   : > { %v6416_v22 = vmul.f32 1.442695, %v6396_v11  ;;  %v6818_v11 = vsel %vm5059_vm0, %v16717_v62, 0  ;;  %v6821_v62 = vsel %vm5059_vm0, %v16904_v42, 0 }
 0x6ba   : > { %v6375_v8 = vpop.xlane.xlu0 %6374 }
 0x6bb   : > { %v6399_v26 = vsub.f32 %v16841_v37, %v6375_v8  ;;  %14445 = vpow2.f32 %v6416_v22 }
 0x6bd   : > { %v6377_v30 = vpop.xlane.xlu1 %6376  ;;  %v6422_v59 = vmul.f32 1.442695, %v6399_v26  ;;  %v16918_v13 = vpop.eup %14437 }
 0x6be   : > { %v6400_v40 = vsub.f32 %v16849_v54, %v6377_v30  ;;  %v6371_v15 = vpop.xlane.xlu0 %6370  ;;  %19835 = vst [vmem:[#allocation45_spill] sm:$0xff] %v16918_v13 }
 0x6bf   : > { %v6397_v34 = vsub.f32 %v16844_v45, %v6371_v15  ;;  %v16921_v56 = vpop.eup %14439  ;;  %14447 = vpow2.f32 %v6422_v59 }
 0x6c0   : > { %v6424_v9 = vmul.f32 1.442695, %v6400_v40 }
 0x6c1   : > { %v16923_v28 = vpop.eup %14441  ;;  %v6418_v37 = vmul.f32 1.442695, %v6397_v34  ;;  %v6379_v55 = vpop.xlane.xlu1 %6378 }
 0x6c2   : > { %19836 = vst [vmem:[#allocation48_spill] sm:$0xff] %v16923_v28  ;;  %v16925_v41 = vpop.eup %14443  ;;  %v6401_v35 = vsub.f32 %v16855_v10, %v6379_v55  ;;  %v6381_v54 = vpop.xlane.xlu0 %6380  ;;  %v6472_v29 = vpack.c.bf16 %v16923_v28, %v16921_v56  ;;  %v6824_v55 = vsel %vm5059_vm0, %v16900_v57, 0 }
 0x6c3   : > { %19837 = vst [vmem:[#allocation49_spill] sm:$0xff] %v16925_v41  ;;  %14449 = vpow2.f32 %v6418_v37  ;;  %v6402_v45 = vsub.f32 %v16847_v36, %v6381_v54  ;;  %v6473_v18 = vpack.c.bf16 %v16918_v13, %v16925_v41 }
 0x6c4   : > { %14451 = vpow2.f32 %v6420_v44  ;;  %v6426_v17 = vmul.f32 1.442695, %v6401_v35  ;;  %12255 = vmatprep.mubr.bf16.mxu0 %v6472_v29 }
 0x6c5   : > { %14453 = vpow2.f32 %v6424_v9  ;;  %12256 = vmatmul.mubr.bf16.vlgmr.msra.gmra.mrb[128].mxu0 %v6473_v18  ;;  %v6428_v10 = vmul.f32 1.442695, %v6402_v45  ;;  %v16938_v53 = vpop.eup %14445  ;;  %v6784_v35 = vpop.permute.xlu1 %6783 }
 0x6c6   : > { %14455 = vpow2.f32 %v6426_v17  ;;  %12272 = vmatpush3.bf16.xpose.msra.mxu0 %v6818_v11  ;;  %v6383_v8 = vpop.xlane.xlu0 %6382  ;;  %19838 = vst [vmem:[#allocation46_spill] sm:$0xff] %v16938_v53  ;;  %v6827_v45 = vsel %vm5059_vm0, %v6784_v35, 0 }
 0x6c7   : > { %13160 = vmatprep.subr.msk.bf16.mxu0 %vm5059_vm0, %v16904_v42  ;;  %v6403_v36 = vsub.f32 %v16852_v0, %v6383_v8  ;;  %14457 = vpow2.f32 %v6428_v10 }
 0x6c9   : > { %v6430_v26 = vmul.f32 1.442695, %v6403_v36  ;;  %v16940_v22 = vpop.eup %14447 }
 0x6ca   : > { %19839 = vst [vmem:[#allocation47_spill] sm:$0xff] %v16940_v22  ;;  %v6389_v44 = vpop.xlane.xlu0 %6388 }
 0x6cb   : > { %14459 = vpow2.f32 %v6430_v26 }
 0x6cd   : > { %v16942_v30 = vpop.eup %14449 }
 0x6ce   : > { %19840 = vst [vmem:[#allocation50_spill] sm:$0xff] %v16942_v30  ;;  %v16946_v59 = vpop.eup %14451  ;;  %12274 = vmatpush3.bf16.xpose.msra.mxu0 %v6821_v62  ;;  %v6474_v40 = vpack.c.bf16 %v16942_v30, %v16938_v53  ;;  %v6385_v29 = vpop.xlane.xlu0 %6384 }
 0x6cf   : > { %19841 = vst [vmem:[#allocation125_spill] sm:$0xff] %v16946_v59  ;;  %v16950_v15 = vpop.eup %14453  ;;  %13161 = vmatprep.subr.msk.bf16.mxu0 %vm5059_vm0, %v16900_v57  ;;  %v6475_v0 = vpack.c.bf16 %v16940_v22, %v16946_v59  ;;  %v6404_v26 = vsub.f32 %v16861_v31, %v6385_v29 }
 0x6d0   : > { %19842 = vst [vmem:[#allocation126_spill] sm:$0xff] %v16950_v15  ;;  %v16956_v34 = vpop.eup %14455  ;;  %12259 = vmatprep.mubr.bf16.mxu0 %v6474_v40 }
 0x6d1   : > { %19843 = vst [vmem:[#allocation127_spill] sm:$0xff] %v16956_v34  ;;  %12260 = vmatmul.mubr.bf16.gmra.mrb[132].mxu0 %v6475_v0  ;;  %v6476_v42 = vpack.c.bf16 %v16956_v34, %v16950_v15  ;;  %v16960_v9 = vpop.eup %14457  ;;  %v6406_v0 = vsub.f32 %v16859_v48, %v6389_v44 }
 0x6d2   : > { %19844 = vst [vmem:[#allocation128_spill] sm:$0xff] %v16960_v9  ;;  %v6786_v18 = vpop.permute.xlu0 %6785 }
 0x6d3   : > { %12263 = vmatprep.mubr.bf16.mxu0 %v6476_v42  ;;  %v6830_v17 = vsel %vm5059_vm0, %v6786_v18, 0  ;;  %v6432_v42 = vmul.f32 1.442695, %v6404_v26 }
 0x6d5   : > { %v16962_v37 = vpop.eup %14459  ;;  %14461 = vpow2.f32 %v6432_v42 }
 0x6d6   : > { %19845 = vst [vmem:[#allocation129_spill] sm:$0xff] %v16962_v37  ;;  %12276 = vmatpush3.bf16.xpose.msra.mxu0 %v6824_v55  ;;  %v6477_v54 = vpack.c.bf16 %v16962_v37, %v16960_v9  ;;  %v6788_v11 = vpop.permute.xlu0 %6787 }
 0x6d7   : > { %13162 = vmatprep.subr.msk.bf16.mxu0 %vm5059_vm0, %v6784_v35  ;;  %v6833_v57 = vsel %vm5059_vm0, %v6788_v11, 0 }
 0x6d9   : > { %12264 = vmatmul.mubr.bf16.gmra.mrb[136].mxu0 %v6477_v54 }
 0x6de   : > { %12278 = vmatpush3.bf16.xpose.msra.mxu0 %v6827_v45  ;;  %v6436_v45 = vmul.f32 1.442695, %v6406_v0 }
 0x6df   : > { %13163 = vmatprep.subr.msk.bf16.mxu0 %vm5059_vm0, %v6786_v18  ;;  %v16983_v44 = vpop.eup %14461 }
 0x6e0   : > { %19846 = vst [vmem:[#allocation130_spill] sm:$0xff] %v16983_v44 }
 0x6e6   : > { %12280 = vmatpush3.bf16.xpose.msra.mxu0 %v6830_v17 }
 0x6e7   : > { %13164 = vmatprep.subr.msk.bf16.mxu0 %vm5059_vm0, %v6788_v11 }
 0x6ee   : > { %12282 = vmatpush3.bf16.xpose.msra.mxu0 %v6833_v57 }
 0x6f6   : > { %v6391_v10 = vpop.xlane.xlu1 %6390 }
 0x6f7   : > { %v6407_v40 = vsub.f32 %v16863_v16, %v6391_v10 }
 0x6f9   : > { %v6438_v55 = vmul.f32 1.442695, %v6407_v40 }
 0x6fa   : > { %v6756_v8 = vpop.permute.xlu1 %6755 }
 0x6fb   : > { %14463 = vpow2.f32 %v6438_v55 }
 0x6fe   : > { %v16974_v36 = vpop.permute.xlu1 %6765 }
 0x702   : > { %v7067_v62 = vpop.permute.xlu1 %7066 }
 0x703   : > { %12303 = vmatprep.subr.bf16.mxu1 %v7067_v62 }
 0x704   : > { %12304 = vmatpush3.bf16.msra.mxu1 %v7067_v62 }
 0x705   : > { %v16986_v29 = vpop.eup %14463 }
 0x706   : > { %19847 = vst [vmem:[#allocation131_spill] sm:$0xff] %v16986_v29 }
 0x707   : > { %v6387_v35 = vpop.xlane.xlu0 %6386 }
 0x708   : > { %v6405_v54 = vsub.f32 %v16866_v38, %v6387_v35 }
 0x70a   : > { %v6434_v18 = vmul.f32 1.442695, %v6405_v54 }
 0x70b   : > { %v6790_v17 = vpop.permute.xlu0 %6789 }
 0x70c   : > { %14465 = vpow2.f32 %v6434_v18  ;;  %13165 = vmatprep.subr.msk.bf16.mxu0 %vm5059_vm0, %v6790_v17  ;;  %v6836_v31 = vsel %vm5059_vm0, %v6790_v17, 0 }
 0x70d   : > { %14467 = vpow2.f32 %v6436_v45  ;;  %12284 = vmatpush3.bf16.xpose.msra.mxu0 %v6836_v31 }
 0x70f   : > { %v6792_v16 = vpop.permute.xlu0 %6791 }
 0x710   : > { %13166 = vmatprep.subr.msk.bf16.mxu0 %vm5059_vm0, %v6792_v16  ;;  %v6839_v38 = vsel %vm5059_vm0, %v6792_v16, 0 }
 0x713   : > { %v6754_v48 = vpop.permute.xlu0 %6753 }
 0x715   : > { %12286 = vmatpush3.bf16.xpose.msra.mxu0 %v6839_v38 }
 0x716   : > { %v16988_v11 = vpop.eup %14465  ;;  %12367 = vmatprep.subr.bf16.mxu0 %v16596_v49 }
 0x717   : > { %19848 = vst [vmem:[#allocation132_spill] sm:$0xff] %v16988_v11  ;;  %v16991_v57 = vpop.eup %14467  ;;  %v6758_v10 = vpop.permute.xlu0 %6757  ;;  %v6478_v26 = vpack.c.bf16 %v16988_v11, %v16983_v44 }
 0x718   : > { %19849 = vst [vmem:[#allocation133_spill] sm:$0xff] %v16991_v57  ;;  %v6479_v62 = vpack.c.bf16 %v16986_v29, %v16991_v57  ;;  %v19870_v29 = vld [vmem:[#allocation75_spill] sm:$0xff] }
 0x719   : > { %12267 = vmatprep.mubr.bf16.mxu0 %v6478_v26 }
 0x71a   : > { %12268 = vmatmul.mubr.bf16.gmra.mrb[140].mxu0 %v6479_v62 }
 0x71b   : > { %12287 = vmatprep.mubr.msk.bf16.mxu0 %vm5059_vm0, %v6754_v48  ;;  %v6760_v40 = vpop.permute.xlu0 %6759 }
 0x71f   : > { %v6762_v0 = vpop.permute.xlu0 %6761 }
 0x722   : > { %12288 = vmatmul.mubr.msk.bf16.vlgmr.msra.gmra.mrb[144].mxu0 %vm5059_vm0, %v6756_v8  ;;  %v7073_v8 = vpop.permute.xlu1 %7072 }
 0x723   : > { %12368 = vmatpush3.bf16.msra.mxu0 %v16596_v49  ;;  %12291 = vmatprep.mubr.msk.bf16.mxu0 %vm5059_vm0, %v6758_v10  ;;  %v6764_v42 = vpop.permute.xlu0 %6763 }
 0x724   : > { %12369 = vmatprep.subr.bf16.mxu0 %v16604_v33 }
 0x726   : > { %v7075_v45 = vpop.permute.xlu1 %7074 }
 0x727   : > { %12370 = vmatpush3.bf16.msra.mxu0 %v16604_v33  ;;  %v6768_v55 = vpop.permute.xlu0 %6767 }
 0x728   : > { %12371 = vmatprep.subr.bf16.mxu0 %v16612_v2 }
 0x72a   : > { %12292 = vmatmul.mubr.msk.bf16.gmra.mrb[148].mxu0 %vm5059_vm0, %v6760_v40 }
 0x72b   : > { %12372 = vmatpush3.bf16.msra.mxu0 %v16612_v2  ;;  %12295 = vmatprep.mubr.msk.bf16.mxu0 %vm5059_vm0, %v6762_v0  ;;  %v7069_v35 = vpop.permute.xlu0 %7068 }
 0x72c   : > { %12373 = vmatprep.subr.bf16.mxu0 %v16620_v1  ;;  %12305 = vmatprep.subr.bf16.mxu1 %v7069_v35 }
 0x72d   : > { %12306 = vmatpush3.bf16.msra.mxu1 %v7069_v35 }
 0x72f   : > { %12374 = vmatpush3.bf16.msra.mxu0 %v16620_v1  ;;  %v7071_v54 = vpop.permute.xlu0 %7070 }
 0x730   : > { %12375 = vmatprep.subr.bf16.mxu0 %v16628_v27  ;;  %12307 = vmatprep.subr.bf16.mxu1 %v7071_v54 }
 0x731   : > { %12308 = vmatpush3.bf16.msra.mxu1 %v7071_v54 }
 0x732   : > { %12296 = vmatmul.mubr.msk.bf16.gmra.mrb[152].mxu0 %vm5059_vm0, %v6764_v42  ;;  %12309 = vmatprep.subr.bf16.mxu1 %v7073_v8 }
 0x733   : > { %12376 = vmatpush3.bf16.msra.mxu0 %v16628_v27  ;;  %12299 = vmatprep.mubr.msk.bf16.mxu0 %vm5059_vm0, %v16974_v36  ;;  %v7077_v18 = vpop.permute.xlu0 %7076 }
 0x734   : > { %12377 = vmatprep.subr.bf16.mxu0 %v16636_v6 }
 0x735   : > { %12310 = vmatpush3.bf16.msra.mxu1 %v7073_v8 }
 0x736   : > { %12311 = vmatprep.subr.bf16.mxu1 %v7075_v45 }
 0x737   : > { %12378 = vmatpush3.bf16.msra.mxu0 %v16636_v6 }
 0x738   : > { %12379 = vmatprep.subr.bf16.mxu0 %v16644_v51 }
 0x739   : > { %12312 = vmatpush3.bf16.msra.mxu1 %v7075_v45 }
 0x73a   : > { %12300 = vmatmul.mubr.msk.bf16.gmra.mrb[156].mxu0 %vm5059_vm0, %v6768_v55  ;;  %12313 = vmatprep.subr.bf16.mxu1 %v7077_v18 }
 0x73b   : > { %12380 = vmatpush3.bf16.msra.mxu0 %v16644_v51 }
 0x73c   : > { %12381 = vmatprep.subr.bf16.mxu0 %v16652_v61 }
 0x73d   : > { %12314 = vmatpush3.bf16.msra.mxu1 %v7077_v18 }
 0x73f   : > { %12382 = vmatpush3.bf16.msra.mxu0 %v16652_v61 }
 0x798   : > { %v17021_v36 = vpop.f32.mrb[128].mxu0 }
 0x799   : > { %19850 = vst [vmem:[#allocation134_spill] sm:$0xff] %v17021_v36  ;;  %v17023_v17 = vpop.f32.mrb[129].mxu0  ;;  %v19867_v36 = vld [vmem:[#allocation54_spill] sm:$0xff] }
 0x79a   : > { %19851 = vst [vmem:[#allocation135_spill] sm:$0xff] %v17023_v17  ;;  %v17025_v31 = vpop.f32.mrb[130].mxu0 }
 0x79b   : > { %19852 = vst [vmem:[#allocation136_spill] sm:$0xff] %v17025_v31  ;;  %v17027_v16 = vpop.f32.mrb[131].mxu0  ;;  %v19866_v31 = vld [vmem:[#allocation51_spill] sm:$0xff] }
 0x79c   : > { %19853 = vst [vmem:[#allocation137_spill] sm:$0xff] %v17027_v16 }
 0x7a4   : > { %v17029_v48 = vpop.f32.mrb[132].mxu0 }
 0x7a5   : > { %19854 = vst [vmem:[#allocation138_spill] sm:$0xff] %v17029_v48  ;;  %v17031_v38 = vpop.f32.mrb[133].mxu0 }
 0x7a6   : > { %19855 = vst [vmem:[#allocation139_spill] sm:$0xff] %v17031_v38  ;;  %v17033_v10 = vpop.f32.mrb[134].mxu0 }
 0x7a7   : > { %19856 = vst [vmem:[#allocation140_spill] sm:$0xff] %v17033_v10  ;;  %v17035_v26 = vpop.f32.mrb[135].mxu0 }
 0x7a8   : > { %19857 = vst [vmem:[#allocation141_spill] sm:$0xff] %v17035_v26 }
 0x7ac   : > { %v17037_v62 = vpop.f32.mrb[136].mxu0 }
 0x7ad   : > { %19858 = vst [vmem:[#allocation142_spill] sm:$0xff] %v17037_v62  ;;  %v17039_v40 = vpop.f32.mrb[137].mxu0 }
 0x7ae   : > { %19859 = vst [vmem:[#allocation143_spill] sm:$0xff] %v17039_v40  ;;  %v17041_v0 = vpop.f32.mrb[138].mxu0 }
 0x7af   : > { %19860 = vst [vmem:[#allocation144_spill] sm:$0xff] %v17041_v0  ;;  %v17043_v42 = vpop.f32.mrb[139].mxu0 }
 0x7b0   : > { %19861 = vst [vmem:[#allocation145_spill] sm:$0xff] %v17043_v42 }
 0x7ed   : > { %v17045_v55 = vpop.f32.mrb[140].mxu0 }
 0x7ee   : > { %19862 = vst [vmem:[#allocation146_spill] sm:$0xff] %v17045_v55  ;;  %v17047_v35 = vpop.f32.mrb[141].mxu0 }
 0x7ef   : > { %19863 = vst [vmem:[#allocation147_spill] sm:$0xff] %v17047_v35  ;;  %v17049_v8 = vpop.f32.mrb[142].mxu0 }
 0x7f0   : > { %19864 = vst [vmem:[#allocation148_spill] sm:$0xff] %v17049_v8  ;;  %v17051_v54 = vpop.f32.mrb[143].mxu0 }
 0x7f1   : > { %19865 = vst [vmem:[#allocation149_spill] sm:$0xff] %v17051_v54 }
 0x7f5   : > { %v12289_v45 = vpop.f32.mrb[144].mxu0 }
 0x7f6   : > { %6942 = vmax.xlane.f32.xlu0 %v12289_v45  ;;  %v6875_v18 = vpop.f32.mrb[145].mxu0 }
 0x7f7   : > { %6938 = vmax.xlane.f32.xlu1 %v6875_v18  ;;  %v12290_v10 = vpop.f32.mrb[146].mxu0 }
 0x7f8   : > { %v6878_v62 = vpop.f32.mrb[147].mxu0 }
 0x7fa   : > { %6940 = vmax.xlane.f32.xlu0 %v6878_v62 }
 0x7fb   : > { %6944 = vmax.xlane.f32.xlu1 %v12290_v10 }
 0x7fd   : > { %v17053_v26 = vpop.f32.mrb[148].mxu0 }
 0x7fe   : > { %v17055_v0 = vpop.f32.mrb[149].mxu0 }
 0x7ff   : > { %v17057_v42 = vpop.f32.mrb[150].mxu0 }
 0x800   : > { %v17059_v55 = vpop.f32.mrb[151].mxu0 }
 0x805   : > { %v17061_v35 = vpop.f32.mrb[152].mxu0 }
 0x806   : > { %v17063_v8 = vpop.f32.mrb[153].mxu0 }
 0x807   : > { %v17065_v54 = vpop.f32.mrb[154].mxu0 }
 0x808   : > { %v17067_v40 = vpop.f32.mrb[155].mxu0 }
 0x80c   : > { %7078 = vrot.lane.b32.xlu1 %v19866_v31, %s15242_s8  ;;  %v19869_v31 = vld [vmem:[#allocation71_spill] sm:$0xff] }
 0x80d   : > { %v17071_v48 = vpop.f32.mrb[156].mxu0 }
 0x80e   : > { %v17073_v16 = vpop.f32.mrb[157].mxu0 }
 0x80f   : > { %v17075_v38 = vpop.f32.mrb[158].mxu0 }
 0x810   : > { %7080 = vrot.lane.b32.xlu0 %v19867_v36, %s15242_s8  ;;  %v17079_v17 = vpop.f32.mrb[159].mxu0  ;;  %v19868_v36 = vld [vmem:[#allocation73_spill] sm:$0xff] }
 0x82f   : > { %6948 = vmax.xlane.f32.xlu0 %v17059_v55 }
 0x830   : > { %6946 = vmax.xlane.f32.xlu1 %v17055_v0 }
 0x833   : > { %6950 = vmax.xlane.f32.xlu0 %v17053_v26 }
 0x834   : > { %6952 = vmax.xlane.f32.xlu1 %v17057_v42 }
 0x837   : > { %6954 = vmax.xlane.f32.xlu0 %v17063_v8 }
 0x838   : > { %6956 = vmax.xlane.f32.xlu1 %v17067_v40 }
 0x83b   : > { %6958 = vmax.xlane.f32.xlu0 %v17061_v35 }
 0x83c   : > { %6960 = vmax.xlane.f32.xlu1 %v17065_v54 }
 0x83f   : > { %6962 = vmax.xlane.f32.xlu0 %v17073_v16 }
 0x840   : > { %6964 = vmax.xlane.f32.xlu1 %v17079_v17 }
 0x843   : > { %6966 = vmax.xlane.f32.xlu0 %v17071_v48 }
 0x844   : > { %6968 = vmax.xlane.f32.xlu1 %v17075_v38 }
 0x855   : > { %7919 = vrot.lane.b32.xlu1 %v19868_v36, %s15242_s8 }
 0x859   : > { %7917 = vrot.lane.b32.xlu0 %v19869_v31, %s15242_s8 }
 0x85d   : > { %7921 = vrot.lane.b32.xlu0 %v19870_v29, %s15242_s8 }
 0x883   : > { %v6943_v11 = vpop.xlane.xlu0 %6942 }
 0x884   : > { %v6972_v37 = vsub.f32 %v12289_v45, %v6943_v11  ;;  %v6939_v57 = vpop.xlane.xlu1 %6938 }
 0x885   : > { %v6970_v34 = vsub.f32 %v6875_v18, %v6939_v57  ;;  %v19874_v57 = vld [vmem:[#allocation81_spill] sm:$0xff] }
 0x886   : > { %v6990_v44 = vmul.f32 1.442695, %v6972_v37 }
 0x887   : > { %v6986_v22 = vmul.f32 1.442695, %v6970_v34  ;;  %v6941_v9 = vpop.xlane.xlu0 %6940 }
 0x888   : > { %v6971_v30 = vsub.f32 %v6878_v62, %v6941_v9  ;;  %v6945_v15 = vpop.xlane.xlu1 %6944  ;;  %14469 = vpow2.f32 %v6990_v44  ;;  %v19873_v44 = vld [vmem:[#allocation79_spill] sm:$0xff] }
 0x889   : > { %v6973_v13 = vsub.f32 %v12290_v10, %v6945_v15  ;;  %14471 = vpow2.f32 %v6986_v22  ;;  %v7386_v22 = vsel %vm5059_vm0, %v19870_v29, 0  ;;  %v7392_v11 = vsel %vm5059_vm0, %v19873_v44, 0 }
 0x88a   : > { %v6988_v59 = vmul.f32 1.442695, %v6971_v30 }
 0x88b   : > { %v6992_v28 = vmul.f32 1.442695, %v6973_v13  ;;  %v7081_v41 = vpop.permute.xlu0 %7080 }
 0x88c   : > { %14473 = vpow2.f32 %v6988_v59  ;;  %v7079_v53 = vpop.permute.xlu1 %7078  ;;  %v19872_v59 = vld [vmem:[#allocation77_spill] sm:$0xff] }
 0x88d   : > { %14475 = vpow2.f32 %v6992_v28  ;;  %12315 = vmatprep.subr.bf16.mxu1 %v7079_v53  ;;  %v7389_v37 = vsel %vm5059_vm0, %v19872_v59, 0 }
 0x88e   : > { %12316 = vmatpush3.bf16.msra.mxu1 %v7079_v53  ;;  %v7383_v53 = vsel %vm5059_vm0, %v19868_v36, 0 }
 0x88f   : > { %12317 = vmatprep.subr.bf16.mxu1 %v7081_v41 }
 0x892   : > { %12318 = vmatpush3.bf16.msra.mxu1 %v7081_v41  ;;  %v17101_v34 = vpop.eup %14469  ;;  %v7380_v41 = vsel %vm5059_vm0, %v19869_v31, 0 }
 0x893   : > { %13167 = vmatprep.subr.msk.bf16.mxu1 %vm5059_vm0, %v19869_v31  ;;  %v17103_v9 = vpop.eup %14471 }
 0x896   : > { %v17105_v15 = vpop.eup %14473 }
 0x897   : > { %v17107_v30 = vpop.eup %14475  ;;  %v7050_v13 = vpack.c.bf16 %v17105_v15, %v17103_v9 }
 0x898   : > { %19871 = vst [vmem:[#allocation51_spill] sm:$0xff] %v17107_v30  ;;  %v7051_v28 = vpack.c.bf16 %v17107_v30, %v17101_v34 }
 0x899   : > { %12319 = vmatprep.mubr.bf16.mxu1 %v7050_v13 }
 0x89a   : > { %12320 = vmatmul.mubr.bf16.vlgmr.msra.gmra.mrb[144].mxu1 %v7051_v28 }
 0x89b   : > { %12336 = vmatpush3.bf16.xpose.msra.mxu1 %v7380_v41 }
 0x89c   : > { %13168 = vmatprep.subr.msk.bf16.mxu1 %vm5059_vm0, %v19868_v36 }
 0x8a3   : > { %12338 = vmatpush3.bf16.xpose.msra.mxu1 %v7383_v53  ;;  %v7395_v53 = vsel %vm5059_vm0, %v19874_v57, 0 }
 0x8a4   : > { %13169 = vmatprep.subr.msk.bf16.mxu1 %vm5059_vm0, %v19870_v29 }
 0x8ab   : > { %12340 = vmatpush3.bf16.xpose.msra.mxu1 %v7386_v22 }
 0x8ac   : > { %13170 = vmatprep.subr.msk.bf16.mxu1 %vm5059_vm0, %v19872_v59 }
 0x8b3   : > { %12342 = vmatpush3.bf16.xpose.msra.mxu1 %v7389_v37 }
 0x8b4   : > { %13171 = vmatprep.subr.msk.bf16.mxu1 %vm5059_vm0, %v19873_v44 }
 0x8bb   : > { %12344 = vmatpush3.bf16.xpose.msra.mxu1 %v7392_v11 }
 0x8bc   : > { %13172 = vmatprep.subr.msk.bf16.mxu1 %vm5059_vm0, %v19874_v57  ;;  %v6949_v10 = vpop.xlane.xlu0 %6948 }
 0x8bd   : > { %v6975_v29 = vsub.f32 %v17059_v55, %v6949_v10  ;;  %v6947_v62 = vpop.xlane.xlu1 %6946  ;;  %v19875_v55 = vld [vmem:[#allocation83_spill] sm:$0xff] }
 0x8be   : > { %v6974_v45 = vsub.f32 %v17055_v0, %v6947_v62 }
 0x8bf   : > { %v6996_v18 = vmul.f32 1.442695, %v6975_v29 }
 0x8c0   : > { %v6994_v36 = vmul.f32 1.442695, %v6974_v45  ;;  %v6951_v31 = vpop.xlane.xlu0 %6950 }
 0x8c1   : > { %14477 = vpow2.f32 %v6996_v18  ;;  %v6976_v13 = vsub.f32 %v17053_v26, %v6951_v31  ;;  %v6953_v28 = vpop.xlane.xlu1 %6952  ;;  %v7398_v31 = vsel %vm5059_vm0, %v19875_v55, 0 }
 0x8c2   : > { %14479 = vpow2.f32 %v6994_v36  ;;  %v6977_v41 = vsub.f32 %v17057_v42, %v6953_v28 }
 0x8c3   : > { %v6998_v22 = vmul.f32 1.442695, %v6976_v13  ;;  %12346 = vmatpush3.bf16.xpose.msra.mxu1 %v7395_v53 }
 0x8c4   : > { %v7000_v37 = vmul.f32 1.442695, %v6977_v41  ;;  %13173 = vmatprep.subr.msk.bf16.mxu1 %vm5059_vm0, %v19875_v55  ;;  %v6955_v0 = vpop.xlane.xlu0 %6954 }
 0x8c5   : > { %14481 = vpow2.f32 %v6998_v22  ;;  %v6978_v11 = vsub.f32 %v17063_v8, %v6955_v0  ;;  %v6957_v10 = vpop.xlane.xlu1 %6956 }
 0x8c6   : > { %14483 = vpow2.f32 %v7000_v37  ;;  %v6979_v26 = vsub.f32 %v17067_v40, %v6957_v10 }
 0x8c7   : > { %v7002_v29 = vmul.f32 1.442695, %v6978_v11 }
 0x8c8   : > { %v7004_v62 = vmul.f32 1.442695, %v6979_v26  ;;  %v6959_v42 = vpop.xlane.xlu0 %6958 }
 0x8c9   : > { %14485 = vpow2.f32 %v7002_v29  ;;  %v6980_v45 = vsub.f32 %v17061_v35, %v6959_v42  ;;  %v6961_v18 = vpop.xlane.xlu1 %6960 }
 0x8ca   : > { %14487 = vpow2.f32 %v7004_v62  ;;  %v6981_v36 = vsub.f32 %v17065_v54, %v6961_v18  ;;  %v7401_v18 = vsel %vm5059_vm0, %v16490_v52, 0 }
 0x8cb   : > { %v17147_v13 = vpop.eup %14477  ;;  %v7006_v8 = vmul.f32 1.442695, %v6980_v45  ;;  %12348 = vmatpush3.bf16.xpose.msra.mxu1 %v7398_v31 }
 0x8cc   : > { %19876 = vst [vmem:[#allocation54_spill] sm:$0xff] %v17147_v13  ;;  %v17149_v28 = vpop.eup %14479  ;;  %v7008_v40 = vmul.f32 1.442695, %v6981_v36  ;;  %13174 = vmatprep.subr.msk.bf16.mxu1 %vm5059_vm0, %v16490_v52  ;;  %v6963_v41 = vpop.xlane.xlu0 %6962 }
 0x8cd   : > { %14489 = vpow2.f32 %v7006_v8  ;;  %v6982_v35 = vsub.f32 %v17073_v16, %v6963_v41  ;;  %v6965_v53 = vpop.xlane.xlu1 %6964  ;;  %v7052_v54 = vpack.c.bf16 %v17147_v13, %v17149_v28 }
 0x8ce   : > { %14491 = vpow2.f32 %v7008_v40  ;;  %v6983_v22 = vsub.f32 %v17079_v17, %v6965_v53 }
 0x8cf   : > { %v17157_v37 = vpop.eup %14481  ;;  %v7010_v0 = vmul.f32 1.442695, %v6982_v35  ;;  %12323 = vmatprep.mubr.bf16.mxu1 %v7052_v54 }
 0x8d0   : > { %19877 = vst [vmem:[#allocation73_spill] sm:$0xff] %v17157_v37  ;;  %v17159_v11 = vpop.eup %14483  ;;  %v7012_v10 = vmul.f32 1.442695, %v6983_v22  ;;  %v6967_v26 = vpop.xlane.xlu0 %6966 }
 0x8d1   : > { %19878 = vst [vmem:[#allocation71_spill] sm:$0xff] %v17159_v11  ;;  %14493 = vpow2.f32 %v7010_v0  ;;  %v6984_v29 = vsub.f32 %v17071_v48, %v6967_v26  ;;  %v6969_v62 = vpop.xlane.xlu1 %6968  ;;  %v7053_v16 = vpack.c.bf16 %v17159_v11, %v17157_v37  ;;  %v19887_v26 = vld [vmem:[#allocation55_spill] sm:$0xff] }
 0x8d2   : > { %14495 = vpow2.f32 %v7012_v10  ;;  %v6985_v42 = vsub.f32 %v17075_v38, %v6969_v62  ;;  %v19889_v62 = vld [vmem:[#allocation59_spill] sm:$0xff] }
 0x8d3   : > { %v17165_v45 = vpop.eup %14485  ;;  %v7014_v17 = vmul.f32 1.442695, %v6984_v29  ;;  %12324 = vmatmul.mubr.bf16.gmra.mrb[148].mxu1 %v7053_v16  ;;  %v19888_v29 = vld [vmem:[#allocation57_spill] sm:$0xff] }
 0x8d4   : > { %19879 = vst [vmem:[#allocation75_spill] sm:$0xff] %v17165_v45  ;;  %v17169_v36 = vpop.eup %14487  ;;  %v7016_v31 = vmul.f32 1.442695, %v6985_v42  ;;  %12350 = vmatpush3.bf16.xpose.msra.mxu1 %v7401_v18  ;;  %v17171_v8 = vpop.permute.xlu0 %7917  ;;  %v19890_v16 = vld [vmem:[#allocation61_spill] sm:$0xff]  ;;  %v19891_v42 = vld [vmem:[#allocation63_spill] sm:$0xff] }
 0x8d5   : > { %19880 = vst [vmem:[#allocation77_spill] sm:$0xff] %v17169_v36  ;;  %14497 = vpow2.f32 %v7014_v17  ;;  %13175 = vmatprep.subr.msk.bf16.mxu0 %vm5059_vm0, %v17171_v8  ;;  %v7054_v48 = vpack.c.bf16 %v17169_v36, %v17165_v45  ;;  %v19892_v17 = vld [vmem:[#allocation65_spill] sm:$0xff]  ;;  %v19893_v18 = vld [vmem:[#allocation67_spill] sm:$0xff] }
 0x8d6   : > { %14499 = vpow2.f32 %v7016_v31  ;;  %v19894_v31 = vld [vmem:[#allocation69_spill] sm:$0xff] }
 0x8d7   : > { %v17177_v38 = vpop.eup %14489  ;;  %12327 = vmatprep.mubr.bf16.mxu1 %v7054_v48 }
 0x8d8   : > { %19881 = vst [vmem:[#allocation79_spill] sm:$0xff] %v17177_v38  ;;  %v17179_v40 = vpop.eup %14491 }
 0x8d9   : > { %19882 = vst [vmem:[#allocation81_spill] sm:$0xff] %v17179_v40  ;;  %v7055_v41 = vpack.c.bf16 %v17179_v40, %v17177_v38 }
 0x8db   : > { %v17183_v35 = vpop.eup %14493  ;;  %12328 = vmatmul.mubr.bf16.gmra.mrb[152].mxu1 %v7055_v41 }
 0x8dc   : > { %19883 = vst [vmem:[#allocation83_spill] sm:$0xff] %v17183_v35  ;;  %v17185_v53 = vpop.eup %14495 }
 0x8dd   : > { %19884 = vst [vmem:[#allocation150_spill] sm:$0xff] %v17185_v53  ;;  %v7056_v54 = vpack.c.bf16 %v17185_v53, %v17183_v35 }
 0x8df   : > { %v17189_v22 = vpop.eup %14497  ;;  %12331 = vmatprep.mubr.bf16.mxu1 %v7056_v54 }
 0x8e0   : > { %19885 = vst [vmem:[#allocation151_spill] sm:$0xff] %v17189_v22  ;;  %v17191_v0 = vpop.eup %14499 }
 0x8e1   : > { %19886 = vst [vmem:[#allocation152_spill] sm:$0xff] %v17191_v0  ;;  %v7057_v10 = vpack.c.bf16 %v17191_v0, %v17189_v22 }
 0x8e3   : > { %12332 = vmatmul.mubr.bf16.gmra.mrb[156].mxu1 %v7057_v10 }
 0x8e4   : > { %12351 = vmatprep.mubr.msk.bf16.mxu1 %vm5059_vm0, %v19887_v26 }
 0x8eb   : > { %12352 = vmatmul.mubr.msk.bf16.vlgmr.msra.gmra.mrb[160].mxu1 %vm5059_vm0, %v19888_v29 }
 0x8ec   : > { %12355 = vmatprep.mubr.msk.bf16.mxu1 %vm5059_vm0, %v19889_v62 }
 0x8f3   : > { %12356 = vmatmul.mubr.msk.bf16.gmra.mrb[164].mxu1 %vm5059_vm0, %v19890_v16 }
 0x8f4   : > { %12359 = vmatprep.mubr.msk.bf16.mxu1 %vm5059_vm0, %v19891_v42 }
 0x8fb   : > { %12360 = vmatmul.mubr.msk.bf16.gmra.mrb[168].mxu1 %vm5059_vm0, %v19892_v17 }
 0x8fc   : > { %12363 = vmatprep.mubr.msk.bf16.mxu1 %vm5059_vm0, %v19893_v18 }
 0x903   : > { %12364 = vmatmul.mubr.msk.bf16.gmra.mrb[172].mxu1 %vm5059_vm0, %v19894_v31 }
 0x96d   : > { %v17211_v48 = vpop.f32.mrb[144].mxu1 }
 0x96e   : > { %19895 = vst [vmem:[#allocation55_spill] sm:$0xff] %v17211_v48  ;;  %v17213_v41 = vpop.f32.mrb[145].mxu1 }
 0x96f   : > { %19896 = vst [vmem:[#allocation57_spill] sm:$0xff] %v17213_v41  ;;  %v17215_v54 = vpop.f32.mrb[146].mxu1 }
 0x970   : > { %19897 = vst [vmem:[#allocation59_spill] sm:$0xff] %v17215_v54  ;;  %v17217_v10 = vpop.f32.mrb[147].mxu1 }
 0x971   : > { %19898 = vst [vmem:[#allocation61_spill] sm:$0xff] %v17217_v10 }
 0x9a6   : > { %v17219_v0 = vpop.f32.mrb[148].mxu1 }
 0x9a7   : > { %19899 = vst [vmem:[#allocation63_spill] sm:$0xff] %v17219_v0  ;;  %v17221_v53 = vpop.f32.mrb[149].mxu1 }
 0x9a8   : > { %19900 = vst [vmem:[#allocation65_spill] sm:$0xff] %v17221_v53  ;;  %v17223_v40 = vpop.f32.mrb[150].mxu1 }
 0x9a9   : > { %19901 = vst [vmem:[#allocation67_spill] sm:$0xff] %v17223_v40  ;;  %v17225_v22 = vpop.f32.mrb[151].mxu1 }
 0x9aa   : > { %19902 = vst [vmem:[#allocation69_spill] sm:$0xff] %v17225_v22 }
 0x9ae   : > { %v17227_v36 = vpop.f32.mrb[152].mxu1 }
 0x9af   : > { %19903 = vst [vmem:[#allocation153_spill] sm:$0xff] %v17227_v36  ;;  %v17229_v35 = vpop.f32.mrb[153].mxu1 }
 0x9b0   : > { %19904 = vst [vmem:[#allocation154_spill] sm:$0xff] %v17229_v35  ;;  %v17231_v11 = vpop.f32.mrb[154].mxu1 }
 0x9b1   : > { %19905 = vst [vmem:[#allocation155_spill] sm:$0xff] %v17231_v11  ;;  %v17233_v48 = vpop.f32.mrb[155].mxu1 }
 0x9b2   : > { %19906 = vst [vmem:[#allocation156_spill] sm:$0xff] %v17233_v48 }
 0x9b6   : > { %v17235_v41 = vpop.f32.mrb[156].mxu1 }
 0x9b7   : > { %19907 = vst [vmem:[#allocation157_spill] sm:$0xff] %v17235_v41  ;;  %v17237_v54 = vpop.f32.mrb[157].mxu1 }
 0x9b8   : > { %19908 = vst [vmem:[#allocation158_spill] sm:$0xff] %v17237_v54  ;;  %v17239_v10 = vpop.f32.mrb[158].mxu1 }
 0x9b9   : > { %19909 = vst [vmem:[#allocation159_spill] sm:$0xff] %v17239_v10  ;;  %v17241_v0 = vpop.f32.mrb[159].mxu1 }
 0x9ba   : > { %19910 = vst [vmem:[#allocation160_spill] sm:$0xff] %v17241_v0 }
 0x9be   : > { %v17243_v53 = vpop.f32.mrb[160].mxu1 }
 0x9bf   : > { %7504 = vmax.xlane.f32.xlu0 %v17243_v53  ;;  %v7437_v40 = vpop.f32.mrb[161].mxu1 }
 0x9c0   : > { %v12354_v36 = vpop.f32.mrb[162].mxu1 }
 0x9c1   : > { %7506 = vmax.xlane.f32.xlu1 %v12354_v36  ;;  %v7440_v22 = vpop.f32.mrb[163].mxu1 }
 0x9c3   : > { %7500 = vmax.xlane.f32.xlu0 %v7437_v40 }
 0x9c5   : > { %7502 = vmax.xlane.f32.xlu1 %v7440_v22 }
 0x9c6   : > { %v17246_v11 = vpop.f32.mrb[164].mxu1 }
 0x9c7   : > { %v17248_v48 = vpop.f32.mrb[165].mxu1 }
 0x9c8   : > { %v17250_v41 = vpop.f32.mrb[166].mxu1 }
 0x9c9   : > { %v17252_v54 = vpop.f32.mrb[167].mxu1 }
 0x9ce   : > { %v17254_v10 = vpop.f32.mrb[168].mxu1 }
 0x9cf   : > { %v17256_v0 = vpop.f32.mrb[169].mxu1 }
 0x9d0   : > { %v17258_v35 = vpop.f32.mrb[170].mxu1 }
 0x9d1   : > { %v17260_v38 = vpop.f32.mrb[171].mxu1 }
 0x9d6   : > { %7923 = vrot.lane.b32.xlu1 %v19872_v59, %s15242_s8  ;;  %v17264_v13 = vpop.f32.mrb[172].mxu1  ;;  %v7920_v59 = vpop.permute.xlu1 %7919 }
 0x9d7   : > { %v17266_v45 = vpop.f32.mrb[173].mxu1 }
 0x9d8   : > { %v17268_v30 = vpop.f32.mrb[174].mxu1 }
 0x9d9   : > { %7925 = vrot.lane.b32.xlu0 %v19873_v44, %s15242_s8  ;;  %v17272_v37 = vpop.f32.mrb[175].mxu1 }
 0x9f8   : > { %7512 = vmax.xlane.f32.xlu0 %v17246_v11 }
 0x9fa   : > { %7508 = vmax.xlane.f32.xlu1 %v17248_v48 }
 0x9fc   : > { %7516 = vmax.xlane.f32.xlu0 %v17256_v0 }
 0x9fe   : > { %7514 = vmax.xlane.f32.xlu1 %v17250_v41 }
 0xa00   : > { %7518 = vmax.xlane.f32.xlu0 %v17260_v38 }
 0xa02   : > { %7510 = vmax.xlane.f32.xlu1 %v17252_v54 }
 0xa04   : > { %7528 = vmax.xlane.f32.xlu0 %v17264_v13 }
 0xa06   : > { %7520 = vmax.xlane.f32.xlu1 %v17254_v10 }
 0xa0a   : > { %7522 = vmax.xlane.f32.xlu1 %v17258_v35 }
 0xa0e   : > { %7524 = vmax.xlane.f32.xlu1 %v17266_v45 }
 0xa12   : > { %7530 = vmax.xlane.f32.xlu1 %v17268_v30 }
 0xa16   : > { %7526 = vmax.xlane.f32.xlu1 %v17272_v37 }
 0xa1a   : > { %7929 = vrot.lane.b32.xlu0 %v19875_v55, %s15242_s8 }
 0xa1e   : > { %7931 = vrot.lane.b32.xlu0 %v16490_v52, %s15242_s8  ;;  %v7922_v52 = vpop.permute.xlu0 %7921 }
 0xa22   : > { %7893 = vrot.lane.b32.xlu0 %v19887_v26, %s15242_s8 }
 0xa26   : > { %7895 = vrot.lane.b32.xlu0 %v19888_v29, %s15242_s8 }
 0xa27   : > { %7927 = vrot.lane.b32.xlu1 %v19874_v57, %s15242_s8 }
 0xa2a   : > { %7899 = vrot.lane.b32.xlu0 %v19890_v16, %s15242_s8 }
 0xa2b   : > { %7897 = vrot.lane.b32.xlu1 %v19889_v62, %s15242_s8 }
 0xa2e   : > { %7903 = vrot.lane.b32.xlu0 %v19892_v17, %s15242_s8 }
 0xa2f   : > { %7901 = vrot.lane.b32.xlu1 %v19891_v42, %s15242_s8 }
 0xa32   : > { %7907 = vrot.lane.b32.xlu0 %v19894_v31, %s15242_s8  ;;  %v7964_v31 = vsel %vm5059_vm0, %v7922_v52, 0 }
 0xa33   : > { %7905 = vrot.lane.b32.xlu1 %v19893_v18, %s15242_s8  ;;  %v7961_v18 = vsel %vm5059_vm0, %v7920_v59, 0 }
 0xa36   : > { %8208 = vrot.lane.b32.xlu0 %v16604_v33, %s15242_s8 }
 0xa37   : > { %8206 = vrot.lane.b32.xlu1 %v16596_v49, %s15242_s8 }
 0xa3a   : > { %8210 = vrot.lane.b32.xlu0 %v16612_v2, %s15242_s8 }
 0xa3b   : > { %8212 = vrot.lane.b32.xlu1 %v16620_v1, %s15242_s8 }
 0xa3e   : > { %8216 = vrot.lane.b32.xlu0 %v16636_v6, %s15242_s8 }
 0xa3f   : > { %8214 = vrot.lane.b32.xlu1 %v16628_v27, %s15242_s8 }
 0xa4c   : > { %v7505_v44 = vpop.xlane.xlu0 %7504 }
 0xa4d   : > { %v7534_v55 = vsub.f32 %v17243_v53, %v7505_v44 }
 0xa4e   : > { %v7507_v57 = vpop.xlane.xlu1 %7506 }
 0xa4f   : > { %v7535_v33 = vsub.f32 %v12354_v36, %v7507_v57  ;;  %v7552_v1 = vmul.f32 1.442695, %v7534_v55 }
 0xa50   : > { %v7501_v49 = vpop.xlane.xlu0 %7500 }
 0xa51   : > { %v7554_v26 = vmul.f32 1.442695, %v7535_v33  ;;  %v7532_v29 = vsub.f32 %v7437_v40, %v7501_v49 }
 0xa52   : > { %v7503_v2 = vpop.xlane.xlu1 %7502 }
 0xa53   : > { %v7548_v62 = vmul.f32 1.442695, %v7532_v29  ;;  %v7533_v16 = vsub.f32 %v7440_v22, %v7503_v2  ;;  %14501 = vpow2.f32 %v7554_v26  ;;  %v7958_v22 = vsel %vm5059_vm0, %v17171_v8, 0 }
 0xa54   : > { %v7926_v33 = vpop.permute.xlu0 %7925 }
 0xa55   : > { %v7550_v42 = vmul.f32 1.442695, %v7533_v16  ;;  %14503 = vpow2.f32 %v7548_v62  ;;  %v7970_v8 = vsel %vm5059_vm0, %v7926_v33, 0 }
 0xa56   : > { %v7924_v44 = vpop.permute.xlu1 %7923 }
 0xa57   : > { %14505 = vpow2.f32 %v7550_v42  ;;  %v7967_v57 = vsel %vm5059_vm0, %v7924_v44, 0 }
 0xa58   : > { %14507 = vpow2.f32 %v7552_v1 }
 0xa5d   : > { %v17321_v27 = vpop.eup %14501 }
 0xa5e   : > { %19911 = vst [vmem:[#allocation161_spill] sm:$0xff] %v17321_v27 }
 0xa5f   : > { %v17323_v6 = vpop.eup %14503 }
 0xa61   : > { %v17325_v17 = vpop.eup %14505 }
 0xa62   : > { %v17327_v36 = vpop.eup %14507  ;;  %v7612_v40 = vpack.c.bf16 %v17325_v17, %v17323_v6 }
 0xa63   : > { %v7613_v53 = vpack.c.bf16 %v17321_v27, %v17327_v36 }
 0xa64   : > { %12383 = vmatprep.mubr.bf16.mxu0 %v7612_v40 }
 0xa65   : > { %12384 = vmatmul.mubr.bf16.vlgmr.msra.gmra.mrb[160].mxu0 %v7613_v53 }
 0xa66   : > { %12400 = vmatpush3.bf16.xpose.msra.mxu0 %v7958_v22 }
 0xa67   : > { %13176 = vmatprep.subr.msk.bf16.mxu0 %vm5059_vm0, %v7920_v59 }
 0xa6e   : > { %12402 = vmatpush3.bf16.xpose.msra.mxu0 %v7961_v18 }
 0xa6f   : > { %13177 = vmatprep.subr.msk.bf16.mxu0 %vm5059_vm0, %v7922_v52 }
 0xa76   : > { %12404 = vmatpush3.bf16.xpose.msra.mxu0 %v7964_v31 }
 0xa77   : > { %13178 = vmatprep.subr.msk.bf16.mxu0 %vm5059_vm0, %v7924_v44 }
 0xa7e   : > { %12406 = vmatpush3.bf16.xpose.msra.mxu0 %v7967_v57 }
 0xa7f   : > { %13179 = vmatprep.subr.msk.bf16.mxu0 %vm5059_vm0, %v7926_v33 }
 0xa85   : > { %v7513_v55 = vpop.xlane.xlu0 %7512 }
 0xa86   : > { %12408 = vmatpush3.bf16.xpose.msra.mxu0 %v7970_v8  ;;  %v7538_v2 = vsub.f32 %v17246_v11, %v7513_v55 }
 0xa87   : > { %v7509_v59 = vpop.xlane.xlu1 %7508 }
 0xa88   : > { %v7536_v49 = vsub.f32 %v17248_v48, %v7509_v59  ;;  %v7560_v31 = vmul.f32 1.442695, %v7538_v2 }
 0xa89   : > { %v7517_v26 = vpop.xlane.xlu0 %7516 }
 0xa8a   : > { %v7556_v62 = vmul.f32 1.442695, %v7536_v49  ;;  %v7540_v1 = vsub.f32 %v17256_v0, %v7517_v26 }
 0xa8b   : > { %v7515_v29 = vpop.xlane.xlu1 %7514 }
 0xa8c   : > { %v7539_v52 = vsub.f32 %v17250_v41, %v7515_v29  ;;  %14509 = vpow2.f32 %v7556_v62  ;;  %v7564_v44 = vmul.f32 1.442695, %v7540_v1 }
 0xa8d   : > { %v7519_v16 = vpop.xlane.xlu0 %7518 }
 0xa8e   : > { %v7562_v42 = vmul.f32 1.442695, %v7539_v52  ;;  %v7541_v40 = vsub.f32 %v17260_v38, %v7519_v16 }
 0xa8f   : > { %v7511_v53 = vpop.xlane.xlu1 %7510 }
 0xa90   : > { %v7566_v22 = vmul.f32 1.442695, %v7541_v40  ;;  %v7537_v18 = vsub.f32 %v17252_v54, %v7511_v53  ;;  %14511 = vpow2.f32 %v7562_v42 }
 0xa91   : > { %v7529_v48 = vpop.xlane.xlu0 %7528 }
 0xa92   : > { %v7558_v57 = vmul.f32 1.442695, %v7537_v18  ;;  %14513 = vpow2.f32 %v7566_v22  ;;  %v7546_v53 = vsub.f32 %v17264_v13, %v7529_v48 }
 0xa93   : > { %v7521_v41 = vpop.xlane.xlu1 %7520 }
 0xa94   : > { %14515 = vpow2.f32 %v7558_v57  ;;  %v7542_v11 = vsub.f32 %v17254_v10, %v7521_v41 }
 0xa95   : > { %14517 = vpow2.f32 %v7560_v31  ;;  %v7930_v0 = vpop.permute.xlu0 %7929 }
 0xa96   : > { %14519 = vpow2.f32 %v7564_v44  ;;  %v7568_v33 = vmul.f32 1.442695, %v7542_v11  ;;  %v17353_v59 = vpop.eup %14509 }
 0xa97   : > { %v7523_v38 = vpop.xlane.xlu1 %7522 }
 0xa98   : > { %v7543_v8 = vsub.f32 %v17258_v35, %v7523_v38  ;;  %14521 = vpow2.f32 %v7568_v33 }
 0xa99   : > { %v17351_v55 = vpop.permute.xlu0 %7931 }
 0xa9a   : > { %v7570_v54 = vmul.f32 1.442695, %v7543_v8  ;;  %v17355_v26 = vpop.eup %14511 }
 0xa9b   : > { %v7525_v49 = vpop.xlane.xlu1 %7524  ;;  %19912 = vst [vmem:[#allocation162_spill] sm:$0xff] %v17355_v26 }
 0xa9c   : > { %14523 = vpow2.f32 %v7570_v54  ;;  %v17357_v29 = vpop.eup %14513  ;;  %v7544_v2 = vsub.f32 %v17266_v45, %v7525_v49 }
 0xa9d   : > { %19913 = vst [vmem:[#allocation163_spill] sm:$0xff] %v17357_v29  ;;  %v7894_v10 = vpop.permute.xlu0 %7893 }
 0xa9e   : > { %v17359_v52 = vpop.eup %14515  ;;  %v7572_v18 = vmul.f32 1.442695, %v7544_v2 }
 0xa9f   : > { %19914 = vst [vmem:[#allocation164_spill] sm:$0xff] %v17359_v52  ;;  %v17362_v62 = vpop.eup %14517  ;;  %v7531_v35 = vpop.xlane.xlu1 %7530  ;;  %v7614_v16 = vpack.c.bf16 %v17359_v52, %v17353_v59 }
 0xaa0   : > { %v17366_v1 = vpop.eup %14519  ;;  %v7547_v42 = vsub.f32 %v17268_v30, %v7531_v35  ;;  %v7615_v40 = vpack.c.bf16 %v17355_v26, %v17362_v62  ;;  %v7576_v30 = vmul.f32 1.442695, %v7546_v53  ;;  %14525 = vpow2.f32 %v7572_v18 }
 0xaa1   : > { %19915 = vst [vmem:[#allocation165_spill] sm:$0xff] %v17366_v1  ;;  %12387 = vmatprep.mubr.bf16.mxu0 %v7614_v16  ;;  %v7896_v22 = vpop.permute.xlu0 %7895  ;;  %v7616_v45 = vpack.c.bf16 %v17357_v29, %v17366_v1  ;;  %v7976_v35 = vsel %vm5059_vm0, %v7930_v0, 0 }
 0xaa2   : > { %12388 = vmatmul.mubr.bf16.gmra.mrb[164].mxu0 %v7615_v40  ;;  %v7578_v31 = vmul.f32 1.442695, %v7547_v42  ;;  %v17375_v41 = vpop.eup %14521 }
 0xaa3   : > { %v7527_v44 = vpop.xlane.xlu1 %7526  ;;  %12391 = vmatprep.mubr.bf16.mxu0 %v7616_v45  ;;  %19916 = vst [vmem:[#allocation166_spill] sm:$0xff] %v17375_v41 }
 0xaa4   : > { %v7545_v57 = vsub.f32 %v17272_v37, %v7527_v44  ;;  %14527 = vpow2.f32 %v7578_v31 }
 0xaa5   : > { %v7900_v11 = vpop.permute.xlu0 %7899 }
 0xaa6   : > { %v17377_v33 = vpop.eup %14523  ;;  %v7574_v13 = vmul.f32 1.442695, %v7545_v57  ;;  %v7979_v57 = vsel %vm5059_vm0, %v17351_v55, 0 }
 0xaa7   : > { %19917 = vst [vmem:[#allocation167_spill] sm:$0xff] %v17377_v33  ;;  %v7928_v48 = vpop.permute.xlu1 %7927  ;;  %v7617_v38 = vpack.c.bf16 %v17377_v33, %v17375_v41 }
 0xaa8   : > { %14529 = vpow2.f32 %v7574_v13  ;;  %13180 = vmatprep.subr.msk.bf16.mxu0 %vm5059_vm0, %v7928_v48  ;;  %v7973_v8 = vsel %vm5059_vm0, %v7928_v48, 0 }
 0xaa9   : > { %14531 = vpow2.f32 %v7576_v30  ;;  %12410 = vmatpush3.bf16.xpose.msra.mxu0 %v7973_v8  ;;  %v7904_v37 = vpop.permute.xlu0 %7903 }
 0xaaa   : > { %12392 = vmatmul.mubr.bf16.gmra.mrb[168].mxu0 %v7617_v38  ;;  %13181 = vmatprep.subr.msk.bf16.mxu0 %vm5059_vm0, %v7930_v0  ;;  %v17384_v2 = vpop.eup %14525 }
 0xaab   : > { %v7898_v54 = vpop.permute.xlu1 %7897  ;;  %19918 = vst [vmem:[#allocation168_spill] sm:$0xff] %v17384_v2 }
 0xaad   : > { %v7908_v42 = vpop.permute.xlu0 %7907 }
 0xaae   : > { %v17387_v16 = vpop.eup %14527 }
 0xaaf   : > { %v7902_v49 = vpop.permute.xlu1 %7901  ;;  %19919 = vst [vmem:[#allocation169_spill] sm:$0xff] %v17387_v16 }
 0xab1   : > { %12412 = vmatpush3.bf16.xpose.msra.mxu0 %v7976_v35  ;;  %v8209_v0 = vpop.permute.xlu0 %8208 }
 0xab2   : > { %v17389_v40 = vpop.eup %14529  ;;  %13182 = vmatprep.subr.msk.bf16.mxu0 %vm5059_vm0, %v17351_v55 }
 0xab3   : > { %19920 = vst [vmem:[#allocation170_spill] sm:$0xff] %v17389_v40  ;;  %v17393_v53 = vpop.eup %14531  ;;  %v7906_v45 = vpop.permute.xlu1 %7905  ;;  %v7618_v18 = vpack.c.bf16 %v17389_v40, %v17384_v2 }
 0xab4   : > { %19921 = vst [vmem:[#allocation171_spill] sm:$0xff] %v17393_v53  ;;  %v7619_v31 = vpack.c.bf16 %v17387_v16, %v17393_v53 }
 0xab5   : > { %12395 = vmatprep.mubr.bf16.mxu0 %v7618_v18  ;;  %v8211_v30 = vpop.permute.xlu0 %8210 }
 0xab6   : > { %12396 = vmatmul.mubr.bf16.gmra.mrb[172].mxu0 %v7619_v31 }
 0xab7   : > { %v8207_v44 = vpop.permute.xlu1 %8206  ;;  %12415 = vmatprep.mubr.msk.bf16.mxu0 %vm5059_vm0, %v7894_v10 }
 0xab8   : > { %12431 = vmatprep.subr.bf16.mxu1 %v8207_v44 }
 0xab9   : > { %12414 = vmatpush3.bf16.xpose.msra.mxu0 %v7979_v57  ;;  %12432 = vmatpush3.bf16.msra.mxu1 %v8207_v44  ;;  %v8217_v10 = vpop.permute.xlu0 %8216 }
 0xaba   : > { %12433 = vmatprep.subr.bf16.mxu1 %v8209_v0  ;;  %12495 = vmatprep.subr.bf16.mxu0 %v16599_v58 }
 0xabb   : > { %v8213_v13 = vpop.permute.xlu1 %8212 }
 0xabd   : > { %12434 = vmatpush3.bf16.msra.mxu1 %v8209_v0 }
 0xabe   : > { %12435 = vmatprep.subr.bf16.mxu1 %v8211_v30 }
 0xabf   : > { %v8215_v55 = vpop.permute.xlu1 %8214 }
 0xac0   : > { %12416 = vmatmul.mubr.msk.bf16.vlgmr.msra.gmra.mrb[176].mxu0 %vm5059_vm0, %v7896_v22 }
 0xac1   : > { %12419 = vmatprep.mubr.msk.bf16.mxu0 %vm5059_vm0, %v7898_v54  ;;  %12436 = vmatpush3.bf16.msra.mxu1 %v8211_v30 }
 0xac2   : > { %12496 = vmatpush3.bf16.msra.mxu0 %v16599_v58  ;;  %12437 = vmatprep.subr.bf16.mxu1 %v8213_v13 }
 0xac3   : > { %12497 = vmatprep.subr.bf16.mxu0 %v16607_v19 }
 0xac5   : > { %12438 = vmatpush3.bf16.msra.mxu1 %v8213_v13 }
 0xac6   : > { %12498 = vmatpush3.bf16.msra.mxu0 %v16607_v19  ;;  %12439 = vmatprep.subr.bf16.mxu1 %v8215_v55 }
 0xac7   : > { %12499 = vmatprep.subr.bf16.mxu0 %v16615_v43 }
 0xac8   : > { %12420 = vmatmul.mubr.msk.bf16.gmra.mrb[180].mxu0 %vm5059_vm0, %v7900_v11 }
 0xac9   : > { %12423 = vmatprep.mubr.msk.bf16.mxu0 %vm5059_vm0, %v7902_v49  ;;  %12440 = vmatpush3.bf16.msra.mxu1 %v8215_v55 }
 0xaca   : > { %12500 = vmatpush3.bf16.msra.mxu0 %v16615_v43  ;;  %12441 = vmatprep.subr.bf16.mxu1 %v8217_v10 }
 0xacb   : > { %12501 = vmatprep.subr.bf16.mxu0 %v16623_v20 }
 0xacd   : > { %12442 = vmatpush3.bf16.msra.mxu1 %v8217_v10 }
 0xace   : > { %12502 = vmatpush3.bf16.msra.mxu0 %v16623_v20 }
 0xacf   : > { %12503 = vmatprep.subr.bf16.mxu0 %v16631_v39 }
 0xad0   : > { %12424 = vmatmul.mubr.msk.bf16.gmra.mrb[184].mxu0 %vm5059_vm0, %v7904_v37 }
 0xad1   : > { %12427 = vmatprep.mubr.msk.bf16.mxu0 %vm5059_vm0, %v7906_v45 }
 0xad2   : > { %12504 = vmatpush3.bf16.msra.mxu0 %v16631_v39 }
 0xad3   : > { %12505 = vmatprep.subr.bf16.mxu0 %v16639_v47 }
 0xad6   : > { %12506 = vmatpush3.bf16.msra.mxu0 %v16639_v47 }
 0xad7   : > { %12507 = vmatprep.subr.bf16.mxu0 %v16647_v3 }
 0xad8   : > { %12428 = vmatmul.mubr.msk.bf16.gmra.mrb[188].mxu0 %vm5059_vm0, %v7908_v42 }
 0xada   : > { %12508 = vmatpush3.bf16.msra.mxu0 %v16647_v3 }
 0xadb   : > { %12509 = vmatprep.subr.bf16.mxu0 %v16654_v5 }
 0xade   : > { %12510 = vmatpush3.bf16.msra.mxu0 %v16654_v5 }
 0xb38   : > { %v17425_v22 = vpop.f32.mrb[160].mxu0 }
 0xb39   : > { %19922 = vst [vmem:[#allocation172_spill] sm:$0xff] %v17425_v22  ;;  %v17427_v11 = vpop.f32.mrb[161].mxu0 }
 0xb3a   : > { %19923 = vst [vmem:[#allocation173_spill] sm:$0xff] %v17427_v11  ;;  %v17429_v48 = vpop.f32.mrb[162].mxu0 }
 0xb3b   : > { %19924 = vst [vmem:[#allocation174_spill] sm:$0xff] %v17429_v48  ;;  %v17431_v38 = vpop.f32.mrb[163].mxu0 }
 0xb3c   : > { %19925 = vst [vmem:[#allocation175_spill] sm:$0xff] %v17431_v38  ;;  %v19940_v38 = vld [vmem:[#allocation76_spill] sm:$0xff] }
 0xb75   : > { %v17433_v8 = vpop.f32.mrb[164].mxu0 }
 0xb76   : > { %19926 = vst [vmem:[#allocation176_spill] sm:$0xff] %v17433_v8  ;;  %v17435_v37 = vpop.f32.mrb[165].mxu0 }
 0xb77   : > { %19927 = vst [vmem:[#allocation177_spill] sm:$0xff] %v17435_v37  ;;  %v17437_v54 = vpop.f32.mrb[166].mxu0 }
 0xb78   : > { %19928 = vst [vmem:[#allocation178_spill] sm:$0xff] %v17437_v54  ;;  %v17439_v49 = vpop.f32.mrb[167].mxu0 }
 0xb79   : > { %19929 = vst [vmem:[#allocation179_spill] sm:$0xff] %v17439_v49 }
 0xb7d   : > { %v17441_v35 = vpop.f32.mrb[168].mxu0 }
 0xb7e   : > { %19930 = vst [vmem:[#allocation180_spill] sm:$0xff] %v17441_v35  ;;  %v17443_v42 = vpop.f32.mrb[169].mxu0 }
 0xb7f   : > { %19931 = vst [vmem:[#allocation181_spill] sm:$0xff] %v17443_v42  ;;  %v17445_v45 = vpop.f32.mrb[170].mxu0 }
 0xb80   : > { %19932 = vst [vmem:[#allocation182_spill] sm:$0xff] %v17445_v45  ;;  %v17447_v18 = vpop.f32.mrb[171].mxu0 }
 0xb81   : > { %19933 = vst [vmem:[#allocation183_spill] sm:$0xff] %v17447_v18 }
 0xb89   : > { %v17449_v31 = vpop.f32.mrb[172].mxu0 }
 0xb8a   : > { %19934 = vst [vmem:[#allocation184_spill] sm:$0xff] %v17449_v31  ;;  %v17451_v0 = vpop.f32.mrb[173].mxu0 }
 0xb8b   : > { %19935 = vst [vmem:[#allocation185_spill] sm:$0xff] %v17451_v0  ;;  %v17453_v44 = vpop.f32.mrb[174].mxu0 }
 0xb8c   : > { %19936 = vst [vmem:[#allocation186_spill] sm:$0xff] %v17453_v44  ;;  %v17455_v57 = vpop.f32.mrb[175].mxu0 }
 0xb8d   : > { %19937 = vst [vmem:[#allocation187_spill] sm:$0xff] %v17455_v57 }
 0xb93   : > { %v12417_v30 = vpop.f32.mrb[176].mxu0 }
 0xb94   : > { %8082 = vmax.xlane.f32.xlu0 %v12417_v30  ;;  %v8015_v13 = vpop.f32.mrb[177].mxu0 }
 0xb95   : > { %8078 = vmax.xlane.f32.xlu1 %v8015_v13  ;;  %v12418_v55 = vpop.f32.mrb[178].mxu0 }
 0xb96   : > { %v8018_v10 = vpop.f32.mrb[179].mxu0 }
 0xb98   : > { %8080 = vmax.xlane.f32.xlu0 %v8018_v10 }
 0xb99   : > { %8084 = vmax.xlane.f32.xlu1 %v12418_v55 }
 0xb9b   : > { %v17457_v54 = vpop.f32.mrb[180].mxu0 }
 0xb9c   : > { %v17459_v45 = vpop.f32.mrb[181].mxu0 }
 0xb9d   : > { %v17461_v18 = vpop.f32.mrb[182].mxu0 }
 0xb9e   : > { %v17463_v31 = vpop.f32.mrb[183].mxu0 }
 0xba3   : > { %v17465_v0 = vpop.f32.mrb[184].mxu0 }
 0xba4   : > { %v17467_v44 = vpop.f32.mrb[185].mxu0 }
 0xba5   : > { %v17469_v57 = vpop.f32.mrb[186].mxu0 }
 0xba6   : > { %v17471_v35 = vpop.f32.mrb[187].mxu0 }
 0xbaa   : > { %8218 = vrot.lane.b32.xlu1 %v16644_v51, %s15242_s8  ;;  %v19938_v51 = vld [vmem:[#allocation74_spill] sm:$0xff] }
 0xbab   : > { %v17475_v49 = vpop.f32.mrb[188].mxu0 }
 0xbac   : > { %v17477_v42 = vpop.f32.mrb[189].mxu0 }
 0xbad   : > { %v17479_v48 = vpop.f32.mrb[190].mxu0 }
 0xbae   : > { %8220 = vrot.lane.b32.xlu0 %v16652_v61, %s15242_s8  ;;  %v17483_v8 = vpop.f32.mrb[191].mxu0  ;;  %v19939_v61 = vld [vmem:[#allocation72_spill] sm:$0xff] }
 0xbcd   : > { %8088 = vmax.xlane.f32.xlu0 %v17463_v31 }
 0xbce   : > { %8086 = vmax.xlane.f32.xlu1 %v17459_v45 }
 0xbd1   : > { %8090 = vmax.xlane.f32.xlu0 %v17457_v54 }
 0xbd2   : > { %8092 = vmax.xlane.f32.xlu1 %v17461_v18 }
 0xbd5   : > { %8094 = vmax.xlane.f32.xlu0 %v17467_v44 }
 0xbd6   : > { %8096 = vmax.xlane.f32.xlu1 %v17471_v35 }
 0xbd9   : > { %8098 = vmax.xlane.f32.xlu0 %v17465_v0 }
 0xbda   : > { %8100 = vmax.xlane.f32.xlu1 %v17469_v57 }
 0xbdd   : > { %8102 = vmax.xlane.f32.xlu0 %v17477_v42 }
 0xbde   : > { %8104 = vmax.xlane.f32.xlu1 %v17483_v8 }
 0xbe1   : > { %8106 = vmax.xlane.f32.xlu0 %v17475_v49 }
 0xbe2   : > { %8108 = vmax.xlane.f32.xlu1 %v17479_v48 }
 0xbf3   : > { %9059 = vrot.lane.b32.xlu1 %v19938_v51, %s15242_s8 }
 0xbf7   : > { %9057 = vrot.lane.b32.xlu0 %v19939_v61, %s15242_s8 }
 0xbfb   : > { %9061 = vrot.lane.b32.xlu0 %v19940_v38, %s15242_s8 }
 0xc21   : > { %v8083_v37 = vpop.xlane.xlu0 %8082 }
 0xc22   : > { %v8112_v22 = vsub.f32 %v12417_v30, %v8083_v37  ;;  %v8079_v11 = vpop.xlane.xlu1 %8078  ;;  %v19944_v37 = vld [vmem:[#allocation82_spill] sm:$0xff] }
 0xc23   : > { %v8110_v16 = vsub.f32 %v8015_v13, %v8079_v11 }
 0xc24   : > { %v8130_v40 = vmul.f32 1.442695, %v8112_v22  ;;  %v19943_v22 = vld [vmem:[#allocation80_spill] sm:$0xff] }
 0xc25   : > { %v8126_v33 = vmul.f32 1.442695, %v8110_v16  ;;  %v8081_v53 = vpop.xlane.xlu0 %8080  ;;  %v8532_v11 = vsel %vm5059_vm0, %v19943_v22, 0 }
 0xc26   : > { %v8111_v29 = vsub.f32 %v8018_v10, %v8081_v53  ;;  %v8085_v2 = vpop.xlane.xlu1 %8084  ;;  %14533 = vpow2.f32 %v8130_v40 }
 0xc27   : > { %v8113_v26 = vsub.f32 %v12418_v55, %v8085_v2  ;;  %14535 = vpow2.f32 %v8126_v33  ;;  %v19942_v33 = vld [vmem:[#allocation78_spill] sm:$0xff] }
 0xc28   : > { %v8128_v41 = vmul.f32 1.442695, %v8111_v29  ;;  %v8529_v40 = vsel %vm5059_vm0, %v19942_v33, 0 }
 0xc29   : > { %v8132_v52 = vmul.f32 1.442695, %v8113_v26  ;;  %v8221_v27 = vpop.permute.xlu0 %8220 }
 0xc2a   : > { %14537 = vpow2.f32 %v8128_v41  ;;  %v8219_v1 = vpop.permute.xlu1 %8218  ;;  %v8526_v41 = vsel %vm5059_vm0, %v19940_v38, 0 }
 0xc2b   : > { %14539 = vpow2.f32 %v8132_v52  ;;  %12443 = vmatprep.subr.bf16.mxu1 %v8219_v1 }
 0xc2c   : > { %12444 = vmatpush3.bf16.msra.mxu1 %v8219_v1  ;;  %v8523_v1 = vsel %vm5059_vm0, %v19938_v51, 0 }
 0xc2d   : > { %12445 = vmatprep.subr.bf16.mxu1 %v8221_v27 }
 0xc30   : > { %12446 = vmatpush3.bf16.msra.mxu1 %v8221_v27  ;;  %v17505_v16 = vpop.eup %14533  ;;  %v8520_v27 = vsel %vm5059_vm0, %v19939_v61, 0 }
 0xc31   : > { %13183 = vmatprep.subr.msk.bf16.mxu1 %vm5059_vm0, %v19939_v61  ;;  %v17507_v53 = vpop.eup %14535 }
 0xc34   : > { %v17509_v2 = vpop.eup %14537 }
 0xc35   : > { %v17511_v29 = vpop.eup %14539  ;;  %v8190_v26 = vpack.c.bf16 %v17509_v2, %v17507_v53 }
 0xc36   : > { %19941 = vst [vmem:[#allocation74_spill] sm:$0xff] %v17511_v29  ;;  %v8191_v52 = vpack.c.bf16 %v17511_v29, %v17505_v16 }
 0xc37   : > { %12447 = vmatprep.mubr.bf16.mxu1 %v8190_v26 }
 0xc38   : > { %12448 = vmatmul.mubr.bf16.vlgmr.msra.gmra.mrb[176].mxu1 %v8191_v52 }
 0xc39   : > { %12464 = vmatpush3.bf16.xpose.msra.mxu1 %v8520_v27 }
 0xc3a   : > { %13184 = vmatprep.subr.msk.bf16.mxu1 %vm5059_vm0, %v19938_v51 }
 0xc41   : > { %12466 = vmatpush3.bf16.xpose.msra.mxu1 %v8523_v1  ;;  %v8535_v1 = vsel %vm5059_vm0, %v19944_v37, 0 }
 0xc42   : > { %13185 = vmatprep.subr.msk.bf16.mxu1 %vm5059_vm0, %v19940_v38 }
 0xc49   : > { %12468 = vmatpush3.bf16.xpose.msra.mxu1 %v8526_v41 }
 0xc4a   : > { %13186 = vmatprep.subr.msk.bf16.mxu1 %vm5059_vm0, %v19942_v33 }
 0xc51   : > { %12470 = vmatpush3.bf16.xpose.msra.mxu1 %v8529_v40 }
 0xc52   : > { %13187 = vmatprep.subr.msk.bf16.mxu1 %vm5059_vm0, %v19943_v22 }
 0xc59   : > { %12472 = vmatpush3.bf16.xpose.msra.mxu1 %v8532_v11 }
 0xc5a   : > { %13188 = vmatprep.subr.msk.bf16.mxu1 %vm5059_vm0, %v19944_v37  ;;  %v8089_v30 = vpop.xlane.xlu0 %8088 }
 0xc5b   : > { %v8115_v38 = vsub.f32 %v17463_v31, %v8089_v30  ;;  %v8087_v13 = vpop.xlane.xlu1 %8086 }
 0xc5c   : > { %v8114_v55 = vsub.f32 %v17459_v45, %v8087_v13 }
 0xc5d   : > { %v8136_v10 = vmul.f32 1.442695, %v8115_v38 }
 0xc5e   : > { %v8134_v51 = vmul.f32 1.442695, %v8114_v55  ;;  %v8091_v61 = vpop.xlane.xlu0 %8090 }
 0xc5f   : > { %14541 = vpow2.f32 %v8136_v10  ;;  %v8116_v26 = vsub.f32 %v17457_v54, %v8091_v61  ;;  %v8093_v52 = vpop.xlane.xlu1 %8092 }
 0xc60   : > { %14543 = vpow2.f32 %v8134_v51  ;;  %v8117_v27 = vsub.f32 %v17461_v18, %v8093_v52  ;;  %v8538_v51 = vsel %vm5059_vm0, %v16482_v21, 0 }
 0xc61   : > { %v8138_v41 = vmul.f32 1.442695, %v8116_v26  ;;  %12474 = vmatpush3.bf16.xpose.msra.mxu1 %v8535_v1 }
 0xc62   : > { %v8140_v40 = vmul.f32 1.442695, %v8117_v27  ;;  %13189 = vmatprep.subr.msk.bf16.mxu1 %vm5059_vm0, %v16482_v21  ;;  %v8095_v45 = vpop.xlane.xlu0 %8094 }
 0xc63   : > { %14545 = vpow2.f32 %v8138_v41  ;;  %v8118_v31 = vsub.f32 %v17467_v44, %v8095_v45  ;;  %v8097_v11 = vpop.xlane.xlu1 %8096 }
 0xc64   : > { %14547 = vpow2.f32 %v8140_v40  ;;  %v8119_v54 = vsub.f32 %v17471_v35, %v8097_v11 }
 0xc65   : > { %v8142_v30 = vmul.f32 1.442695, %v8118_v31 }
 0xc66   : > { %v8144_v38 = vmul.f32 1.442695, %v8119_v54  ;;  %v8099_v18 = vpop.xlane.xlu0 %8098 }
 0xc67   : > { %14549 = vpow2.f32 %v8142_v30  ;;  %v8120_v13 = vsub.f32 %v17465_v0, %v8099_v18  ;;  %v8101_v55 = vpop.xlane.xlu1 %8100 }
 0xc68   : > { %14551 = vpow2.f32 %v8144_v38  ;;  %v8121_v10 = vsub.f32 %v17469_v57, %v8101_v55 }
 0xc69   : > { %v17551_v61 = vpop.eup %14541  ;;  %v8146_v44 = vmul.f32 1.442695, %v8120_v13  ;;  %12476 = vmatpush3.bf16.xpose.msra.mxu1 %v8538_v51  ;;  %v8541_v13 = vsel %vm5059_vm0, %v16492_v60, 0 }
 0xc6a   : > { %19945 = vst [vmem:[#allocation72_spill] sm:$0xff] %v17551_v61  ;;  %v17553_v26 = vpop.eup %14543  ;;  %v8148_v35 = vmul.f32 1.442695, %v8121_v10  ;;  %13190 = vmatprep.subr.msk.bf16.mxu1 %vm5059_vm0, %v16492_v60  ;;  %v8103_v52 = vpop.xlane.xlu0 %8102 }
 0xc6b   : > { %14553 = vpow2.f32 %v8146_v44  ;;  %v8122_v0 = vsub.f32 %v17477_v42, %v8103_v52  ;;  %v8105_v27 = vpop.xlane.xlu1 %8104  ;;  %v8192_v57 = vpack.c.bf16 %v17551_v61, %v17553_v26 }
 0xc6c   : > { %14555 = vpow2.f32 %v8148_v35  ;;  %v8123_v1 = vsub.f32 %v17483_v8, %v8105_v27 }
 0xc6d   : > { %v17561_v41 = vpop.eup %14545  ;;  %v8150_v40 = vmul.f32 1.442695, %v8122_v0  ;;  %12451 = vmatprep.mubr.bf16.mxu1 %v8192_v57 }
 0xc6e   : > { %v17563_v45 = vpop.eup %14547  ;;  %v8152_v31 = vmul.f32 1.442695, %v8123_v1  ;;  %v8107_v11 = vpop.xlane.xlu0 %8106 }
 0xc6f   : > { %19946 = vst [vmem:[#allocation76_spill] sm:$0xff] %v17563_v45  ;;  %14557 = vpow2.f32 %v8150_v40  ;;  %v8124_v54 = vsub.f32 %v17475_v49, %v8107_v11  ;;  %v8109_v30 = vpop.xlane.xlu1 %8108  ;;  %v8193_v42 = vpack.c.bf16 %v17563_v45, %v17561_v41  ;;  %v19956_v11 = vld [vmem:[#allocation58_spill] sm:$0xff] }
 0xc70   : > { %14559 = vpow2.f32 %v8152_v31  ;;  %v8125_v38 = vsub.f32 %v17479_v48, %v8109_v30  ;;  %v19955_v31 = vld [vmem:[#allocation56_spill] sm:$0xff]  ;;  %v19958_v30 = vld [vmem:[#allocation62_spill] sm:$0xff] }
 0xc71   : > { %v17569_v18 = vpop.eup %14549  ;;  %v8154_v8 = vmul.f32 1.442695, %v8124_v54  ;;  %12452 = vmatmul.mubr.bf16.gmra.mrb[180].mxu1 %v8193_v42  ;;  %v19957_v54 = vld [vmem:[#allocation60_spill] sm:$0xff] }
 0xc72   : > { %19947 = vst [vmem:[#allocation78_spill] sm:$0xff] %v17569_v18  ;;  %v17573_v55 = vpop.eup %14551  ;;  %v8156_v10 = vmul.f32 1.442695, %v8125_v38  ;;  %12478 = vmatpush3.bf16.xpose.msra.mxu1 %v8541_v13  ;;  %v17575_v51 = vpop.permute.xlu0 %9057  ;;  %v19959_v42 = vld [vmem:[#allocation64_spill] sm:$0xff]  ;;  %v19960_v38 = vld [vmem:[#allocation66_spill] sm:$0xff] }
 0xc73   : > { %19948 = vst [vmem:[#allocation80_spill] sm:$0xff] %v17573_v55  ;;  %14561 = vpow2.f32 %v8154_v8  ;;  %13191 = vmatprep.subr.msk.bf16.mxu0 %vm5059_vm0, %v17575_v51  ;;  %v8194_v48 = vpack.c.bf16 %v17573_v55, %v17569_v18  ;;  %v19961_v8 = vld [vmem:[#allocation68_spill] sm:$0xff]  ;;  %v19962_v13 = vld [vmem:[#allocation70_spill] sm:$0xff] }
 0xc74   : > { %14563 = vpow2.f32 %v8156_v10 }
 0xc75   : > { %v17581_v49 = vpop.eup %14553  ;;  %12455 = vmatprep.mubr.bf16.mxu1 %v8194_v48 }
 0xc76   : > { %19949 = vst [vmem:[#allocation82_spill] sm:$0xff] %v17581_v49  ;;  %v17583_v44 = vpop.eup %14555 }
 0xc77   : > { %19950 = vst [vmem:[#allocation188_spill] sm:$0xff] %v17583_v44  ;;  %v8195_v35 = vpack.c.bf16 %v17583_v44, %v17581_v49 }
 0xc79   : > { %v17587_v52 = vpop.eup %14557  ;;  %12456 = vmatmul.mubr.bf16.gmra.mrb[184].mxu1 %v8195_v35 }
 0xc7a   : > { %19951 = vst [vmem:[#allocation189_spill] sm:$0xff] %v17587_v52  ;;  %v17589_v0 = vpop.eup %14559 }
 0xc7b   : > { %19952 = vst [vmem:[#allocation190_spill] sm:$0xff] %v17589_v0  ;;  %v8196_v27 = vpack.c.bf16 %v17589_v0, %v17587_v52 }
 0xc7d   : > { %v17593_v57 = vpop.eup %14561  ;;  %12459 = vmatprep.mubr.bf16.mxu1 %v8196_v27 }
 0xc7e   : > { %19953 = vst [vmem:[#allocation191_spill] sm:$0xff] %v17593_v57  ;;  %v17595_v1 = vpop.eup %14563 }
 0xc7f   : > { %19954 = vst [vmem:[#allocation192_spill] sm:$0xff] %v17595_v1  ;;  %v8197_v40 = vpack.c.bf16 %v17595_v1, %v17593_v57 }
 0xc81   : > { %12460 = vmatmul.mubr.bf16.gmra.mrb[188].mxu1 %v8197_v40 }
 0xc82   : > { %12479 = vmatprep.mubr.msk.bf16.mxu1 %vm5059_vm0, %v19955_v31 }
 0xc89   : > { %12480 = vmatmul.mubr.msk.bf16.vlgmr.msra.gmra.mrb[192].mxu1 %vm5059_vm0, %v19956_v11 }
 0xc8a   : > { %12483 = vmatprep.mubr.msk.bf16.mxu1 %vm5059_vm0, %v19957_v54 }
 0xc91   : > { %12484 = vmatmul.mubr.msk.bf16.gmra.mrb[196].mxu1 %vm5059_vm0, %v19958_v30 }
 0xc92   : > { %12487 = vmatprep.mubr.msk.bf16.mxu1 %vm5059_vm0, %v19959_v42 }
 0xc99   : > { %12488 = vmatmul.mubr.msk.bf16.gmra.mrb[200].mxu1 %vm5059_vm0, %v19960_v38 }
 0xc9a   : > { %12491 = vmatprep.mubr.msk.bf16.mxu1 %vm5059_vm0, %v19961_v8 }
 0xca1   : > { %12492 = vmatmul.mubr.msk.bf16.gmra.mrb[204].mxu1 %vm5059_vm0, %v19962_v13 }
 0xd0b   : > { %v17615_v10 = vpop.f32.mrb[176].mxu1 }
 0xd0c   : > { %19963 = vst [vmem:[#allocation56_spill] sm:$0xff] %v17615_v10  ;;  %v17617_v48 = vpop.f32.mrb[177].mxu1 }
 0xd0d   : > { %19964 = vst [vmem:[#allocation58_spill] sm:$0xff] %v17617_v48  ;;  %v17619_v35 = vpop.f32.mrb[178].mxu1 }
 0xd0e   : > { %19965 = vst [vmem:[#allocation60_spill] sm:$0xff] %v17619_v35  ;;  %v17621_v27 = vpop.f32.mrb[179].mxu1 }
 0xd0f   : > { %19966 = vst [vmem:[#allocation62_spill] sm:$0xff] %v17621_v27 }
 0xd44   : > { %v17623_v40 = vpop.f32.mrb[180].mxu1 }
 0xd45   : > { %19967 = vst [vmem:[#allocation64_spill] sm:$0xff] %v17623_v40  ;;  %v17625_v1 = vpop.f32.mrb[181].mxu1 }
 0xd46   : > { %19968 = vst [vmem:[#allocation66_spill] sm:$0xff] %v17625_v1  ;;  %v17627_v0 = vpop.f32.mrb[182].mxu1 }
 0xd47   : > { %19969 = vst [vmem:[#allocation68_spill] sm:$0xff] %v17627_v0  ;;  %v17629_v44 = vpop.f32.mrb[183].mxu1 }
 0xd48   : > { %19970 = vst [vmem:[#allocation70_spill] sm:$0xff] %v17629_v44 }
 0xd4c   : > { %v17631_v57 = vpop.f32.mrb[184].mxu1 }
 0xd4d   : > { %19971 = vst [vmem:[#allocation193_spill] sm:$0xff] %v17631_v57  ;;  %v17633_v55 = vpop.f32.mrb[185].mxu1 }
 0xd4e   : > { %19972 = vst [vmem:[#allocation194_spill] sm:$0xff] %v17633_v55  ;;  %v17635_v52 = vpop.f32.mrb[186].mxu1 }
 0xd4f   : > { %19973 = vst [vmem:[#allocation195_spill] sm:$0xff] %v17635_v52  ;;  %v17637_v10 = vpop.f32.mrb[187].mxu1 }
 0xd50   : > { %19974 = vst [vmem:[#allocation196_spill] sm:$0xff] %v17637_v10 }
 0xd54   : > { %v17639_v48 = vpop.f32.mrb[188].mxu1 }
 0xd55   : > { %19975 = vst [vmem:[#allocation197_spill] sm:$0xff] %v17639_v48  ;;  %v17641_v35 = vpop.f32.mrb[189].mxu1 }
 0xd56   : > { %19976 = vst [vmem:[#allocation198_spill] sm:$0xff] %v17641_v35  ;;  %v17643_v27 = vpop.f32.mrb[190].mxu1 }
 0xd57   : > { %19977 = vst [vmem:[#allocation199_spill] sm:$0xff] %v17643_v27  ;;  %v17645_v40 = vpop.f32.mrb[191].mxu1 }
 0xd58   : > { %19978 = vst [vmem:[#allocation200_spill] sm:$0xff] %v17645_v40 }
 0xd5c   : > { %v17647_v1 = vpop.f32.mrb[192].mxu1 }
 0xd5d   : > { %8644 = vmax.xlane.f32.xlu0 %v17647_v1  ;;  %v8577_v0 = vpop.f32.mrb[193].mxu1 }
 0xd5e   : > { %v12482_v57 = vpop.f32.mrb[194].mxu1 }
 0xd5f   : > { %8646 = vmax.xlane.f32.xlu1 %v12482_v57  ;;  %v8580_v44 = vpop.f32.mrb[195].mxu1 }
 0xd61   : > { %8640 = vmax.xlane.f32.xlu0 %v8577_v0 }
 0xd63   : > { %8642 = vmax.xlane.f32.xlu1 %v8580_v44 }
 0xd64   : > { %v17650_v52 = vpop.f32.mrb[196].mxu1 }
 0xd65   : > { %v17652_v10 = vpop.f32.mrb[197].mxu1 }
 0xd66   : > { %v17654_v48 = vpop.f32.mrb[198].mxu1 }
 0xd67   : > { %v17656_v35 = vpop.f32.mrb[199].mxu1 }
 0xd6c   : > { %v17658_v27 = vpop.f32.mrb[200].mxu1 }
 0xd6d   : > { %v17660_v40 = vpop.f32.mrb[201].mxu1 }
 0xd6e   : > { %v17662_v55 = vpop.f32.mrb[202].mxu1 }
 0xd6f   : > { %v17664_v45 = vpop.f32.mrb[203].mxu1 }
 0xd74   : > { %9063 = vrot.lane.b32.xlu1 %v19942_v33, %s15242_s8  ;;  %v17668_v49 = vpop.f32.mrb[204].mxu1 }
 0xd75   : > { %v17670_v61 = vpop.f32.mrb[205].mxu1 }
 0xd76   : > { %v17672_v18 = vpop.f32.mrb[206].mxu1 }
 0xd77   : > { %9065 = vrot.lane.b32.xlu0 %v19943_v22, %s15242_s8  ;;  %v17676_v29 = vpop.f32.mrb[207].mxu1 }
 0xd96   : > { %8652 = vmax.xlane.f32.xlu0 %v17650_v52 }
 0xd98   : > { %8648 = vmax.xlane.f32.xlu1 %v17652_v10 }
 0xd9a   : > { %8656 = vmax.xlane.f32.xlu0 %v17660_v40 }
 0xd9c   : > { %8654 = vmax.xlane.f32.xlu1 %v17654_v48 }
 0xd9e   : > { %8658 = vmax.xlane.f32.xlu0 %v17664_v45 }
 0xda0   : > { %8650 = vmax.xlane.f32.xlu1 %v17656_v35 }
 0xda2   : > { %8668 = vmax.xlane.f32.xlu0 %v17668_v49 }
 0xda4   : > { %8660 = vmax.xlane.f32.xlu1 %v17658_v27 }
 0xda8   : > { %8662 = vmax.xlane.f32.xlu1 %v17662_v55 }
 0xdac   : > { %8664 = vmax.xlane.f32.xlu1 %v17670_v61 }
 0xdb0   : > { %8670 = vmax.xlane.f32.xlu1 %v17672_v18 }
 0xdb4   : > { %8666 = vmax.xlane.f32.xlu1 %v17676_v29 }
 0xdb8   : > { %9069 = vrot.lane.b32.xlu0 %v16482_v21, %s15242_s8  ;;  %v9062_v21 = vpop.permute.xlu0 %9061 }
 0xdbc   : > { %9071 = vrot.lane.b32.xlu0 %v16492_v60, %s15242_s8  ;;  %v9060_v60 = vpop.permute.xlu1 %9059 }
 0xdc0   : > { %9033 = vrot.lane.b32.xlu0 %v19955_v31, %s15242_s8 }
 0xdc4   : > { %9035 = vrot.lane.b32.xlu0 %v19956_v11, %s15242_s8 }
 0xdc5   : > { %9067 = vrot.lane.b32.xlu1 %v19944_v37, %s15242_s8 }
 0xdc8   : > { %9039 = vrot.lane.b32.xlu0 %v19958_v30, %s15242_s8 }
 0xdc9   : > { %9037 = vrot.lane.b32.xlu1 %v19957_v54, %s15242_s8 }
 0xdcc   : > { %9043 = vrot.lane.b32.xlu0 %v19960_v38, %s15242_s8 }
 0xdcd   : > { %9041 = vrot.lane.b32.xlu1 %v19959_v42, %s15242_s8  ;;  %v19983_v42 = vld [vmem:[#allocation87_spill] sm:$0xff] }
 0xdd0   : > { %9047 = vrot.lane.b32.xlu0 %v19962_v13, %s15242_s8 }
 0xdd1   : > { %9045 = vrot.lane.b32.xlu1 %v19961_v8, %s15242_s8 }
 0xdd4   : > { %9346 = vrot.lane.b32.xlu0 %v16599_v58, %s15242_s8 }
 0xdd5   : > { %9348 = vrot.lane.b32.xlu1 %v16607_v19, %s15242_s8 }
 0xdd8   : > { %9350 = vrot.lane.b32.xlu0 %v16615_v43, %s15242_s8 }
 0xdd9   : > { %9352 = vrot.lane.b32.xlu1 %v16623_v20, %s15242_s8 }
 0xddc   : > { %9354 = vrot.lane.b32.xlu0 %v16631_v39, %s15242_s8 }
 0xddd   : > { %9356 = vrot.lane.b32.xlu1 %v16639_v47, %s15242_s8 }
 0xde0   : > { %9358 = vrot.lane.b32.xlu0 %v16647_v3, %s15242_s8 }
 0xde1   : > { %9360 = vrot.lane.b32.xlu1 %v16654_v5, %s15242_s8 }
 0xdea   : > { %v8645_v58 = vpop.xlane.xlu0 %8644 }
 0xdeb   : > { %v8674_v33 = vsub.f32 %v17647_v1, %v8645_v58  ;;  %v9098_v1 = vsel %vm5059_vm0, %v17575_v51, 0  ;;  %v19980_v51 = vld [vmem:[#allocation84_spill] sm:$0xff] }
 0xdec   : > { %v8647_v19 = vpop.xlane.xlu1 %8646 }
 0xded   : > { %v8675_v43 = vsub.f32 %v12482_v57, %v8647_v19  ;;  %v8692_v47 = vmul.f32 1.442695, %v8674_v33 }
 0xdee   : > { %v8641_v20 = vpop.xlane.xlu0 %8640 }
 0xdef   : > { %v8694_v22 = vmul.f32 1.442695, %v8675_v43  ;;  %v8672_v37 = vsub.f32 %v8577_v0, %v8641_v20 }
 0xdf0   : > { %v8643_v39 = vpop.xlane.xlu1 %8642 }
 0xdf1   : > { %v8688_v31 = vmul.f32 1.442695, %v8672_v37  ;;  %v8673_v11 = vsub.f32 %v8580_v44, %v8643_v39  ;;  %14565 = vpow2.f32 %v8694_v22 }
 0xdf2   : > { %v9066_v38 = vpop.permute.xlu0 %9065 }
 0xdf3   : > { %v8690_v54 = vmul.f32 1.442695, %v8673_v11  ;;  %14567 = vpow2.f32 %v8688_v31  ;;  %v9110_v8 = vsel %vm5059_vm0, %v9066_v38, 0 }
 0xdf5   : > { %14569 = vpow2.f32 %v8690_v54 }
 0xdf6   : > { %14571 = vpow2.f32 %v8692_v47 }
 0xdfb   : > { %v17729_v5 = vpop.eup %14565 }
 0xdfd   : > { %v17731_v3 = vpop.eup %14567 }
 0xdff   : > { %v17733_v30 = vpop.eup %14569  ;;  %5287 = vadd.xlane.f32.xlu0 %v16498_v12  ;;  %v9101_v12 = vsel %vm5059_vm0, %v9060_v60, 0 }
 0xe00   : > { %v17736_v57 = vpop.eup %14571  ;;  %v8752_v0 = vpack.c.bf16 %v17733_v30, %v17731_v3 }
 0xe01   : > { %v8753_v44 = vpack.c.bf16 %v17729_v5, %v17736_v57 }
 0xe02   : > { %12511 = vmatprep.mubr.bf16.mxu0 %v8752_v0 }
 0xe03   : > { %5289 = vadd.xlane.f32.xlu0 %v16506_v46  ;;  %12512 = vmatmul.mubr.bf16.vlgmr.msra.gmra.mrb[192].mxu0 %v8753_v44  ;;  %v19979_v46 = vld [vmem:[#allocation86_spill] sm:$0xff] }
 0xe04   : > { %12528 = vmatpush3.bf16.xpose.msra.mxu0 %v9098_v1 }
 0xe05   : > { %13192 = vmatprep.subr.msk.bf16.mxu0 %vm5059_vm0, %v9060_v60  ;;  %5285 = vadd.xlane.f32.xlu1 %v16500_v23  ;;  %v9104_v23 = vsel %vm5059_vm0, %v9062_v21, 0 }
 0xe07   : > { %5291 = vadd.xlane.f32.xlu0 %v16508_v24  ;;  %v9064_v24 = vpop.permute.xlu1 %9063 }
 0xe09   : > { %5299 = vadd.xlane.f32.xlu1 %v16520_v63  ;;  %v19982_v63 = vld [vmem:[#allocation85_spill] sm:$0xff] }
 0xe0b   : > { %5293 = vadd.xlane.f32.xlu0 %v16516_v14  ;;  %v19981_v14 = vld [vmem:[#allocation90_spill] sm:$0xff] }
 0xe0c   : > { %12530 = vmatpush3.bf16.xpose.msra.mxu0 %v9101_v12 }
 0xe0d   : > { %13193 = vmatprep.subr.msk.bf16.mxu0 %vm5059_vm0, %v9062_v21  ;;  %5303 = vadd.xlane.f32.xlu1 %v16544_v4  ;;  %v9107_v4 = vsel %vm5059_vm0, %v9064_v24, 0 }
 0xe0f   : > { %5295 = vadd.xlane.f32.xlu0 %v16522_v25  ;;  %v19984_v25 = vld [vmem:[#allocation88_spill] sm:$0xff] }
 0xe11   : > { %5307 = vadd.xlane.f32.xlu1 %v19979_v46 }
 0xe13   : > { %5297 = vadd.xlane.f32.xlu0 %v19980_v51 }
 0xe14   : > { %12532 = vmatpush3.bf16.xpose.msra.mxu0 %v9104_v23 }
 0xe15   : > { %13194 = vmatprep.subr.msk.bf16.mxu0 %vm5059_vm0, %v9064_v24  ;;  %5311 = vadd.xlane.f32.xlu1 %v19981_v14 }
 0xe17   : > { %5301 = vadd.xlane.f32.xlu0 %v19982_v63 }
 0xe1b   : > { %5305 = vadd.xlane.f32.xlu0 %v19983_v42 }
 0xe1c   : > { %12534 = vmatpush3.bf16.xpose.msra.mxu0 %v9107_v4 }
 0xe1d   : > { %13195 = vmatprep.subr.msk.bf16.mxu0 %vm5059_vm0, %v9066_v38 }
 0xe1f   : > { %5309 = vadd.xlane.f32.xlu0 %v19984_v25 }
 0xe23   : > { %v8653_v13 = vpop.xlane.xlu0 %8652 }
 0xe24   : > { %12536 = vmatpush3.bf16.xpose.msra.mxu0 %v9110_v8  ;;  %v8678_v33 = vsub.f32 %v17650_v52, %v8653_v13 }
 0xe25   : > { %v8649_v21 = vpop.xlane.xlu1 %8648 }
 0xe26   : > { %v8676_v60 = vsub.f32 %v17652_v10, %v8649_v21  ;;  %v8700_v0 = vmul.f32 1.442695, %v8678_v33 }
 0xe27   : > { %v8657_v58 = vpop.xlane.xlu0 %8656 }
 0xe28   : > { %v8696_v20 = vmul.f32 1.442695, %v8676_v60  ;;  %v8680_v37 = vsub.f32 %v17660_v40, %v8657_v58 }
 0xe29   : > { %v8655_v19 = vpop.xlane.xlu1 %8654 }
 0xe2a   : > { %v8679_v43 = vsub.f32 %v17654_v48, %v8655_v19  ;;  %14573 = vpow2.f32 %v8696_v20  ;;  %v8704_v44 = vmul.f32 1.442695, %v8680_v37 }
 0xe2b   : > { %v8659_v22 = vpop.xlane.xlu0 %8658 }
 0xe2c   : > { %v8702_v39 = vmul.f32 1.442695, %v8679_v43  ;;  %v8681_v31 = vsub.f32 %v17664_v45, %v8659_v22 }
 0xe2d   : > { %v8651_v11 = vpop.xlane.xlu1 %8650 }
 0xe2e   : > { %v8706_v47 = vmul.f32 1.442695, %v8681_v31  ;;  %v8677_v54 = vsub.f32 %v17656_v35, %v8651_v11  ;;  %14575 = vpow2.f32 %v8702_v39 }
 0xe2f   : > { %v8669_v10 = vpop.xlane.xlu0 %8668 }
 0xe30   : > { %v8698_v1 = vmul.f32 1.442695, %v8677_v54  ;;  %14577 = vpow2.f32 %v8706_v47  ;;  %v8686_v60 = vsub.f32 %v17668_v49, %v8669_v10 }
 0xe31   : > { %v8661_v48 = vpop.xlane.xlu1 %8660 }
 0xe32   : > { %14579 = vpow2.f32 %v8698_v1  ;;  %v8682_v52 = vsub.f32 %v17658_v27, %v8661_v48 }
 0xe33   : > { %14581 = vpow2.f32 %v8700_v0  ;;  %v9070_v40 = vpop.permute.xlu0 %9069 }
 0xe34   : > { %14583 = vpow2.f32 %v8704_v44  ;;  %v8708_v12 = vmul.f32 1.442695, %v8682_v52  ;;  %v17775_v23 = vpop.eup %14573  ;;  %v9116_v1 = vsel %vm5059_vm0, %v9070_v40, 0 }
 0xe35   : > { %v8663_v45 = vpop.xlane.xlu1 %8662 }
 0xe36   : > { %v8683_v46 = vsub.f32 %v17662_v55, %v8663_v45  ;;  %14585 = vpow2.f32 %v8708_v12 }
 0xe37   : > { %v17773_v51 = vpop.permute.xlu0 %9071 }
 0xe38   : > { %v8710_v35 = vmul.f32 1.442695, %v8683_v46  ;;  %v17777_v14 = vpop.eup %14575 }
 0xe39   : > { %v8665_v24 = vpop.xlane.xlu1 %8664 }
 0xe3a   : > { %14587 = vpow2.f32 %v8710_v35  ;;  %v17779_v63 = vpop.eup %14577  ;;  %v8684_v4 = vsub.f32 %v17670_v61, %v8665_v24 }
 0xe3b   : > { %v9034_v27 = vpop.permute.xlu0 %9033 }
 0xe3c   : > { %v17781_v42 = vpop.eup %14579  ;;  %v8712_v19 = vmul.f32 1.442695, %v8684_v4  ;;  %v9119_v4 = vsel %vm5059_vm0, %v17773_v51, 0 }
 0xe3d   : > { %v17784_v38 = vpop.eup %14581  ;;  %v8671_v55 = vpop.xlane.xlu1 %8670  ;;  %v8754_v25 = vpack.c.bf16 %v17781_v42, %v17775_v23 }
 0xe3e   : > { %v17788_v8 = vpop.eup %14583  ;;  %v8687_v13 = vsub.f32 %v17672_v18, %v8671_v55  ;;  %v8755_v21 = vpack.c.bf16 %v17777_v14, %v17784_v38  ;;  %v8716_v18 = vmul.f32 1.442695, %v8686_v60  ;;  %14589 = vpow2.f32 %v8712_v19 }
 0xe3f   : > { %12515 = vmatprep.mubr.bf16.mxu0 %v8754_v25  ;;  %v9036_v58 = vpop.permute.xlu0 %9035  ;;  %v8756_v61 = vpack.c.bf16 %v17779_v63, %v17788_v8 }
 0xe40   : > { %12516 = vmatmul.mubr.bf16.gmra.mrb[196].mxu0 %v8755_v21  ;;  %v8718_v43 = vmul.f32 1.442695, %v8687_v13  ;;  %v17797_v22 = vpop.eup %14585 }
 0xe41   : > { %v8667_v33 = vpop.xlane.xlu1 %8666  ;;  %12519 = vmatprep.mubr.bf16.mxu0 %v8756_v61 }
 0xe42   : > { %v8685_v20 = vsub.f32 %v17676_v29, %v8667_v33  ;;  %14591 = vpow2.f32 %v8718_v43 }
 0xe43   : > { %v9040_v37 = vpop.permute.xlu0 %9039 }
 0xe44   : > { %v17799_v39 = vpop.eup %14587  ;;  %v8714_v49 = vmul.f32 1.442695, %v8685_v20 }
 0xe45   : > { %v9068_v31 = vpop.permute.xlu1 %9067  ;;  %v8757_v11 = vpack.c.bf16 %v17799_v39, %v17797_v22 }
 0xe46   : > { %14593 = vpow2.f32 %v8714_v49  ;;  %13196 = vmatprep.subr.msk.bf16.mxu0 %vm5059_vm0, %v9068_v31  ;;  %v9113_v47 = vsel %vm5059_vm0, %v9068_v31, 0 }
 0xe47   : > { %14595 = vpow2.f32 %v8716_v18  ;;  %12538 = vmatpush3.bf16.xpose.msra.mxu0 %v9113_v47  ;;  %v9044_v29 = vpop.permute.xlu0 %9043 }
 0xe48   : > { %12520 = vmatmul.mubr.bf16.gmra.mrb[200].mxu0 %v8757_v11  ;;  %13197 = vmatprep.subr.msk.bf16.mxu0 %vm5059_vm0, %v9070_v40  ;;  %v17806_v44 = vpop.eup %14589 }
 0xe49   : > { %v9038_v54 = vpop.permute.xlu1 %9037 }
 0xe4b   : > { %v9048_v0 = vpop.permute.xlu0 %9047 }
 0xe4c   : > { %v17809_v48 = vpop.eup %14591 }
 0xe4d   : > { %v9042_v10 = vpop.permute.xlu1 %9041 }
 0xe4f   : > { %12540 = vmatpush3.bf16.xpose.msra.mxu0 %v9116_v1  ;;  %v9347_v52 = vpop.permute.xlu0 %9346 }
 0xe50   : > { %v17811_v12 = vpop.eup %14593  ;;  %13198 = vmatprep.subr.msk.bf16.mxu0 %vm5059_vm0, %v17773_v51  ;;  %12559 = vmatprep.subr.bf16.mxu1 %v9347_v52 }
 0xe51   : > { %v17815_v45 = vpop.eup %14595  ;;  %v9046_v46 = vpop.permute.xlu1 %9045  ;;  %12560 = vmatpush3.bf16.msra.mxu1 %v9347_v52  ;;  %v8758_v35 = vpack.c.bf16 %v17811_v12, %v17806_v44 }
 0xe52   : > { %v8759_v40 = vpack.c.bf16 %v17809_v48, %v17815_v45 }
 0xe53   : > { %12523 = vmatprep.mubr.bf16.mxu0 %v8758_v35  ;;  %v9351_v55 = vpop.permute.xlu0 %9350 }
 0xe54   : > { %12524 = vmatmul.mubr.bf16.gmra.mrb[204].mxu0 %v8759_v40 }
 0xe55   : > { %v9349_v24 = vpop.permute.xlu1 %9348  ;;  %12543 = vmatprep.mubr.msk.bf16.mxu0 %vm5059_vm0, %v9034_v27 }
 0xe56   : > { %12561 = vmatprep.subr.bf16.mxu1 %v9349_v24 }
 0xe57   : > { %12542 = vmatpush3.bf16.xpose.msra.mxu0 %v9119_v4  ;;  %12562 = vmatpush3.bf16.msra.mxu1 %v9349_v24  ;;  %v9355_v13 = vpop.permute.xlu0 %9354 }
 0xe58   : > { %12563 = vmatprep.subr.bf16.mxu1 %v9351_v55 }
 0xe59   : > { %v9353_v25 = vpop.permute.xlu1 %9352 }
 0xe5b   : > { %12564 = vmatpush3.bf16.msra.mxu1 %v9351_v55  ;;  %v9359_v51 = vpop.permute.xlu0 %9358 }
 0xe5c   : > { %12565 = vmatprep.subr.bf16.mxu1 %v9353_v25 }
 0xe5d   : > { %v9357_v21 = vpop.permute.xlu1 %9356 }
 0xe5e   : > { %12544 = vmatmul.mubr.msk.bf16.vlgmr.msra.gmra.mrb[208].mxu0 %vm5059_vm0, %v9036_v58 }
 0xe5f   : > { %12547 = vmatprep.mubr.msk.bf16.mxu0 %vm5059_vm0, %v9038_v54  ;;  %12566 = vmatpush3.bf16.msra.mxu1 %v9353_v25  ;;  %v19988_v25 = vld [vmem:[#allocation104_spill] sm:$0xff] }
 0xe60   : > { %12567 = vmatprep.subr.bf16.mxu1 %v9355_v13 }
 0xe61   : > { %v9361_v27 = vpop.permute.xlu1 %9360 }
 0xe63   : > { %12568 = vmatpush3.bf16.msra.mxu1 %v9355_v13 }
 0xe64   : > { %12569 = vmatprep.subr.bf16.mxu1 %v9357_v21 }
 0xe66   : > { %12548 = vmatmul.mubr.msk.bf16.gmra.mrb[212].mxu0 %vm5059_vm0, %v9040_v37 }
 0xe67   : > { %12551 = vmatprep.mubr.msk.bf16.mxu0 %vm5059_vm0, %v9042_v10  ;;  %12570 = vmatpush3.bf16.msra.mxu1 %v9357_v21 }
 0xe68   : > { %12571 = vmatprep.subr.bf16.mxu1 %v9359_v51 }
 0xe6b   : > { %12572 = vmatpush3.bf16.msra.mxu1 %v9359_v51  ;;  %v19989_v51 = vld [vmem:[#allocation37_spill] sm:$0xff] }
 0xe6c   : > { %12573 = vmatprep.subr.bf16.mxu1 %v9361_v27 }
 0xe6e   : > { %12552 = vmatmul.mubr.msk.bf16.gmra.mrb[216].mxu0 %vm5059_vm0, %v9044_v29 }
 0xe6f   : > { %12555 = vmatprep.mubr.msk.bf16.mxu0 %vm5059_vm0, %v9046_v46  ;;  %12574 = vmatpush3.bf16.msra.mxu1 %v9361_v27 }
 0xe76   : > { %12556 = vmatmul.mubr.msk.bf16.gmra.mrb[220].mxu0 %vm5059_vm0, %v9048_v0 }
 0xe8c   : > { %v5288_v60 = vpop.xlane.xlu0 %5287 }
 0xe8d   : > { %14597 = vrcp.f32 %v5288_v60 }
 0xe90   : > { %v5290_v58 = vpop.xlane.xlu0 %5289 }
 0xe91   : > { %14599 = vrcp.f32 %v5290_v58 }
 0xe92   : > { %v5286_v61 = vpop.xlane.xlu1 %5285 }
 0xe93   : > { %14601 = vrcp.f32 %v5286_v61  ;;  %v19990_v61 = vld [vmem:[#allocation40_spill] sm:$0xff] }
 0xe94   : > { %v5292_v19 = vpop.xlane.xlu0 %5291 }
 0xe95   : > { %14603 = vrcp.f32 %v5292_v19 }
 0xe96   : > { %v5300_v43 = vpop.xlane.xlu1 %5299 }
 0xe97   : > { %v14598_v33 = vpop.eup %14597  ;;  %14605 = vrcp.f32 %v5300_v43 }
 0xe98   : > { %v5439_v20 = vmul.f32 %v14598_v33, %v16772_v50  ;;  %v5294_v18 = vpop.xlane.xlu0 %5293  ;;  %v19985_v50 = vld [vmem:[#allocation33_spill] sm:$0xff]  ;;  %v19991_v33 = vld [vmem:[#allocation34_spill] sm:$0xff] }
 0xe99   : > { %14607 = vrcp.f32 %v5294_v18 }
 0xe9a   : > { %5455 = vst.msk [vmem:[#allocation6 + $0x8] sm:$0xff] %vm5059_vm0, %v5439_v20  ;;  %v5304_v37 = vpop.xlane.xlu1 %5303 }
 0xe9b   : > { %v14600_v49 = vpop.eup %14599  ;;  %14609 = vrcp.f32 %v5304_v37 }
 0xe9c   : > { %v5440_v31 = vmul.f32 %v14600_v49, %v16766_v32  ;;  %v5296_v11 = vpop.xlane.xlu0 %5295  ;;  %v19986_v32 = vld [vmem:[#allocation36_spill] sm:$0xff] }
 0xe9d   : > { %v14602_v47 = vpop.eup %14601  ;;  %14611 = vrcp.f32 %v5296_v11  ;;  %v19992_v49 = vld [vmem:[#allocation108_spill] sm:$0xff] }
 0xe9e   : > { %5456 = vst.msk [vmem:[#allocation6 + $0x10] sm:$0xff] %vm5059_vm0, %v5440_v31  ;;  %v5438_v29 = vmul.f32 %v14602_v47, %v16768_v7  ;;  %v5308_v54 = vpop.xlane.xlu1 %5307  ;;  %v19987_v7 = vld [vmem:[#allocation35_spill] sm:$0xff] }
 0xe9f   : > { %v14604_v0 = vpop.eup %14603  ;;  %14613 = vrcp.f32 %v5308_v54  ;;  %v19993_v47 = vld [vmem:[#allocation39_spill] sm:$0xff] }
 0xea0   : > { %5454 = vst.msk [vmem:[#allocation6] sm:$0xff] %vm5059_vm0, %v5438_v29  ;;  %v5441_v10 = vmul.f32 %v14604_v0, %v19985_v50  ;;  %v5298_v1 = vpop.xlane.xlu0 %5297  ;;  %v19994_v0 = vld [vmem:[#allocation38_spill] sm:$0xff] }
 0xea1   : > { %v14606_v52 = vpop.eup %14605  ;;  %14615 = vrcp.f32 %v5298_v1  ;;  %v19995_v1 = vld [vmem:[#allocation106_spill] sm:$0xff] }
 0xea2   : > { %5457 = vst.msk [vmem:[#allocation6 + $0x18] sm:$0xff] %vm5059_vm0, %v5441_v10  ;;  %v5445_v46 = vmul.f32 %v14606_v52, %v19986_v32  ;;  %v5312_v35 = vpop.xlane.xlu1 %5311 }
 0xea3   : > { %v14608_v40 = vpop.eup %14607  ;;  %14617 = vrcp.f32 %v5312_v35 }
 0xea4   : > { %5461 = vst.msk [vmem:[#allocation6 + $0x38] sm:$0xff] %vm5059_vm0, %v5445_v46  ;;  %v5442_v24 = vmul.f32 %v14608_v40, %v19987_v7  ;;  %v5302_v4 = vpop.xlane.xlu0 %5301 }
 0xea5   : > { %v14610_v55 = vpop.eup %14609  ;;  %14619 = vrcp.f32 %v5302_v4 }
 0xea6   : > { %5458 = vst.msk [vmem:[#allocation6 + $0x20] sm:$0xff] %vm5059_vm0, %v5442_v24  ;;  %v5447_v13 = vmul.f32 %v14610_v55, %v19988_v25 }
 0xea7   : > { %v14612_v21 = vpop.eup %14611 }
 0xea8   : > { %5463 = vst.msk [vmem:[#allocation6 + $0x48] sm:$0xff] %vm5059_vm0, %v5447_v13  ;;  %v5443_v27 = vmul.f32 %v14612_v21, %v19989_v51  ;;  %v5306_v60 = vpop.xlane.xlu0 %5305 }
 0xea9   : > { %v14614_v58 = vpop.eup %14613  ;;  %14621 = vrcp.f32 %v5306_v60 }
 0xeaa   : > { %5459 = vst.msk [vmem:[#allocation6 + $0x28] sm:$0xff] %vm5059_vm0, %v5443_v27  ;;  %v5449_v19 = vmul.f32 %v14614_v58, %v19990_v61 }
 0xeab   : > { %v14616_v43 = vpop.eup %14615 }
 0xeac   : > { %5465 = vst.msk [vmem:[#allocation6 + $0x58] sm:$0xff] %vm5059_vm0, %v5449_v19  ;;  %v5444_v20 = vmul.f32 %v14616_v43, %v19991_v33  ;;  %v5310_v18 = vpop.xlane.xlu0 %5309 }
 0xead   : > { %v14618_v37 = vpop.eup %14617  ;;  %14623 = vrcp.f32 %v5310_v18  ;;  %v20006_v18 = vld [vmem:[#allocation91_spill] sm:$0xff] }
 0xeae   : > { %5460 = vst.msk [vmem:[#allocation6 + $0x30] sm:$0xff] %vm5059_vm0, %v5444_v20  ;;  %v5451_v31 = vmul.f32 %v14618_v37, %v19992_v49 }
 0xeaf   : > { %v14620_v11 = vpop.eup %14619 }
 0xeb0   : > { %5467 = vst.msk [vmem:[#allocation6 + $0x68] sm:$0xff] %vm5059_vm0, %v5451_v31  ;;  %v5446_v29 = vmul.f32 %v14620_v11, %v19993_v47  ;;  %v20007_v47 = vld [vmem:[#allocation89_spill] sm:$0xff] }
 0xeb2   : > { %5462 = vst.msk [vmem:[#allocation6 + $0x40] sm:$0xff] %vm5059_vm0, %v5446_v29 }
 0xeb3   : > { %v14622_v54 = vpop.eup %14621 }
 0xeb4   : > { %v5448_v50 = vmul.f32 %v14622_v54, %v19994_v0 }
 0xeb6   : > { %5464 = vst.msk [vmem:[#allocation6 + $0x50] sm:$0xff] %vm5059_vm0, %v5448_v50 }
 0xeb7   : > { %v14624_v10 = vpop.eup %14623 }
 0xeb8   : > { %v5450_v52 = vmul.f32 %v14624_v10, %v19995_v1 }
 0xeba   : > { %5466 = vst.msk [vmem:[#allocation6 + $0x60] sm:$0xff] %vm5059_vm0, %v5450_v52 }
 0xed6   : > { %v17859_v32 = vpop.f32.mrb[192].mxu0 }
 0xed7   : > { %v17861_v46 = vpop.f32.mrb[193].mxu0 }
 0xed8   : > { %v17863_v35 = vpop.f32.mrb[194].mxu0 }
 0xed9   : > { %v17865_v40 = vpop.f32.mrb[195].mxu0 }
 0xf13   : > { %v17867_v7 = vpop.f32.mrb[196].mxu0 }
 0xf14   : > { %v17869_v24 = vpop.f32.mrb[197].mxu0 }
 0xf15   : > { %v17871_v4 = vpop.f32.mrb[198].mxu0 }
 0xf16   : > { %19996 = vst [vmem:[#allocation86_spill] sm:$0xff] %v17871_v4  ;;  %v17873_v55 = vpop.f32.mrb[199].mxu0  ;;  %v20015_v4 = vld [vmem:[#allocation41_spill] sm:$0xff] }
 0xf17   : > { %19997 = vst [vmem:[#allocation84_spill] sm:$0xff] %v17873_v55  ;;  %v20018_v55 = vld [vmem:[#allocation100_spill] sm:$0xff] }
 0xf1b   : > { %v17875_v25 = vpop.f32.mrb[200].mxu0 }
 0xf1c   : > { %19998 = vst [vmem:[#allocation90_spill] sm:$0xff] %v17875_v25  ;;  %v17877_v13 = vpop.f32.mrb[201].mxu0  ;;  %v20016_v25 = vld [vmem:[#allocation98_spill] sm:$0xff] }
 0xf1d   : > { %19999 = vst [vmem:[#allocation85_spill] sm:$0xff] %v17877_v13  ;;  %v17879_v21 = vpop.f32.mrb[202].mxu0  ;;  %v20020_v13 = vld [vmem:[#allocation102_spill] sm:$0xff] }
 0xf1e   : > { %20000 = vst [vmem:[#allocation87_spill] sm:$0xff] %v17879_v21  ;;  %v17881_v51 = vpop.f32.mrb[203].mxu0  ;;  %v20011_v21 = vld [vmem:[#allocation94_spill] sm:$0xff] }
 0xf1f   : > { %20001 = vst [vmem:[#allocation88_spill] sm:$0xff] %v17881_v51  ;;  %v20013_v51 = vld [vmem:[#allocation92_spill] sm:$0xff] }
 0xf27   : > { %v17883_v27 = vpop.f32.mrb[204].mxu0 }
 0xf28   : > { %20002 = vst [vmem:[#allocation33_spill] sm:$0xff] %v17883_v27  ;;  %v17885_v60 = vpop.f32.mrb[205].mxu0  ;;  %v20012_v27 = vld [vmem:[#allocation43_spill] sm:$0xff] }
 0xf29   : > { %20003 = vst [vmem:[#allocation36_spill] sm:$0xff] %v17885_v60  ;;  %v17887_v58 = vpop.f32.mrb[206].mxu0  ;;  %v20014_v60 = vld [vmem:[#allocation96_spill] sm:$0xff] }
 0xf2a   : > { %20004 = vst [vmem:[#allocation35_spill] sm:$0xff] %v17887_v58  ;;  %v17889_v61 = vpop.f32.mrb[207].mxu0  ;;  %v20009_v58 = vld [vmem:[#allocation95_spill] sm:$0xff] }
 0xf2b   : > { %20005 = vst [vmem:[#allocation104_spill] sm:$0xff] %v17889_v61  ;;  %v20010_v61 = vld [vmem:[#allocation42_spill] sm:$0xff] }
 0xf31   : > { %v17891_v19 = vpop.f32.mrb[208].mxu0 }
 0xf32   : > { %9222 = vmax.xlane.f32.xlu1 %v17891_v19  ;;  %v17894_v43 = vpop.f32.mrb[209].mxu0 }
 0xf33   : > { %v17896_v33 = vpop.f32.mrb[210].mxu0 }
 0xf34   : > { %v17898_v20 = vpop.f32.mrb[211].mxu0 }
 0xf35   : > { %9220 = vmax.xlane.f32.xlu0 %v17898_v20 }
 0xf36   : > { %9218 = vmax.xlane.f32.xlu1 %v17894_v43 }
 0xf39   : > { %5313 = vadd.xlane.f32.xlu0 %v20006_v18  ;;  %v17903_v37 = vpop.f32.mrb[212].mxu0 }
 0xf3a   : > { %9224 = vmax.xlane.f32.xlu1 %v17896_v33  ;;  %v17906_v49 = vpop.f32.mrb[213].mxu0 }
 0xf3b   : > { %v17908_v31 = vpop.f32.mrb[214].mxu0 }
 0xf3c   : > { %v17910_v11 = vpop.f32.mrb[215].mxu0 }
 0xf3d   : > { %9226 = vmax.xlane.f32.xlu0 %v17906_v49 }
 0xf3e   : > { %5315 = vadd.xlane.f32.xlu1 %v20007_v47  ;;  %v20008_v47 = vld [vmem:[#allocation93_spill] sm:$0xff] }
 0xf41   : > { %v17914_v29 = vpop.f32.mrb[216].mxu0 }
 0xf42   : > { %9230 = vmax.xlane.f32.xlu1 %v17903_v37  ;;  %v17917_v54 = vpop.f32.mrb[217].mxu0 }
 0xf43   : > { %9234 = vmax.xlane.f32.xlu0 %v17917_v54  ;;  %v17920_v0 = vpop.f32.mrb[218].mxu0 }
 0xf44   : > { %v17922_v50 = vpop.f32.mrb[219].mxu0 }
 0xf46   : > { %9232 = vmax.xlane.f32.xlu1 %v17908_v31 }
 0xf47   : > { %9240 = vmax.xlane.f32.xlu0 %v17920_v0 }
 0xf49   : > { %v17926_v10 = vpop.f32.mrb[220].mxu0 }
 0xf4a   : > { %9228 = vmax.xlane.f32.xlu1 %v17910_v11  ;;  %v17929_v1 = vpop.f32.mrb[221].mxu0 }
 0xf4b   : > { %v17931_v52 = vpop.f32.mrb[222].mxu0 }
 0xf4c   : > { %9248 = vmax.xlane.f32.xlu0 %v17931_v52  ;;  %v17934_v18 = vpop.f32.mrb[223].mxu0 }
 0xf4e   : > { %9238 = vmax.xlane.f32.xlu1 %v17914_v29 }
 0xf50   : > { %9244 = vmax.xlane.f32.xlu0 %v17934_v18 }
 0xf52   : > { %9236 = vmax.xlane.f32.xlu1 %v17922_v50 }
 0xf54   : > { %5878 = vadd.xlane.f32.xlu0 %v20008_v47  ;;  %v20017_v47 = vld [vmem:[#allocation44_spill] sm:$0xff] }
 0xf56   : > { %9246 = vmax.xlane.f32.xlu1 %v17926_v10 }
 0xf58   : > { %5882 = vadd.xlane.f32.xlu0 %v20009_v58  ;;  %v20019_v58 = vld [vmem:[#allocation97_spill] sm:$0xff] }
 0xf5a   : > { %9242 = vmax.xlane.f32.xlu1 %v17929_v1 }
 0xf5c   : > { %5886 = vadd.xlane.f32.xlu0 %v20010_v61  ;;  %v20021_v61 = vld [vmem:[#allocation99_spill] sm:$0xff] }
 0xf5e   : > { %5880 = vadd.xlane.f32.xlu1 %v20011_v21  ;;  %v20022_v21 = vld [vmem:[#allocation101_spill] sm:$0xff] }
 0xf60   : > { %5890 = vadd.xlane.f32.xlu0 %v20012_v27  ;;  %v20024_v27 = vld [vmem:[#allocation103_spill] sm:$0xff] }
 0xf62   : > { %5884 = vadd.xlane.f32.xlu1 %v20013_v51  ;;  %v20023_v51 = vld [vmem:[#allocation49_spill] sm:$0xff] }
 0xf64   : > { %5894 = vadd.xlane.f32.xlu0 %v20014_v60  ;;  %v20027_v60 = vld [vmem:[#allocation125_spill] sm:$0xff] }
 0xf66   : > { %5888 = vadd.xlane.f32.xlu1 %v20015_v4  ;;  %v20025_v4 = vld [vmem:[#allocation46_spill] sm:$0xff] }
 0xf68   : > { %5898 = vadd.xlane.f32.xlu0 %v20016_v25  ;;  %v20026_v25 = vld [vmem:[#allocation48_spill] sm:$0xff] }
 0xf6a   : > { %5892 = vadd.xlane.f32.xlu1 %v20017_v47  ;;  %v20029_v47 = vld [vmem:[#allocation126_spill] sm:$0xff] }
 0xf6c   : > { %5902 = vadd.xlane.f32.xlu0 %v20018_v55  ;;  %v20028_v55 = vld [vmem:[#allocation45_spill] sm:$0xff] }
 0xf6e   : > { %5896 = vadd.xlane.f32.xlu1 %v20019_v58  ;;  %v20031_v58 = vld [vmem:[#allocation128_spill] sm:$0xff] }
 0xf70   : > { %5906 = vadd.xlane.f32.xlu0 %v20020_v13  ;;  %v20030_v13 = vld [vmem:[#allocation50_spill] sm:$0xff] }
 0xf72   : > { %5900 = vadd.xlane.f32.xlu1 %v20021_v61  ;;  %v20033_v61 = vld [vmem:[#allocation130_spill] sm:$0xff] }
 0xf74   : > { %6440 = vadd.xlane.f32.xlu0 %v16921_v56  ;;  %v20032_v56 = vld [vmem:[#allocation47_spill] sm:$0xff] }
 0xf76   : > { %5904 = vadd.xlane.f32.xlu1 %v20022_v21  ;;  %v20034_v21 = vld [vmem:[#allocation127_spill] sm:$0xff] }
 0xf78   : > { %6444 = vadd.xlane.f32.xlu0 %v20023_v51  ;;  %v20035_v51 = vld [vmem:[#allocation133_spill] sm:$0xff] }
 0xf7a   : > { %5908 = vadd.xlane.f32.xlu1 %v20024_v27  ;;  %v20036_v27 = vld [vmem:[#allocation129_spill] sm:$0xff] }
 0xf7c   : > { %6448 = vadd.xlane.f32.xlu0 %v20025_v4  ;;  %v20037_v4 = vld [vmem:[#allocation132_spill] sm:$0xff] }
 0xf7e   : > { %6442 = vadd.xlane.f32.xlu1 %v20026_v25  ;;  %v20038_v25 = vld [vmem:[#allocation131_spill] sm:$0xff] }
 0xf80   : > { %6452 = vadd.xlane.f32.xlu0 %v20027_v60  ;;  %v20039_v60 = vld [vmem:[#allocation73_spill] sm:$0xff] }
 0xf82   : > { %6446 = vadd.xlane.f32.xlu1 %v20028_v55  ;;  %v20040_v55 = vld [vmem:[#allocation51_spill] sm:$0xff] }
 0xf84   : > { %6456 = vadd.xlane.f32.xlu0 %v20029_v47  ;;  %v20041_v47 = vld [vmem:[#allocation75_spill] sm:$0xff] }
 0xf86   : > { %6450 = vadd.xlane.f32.xlu1 %v20030_v13  ;;  %v20042_v13 = vld [vmem:[#allocation54_spill] sm:$0xff] }
 0xf88   : > { %6460 = vadd.xlane.f32.xlu0 %v20031_v58  ;;  %v20043_v58 = vld [vmem:[#allocation79_spill] sm:$0xff] }
 0xf8a   : > { %6454 = vadd.xlane.f32.xlu1 %v20032_v56  ;;  %v20045_v56 = vld [vmem:[#allocation83_spill] sm:$0xff] }
 0xf8c   : > { %6464 = vadd.xlane.f32.xlu0 %v20033_v61  ;;  %v20047_v61 = vld [vmem:[#allocation151_spill] sm:$0xff] }
 0xf8e   : > { %6458 = vadd.xlane.f32.xlu1 %v20034_v21  ;;  %v20050_v21 = vld [vmem:[#allocation152_spill] sm:$0xff] }
 0xf90   : > { %6468 = vadd.xlane.f32.xlu0 %v20035_v51 }
 0xf92   : > { %6462 = vadd.xlane.f32.xlu1 %v20036_v27  ;;  %v20051_v27 = vld [vmem:[#allocation161_spill] sm:$0xff] }
 0xf94   : > { %7018 = vadd.xlane.f32.xlu0 %v17103_v9  ;;  %v20044_v9 = vld [vmem:[#allocation71_spill] sm:$0xff] }
 0xf96   : > { %6466 = vadd.xlane.f32.xlu1 %v20037_v4 }
 0xf98   : > { %7022 = vadd.xlane.f32.xlu0 %v17101_v34  ;;  %v20046_v34 = vld [vmem:[#allocation77_spill] sm:$0xff] }
 0xf9a   : > { %6470 = vadd.xlane.f32.xlu1 %v20038_v25 }
 0xf9c   : > { %7026 = vadd.xlane.f32.xlu0 %v17149_v28  ;;  %v20048_v28 = vld [vmem:[#allocation81_spill] sm:$0xff] }
 0xf9e   : > { %7020 = vadd.xlane.f32.xlu1 %v17105_v15  ;;  %v20049_v15 = vld [vmem:[#allocation150_spill] sm:$0xff] }
 0xfa0   : > { %7030 = vadd.xlane.f32.xlu0 %v20039_v60 }
 0xfa2   : > { %7024 = vadd.xlane.f32.xlu1 %v20040_v55 }
 0xfa4   : > { %7034 = vadd.xlane.f32.xlu0 %v20041_v47 }
 0xfa6   : > { %7028 = vadd.xlane.f32.xlu1 %v20042_v13 }
 0xfa8   : > { %7038 = vadd.xlane.f32.xlu0 %v20043_v58 }
 0xfaa   : > { %7032 = vadd.xlane.f32.xlu1 %v20044_v9 }
 0xfac   : > { %7042 = vadd.xlane.f32.xlu0 %v20045_v56  ;;  %v20054_v56 = vld [vmem:[#allocation166_spill] sm:$0xff] }
 0xfae   : > { %7036 = vadd.xlane.f32.xlu1 %v20046_v34 }
 0xfb0   : > { %7046 = vadd.xlane.f32.xlu0 %v20047_v61  ;;  %v20056_v61 = vld [vmem:[#allocation168_spill] sm:$0xff] }
 0xfb2   : > { %7040 = vadd.xlane.f32.xlu1 %v20048_v28  ;;  %v20057_v28 = vld [vmem:[#allocation163_spill] sm:$0xff] }
 0xfb4   : > { %7580 = vadd.xlane.f32.xlu0 %v17323_v6 }
 0xfb6   : > { %7044 = vadd.xlane.f32.xlu1 %v20049_v15 }
 0xfb8   : > { %7584 = vadd.xlane.f32.xlu0 %v17327_v36  ;;  %v20052_v36 = vld [vmem:[#allocation165_spill] sm:$0xff] }
 0xfba   : > { %7048 = vadd.xlane.f32.xlu1 %v20050_v21 }
 0xfbc   : > { %7588 = vadd.xlane.f32.xlu0 %v17353_v59  ;;  %v20053_v59 = vld [vmem:[#allocation164_spill] sm:$0xff] }
 0xfbe   : > { %7582 = vadd.xlane.f32.xlu1 %v17325_v17 }
 0xfbf   : > { %v9223_v51 = vpop.xlane.xlu1 %9222 }
 0xfc0   : > { %7592 = vadd.xlane.f32.xlu0 %v17362_v62  ;;  %v9252_v25 = vsub.f32 %v17891_v19, %v9223_v51  ;;  %v20058_v51 = vld [vmem:[#allocation171_spill] sm:$0xff] }
 0xfc2   : > { %7586 = vadd.xlane.f32.xlu1 %v20051_v27  ;;  %v9221_v4 = vpop.xlane.xlu0 %9220  ;;  %v9270_v58 = vmul.f32 1.442695, %v9252_v25  ;;  %v20059_v25 = vld [vmem:[#allocation167_spill] sm:$0xff] }
 0xfc3   : > { %v9251_v6 = vsub.f32 %v17898_v20, %v9221_v4  ;;  %v9219_v60 = vpop.xlane.xlu1 %9218  ;;  %v20055_v20 = vld [vmem:[#allocation162_spill] sm:$0xff] }
 0xfc4   : > { %v9250_v55 = vsub.f32 %v17894_v43, %v9219_v60  ;;  %7596 = vadd.xlane.f32.xlu0 %v20052_v36 }
 0xfc5   : > { %v9268_v47 = vmul.f32 1.442695, %v9251_v6 }
 0xfc6   : > { %v9266_v13 = vmul.f32 1.442695, %v9250_v55  ;;  %7590 = vadd.xlane.f32.xlu1 %v20053_v59  ;;  %v5314_v17 = vpop.xlane.xlu0 %5313 }
 0xfc7   : > { %14625 = vpow2.f32 %v9268_v47  ;;  %v9225_v62 = vpop.xlane.xlu1 %9224 }
 0xfc8   : > { %14627 = vpow2.f32 %v9266_v13  ;;  %v9253_v9 = vsub.f32 %v17896_v33, %v9225_v62  ;;  %7600 = vadd.xlane.f32.xlu0 %v20054_v56  ;;  %v20060_v13 = vld [vmem:[#allocation105_spill] sm:$0xff] }
 0xfc9   : > { %14629 = vrcp.f32 %v5314_v17 }
 0xfca   : > { %v9272_v19 = vmul.f32 1.442695, %v9253_v9  ;;  %7594 = vadd.xlane.f32.xlu1 %v20055_v20  ;;  %14631 = vpow2.f32 %v9270_v58  ;;  %v9227_v34 = vpop.xlane.xlu0 %9226  ;;  %v20061_v9 = vld [vmem:[#allocation170_spill] sm:$0xff] }
 0xfcb   : > { %v5316_v43 = vpop.xlane.xlu1 %5315  ;;  %v9254_v60 = vsub.f32 %v17906_v49, %v9227_v34 }
 0xfcc   : > { %14633 = vpow2.f32 %v9272_v19  ;;  %7604 = vadd.xlane.f32.xlu0 %v20056_v61 }
 0xfcd   : > { %14635 = vrcp.f32 %v5316_v43  ;;  %v9274_v19 = vmul.f32 1.442695, %v9254_v60 }
 0xfce   : > { %7598 = vadd.xlane.f32.xlu1 %v20057_v28 }
 0xfcf   : > { %v9231_v15 = vpop.xlane.xlu1 %9230 }
 0xfd0   : > { %v9256_v21 = vsub.f32 %v17903_v37, %v9231_v15  ;;  %7608 = vadd.xlane.f32.xlu0 %v20058_v51  ;;  %v9235_v33 = vpop.xlane.xlu0 %9234 }
 0xfd1   : > { %v18007_v27 = vpop.eup %14625 }
 0xfd2   : > { %v18009_v4 = vpop.eup %14627  ;;  %7602 = vadd.xlane.f32.xlu1 %v20059_v25  ;;  %v9278_v55 = vmul.f32 1.442695, %v9256_v21  ;;  %v20063_v21 = vld [vmem:[#allocation169_spill] sm:$0xff]  ;;  %v9258_v25 = vsub.f32 %v17917_v54, %v9235_v33 }
 0xfd3   : > { %v14630_v6 = vpop.eup %14629  ;;  %v9233_v36 = vpop.xlane.xlu1 %9232  ;;  %v9330_v47 = vpack.c.bf16 %v18007_v27, %v18009_v4 }
 0xfd4   : > { %v5452_v59 = vmul.f32 %v14630_v6, %v20060_v13  ;;  %v9257_v37 = vsub.f32 %v17908_v31, %v9233_v36  ;;  %8158 = vadd.xlane.f32.xlu0 %v17507_v53  ;;  %v9241_v17 = vpop.xlane.xlu0 %9240  ;;  %v18018_v58 = vpop.eup %14631  ;;  %14637 = vpow2.f32 %v9278_v55  ;;  %v20062_v31 = vld [vmem:[#allocation107_spill] sm:$0xff] }
 0xfd5   : > { %12575 = vmatprep.mubr.bf16.mxu1 %v9330_v47  ;;  %v9261_v20 = vsub.f32 %v17920_v0, %v9241_v17  ;;  %v18037_v36 = vld [vmem:[#allocation6 + $0x40] ss:$8 sm:$0xf]  ;;  %v9282_v47 = vmul.f32 1.442695, %v9258_v25 }
 0xfd6   : > { %v18020_v62 = vpop.eup %14633  ;;  %5468 = vst.msk [vmem:[#allocation6 + $0x70] sm:$0xff] %vm5059_vm0, %v5452_v59  ;;  %v9280_v49 = vmul.f32 1.442695, %v9257_v37  ;;  %7606 = vadd.xlane.f32.xlu1 %v20061_v9  ;;  %v20064_v59 = vld [vmem:[#allocation74_spill] sm:$0xff] }
 0xfd7   : > { %v14636_v56 = vpop.eup %14635  ;;  %v9229_v43 = vpop.xlane.xlu1 %9228  ;;  %v9331_v53 = vpack.c.bf16 %v18020_v62, %v18018_v58  ;;  %v9288_v0 = vmul.f32 1.442695, %v9261_v20  ;;  %v20065_v9 = vld [vmem:[#allocation78_spill] sm:$0xff] }
 0xfd8   : > { %v5453_v34 = vmul.f32 %v14636_v56, %v20062_v31  ;;  %14639 = vpow2.f32 %v9280_v49  ;;  %v9255_v61 = vsub.f32 %v17910_v11, %v9229_v43  ;;  %8162 = vadd.xlane.f32.xlu0 %v17505_v16 }
 0xfd9   : > { %12576 = vmatmul.mubr.bf16.vlgmr.msra.gmra.mrb[208].mxu1 %v9331_v53  ;;  %v9249_v28 = vpop.xlane.xlu0 %9248  ;;  %14641 = vpow2.f32 %v9274_v19 }
 0xfda   : > { %5469 = vst.msk [vmem:[#allocation6 + $0x78] sm:$0xff] %vm5059_vm0, %v5453_v34  ;;  %v9276_v15 = vmul.f32 1.442695, %v9255_v61  ;;  %7610 = vadd.xlane.f32.xlu1 %v20063_v21  ;;  %v9265_v11 = vsub.f32 %v17931_v52, %v9249_v28  ;;  %v20067_v61 = vld [vmem:[#allocation82_spill] sm:$0xff] }
 0xfdb   : > { %v9239_v51 = vpop.xlane.xlu1 %9238 }
 0xfdc   : > { %14643 = vpow2.f32 %v9276_v15  ;;  %v9260_v6 = vsub.f32 %v17914_v29, %v9239_v51  ;;  %8166 = vadd.xlane.f32.xlu0 %v17553_v26  ;;  %v9296_v29 = vmul.f32 1.442695, %v9265_v11  ;;  %v20068_v51 = vld [vmem:[#allocation76_spill] sm:$0xff] }
 0xfdd   : > { %v9245_v16 = vpop.xlane.xlu0 %9244  ;;  %14645 = vpow2.f32 %v9288_v0 }
 0xfde   : > { %v9286_v60 = vmul.f32 1.442695, %v9260_v6  ;;  %8160 = vadd.xlane.f32.xlu1 %v17509_v2  ;;  %v18040_v54 = vpop.eup %14637  ;;  %v9263_v37 = vsub.f32 %v17934_v18, %v9245_v16  ;;  %v20066_v18 = vld [vmem:[#allocation72_spill] sm:$0xff] }
 0xfdf   : > { %v9237_v55 = vpop.xlane.xlu1 %9236  ;;  %v18072_v16 = vld [vmem:[#allocation6] ss:$8 sm:$0xf]  ;;  %v18127_v2 = vld [vmem:[#allocation6 + $0x7] ss:$8 sm:$0xf0] }
 0xfe0   : > { %14647 = vpow2.f32 %v9286_v60  ;;  %8170 = vadd.xlane.f32.xlu0 %v17561_v41  ;;  %v9259_v26 = vsub.f32 %v17922_v50, %v9237_v55  ;;  %v9292_v53 = vmul.f32 1.442695, %v9263_v37  ;;  %v18074_v60 = vld [vmem:[#allocation6 + $0x1] ss:$8 sm:$0xf]  ;;  %20083 = vst [vmem:[#allocation91_spill] sm:$0xff] %v18127_v2 }
 0xfe1   : > { %v18042_v33 = vld [vmem:[#allocation6 + $0x40] ss:$8 sm:$0xf0]  ;;  %v5879_v52 = vpop.xlane.xlu0 %5878  ;;  %v18076_v55 = vld [vmem:[#allocation6 + $0x2] ss:$8 sm:$0xf] }
 0xfe2   : > { %v18045_v13 = vpop.eup %14639  ;;  %8164 = vadd.xlane.f32.xlu1 %v20064_v59  ;;  %14649 = vrcp.f32 %v5879_v52  ;;  %v9284_v56 = vmul.f32 1.442695, %v9259_v26  ;;  %v18082_v52 = vld [vmem:[#allocation6 + $0x4] ss:$8 sm:$0xf] }
 0xfe3   : > { %v9247_v17 = vpop.xlane.xlu1 %9246  ;;  %v9333_v41 = vpack.c.bf16 %v18045_v13, %v18040_v54  ;;  %14651 = vpow2.f32 %v9282_v47  ;;  %v18055_v50 = vpop.eup %14641  ;;  %v18078_v47 = vld [vmem:[#allocation6 + $0x3] ss:$8 sm:$0xf]  ;;  %20070 = vst [vmem:[#allocation37_spill] sm:$0xff] %v18082_v52 }
 0xfe4   : > { %v9264_v49 = vsub.f32 %v17926_v10, %v9247_v17  ;;  %8174 = vadd.xlane.f32.xlu0 %v20065_v9  ;;  %14653 = vpow2.f32 %v9296_v29  ;;  %v18084_v59 = vld [vmem:[#allocation6 + $0x5] ss:$8 sm:$0xf]  ;;  %v18090_v9 = vld [vmem:[#allocation6 + $0x6] ss:$8 sm:$0xf] }
 0xfe5   : > { %v5883_v19 = vpop.xlane.xlu0 %5882  ;;  %20071 = vst [vmem:[#allocation40_spill] sm:$0xff] %v18084_v59  ;;  %v20072_v37 = vld [vmem:[#allocation110_spill] sm:$0xff]  ;;  %20074 = vst [vmem:[#allocation34_spill] sm:$0xff] %v18090_v9 }
 0xfe6   : > { %v18057_v20 = vpop.eup %14643  ;;  %v9294_v43 = vmul.f32 1.442695, %v9264_v49  ;;  %14655 = vrcp.f32 %v5883_v19  ;;  %8168 = vadd.xlane.f32.xlu1 %v20066_v18  ;;  %v20076_v18 = vld [vmem:[#allocation191_spill] sm:$0xff] }
 0xfe7   : > { %14657 = vpow2.f32 %v9284_v56  ;;  %v9243_v31 = vpop.xlane.xlu1 %9242  ;;  %v9332_v34 = vpack.c.bf16 %v18057_v20, %v18055_v50  ;;  %v18064_v28 = vpop.eup %14645  ;;  %v18092_v56 = vld [vmem:[#allocation6 + $0x7] ss:$8 sm:$0xf] }
 0xfe8   : > { %14659 = vpow2.f32 %v9294_v43  ;;  %v9262_v10 = vsub.f32 %v17929_v1, %v9243_v31  ;;  %8178 = vadd.xlane.f32.xlu0 %v20067_v61  ;;  %v20069_v1 = vld [vmem:[#allocation189_spill] sm:$0xff]  ;;  %20075 = vst [vmem:[#allocation108_spill] sm:$0xff] %v18092_v56 }
 0xfe9   : > { %12579 = vmatprep.mubr.bf16.mxu1 %v9332_v34  ;;  %v5887_v15 = vpop.xlane.xlu0 %5886  ;;  %v20077_v31 = vld [vmem:[#allocation109_spill] sm:$0xff] }
 0xfea   : > { %v18066_v21 = vpop.eup %14647  ;;  %v9290_v0 = vmul.f32 1.442695, %v9262_v10  ;;  %14661 = vrcp.f32 %v5887_v15  ;;  %8172 = vadd.xlane.f32.xlu1 %v20068_v51  ;;  %12580 = vmatmul.mubr.bf16.gmra.mrb[212].mxu1 %v9333_v41  ;;  %v20073_v41 = vld [vmem:[#allocation80_spill] sm:$0xff] }
 0xfeb   : > { %14663 = vpow2.f32 %v9292_v53  ;;  %v5881_v25 = vpop.xlane.xlu1 %5880  ;;  %v9335_v6 = vpack.c.bf16 %v18064_v28, %v18066_v21 }
 0xfec   : > { %14665 = vpow2.f32 %v9290_v0  ;;  %8182 = vadd.xlane.f32.xlu0 %v20069_v1  ;;  %v14650_v11 = vpop.eup %14649  ;;  %v20078_v0 = vld [vmem:[#allocation188_spill] sm:$0xff] }
 0xfed   : > { %14667 = vrcp.f32 %v5881_v25  ;;  %v5891_v29 = vpop.xlane.xlu0 %5890  ;;  %v18080_v26 = vpop.eup %14651  ;;  %v6063_v17 = vmul.f32 %v14650_v11, %v20072_v37  ;;  %v18107_v11 = vld [vmem:[#allocation6] ss:$8 sm:$0xf0]  ;;  %v18111_v37 = vld [vmem:[#allocation6 + $0x2] ss:$8 sm:$0xf0] }
 0xfee   : > { %14669 = vrcp.f32 %v5891_v29  ;;  %8176 = vadd.xlane.f32.xlu1 %v20073_v41  ;;  %v18088_v49 = vpop.eup %14653  ;;  %v18109_v29 = vld [vmem:[#allocation6 + $0x1] ss:$8 sm:$0xf0] }
 0xfef   : > { %v5885_v19 = vpop.xlane.xlu1 %5884  ;;  %6079 = vst.msk [vmem:[#allocation6] sm:$0xff] %vm5059_vm0, %v6063_v17  ;;  %v18113_v17 = vld [vmem:[#allocation6 + $0x3] ss:$8 sm:$0xf0] }
 0xff0   : > { %v14656_v43 = vpop.eup %14655  ;;  %14671 = vrcp.f32 %v5885_v19  ;;  %8186 = vadd.xlane.f32.xlu0 %v20076_v18  ;;  %v18118_v19 = vld [vmem:[#allocation6 + $0x4] ss:$8 sm:$0xf0] }
 0xff1   : > { %v18096_v53 = vpop.eup %14657  ;;  %v6065_v34 = vmul.f32 %v14656_v43, %v20077_v31  ;;  %v5895_v10 = vpop.xlane.xlu0 %5894  ;;  %20079 = vst [vmem:[#allocation39_spill] sm:$0xff] %v18118_v19  ;;  %v18120_v43 = vld [vmem:[#allocation6 + $0x5] ss:$8 sm:$0xf0] }
 0xff2   : > { %v18099_v61 = vpop.eup %14659  ;;  %v9334_v15 = vpack.c.bf16 %v18096_v53, %v18080_v26  ;;  %14673 = vrcp.f32 %v5895_v10  ;;  %8180 = vadd.xlane.f32.xlu1 %v20078_v0  ;;  %20080 = vst [vmem:[#allocation38_spill] sm:$0xff] %v18120_v43  ;;  %v20081_v18 = vld [vmem:[#allocation114_spill] sm:$0xff] }
 0xff3   : > { %6081 = vst.msk [vmem:[#allocation6 + $0x10] sm:$0xff] %vm5059_vm0, %v6065_v34  ;;  %v5889_v51 = vpop.xlane.xlu1 %5888  ;;  %v9337_v25 = vpack.c.bf16 %v18088_v49, %v18099_v61  ;;  %v18125_v0 = vld [vmem:[#allocation6 + $0x6] ss:$8 sm:$0xf0] }
 0xff4   : > { %v14662_v1 = vpop.eup %14661  ;;  %12583 = vmatprep.mubr.bf16.mxu1 %v9334_v15  ;;  %14675 = vrcp.f32 %v5889_v51  ;;  %8720 = vadd.xlane.f32.xlu0 %v17731_v3  ;;  %20082 = vst [vmem:[#allocation106_spill] sm:$0xff] %v18125_v0  ;;  %v20084_v15 = vld [vmem:[#allocation190_spill] sm:$0xff] }
 0xff5   : > { %v18116_v41 = vpop.eup %14663  ;;  %v6067_v31 = vmul.f32 %v14662_v1, %v20081_v18  ;;  %12584 = vmatmul.mubr.bf16.gmra.mrb[216].mxu1 %v9335_v6  ;;  %v5899_v34 = vpop.xlane.xlu0 %5898  ;;  %v20085_v1 = vld [vmem:[#allocation112_spill] sm:$0xff]  ;;  %v20086_v18 = vld [vmem:[#allocation113_spill] sm:$0xff] }
 0xff6   : > { %v18123_v10 = vpop.eup %14665  ;;  %14677 = vrcp.f32 %v5899_v34  ;;  %8184 = vadd.xlane.f32.xlu1 %v20084_v15  ;;  %v20087_v15 = vld [vmem:[#allocation192_spill] sm:$0xff] }
 0xff7   : > { %v14668_v3 = vpop.eup %14667  ;;  %6083 = vst.msk [vmem:[#allocation6 + $0x20] sm:$0xff] %vm5059_vm0, %v6067_v31  ;;  %v5893_v51 = vpop.xlane.xlu1 %5892  ;;  %v9336_v19 = vpack.c.bf16 %v18116_v41, %v18123_v10  ;;  %v20088_v31 = vld [vmem:[#allocation111_spill] sm:$0xff] }
 0xff8   : > { %v14670_v52 = vpop.eup %14669  ;;  %v6064_v6 = vmul.f32 %v14668_v3, %v20085_v1  ;;  %14679 = vrcp.f32 %v5893_v51  ;;  %8724 = vadd.xlane.f32.xlu0 %v17736_v57  ;;  %v18140_v3 = vld [vmem:[#allocation6 + $0x41] ss:$8 sm:$0xf]  ;;  %v18142_v51 = vld [vmem:[#allocation6 + $0x42] ss:$8 sm:$0xf] }
 0xff9   : > { %v6069_v0 = vmul.f32 %v14670_v52, %v20086_v18  ;;  %12587 = vmatprep.mubr.bf16.mxu1 %v9336_v19  ;;  %v5903_v9 = vpop.xlane.xlu0 %5902  ;;  %v18144_v57 = vld [vmem:[#allocation6 + $0x43] ss:$8 sm:$0xf]  ;;  %v18147_v52 = vld [vmem:[#allocation6 + $0x44] ss:$8 sm:$0xf] }
 0xffa   : > { %v14672_v34 = vpop.eup %14671  ;;  %6080 = vst.msk [vmem:[#allocation6 + $0x8] sm:$0xff] %vm5059_vm0, %v6064_v6  ;;  %14681 = vrcp.f32 %v5903_v9  ;;  %8188 = vadd.xlane.f32.xlu1 %v20087_v15  ;;  %20089 = vst [vmem:[#allocation89_spill] sm:$0xff] %v18147_v52  ;;  %v18149_v9 = vld [vmem:[#allocation6 + $0x45] ss:$8 sm:$0xf] }
 0xffb   : > { %6085 = vst.msk [vmem:[#allocation6 + $0x30] sm:$0xff] %vm5059_vm0, %v6069_v0  ;;  %v6066_v2 = vmul.f32 %v14672_v34, %v20088_v31  ;;  %v5897_v56 = vpop.xlane.xlu1 %5896  ;;  %20090 = vst [vmem:[#allocation93_spill] sm:$0xff] %v18149_v9  ;;  %v20091_v19 = vld [vmem:[#allocation118_spill] sm:$0xff] }
 0xffc   : > { %v14674_v43 = vpop.eup %14673  ;;  %14683 = vrcp.f32 %v5897_v56  ;;  %8728 = vadd.xlane.f32.xlu0 %v17775_v23  ;;  %v18153_v18 = vld [vmem:[#allocation6 + $0x46] ss:$8 sm:$0xf]  ;;  %v18155_v34 = vld [vmem:[#allocation6 + $0x47] ss:$8 sm:$0xf] }
 0xffd   : > { %6082 = vst.msk [vmem:[#allocation6 + $0x18] sm:$0xff] %vm5059_vm0, %v6066_v2  ;;  %v6071_v0 = vmul.f32 %v14674_v43, %v20091_v19  ;;  %12588 = vmatmul.mubr.bf16.gmra.mrb[220].mxu1 %v9337_v25  ;;  %v5907_v1 = vpop.xlane.xlu0 %5906  ;;  %20092 = vst [vmem:[#allocation95_spill] sm:$0xff] %v18153_v18  ;;  %v20094_v23 = vld [vmem:[#allocation116_spill] sm:$0xff]  ;;  %v20095_v2 = vld [vmem:[#allocation117_spill] sm:$0xff] }
 0xffe   : > { %v14676_v6 = vpop.eup %14675  ;;  %20093 = vst [vmem:[#allocation42_spill] sm:$0xff] %v18155_v34  ;;  %14685 = vrcp.f32 %v5907_v1  ;;  %8722 = vadd.xlane.f32.xlu1 %v17733_v30  ;;  %v20096_v30 = vld [vmem:[#allocation115_spill] sm:$0xff] }
 0xfff   : > { %6087 = vst.msk [vmem:[#allocation6 + $0x40] sm:$0xff] %vm5059_vm0, %v6071_v0  ;;  %v6068_v56 = vmul.f32 %v14676_v6, %v20094_v23  ;;  %v5901_v15 = vpop.xlane.xlu1 %5900  ;;  %v18166_v23 = vld [vmem:[#allocation6 + $0x41] ss:$8 sm:$0xf0] }
0x1000   : > { %v14678_v31 = vpop.eup %14677  ;;  %14687 = vrcp.f32 %v5901_v15  ;;  %8732 = vadd.xlane.f32.xlu0 %v17784_v38  ;;  %v18168_v15 = vld [vmem:[#allocation6 + $0x42] ss:$8 sm:$0xf0]  ;;  %v18170_v38 = vld [vmem:[#allocation6 + $0x43] ss:$8 sm:$0xf0] }
0x1001   : > { %6084 = vst.msk [vmem:[#allocation6 + $0x28] sm:$0xff] %vm5059_vm0, %v6068_v56  ;;  %v6073_v25 = vmul.f32 %v14678_v31, %v20095_v2  ;;  %v6441_v43 = vpop.xlane.xlu0 %6440  ;;  %v18173_v56 = vld [vmem:[#allocation6 + $0x44] ss:$8 sm:$0xf0] }
0x1002   : > { %v14680_v19 = vpop.eup %14679  ;;  %14689 = vrcp.f32 %v6441_v43  ;;  %8726 = vadd.xlane.f32.xlu1 %v17729_v5  ;;  %20097 = vst [vmem:[#allocation94_spill] sm:$0xff] %v18173_v56  ;;  %v18175_v31 = vld [vmem:[#allocation6 + $0x45] ss:$8 sm:$0xf0] }
0x1003   : > { %6089 = vst.msk [vmem:[#allocation6 + $0x50] sm:$0xff] %vm5059_vm0, %v6073_v25  ;;  %v6070_v0 = vmul.f32 %v14680_v19, %v20096_v30  ;;  %v5905_v1 = vpop.xlane.xlu1 %5904  ;;  %20098 = vst [vmem:[#allocation43_spill] sm:$0xff] %v18175_v31  ;;  %v20099_v5 = vld [vmem:[#allocation122_spill] sm:$0xff] }
0x1004   : > { %v14682_v6 = vpop.eup %14681  ;;  %14691 = vrcp.f32 %v5905_v1  ;;  %8736 = vadd.xlane.f32.xlu0 %v17788_v8  ;;  %v18179_v19 = vld [vmem:[#allocation6 + $0x46] ss:$8 sm:$0xf0]  ;;  %v18181_v30 = vld [vmem:[#allocation6 + $0x47] ss:$8 sm:$0xf0] }
0x1005   : > { %6086 = vst.msk [vmem:[#allocation6 + $0x38] sm:$0xff] %vm5059_vm0, %v6070_v0  ;;  %v6075_v2 = vmul.f32 %v14682_v6, %v20099_v5  ;;  %v6445_v25 = vpop.xlane.xlu0 %6444  ;;  %20100 = vst [vmem:[#allocation92_spill] sm:$0xff] %v18179_v19  ;;  %v20102_v8 = vld [vmem:[#allocation120_spill] sm:$0xff]  ;;  %v20103_v0 = vld [vmem:[#allocation121_spill] sm:$0xff] }
0x1006   : > { %v14684_v43 = vpop.eup %14683  ;;  %20101 = vst [vmem:[#allocation96_spill] sm:$0xff] %v18181_v30  ;;  %14693 = vrcp.f32 %v6445_v25  ;;  %8730 = vadd.xlane.f32.xlu1 %v17781_v42  ;;  %v18190_v25 = vld [vmem:[#allocation6] ss:$8 sm:$0xf] }
0x1007   : > { %6091 = vst.msk [vmem:[#allocation6 + $0x60] sm:$0xff] %vm5059_vm0, %v6075_v2  ;;  %v6072_v1 = vmul.f32 %v14684_v43, %v20102_v8  ;;  %v5909_v56 = vpop.xlane.xlu1 %5908  ;;  %v20104_v42 = vld [vmem:[#allocation119_spill] sm:$0xff] }
0x1008   : > { %v14686_v52 = vpop.eup %14685  ;;  %14695 = vrcp.f32 %v5909_v56  ;;  %8740 = vadd.xlane.f32.xlu0 %v17797_v22  ;;  %v18194_v56 = vld [vmem:[#allocation6 + $0x1] ss:$8 sm:$0xf]  ;;  %v18196_v22 = vld [vmem:[#allocation6 + $0x2] ss:$8 sm:$0xf] }
0x1009   : > { %6088 = vst.msk [vmem:[#allocation6 + $0x48] sm:$0xff] %vm5059_vm0, %v6072_v1  ;;  %v6077_v6 = vmul.f32 %v14686_v52, %v20103_v0  ;;  %v6449_v5 = vpop.xlane.xlu0 %6448  ;;  %v18198_v1 = vld [vmem:[#allocation6 + $0x3] ss:$8 sm:$0xf] }
0x100a   : > { %v14688_v19 = vpop.eup %14687  ;;  %14697 = vrcp.f32 %v6449_v5  ;;  %8734 = vadd.xlane.f32.xlu1 %v17777_v14  ;;  %v18203_v14 = vld [vmem:[#allocation6 + $0x4] ss:$8 sm:$0xf]  ;;  %v18205_v0 = vld [vmem:[#allocation6 + $0x5] ss:$8 sm:$0xf] }
0x100b   : > { %6093 = vst.msk [vmem:[#allocation6 + $0x70] sm:$0xff] %vm5059_vm0, %v6077_v6  ;;  %v6074_v2 = vmul.f32 %v14688_v19, %v20104_v42  ;;  %v6443_v43 = vpop.xlane.xlu1 %6442  ;;  %20105 = vst [vmem:[#allocation41_spill] sm:$0xff] %v18203_v14  ;;  %v20107_v19 = vld [vmem:[#allocation135_spill] sm:$0xff] }
0x100c   : > { %v14690_v8 = vpop.eup %14689  ;;  %v18200_v52 = vld [vmem:[#allocation6] ss:$8 sm:$0xf0]  ;;  %14699 = vrcp.f32 %v6443_v43  ;;  %8744 = vadd.xlane.f32.xlu0 %v17806_v44  ;;  %20106 = vst [vmem:[#allocation98_spill] sm:$0xff] %v18205_v0 }
0x100d   : > { %6090 = vst.msk [vmem:[#allocation6 + $0x58] sm:$0xff] %vm5059_vm0, %v6074_v2  ;;  %v6593_v6 = vmul.f32 %v14690_v8, %v20107_v19  ;;  %v6453_v5 = vpop.xlane.xlu0 %6452  ;;  %v18211_v59 = vld [vmem:[#allocation6 + $0x6] ss:$8 sm:$0xf] }
0x100e   : > { %v14692_v18 = vpop.eup %14691  ;;  %20108 = vst [vmem:[#allocation44_spill] sm:$0xff] %v18211_v59  ;;  %v18213_v30 = vld [vmem:[#allocation6 + $0x7] ss:$8 sm:$0xf]  ;;  %14701 = vrcp.f32 %v6453_v5  ;;  %8738 = vadd.xlane.f32.xlu1 %v17779_v63 }
0x100f   : > { %20109 = vst [vmem:[#allocation100_spill] sm:$0xff] %v18213_v30  ;;  %6609 = vst.msk [vmem:[#allocation6] sm:$0xff] %vm5059_vm0, %v6593_v6  ;;  %v20110_v44 = vld [vmem:[#allocation124_spill] sm:$0xff]  ;;  %v6447_v14 = vpop.xlane.xlu1 %6446  ;;  %v20111_v8 = vld [vmem:[#allocation134_spill] sm:$0xff] }
0x1010   : > { %v6076_v43 = vmul.f32 %v14692_v18, %v20110_v44  ;;  %v14694_v2 = vpop.eup %14693  ;;  %14703 = vrcp.f32 %v6447_v14  ;;  %8748 = vadd.xlane.f32.xlu0 %v17815_v45  ;;  %v20112_v63 = vld [vmem:[#allocation123_spill] sm:$0xff]  ;;  %v14186_v44 = vld [vmem:[#allocation18 + $0xc] ss:$16 sps:$4 sm:$0xff]  }
0x1011   : > { %v6595_v19 = vmul.f32 %v14694_v2, %v20111_v8  ;;  %v6457_v42 = vpop.xlane.xlu0 %6456  ;;  %v14183_v18 = vld [vmem:[#allocation18 + $0x4] ss:$16 sps:$4 sm:$0xff]   ;;  %v18224_v14 = vld [vmem:[#allocation6 + $0x1] ss:$8 sm:$0xf0]  ;;  %10659 = vmatprep.subr.bf16.mxu0 %v14186_v44 }
0x1012   : > { %6092 = vst.msk [vmem:[#allocation6 + $0x68] sm:$0xff] %vm5059_vm0, %v6076_v43  ;;  %v14696_v59 = vpop.eup %14695  ;;  %14705 = vrcp.f32 %v6457_v42  ;;  %8742 = vadd.xlane.f32.xlu1 %v17799_v39  ;;  %v18226_v45 = vld [vmem:[#allocation6 + $0x2] ss:$8 sm:$0xf0]  ;;  %10433 = vmatprep.subr.bf16.mxu1 %v14183_v18 }
0x1013   : > { %6611 = vst.msk [vmem:[#allocation6 + $0x10] sm:$0xff] %vm5059_vm0, %v6595_v19  ;;  %v6078_v6 = vmul.f32 %v14696_v59, %v20112_v63  ;;  %v6451_v5 = vpop.xlane.xlu1 %6450  ;;  %v18228_v43 = vld [vmem:[#allocation6 + $0x3] ss:$8 sm:$0xf0] }
0x1014   : > { %v14698_v0 = vpop.eup %14697  ;;  %14707 = vrcp.f32 %v6451_v5  ;;  %9302 = vadd.xlane.f32.xlu0 %v18018_v58  ;;  %v18231_v42 = vld [vmem:[#allocation6 + $0x4] ss:$8 sm:$0xf0]  ;;  %v18233_v39 = vld [vmem:[#allocation6 + $0x5] ss:$8 sm:$0xf0] }
0x1015   : > { %20113 = vst [vmem:[#allocation97_spill] sm:$0xff] %v18231_v42  ;;  %20114 = vst [vmem:[#allocation102_spill] sm:$0xff] %v18233_v39  ;;  %v20115_v59 = vld [vmem:[#allocation139_spill] sm:$0xff]  ;;  %v6461_v8 = vpop.xlane.xlu0 %6460  ;;  %v20118_v58 = vld [vmem:[#allocation137_spill] sm:$0xff] }
0x1016   : > { %6094 = vst.msk [vmem:[#allocation6 + $0x78] sm:$0xff] %vm5059_vm0, %v6078_v6  ;;  %v6597_v2 = vmul.f32 %v14698_v0, %v20115_v59  ;;  %v14700_v19 = vpop.eup %14699  ;;  %v18237_v63 = vld [vmem:[#allocation6 + $0x6] ss:$8 sm:$0xf0]  ;;  %14709 = vrcp.f32 %v6461_v8  ;;  %8746 = vadd.xlane.f32.xlu1 %v17811_v12  ;;  %v14181_v0 = vld [vmem:[#allocation18] ss:$16 sps:$4 sm:$0xff]  }
0x1017   : > { %20116 = vst [vmem:[#allocation99_spill] sm:$0xff] %v18237_v63  ;;  %v18239_v30 = vld [vmem:[#allocation6 + $0x7] ss:$8 sm:$0xf0]  ;;  %v6594_v5 = vmul.f32 %v14700_v19, %v20118_v58  ;;  %v6455_v42 = vpop.xlane.xlu1 %6454  ;;  %v14184_v6 = vld [vmem:[#allocation18 + $0x8] ss:$16 sps:$4 sm:$0xff]   ;;  %10434 = vmatpush1.bf16.msra.mxu1 %v14181_v0 }
0x1018   : > { %20117 = vst [vmem:[#allocation101_spill] sm:$0xff] %v18239_v30  ;;  %6613 = vst.msk [vmem:[#allocation6 + $0x20] sm:$0xff] %vm5059_vm0, %v6597_v2  ;;  %v14702_v39 = vpop.eup %14701  ;;  %14711 = vrcp.f32 %v6455_v42  ;;  %9298 = vadd.xlane.f32.xlu0 %v18009_v4  ;;  %v20119_v18 = vld [vmem:[#allocation138_spill] sm:$0xff]  ;;  %v14189_v63 = vld [vmem:[#allocation18 + $0x24] ss:$16 sps:$4 sm:$0xff]   ;;  %10660 = vmatpush1.bf16.msra.mxu0 %v14184_v6 }
0x1019   : > { %6610 = vst.msk [vmem:[#allocation6 + $0x8] sm:$0xff] %vm5059_vm0, %v6594_v5  ;;  %v6599_v44 = vmul.f32 %v14702_v39, %v20119_v18  ;;  %v6465_v59 = vpop.xlane.xlu0 %6464  ;;  %v14192_v8 = vld [vmem:[#allocation18 + $0x2c] ss:$16 sps:$4 sm:$0xff]   ;;  %v18247_v12 = vld [vmem:[#allocation6 + $0x40] ss:$8 sm:$0xf]  ;;  %10435 = vmatprep.subr.bf16.mxu1 %v14189_v63 }
0x101a   : > { %v14704_v30 = vpop.eup %14703  ;;  %14713 = vrcp.f32 %v6465_v59  ;;  %8750 = vadd.xlane.f32.xlu1 %v17809_v48  ;;  %v14187_v2 = vld [vmem:[#allocation18 + $0x20] ss:$16 sps:$4 sm:$0xff]   ;;  %v20120_v4 = vld [vmem:[#allocation136_spill] sm:$0xff]  ;;  %v14195_v39 = vld [vmem:[#allocation18 + $0x44] ss:$16 sps:$4 sm:$0xff]   ;;  %10661 = vmatprep.subr.bf16.mxu0 %v14192_v8 }
0x101b   : > { %6615 = vst.msk [vmem:[#allocation6 + $0x30] sm:$0xff] %vm5059_vm0, %v6599_v44  ;;  %v6596_v42 = vmul.f32 %v14704_v30, %v20120_v4  ;;  %v6459_v19 = vpop.xlane.xlu1 %6458  ;;  %v14190_v58 = vld [vmem:[#allocation18 + $0x28] ss:$16 sps:$4 sm:$0xff]   ;;  %v14198_v48 = vld [vmem:[#allocation18 + $0x4c] ss:$16 sps:$4 sm:$0xff]   ;;  %v20124_v63 = vld [vmem:[#allocation143_spill] sm:$0xff]  ;;  %10436 = vmatpush1.bf16.msra.mxu1 %v14187_v2 }
0x101c   : > { %v14706_v5 = vpop.eup %14705  ;;  %v18252_v18 = vld [vmem:[#allocation6 + $0x41] ss:$8 sm:$0xf]  ;;  %v18254_v34 = vld [vmem:[#allocation6 + $0x42] ss:$8 sm:$0xf]  ;;  %14715 = vrcp.f32 %v6459_v19  ;;  %9310 = vadd.xlane.f32.xlu0 %v18040_v54  ;;  %10662 = vmatpush1.bf16.msra.mxu0 %v14190_v58 }
0x101d   : > { %20121 = vst [vmem:[#allocation49_spill] sm:$0xff] %v18254_v34  ;;  %v18256_v31 = vld [vmem:[#allocation6 + $0x43] ss:$8 sm:$0xf]  ;;  %6612 = vst.msk [vmem:[#allocation6 + $0x18] sm:$0xff] %vm5059_vm0, %v6596_v42  ;;  %v6601_v6 = vmul.f32 %v14706_v5, %v20124_v63  ;;  %v6469_v44 = vpop.xlane.xlu0 %6468  ;;  %10437 = vmatprep.subr.bf16.mxu1 %v14195_v39  ;;  %10663 = vmatprep.subr.bf16.mxu0 %v14198_v48 }
0x101e   : > { %v18258_v59 = vld [vmem:[#allocation6 + $0x40] ss:$8 sm:$0xf0]  ;;  %v18261_v30 = vld [vmem:[#allocation6 + $0x44] ss:$8 sm:$0xf]  ;;  %v14708_v9 = vpop.eup %14707  ;;  %14717 = vrcp.f32 %v6469_v44  ;;  %9304 = vadd.xlane.f32.xlu1 %v18020_v62 }
0x101f   : > { %20122 = vst [vmem:[#allocation103_spill] sm:$0xff] %v18261_v30  ;;  %v18263_v0 = vld [vmem:[#allocation6 + $0x45] ss:$8 sm:$0xf]  ;;  %v6463_v42 = vpop.xlane.xlu1 %6462  ;;  %v14193_v63 = vld [vmem:[#allocation18 + $0x40] ss:$16 sps:$4 sm:$0xff]  }
0x1020   : > { %20123 = vst [vmem:[#allocation46_spill] sm:$0xff] %v18263_v0  ;;  %v18269_v34 = vld [vmem:[#allocation6 + $0x46] ss:$8 sm:$0xf]  ;;  %v14710_v5 = vpop.eup %14709  ;;  %14719 = vrcp.f32 %v6463_v42  ;;  %9306 = vadd.xlane.f32.xlu0 %v18055_v50  ;;  %v14196_v4 = vld [vmem:[#allocation18 + $0x48] ss:$16 sps:$4 sm:$0xff]   ;;  %10438 = vmatpush1.bf16.msra.mxu1 %v14193_v63 }
0x1021   : > { %20125 = vst [vmem:[#allocation48_spill] sm:$0xff] %v18269_v34  ;;  %v18271_v19 = vld [vmem:[#allocation6 + $0x47] ss:$8 sm:$0xf]  ;;  %v7019_v62 = vpop.xlane.xlu0 %7018  ;;  %10664 = vmatpush1.bf16.msra.mxu0 %v14196_v4  ;;  %v14202_v48 = vld [vmem:[#allocation18 + $0x68] ss:$16 sps:$4 sm:$0xff]  }
0x1022   : > { %20126 = vst [vmem:[#allocation125_spill] sm:$0xff] %v18271_v19  ;;  %6617 = vst.msk [vmem:[#allocation6 + $0x40] sm:$0xff] %vm5059_vm0, %v6601_v6  ;;  %v20127_v54 = vld [vmem:[#allocation141_spill] sm:$0xff]  ;;  %v20128_v44 = vld [vmem:[#allocation142_spill] sm:$0xff]  ;;  %v14712_v6 = vpop.eup %14711  ;;  %14721 = vrcp.f32 %v7019_v62  ;;  %9300 = vadd.xlane.f32.xlu1 %v18007_v27 }
0x1023   : > { %v6598_v8 = vmul.f32 %v14708_v9, %v20127_v54  ;;  %v6603_v30 = vmul.f32 %v14710_v5, %v20128_v44  ;;  %v14201_v2 = vld [vmem:[#allocation18 + $0x64] ss:$16 sps:$4 sm:$0xff]   ;;  %v14204_v34 = vld [vmem:[#allocation18 + $0x6c] ss:$16 sps:$4 sm:$0xff]   ;;  %v14199_v9 = vld [vmem:[#allocation18 + $0x60] ss:$16 sps:$4 sm:$0xff]   ;;  %v6467_v39 = vpop.xlane.xlu1 %6466 }
0x1024   : > { %v20129_v58 = vld [vmem:[#allocation140_spill] sm:$0xff]  ;;  %10439 = vmatprep.subr.bf16.mxu1 %v14201_v2  ;;  %v14207_v54 = vld [vmem:[#allocation18 + $0x84] ss:$16 sps:$4 sm:$0xff]   ;;  %14723 = vrcp.f32 %v6467_v39  ;;  %9318 = vadd.xlane.f32.xlu0 %v18066_v21  ;;  %v14241_v19 = vld [vmem:[#allocation18 + $0x140] ss:$16 sps:$4 sm:$0xff]  }
0x1025   : > { %6614 = vst.msk [vmem:[#allocation6 + $0x28] sm:$0xff] %vm5059_vm0, %v6598_v8  ;;  %6619 = vst.msk [vmem:[#allocation6 + $0x50] sm:$0xff] %vm5059_vm0, %v6603_v30  ;;  %v6600_v50 = vmul.f32 %v14712_v6, %v20129_v58  ;;  %v14714_v8 = vpop.eup %14713  ;;  %v18282_v42 = vld [vmem:[#allocation6 + $0x41] ss:$8 sm:$0xf0]  ;;  %10665 = vmatprep.subr.bf16.mxu0 %v14204_v34  ;;  %v7023_v2 = vpop.xlane.xlu0 %7022  ;;  %10440 = vmatpush1.bf16.msra.mxu1 %v14199_v9 }
0x1026   : > { %v18284_v5 = vld [vmem:[#allocation6 + $0x42] ss:$8 sm:$0xf0]  ;;  %v18286_v44 = vld [vmem:[#allocation6 + $0x43] ss:$8 sm:$0xf0]  ;;  %v14716_v6 = vpop.eup %14715  ;;  %14725 = vrcp.f32 %v7023_v2  ;;  %9312 = vadd.xlane.f32.xlu1 %v18045_v13  ;;  %10666 = vmatpush1.bf16.msra.mxu0 %v14202_v48 }
0x1027   : > { %v14210_v27 = vld [vmem:[#allocation18 + $0x8c] ss:$16 sps:$4 sm:$0xff]   ;;  %6616 = vst.msk [vmem:[#allocation6 + $0x38] sm:$0xff] %vm5059_vm0, %v6600_v50  ;;  %v20132_v4 = vld [vmem:[#allocation147_spill] sm:$0xff]  ;;  %v20135_v21 = vld [vmem:[#allocation145_spill] sm:$0xff]  ;;  %v6471_v39 = vpop.xlane.xlu1 %6470  ;;  %10441 = vmatprep.subr.bf16.mxu1 %v14207_v54 }
0x1028   : > { %v18289_v30 = vld [vmem:[#allocation6 + $0x44] ss:$8 sm:$0xf0]  ;;  %v18291_v63 = vld [vmem:[#allocation6 + $0x45] ss:$8 sm:$0xf0]  ;;  %v6605_v62 = vmul.f32 %v14714_v8, %v20132_v4  ;;  %v6602_v34 = vmul.f32 %v14716_v6, %v20135_v21  ;;  %v14718_v50 = vpop.eup %14717  ;;  %14727 = vrcp.f32 %v6471_v39  ;;  %9314 = vadd.xlane.f32.xlu0 %v18080_v26  ;;  %10667 = vmatprep.subr.bf16.mxu0 %v14210_v27 }
0x1029   : > { %20130 = vst [vmem:[#allocation45_spill] sm:$0xff] %v18289_v30  ;;  %20131 = vst [vmem:[#allocation126_spill] sm:$0xff] %v18291_v63  ;;  %v18295_v58 = vld [vmem:[#allocation6 + $0x46] ss:$8 sm:$0xf0]  ;;  %v7027_v13 = vpop.xlane.xlu0 %7026 }
0x102a   : > { %20133 = vst [vmem:[#allocation50_spill] sm:$0xff] %v18295_v58  ;;  %v18297_v0 = vld [vmem:[#allocation6 + $0x47] ss:$8 sm:$0xf0]  ;;  %v14205_v8 = vld [vmem:[#allocation18 + $0x80] ss:$16 sps:$4 sm:$0xff]   ;;  %14729 = vrcp.f32 %v7027_v13  ;;  %9308 = vadd.xlane.f32.xlu1 %v18057_v20 }
0x102b   : > { %20134 = vst [vmem:[#allocation128_spill] sm:$0xff] %v18297_v0  ;;  %6621 = vst.msk [vmem:[#allocation6 + $0x60] sm:$0xff] %vm5059_vm0, %v6605_v62  ;;  %v14208_v4 = vld [vmem:[#allocation18 + $0x88] ss:$16 sps:$4 sm:$0xff]   ;;  %v14213_v9 = vld [vmem:[#allocation18 + $0xa4] ss:$16 sps:$4 sm:$0xff]   ;;  %v14720_v62 = vpop.eup %14719  ;;  %10442 = vmatpush1.bf16.msra.mxu1 %v14205_v8  ;;  %v7021_v27 = vpop.xlane.xlu1 %7020 }
0x102c   : > { %6618 = vst.msk [vmem:[#allocation6 + $0x48] sm:$0xff] %vm5059_vm0, %v6602_v34  ;;  %v20136_v2 = vld [vmem:[#allocation146_spill] sm:$0xff]  ;;  %v14211_v54 = vld [vmem:[#allocation18 + $0xa0] ss:$16 sps:$4 sm:$0xff]   ;;  %v20137_v26 = vld [vmem:[#allocation144_spill] sm:$0xff]  ;;  %10668 = vmatpush1.bf16.msra.mxu0 %v14208_v4  ;;  %10443 = vmatprep.subr.bf16.mxu1 %v14213_v9  ;;  %v14722_v39 = vpop.eup %14721  ;;  %14731 = vrcp.f32 %v7021_v27 }
0x102d   : > { %v6607_v30 = vmul.f32 %v14718_v50, %v20136_v2  ;;  %v14216_v58 = vld [vmem:[#allocation18 + $0xac] ss:$16 sps:$4 sm:$0xff]   ;;  %v18306_v48 = vld [vmem:[#allocation6] ss:$8 sm:$0xf]  ;;  %v6604_v6 = vmul.f32 %v14720_v62, %v20137_v26  ;;  %9322 = vadd.xlane.f32.xlu0 %v18123_v10  ;;  %v7031_v9 = vpop.xlane.xlu0 %7030 }
0x102e   : > { %v14214_v21 = vld [vmem:[#allocation18 + $0xa8] ss:$16 sps:$4 sm:$0xff]   ;;  %v14219_v34 = vld [vmem:[#allocation18 + $0xc4] ss:$16 sps:$4 sm:$0xff]   ;;  %10669 = vmatprep.subr.bf16.mxu0 %v14216_v58  ;;  %v14724_v27 = vpop.eup %14723  ;;  %14733 = vrcp.f32 %v7031_v9  ;;  %9320 = vadd.xlane.f32.xlu1 %v18064_v28  ;;  %v14217_v10 = vld [vmem:[#allocation18 + $0xc0] ss:$16 sps:$4 sm:$0xff]  }
0x102f   : > { %6623 = vst.msk [vmem:[#allocation6 + $0x70] sm:$0xff] %vm5059_vm0, %v6607_v30  ;;  %v18311_v50 = vld [vmem:[#allocation6] ss:$8 sm:$0xf0]  ;;  %v14222_v30 = vld [vmem:[#allocation18 + $0xcc] ss:$16 sps:$4 sm:$0xff]   ;;  %10444 = vmatpush1.bf16.msra.mxu1 %v14211_v54 }
0x1030   : > { %v18313_v20 = vld [vmem:[#allocation6 + $0x1] ss:$8 sm:$0xf]  ;;  %v18315_v2 = vld [vmem:[#allocation6 + $0x2] ss:$8 sm:$0xf]  ;;  %10670 = vmatpush1.bf16.msra.mxu0 %v14214_v21  ;;  %10445 = vmatprep.subr.bf16.mxu1 %v14219_v34 }
0x1031   : > { %20138 = vst [vmem:[#allocation47_spill] sm:$0xff] %v18315_v2  ;;  %v18317_v8 = vld [vmem:[#allocation6 + $0x4] ss:$8 sm:$0xf]  ;;  %6620 = vst.msk [vmem:[#allocation6 + $0x58] sm:$0xff] %vm5059_vm0, %v6604_v6  ;;  %9326 = vadd.xlane.f32.xlu0 %v18099_v61  ;;  %10671 = vmatprep.subr.bf16.mxu0 %v14222_v30 }
0x1032   : > { %20139 = vst [vmem:[#allocation130_spill] sm:$0xff] %v18317_v8  ;;  %v20140_v4 = vld [vmem:[#allocation57_spill] sm:$0xff]  ;;  %v14220_v9 = vld [vmem:[#allocation18 + $0xc8] ss:$16 sps:$4 sm:$0xff]   ;;  %v20145_v28 = vld [vmem:[#allocation55_spill] sm:$0xff]  ;;  %9316 = vadd.xlane.f32.xlu1 %v18096_v53 }
0x1033   : > { %v7203_v13 = vmul.f32 %v14722_v39, %v20140_v4  ;;  %v18321_v62 = vld [vmem:[#allocation6 + $0x5] ss:$8 sm:$0xf]  ;;  %v18323_v26 = vld [vmem:[#allocation6 + $0x6] ss:$8 sm:$0xf]  ;;  %v7025_v39 = vpop.xlane.xlu1 %7024  ;;  %v14726_v4 = vpop.eup %14725  ;;  %10446 = vmatpush1.bf16.msra.mxu1 %v14217_v10 }
0x1034   : > { %20141 = vst [vmem:[#allocation127_spill] sm:$0xff] %v18321_v62  ;;  %20142 = vst [vmem:[#allocation133_spill] sm:$0xff] %v18323_v26  ;;  %v18328_v63 = vld [vmem:[#allocation6 + $0x7] ss:$8 sm:$0xf]  ;;  %14735 = vrcp.f32 %v7025_v39  ;;  %v7205_v26 = vmul.f32 %v14726_v4, %v20145_v28  ;;  %10672 = vmatpush1.bf16.msra.mxu0 %v14220_v9 }
0x1035   : > { %20143 = vst [vmem:[#allocation129_spill] sm:$0xff] %v18328_v63  ;;  %v18330_v58 = vld [vmem:[#allocation6 + $0x3] ss:$8 sm:$0xf]  ;;  %v7035_v63 = vpop.xlane.xlu0 %7034  ;;  %v14225_v54 = vld [vmem:[#allocation18 + $0xe4] ss:$16 sps:$4 sm:$0xff]  }
0x1036   : > { %v20144_v6 = vld [vmem:[#allocation149_spill] sm:$0xff]  ;;  %7219 = vst.msk [vmem:[#allocation6] sm:$0xff] %vm5059_vm0, %v7203_v13  ;;  %v14228_v62 = vld [vmem:[#allocation18 + $0xec] ss:$16 sps:$4 sm:$0xff]   ;;  %14737 = vrcp.f32 %v7035_v63  ;;  %7221 = vst.msk [vmem:[#allocation6 + $0x10] sm:$0xff] %vm5059_vm0, %v7205_v26  ;;  %10447 = vmatprep.subr.bf16.mxu1 %v14225_v54  ;;  %9324 = vadd.xlane.f32.xlu1 %v18116_v41 }
0x1037   : > { %v6606_v8 = vmul.f32 %v14724_v27, %v20144_v6  ;;  %v14728_v27 = vpop.eup %14727  ;;  %v14223_v21 = vld [vmem:[#allocation18 + $0xe0] ss:$16 sps:$4 sm:$0xff]   ;;  %v20146_v34 = vld [vmem:[#allocation148_spill] sm:$0xff]  ;;  %v7029_v6 = vpop.xlane.xlu1 %7028  ;;  %10673 = vmatprep.subr.bf16.mxu0 %v14228_v62 }
0x1038   : > { %v6608_v13 = vmul.f32 %v14728_v27, %v20146_v34  ;;  %v14226_v61 = vld [vmem:[#allocation18 + $0xe8] ss:$16 sps:$4 sm:$0xff]   ;;  %v14730_v30 = vpop.eup %14729  ;;  %14739 = vrcp.f32 %v7029_v6  ;;  %v18344_v63 = vld [vmem:[#allocation6 + $0x4] ss:$8 sm:$0xf0]  ;;  %10448 = vmatpush1.bf16.msra.mxu1 %v14223_v21 }
0x1039   : > { %6622 = vst.msk [vmem:[#allocation6 + $0x68] sm:$0xff] %vm5059_vm0, %v6606_v8  ;;  %v14231_v8 = vld [vmem:[#allocation18 + $0x104] ss:$16 sps:$4 sm:$0xff]   ;;  %v18340_v39 = vld [vmem:[#allocation6 + $0x1] ss:$8 sm:$0xf0]  ;;  %v7039_v27 = vpop.xlane.xlu0 %7038  ;;  %v14732_v54 = vpop.eup %14731  ;;  %10674 = vmatpush1.bf16.msra.mxu0 %v14226_v61 }
0x103a   : > { %v18342_v4 = vld [vmem:[#allocation6 + $0x2] ss:$8 sm:$0xf0]  ;;  %20148 = vst [vmem:[#allocation131_spill] sm:$0xff] %v18344_v63  ;;  %v14234_v53 = vld [vmem:[#allocation18 + $0x10c] ss:$16 sps:$4 sm:$0xff]   ;;  %14741 = vrcp.f32 %v7039_v27  ;;  %10449 = vmatprep.subr.bf16.mxu1 %v14231_v8  ;;  %9328 = vadd.xlane.f32.xlu1 %v18088_v49 }
0x103b   : > { %20147 = vst [vmem:[#allocation132_spill] sm:$0xff] %v18342_v4  ;;  %6624 = vst.msk [vmem:[#allocation6 + $0x78] sm:$0xff] %vm5059_vm0, %v6608_v13  ;;  %v20149_v10 = vld [vmem:[#allocation65_spill] sm:$0xff]  ;;  %v7033_v0 = vpop.xlane.xlu1 %7032  ;;  %v14734_v13 = vpop.eup %14733  ;;  %10675 = vmatprep.subr.bf16.mxu0 %v14234_v53  ;;  %v20154_v27 = vld [vmem:[#allocation63_spill] sm:$0xff] }
0x103c   : > { %v7207_v28 = vmul.f32 %v14730_v30, %v20149_v10  ;;  %v18348_v26 = vld [vmem:[#allocation6 + $0x5] ss:$8 sm:$0xf0]  ;;  %v18350_v9 = vld [vmem:[#allocation6 + $0x6] ss:$8 sm:$0xf0]  ;;  %14743 = vrcp.f32 %v7033_v0 }
0x103d   : > { %20150 = vst [vmem:[#allocation73_spill] sm:$0xff] %v18348_v26  ;;  %20151 = vst [vmem:[#allocation51_spill] sm:$0xff] %v18350_v9  ;;  %v18353_v34 = vld [vmem:[#allocation6 + $0x7] ss:$8 sm:$0xf0]  ;;  %v7209_v9 = vmul.f32 %v14734_v13, %v20154_v27  ;;  %v7043_v41 = vpop.xlane.xlu0 %7042 }
0x103e   : > { %20152 = vst [vmem:[#allocation75_spill] sm:$0xff] %v18353_v34  ;;  %v18355_v6 = vld [vmem:[#allocation6 + $0x3] ss:$8 sm:$0xf0]  ;;  %v14237_v34 = vld [vmem:[#allocation18 + $0x124] ss:$16 sps:$4 sm:$0xff]   ;;  %v14736_v21 = vpop.eup %14735  ;;  %14745 = vrcp.f32 %v7043_v41 }
0x103f   : > { %v20153_v62 = vld [vmem:[#allocation61_spill] sm:$0xff]  ;;  %7223 = vst.msk [vmem:[#allocation6 + $0x20] sm:$0xff] %vm5059_vm0, %v7207_v28  ;;  %v14232_v10 = vld [vmem:[#allocation18 + $0x108] ss:$16 sps:$4 sm:$0xff]   ;;  %v14240_v26 = vld [vmem:[#allocation18 + $0x12c] ss:$16 sps:$4 sm:$0xff]  }
0x1040   : > { %v7204_v63 = vmul.f32 %v14732_v54, %v20153_v62  ;;  %v14229_v30 = vld [vmem:[#allocation18 + $0x100] ss:$16 sps:$4 sm:$0xff]   ;;  %v7037_v54 = vpop.xlane.xlu1 %7036  ;;  %7225 = vst.msk [vmem:[#allocation6 + $0x30] sm:$0xff] %vm5059_vm0, %v7209_v9  ;;  %10676 = vmatpush1.bf16.msra.mxu0 %v14232_v10  ;;  %v14238_v0 = vld [vmem:[#allocation18 + $0x128] ss:$16 sps:$4 sm:$0xff]   ;;  %v14738_v62 = vpop.eup %14737 }
0x1041   : > { %10450 = vmatpush1.bf16.msra.mxu1 %v14229_v30  ;;  %v14235_v28 = vld [vmem:[#allocation18 + $0x120] ss:$16 sps:$4 sm:$0xff]   ;;  %v14243_v53 = vld [vmem:[#allocation18 + $0x144] ss:$16 sps:$4 sm:$0xff]   ;;  %14747 = vrcp.f32 %v7037_v54  ;;  %10677 = vmatprep.subr.bf16.mxu0 %v14240_v26  ;;  %v20159_v41 = vld [vmem:[#allocation154_spill] sm:$0xff]  ;;  %v7047_v9 = vpop.xlane.xlu0 %7046 }
0x1042   : > { %7220 = vst.msk [vmem:[#allocation6 + $0x8] sm:$0xff] %vm5059_vm0, %v7204_v63  ;;  %v20155_v61 = vld [vmem:[#allocation59_spill] sm:$0xff]  ;;  %10451 = vmatprep.subr.bf16.mxu1 %v14237_v34  ;;  %14749 = vrcp.f32 %v7047_v9  ;;  %v14244_v26 = vld [vmem:[#allocation18 + $0x148] ss:$16 sps:$4 sm:$0xff]  }
0x1043   : > { %v7206_v8 = vmul.f32 %v14736_v21, %v20155_v61  ;;  %v18364_v63 = vld [vmem:[#allocation6 + $0x40] ss:$8 sm:$0xf]  ;;  %v18366_v13 = vld [vmem:[#allocation6 + $0x41] ss:$8 sm:$0xf]  ;;  %v7211_v21 = vmul.f32 %v14738_v62, %v20159_v41  ;;  %v14740_v61 = vpop.eup %14739 }
0x1044   : > { %v18368_v27 = vld [vmem:[#allocation6 + $0x42] ss:$8 sm:$0xf]  ;;  %v18370_v49 = vld [vmem:[#allocation6 + $0x44] ss:$8 sm:$0xf]  ;;  %v7041_v4 = vpop.xlane.xlu1 %7040  ;;  %10678 = vmatpush1.bf16.msra.mxu0 %v14238_v0  ;;  %v14742_v62 = vpop.eup %14741  ;;  %v5496_v0 = vor.u32 %v18113_v17, %v18078_v47 }
0x1045   : > { %20156 = vst [vmem:[#allocation54_spill] sm:$0xff] %v18368_v27  ;;  %20157 = vst [vmem:[#allocation79_spill] sm:$0xff] %v18370_v49  ;;  %v18372_v30 = vld [vmem:[#allocation6 + $0x45] ss:$8 sm:$0xf]  ;;  %10452 = vmatpush1.bf16.msra.mxu1 %v14235_v28  ;;  %14751 = vrcp.f32 %v7041_v4 }
0x1046   : > { %20158 = vst [vmem:[#allocation71_spill] sm:$0xff] %v18372_v30  ;;  %v18375_v10 = vld [vmem:[#allocation6 + $0x46] ss:$8 sm:$0xf]  ;;  %7222 = vst.msk [vmem:[#allocation6 + $0x18] sm:$0xff] %vm5059_vm0, %v7206_v8  ;;  %10453 = vmatprep.subr.bf16.mxu1 %v14243_v53  ;;  %v5500_v8 = vor.u32 %v18170_v38, %v18144_v57 }
0x1047   : > { %20160 = vst [vmem:[#allocation83_spill] sm:$0xff] %v18375_v10  ;;  %v18377_v34 = vld [vmem:[#allocation6 + $0x47] ss:$8 sm:$0xf]  ;;  %v14247_v4 = vld [vmem:[#allocation18 + $0x160] ss:$16 sps:$4 sm:$0xff]  }
0x1048   : > { %20161 = vst [vmem:[#allocation77_spill] sm:$0xff] %v18377_v34  ;;  %v18380_v54 = vld [vmem:[#allocation6 + $0x43] ss:$8 sm:$0xf]  ;;  %v14246_v41 = vld [vmem:[#allocation18 + $0x14c] ss:$16 sps:$4 sm:$0xff]   ;;  %v7045_v53 = vpop.xlane.xlu1 %7044  ;;  %v13301_v28 = vpack.i.bf16 %v5500_v8, %v5496_v0 }
0x1049   : > { %v20162_v27 = vld [vmem:[#allocation69_spill] sm:$0xff]  ;;  %7227 = vst.msk [vmem:[#allocation6 + $0x40] sm:$0xff] %vm5059_vm0, %v7211_v21  ;;  %v14252_v34 = vld [vmem:[#allocation18 + $0x16c] ss:$16 sps:$4 sm:$0xff]   ;;  %v14744_v21 = vpop.eup %14743  ;;  %10679 = vmatprep.subr.bf16.mxu0 %v14246_v41  ;;  %10454 = vmatpush1.bf16.msra.mxu1 %v14241_v19  ;;  %v20164_v57 = vld [vmem:[#allocation67_spill] sm:$0xff] }
0x104a   : > { %v7208_v49 = vmul.f32 %v14740_v61, %v20162_v27  ;;  %v18383_v30 = vld [vmem:[#allocation6 + $0x40] ss:$8 sm:$0xf0]  ;;  %v14249_v9 = vld [vmem:[#allocation18 + $0x164] ss:$16 sps:$4 sm:$0xff]   ;;  %v7581_v61 = vpop.xlane.xlu0 %7580  ;;  %v7210_v38 = vmul.f32 %v14744_v21, %v20164_v57  ;;  %10680 = vmatpush1.bf16.msra.mxu0 %v14244_v26  ;;  %v5484_v26 = vor.u32 %v18166_v23, %v18140_v3  ;;  %13302 = vrot.lane.b32.xlu0 %v13301_v28, %s15242_s8 }
0x104b   : > { %v20163_v10 = vld [vmem:[#allocation153_spill] sm:$0xff]  ;;  %14753 = vrcp.f32 %v7581_v61  ;;  %10455 = vmatprep.subr.bf16.mxu1 %v14249_v9  ;;  %v6106_v61 = vor.u32 %v18282_v42, %v18252_v18  ;;  %10681 = vmatprep.subr.bf16.mxu0 %v14252_v34  ;;  %v20166_v19 = vld [vmem:[#allocation158_spill] sm:$0xff]  ;;  %v6103_v18 = vor.u32 %v18224_v14, %v18194_v56  ;;  %v20168_v0 = vld [vmem:[#allocation156_spill] sm:$0xff]  ;;  %v5480_v57 = vor.u32 %v18109_v29, %v18074_v60 }
0x104c   : > { %v7213_v27 = vmul.f32 %v14742_v62, %v20163_v10  ;;  %7224 = vst.msk [vmem:[#allocation6 + $0x28] sm:$0xff] %vm5059_vm0, %v7208_v49  ;;  %v6635_v2 = vld [vmem:[#allocation6 + $0x41] ss:$8 sm:$0xf0]  ;;  %v14255_v62 = vld [vmem:[#allocation18 + $0x184] ss:$16 sps:$4 sm:$0xff]   ;;  %v14746_v49 = vpop.eup %14745  ;;  %14755 = vrcp.f32 %v7045_v53  ;;  %v7049_v23 = vpop.xlane.xlu1 %7048  ;;  %v6118_v60 = vor.u32 %v18286_v44, %v18256_v31 }
0x104d   : > { %v14250_v10 = vld [vmem:[#allocation18 + $0x168] ss:$16 sps:$4 sm:$0xff]   ;;  %v18400_v17 = vld [vmem:[#allocation6 + $0x44] ss:$8 sm:$0xf0]  ;;  %v7215_v41 = vmul.f32 %v14746_v49, %v20166_v19  ;;  %7226 = vst.msk [vmem:[#allocation6 + $0x38] sm:$0xff] %vm5059_vm0, %v7210_v38  ;;  %v14748_v8 = vpop.eup %14747  ;;  %10456 = vmatpush1.bf16.msra.mxu1 %v14247_v4  ;;  %v13316_v53 = vpack.i.bf16 %v6106_v61, %v6103_v18  ;;  %v6636_v56 = vor.u32 %v6635_v2, %v18366_v13 }
0x104e   : > { %7229 = vst.msk [vmem:[#allocation6 + $0x50] sm:$0xff] %vm5059_vm0, %v7213_v27  ;;  %v18398_v47 = vld [vmem:[#allocation6 + $0x42] ss:$8 sm:$0xf0]  ;;  %20165 = vst [vmem:[#allocation151_spill] sm:$0xff] %v18400_v17  ;;  %v7585_v21 = vpop.xlane.xlu0 %7584  ;;  %v7212_v3 = vmul.f32 %v14748_v8, %v20168_v0  ;;  %10682 = vmatpush1.bf16.msra.mxu0 %v14250_v10  ;;  %10457 = vmatprep.subr.bf16.mxu1 %v14255_v62  ;;  %v14750_v28 = vpop.eup %14749  ;;  %v13306_v0 = vpack.i.bf16 %v5484_v26, %v5480_v57 }
0x104f   : > { %v18405_v9 = vld [vmem:[#allocation6 + $0x45] ss:$8 sm:$0xf0]  ;;  %v18407_v27 = vld [vmem:[#allocation6 + $0x46] ss:$8 sm:$0xf0]  ;;  %14757 = vrcp.f32 %v7585_v21  ;;  %v14752_v10 = vpop.eup %14751  ;;  %13317 = vrot.lane.b32.xlu0 %v13316_v53, %s15242_s8  ;;  %v6633_v2 = vor.u32 %v18340_v39, %v18313_v20 }
0x1050   : > { %20167 = vst [vmem:[#allocation81_spill] sm:$0xff] %v18407_v27  ;;  %v18413_v42 = vld [vmem:[#allocation6 + $0x47] ss:$8 sm:$0xf0]  ;;  %v14253_v38 = vld [vmem:[#allocation18 + $0x180] ss:$16 sps:$4 sm:$0xff]   ;;  %14759 = vrcp.f32 %v7049_v23  ;;  %v7583_v61 = vpop.xlane.xlu1 %7582  ;;  %13307 = vrot.lane.b32.xlu1 %v13306_v0, %s15242_s8 }
0x1051   : > { %v18415_v34 = vld [vmem:[#allocation6 + $0x43] ss:$8 sm:$0xf0]  ;;  %v14258_v49 = vld [vmem:[#allocation18 + $0x18c] ss:$16 sps:$4 sm:$0xff]   ;;  %7228 = vst.msk [vmem:[#allocation6 + $0x48] sm:$0xff] %vm5059_vm0, %v7212_v3  ;;  %10458 = vmatpush1.bf16.msra.mxu1 %v14253_v38  ;;  %v13326_v18 = vpack.i.bf16 %v6636_v56, %v6633_v2 }
0x1052   : > { %7231 = vst.msk [vmem:[#allocation6 + $0x60] sm:$0xff] %vm5059_vm0, %v7215_v41  ;;  %v14256_v14 = vld [vmem:[#allocation18 + $0x188] ss:$16 sps:$4 sm:$0xff]   ;;  %v14261_v19 = vld [vmem:[#allocation18 + $0x1a4] ss:$16 sps:$4 sm:$0xff]   ;;  %v7589_v8 = vpop.xlane.xlu0 %7588  ;;  %10683 = vmatprep.subr.bf16.mxu0 %v14258_v49  ;;  %v6115_v41 = vor.u32 %v18228_v43, %v18198_v1  ;;  %v6648_v56 = vor.u32 %v18415_v34, %v18380_v54  ;;  %v6645_v34 = vor.u32 %v18355_v6, %v18330_v58 }
0x1053   : > { %v20169_v4 = vld [vmem:[#allocation157_spill] sm:$0xff]  ;;  %v14264_v29 = vld [vmem:[#allocation18 + $0x1ac] ss:$16 sps:$4 sm:$0xff]   ;;  %14761 = vrcp.f32 %v7589_v8  ;;  %v20170_v13 = vld [vmem:[#allocation155_spill] sm:$0xff]  ;;  %10684 = vmatpush1.bf16.msra.mxu0 %v14256_v14  ;;  %10459 = vmatprep.subr.bf16.mxu1 %v14261_v19 }
0x1054   : > { %v7217_v21 = vmul.f32 %v14750_v28, %v20169_v4  ;;  %v7214_v62 = vmul.f32 %v14752_v10, %v20170_v13  ;;  %v18434_v31 = vld [vmem:[#allocation6] ss:$8 sm:$0xf]  ;;  %14763 = vrcp.f32 %v7583_v61  ;;  %v18436_v3 = vld [vmem:[#allocation6 + $0x3] ss:$8 sm:$0xf]  ;;  %v13311_v49 = vpack.i.bf16 %v6118_v60, %v6115_v41  ;;  %10685 = vmatprep.subr.bf16.mxu0 %v14264_v29  ;;  %13327 = vrot.lane.b32.xlu0 %v13326_v18, %s15242_s8  ;;  %v7587_v54 = vpop.xlane.xlu1 %7586 }
0x1055   : > { %v14259_v44 = vld [vmem:[#allocation18 + $0x1a0] ss:$16 sps:$4 sm:$0xff]   ;;  %v14754_v26 = vpop.eup %14753  ;;  %v18442_v23 = vld [vmem:[#allocation6 + $0x4] ss:$8 sm:$0xf] }
0x1056   : > { %7233 = vst.msk [vmem:[#allocation6 + $0x70] sm:$0xff] %vm5059_vm0, %v7217_v21  ;;  %v18438_v20 = vld [vmem:[#allocation6 + $0x1] ss:$8 sm:$0xf]  ;;  %20171 = vst [vmem:[#allocation150_spill] sm:$0xff] %v18442_v23  ;;  %v7593_v53 = vpop.xlane.xlu0 %7592  ;;  %v14756_v8 = vpop.eup %14755  ;;  %13312 = vrot.lane.b32.xlu1 %v13311_v49, %s15242_s8  ;;  %10460 = vmatpush1.bf16.msra.mxu1 %v14259_v44 }
0x1057   : > { %v18440_v39 = vld [vmem:[#allocation6 + $0x2] ss:$8 sm:$0xf]  ;;  %v18444_v57 = vld [vmem:[#allocation6 + $0x5] ss:$8 sm:$0xf]  ;;  %14765 = vrcp.f32 %v7593_v53 }
0x1058   : > { %20172 = vst [vmem:[#allocation152_spill] sm:$0xff] %v18444_v57  ;;  %v14262_v1 = vld [vmem:[#allocation18 + $0x1a8] ss:$16 sps:$4 sm:$0xff]   ;;  %v14267_v43 = vld [vmem:[#allocation18 + $0x1c4] ss:$16 sps:$4 sm:$0xff]   ;;  %7230 = vst.msk [vmem:[#allocation6 + $0x58] sm:$0xff] %vm5059_vm0, %v7214_v62  ;;  %14767 = vrcp.f32 %v7587_v54  ;;  %v7591_v44 = vpop.xlane.xlu1 %7590 }
0x1059   : > { %v20173_v28 = vld [vmem:[#allocation173_spill] sm:$0xff]  ;;  %v14270_v21 = vld [vmem:[#allocation18 + $0x1cc] ss:$16 sps:$4 sm:$0xff]   ;;  %v14758_v29 = vpop.eup %14757  ;;  %10686 = vmatpush1.bf16.msra.mxu0 %v14262_v1  ;;  %10461 = vmatprep.subr.bf16.mxu1 %v14267_v43  ;;  %v14268_v13 = vld [vmem:[#allocation18 + $0x1c8] ss:$16 sps:$4 sm:$0xff]  }
0x105a   : > { %v7733_v38 = vmul.f32 %v14754_v26, %v20173_v28  ;;  %v18450_v4 = vld [vmem:[#allocation6] ss:$8 sm:$0xf0]  ;;  %v18453_v14 = vld [vmem:[#allocation6 + $0x6] ss:$8 sm:$0xf]  ;;  %v7597_v41 = vpop.xlane.xlu0 %7596  ;;  %v13321_v26 = vpack.i.bf16 %v6648_v56, %v6645_v34  ;;  %10687 = vmatprep.subr.bf16.mxu0 %v14270_v21  ;;  %v14760_v53 = vpop.eup %14759 }
0x105b   : > { %20174 = vst [vmem:[#allocation161_spill] sm:$0xff] %v18453_v14  ;;  %v18455_v19 = vld [vmem:[#allocation6 + $0x7] ss:$8 sm:$0xf]  ;;  %v14265_v2 = vld [vmem:[#allocation18 + $0x1c0] ss:$16 sps:$4 sm:$0xff]   ;;  %14769 = vrcp.f32 %v7597_v41 }
0x105c   : > { %20175 = vst [vmem:[#allocation165_spill] sm:$0xff] %v18455_v19  ;;  %v20176_v60 = vld [vmem:[#allocation160_spill] sm:$0xff]  ;;  %7749 = vst.msk [vmem:[#allocation6] sm:$0xff] %vm5059_vm0, %v7733_v38  ;;  %v14273_v18 = vld [vmem:[#allocation18 + $0x1e4] ss:$16 sps:$4 sm:$0xff]   ;;  %13322 = vrot.lane.b32.xlu1 %v13321_v26, %s15242_s8  ;;  %10462 = vmatpush1.bf16.msra.mxu1 %v14265_v2  ;;  %14771 = vrcp.f32 %v7591_v44  ;;  %v7595_v41 = vpop.xlane.xlu1 %7594 }
0x105d   : > { %v7216_v10 = vmul.f32 %v14756_v8, %v20176_v60  ;;  %v20177_v62 = vld [vmem:[#allocation172_spill] sm:$0xff]  ;;  %v20178_v58 = vld [vmem:[#allocation159_spill] sm:$0xff]  ;;  %v14762_v43 = vpop.eup %14761  ;;  %10688 = vmatpush1.bf16.msra.mxu0 %v14268_v13  ;;  %10463 = vmatprep.subr.bf16.mxu1 %v14273_v18  ;;  %v20179_v8 = vld [vmem:[#allocation177_spill] sm:$0xff] }
0x105e   : > { %v7735_v61 = vmul.f32 %v14758_v29, %v20177_v62  ;;  %v14276_v28 = vld [vmem:[#allocation18 + $0x1ec] ss:$16 sps:$4 sm:$0xff]   ;;  %v7218_v6 = vmul.f32 %v14760_v53, %v20178_v58  ;;  %v14271_v1 = vld [vmem:[#allocation18 + $0x1e0] ss:$16 sps:$4 sm:$0xff]   ;;  %v14274_v21 = vld [vmem:[#allocation18 + $0x1e8] ss:$16 sps:$4 sm:$0xff]   ;;  %v7737_v60 = vmul.f32 %v14762_v43, %v20179_v8  ;;  %v14764_v29 = vpop.eup %14763 }
0x105f   : > { %7232 = vst.msk [vmem:[#allocation6 + $0x68] sm:$0xff] %vm5059_vm0, %v7216_v10  ;;  %v7254_v38 = vld [vmem:[#allocation6 + $0x3] ss:$8 sm:$0xf0]  ;;  %v7601_v10 = vpop.xlane.xlu0 %7600  ;;  %10689 = vmatprep.subr.bf16.mxu0 %v14276_v28 }
0x1060   : > { %7751 = vst.msk [vmem:[#allocation6 + $0x10] sm:$0xff] %vm5059_vm0, %v7735_v61  ;;  %v7242_v49 = vld [vmem:[#allocation6 + $0x1] ss:$8 sm:$0xf0]  ;;  %7234 = vst.msk [vmem:[#allocation6 + $0x78] sm:$0xff] %vm5059_vm0, %v7218_v6  ;;  %14773 = vrcp.f32 %v7601_v10  ;;  %10464 = vmatpush1.bf16.msra.mxu1 %v14271_v1  ;;  %v7599_v8 = vpop.xlane.xlu1 %7598 }
0x1061   : > { %v18469_v56 = vld [vmem:[#allocation6 + $0x2] ss:$8 sm:$0xf0]  ;;  %v18473_v54 = vld [vmem:[#allocation6 + $0x4] ss:$8 sm:$0xf0]  ;;  %v14766_v26 = vpop.eup %14765  ;;  %14775 = vrcp.f32 %v7595_v41  ;;  %10690 = vmatpush1.bf16.msra.mxu0 %v14274_v21  ;;  %v7255_v21 = vor.u32 %v7254_v38, %v18436_v3 }
0x1062   : > { %20180 = vst [vmem:[#allocation164_spill] sm:$0xff] %v18473_v54  ;;  %v18475_v34 = vld [vmem:[#allocation6 + $0x5] ss:$8 sm:$0xf0]  ;;  %v14768_v28 = vpop.eup %14767 }
0x1063   : > { %20181 = vst [vmem:[#allocation166_spill] sm:$0xff] %v18475_v34  ;;  %v18477_v2 = vld [vmem:[#allocation6 + $0x6] ss:$8 sm:$0xf0]  ;;  %v7605_v58 = vpop.xlane.xlu0 %7604 }
0x1064   : > { %20182 = vst [vmem:[#allocation162_spill] sm:$0xff] %v18477_v2  ;;  %v18479_v62 = vld [vmem:[#allocation6 + $0x7] ss:$8 sm:$0xf0]  ;;  %14777 = vrcp.f32 %v7605_v58 }
0x1065   : > { %20183 = vst [vmem:[#allocation168_spill] sm:$0xff] %v18479_v62  ;;  %v20184_v61 = vld [vmem:[#allocation175_spill] sm:$0xff]  ;;  %7753 = vst.msk [vmem:[#allocation6 + $0x20] sm:$0xff] %vm5059_vm0, %v7737_v60  ;;  %v20185_v18 = vld [vmem:[#allocation176_spill] sm:$0xff]  ;;  %v14770_v1 = vpop.eup %14769  ;;  %14779 = vrcp.f32 %v7599_v8 }
0x1066   : > { %v7734_v13 = vmul.f32 %v14764_v29, %v20184_v61  ;;  %v7739_v53 = vmul.f32 %v14766_v26, %v20185_v18  ;;  %v7256_v6 = vld [vmem:[#allocation6 + $0x43] ss:$8 sm:$0xf]  ;;  %v7244_v10 = vld [vmem:[#allocation6 + $0x41] ss:$8 sm:$0xf]  ;;  %v14772_v3 = vpop.eup %14771 }
0x1067   : > { %v20186_v44 = vld [vmem:[#allocation174_spill] sm:$0xff]  ;;  %v20188_v26 = vld [vmem:[#allocation181_spill] sm:$0xff]  ;;  %v7609_v58 = vpop.xlane.xlu0 %7608  ;;  %v20209_v2 = vld [vmem:[#allocation187_spill] sm:$0xff] }
0x1068   : > { %7750 = vst.msk [vmem:[#allocation6 + $0x8] sm:$0xff] %vm5059_vm0, %v7734_v13  ;;  %v7736_v43 = vmul.f32 %v14768_v28, %v20186_v44  ;;  %v18486_v29 = vld [vmem:[#allocation6 + $0x40] ss:$8 sm:$0xf]  ;;  %7755 = vst.msk [vmem:[#allocation6 + $0x30] sm:$0xff] %vm5059_vm0, %v7739_v53  ;;  %v7741_v18 = vmul.f32 %v14770_v1, %v20188_v26  ;;  %v7243_v44 = vor.u32 %v7242_v49, %v18438_v20  ;;  %14781 = vrcp.f32 %v7609_v58 }
0x1069   : > { %v7257_v60 = vld [vmem:[#allocation6 + $0x43] ss:$8 sm:$0xf0]  ;;  %v7245_v61 = vld [vmem:[#allocation6 + $0x41] ss:$8 sm:$0xf0] }
0x106a   : > { %v18490_v41 = vld [vmem:[#allocation6 + $0x42] ss:$8 sm:$0xf]  ;;  %v18492_v13 = vld [vmem:[#allocation6 + $0x44] ss:$8 sm:$0xf]  ;;  %v7258_v28 = vor.u32 %v7257_v60, %v7256_v6  ;;  %v7246_v0 = vor.u32 %v7245_v61, %v7244_v10  ;;  %v7603_v60 = vpop.xlane.xlu1 %7602  ;;  %v14774_v10 = vpop.eup %14773 }
0x106b   : > { %20187 = vst [vmem:[#allocation163_spill] sm:$0xff] %v18492_v13  ;;  %v18496_v54 = vld [vmem:[#allocation6 + $0x40] ss:$8 sm:$0xf0]  ;;  %7752 = vst.msk [vmem:[#allocation6 + $0x18] sm:$0xff] %vm5059_vm0, %v7736_v43  ;;  %14783 = vrcp.f32 %v7603_v60  ;;  %v8159_v58 = vpop.xlane.xlu0 %8158  ;;  %v14776_v13 = vpop.eup %14775 }
0x106c   : > { %v18498_v53 = vld [vmem:[#allocation6 + $0x45] ss:$8 sm:$0xf]  ;;  %v18501_v38 = vld [vmem:[#allocation6 + $0x46] ss:$8 sm:$0xf]  ;;  %v13331_v20 = vpack.i.bf16 %v7258_v28, %v7255_v21  ;;  %v13336_v49 = vpack.i.bf16 %v7246_v0, %v7243_v44  ;;  %14785 = vrcp.f32 %v8159_v58 }
0x106d   : > { %20189 = vst [vmem:[#allocation171_spill] sm:$0xff] %v18498_v53  ;;  %20190 = vst [vmem:[#allocation167_spill] sm:$0xff] %v18501_v38  ;;  %v18503_v8 = vld [vmem:[#allocation6 + $0x47] ss:$8 sm:$0xf] }
0x106e   : > { %v20191_v26 = vld [vmem:[#allocation179_spill] sm:$0xff]  ;;  %7757 = vst.msk [vmem:[#allocation6 + $0x40] sm:$0xff] %vm5059_vm0, %v7741_v18  ;;  %v20192_v61 = vld [vmem:[#allocation180_spill] sm:$0xff]  ;;  %13332 = vrot.lane.b32.xlu1 %v13331_v20, %s15242_s8  ;;  %13337 = vrot.lane.b32.xlu0 %v13336_v49, %s15242_s8  ;;  %v20193_v1 = vld [vmem:[#allocation178_spill] sm:$0xff]  ;;  %v14778_v0 = vpop.eup %14777 }
0x106f   : > { %v7738_v6 = vmul.f32 %v14772_v3, %v20191_v26  ;;  %v7743_v43 = vmul.f32 %v14774_v10, %v20192_v61  ;;  %v7740_v3 = vmul.f32 %v14776_v13, %v20193_v1  ;;  %v7607_v26 = vpop.xlane.xlu1 %7606  ;;  %v18515_v21 = vld [vmem:[#allocation6 + $0x42] ss:$8 sm:$0xf0]  ;;  %v8163_v44 = vpop.xlane.xlu0 %8162  ;;  %v18518_v60 = vld [vmem:[#allocation6 + $0x44] ss:$8 sm:$0xf0] }
0x1070   : > { %14787 = vrcp.f32 %v7607_v26  ;;  %v20194_v18 = vld [vmem:[#allocation185_spill] sm:$0xff]  ;;  %20195 = vst [vmem:[#allocation105_spill] sm:$0xff] %v18518_v60  ;;  %v20198_v1 = vld [vmem:[#allocation183_spill] sm:$0xff]  ;;  %v20199_v58 = vld [vmem:[#allocation184_spill] sm:$0xff] }
0x1071   : > { %7754 = vst.msk [vmem:[#allocation6 + $0x28] sm:$0xff] %vm5059_vm0, %v7738_v6  ;;  %7759 = vst.msk [vmem:[#allocation6 + $0x50] sm:$0xff] %vm5059_vm0, %v7743_v43  ;;  %v7745_v28 = vmul.f32 %v14778_v0, %v20194_v18  ;;  %v18520_v20 = vld [vmem:[#allocation6 + $0x45] ss:$8 sm:$0xf0]  ;;  %v14780_v6 = vpop.eup %14779  ;;  %14789 = vrcp.f32 %v8163_v44 }
0x1072   : > { %20196 = vst [vmem:[#allocation170_spill] sm:$0xff] %v18520_v20  ;;  %7756 = vst.msk [vmem:[#allocation6 + $0x38] sm:$0xff] %vm5059_vm0, %v7740_v3  ;;  %v18523_v49 = vld [vmem:[#allocation6 + $0x46] ss:$8 sm:$0xf0]  ;;  %v7742_v10 = vmul.f32 %v14780_v6, %v20198_v1  ;;  %v14782_v43 = vpop.eup %14781 }
0x1073   : > { %20197 = vst [vmem:[#allocation107_spill] sm:$0xff] %v18523_v49  ;;  %v18525_v13 = vld [vmem:[#allocation6 + $0x47] ss:$8 sm:$0xf0]  ;;  %v7611_v61 = vpop.xlane.xlu1 %7610  ;;  %v7747_v26 = vmul.f32 %v14782_v43, %v20199_v58  ;;  %v8167_v0 = vpop.xlane.xlu0 %8166 }
0x1074   : > { %7761 = vst.msk [vmem:[#allocation6 + $0x60] sm:$0xff] %vm5059_vm0, %v7745_v28  ;;  %14791 = vrcp.f32 %v7611_v61  ;;  %7758 = vst.msk [vmem:[#allocation6 + $0x48] sm:$0xff] %vm5059_vm0, %v7742_v10  ;;  %v20200_v3 = vld [vmem:[#allocation182_spill] sm:$0xff] }
0x1075   : > { %v14784_v18 = vpop.eup %14783  ;;  %14793 = vrcp.f32 %v8167_v0  ;;  %7763 = vst.msk [vmem:[#allocation6 + $0x70] sm:$0xff] %vm5059_vm0, %v7747_v26  ;;  %v18533_v23 = vld [vmem:[#allocation6] ss:$8 sm:$0xf] }
0x1076   : > { %v7744_v44 = vmul.f32 %v14784_v18, %v20200_v3  ;;  %20201 = vst [vmem:[#allocation169_spill] sm:$0xff] %v18533_v23  ;;  %v14786_v6 = vpop.eup %14785  ;;  %v18535_v1 = vld [vmem:[#allocation6 + $0x3] ss:$8 sm:$0xf] }
0x1077   : > { %v8161_v60 = vpop.xlane.xlu1 %8160  ;;  %v18537_v28 = vld [vmem:[#allocation6 + $0x1] ss:$8 sm:$0xf]  ;;  %v18539_v61 = vld [vmem:[#allocation6 + $0x2] ss:$8 sm:$0xf]  ;;  %v8171_v0 = vpop.xlane.xlu0 %8170 }
0x1078   : > { %14795 = vrcp.f32 %v8161_v60  ;;  %20202 = vst [vmem:[#allocation74_spill] sm:$0xff] %v18539_v61  ;;  %v18541_v43 = vld [vmem:[#allocation6 + $0x4] ss:$8 sm:$0xf]  ;;  %7760 = vst.msk [vmem:[#allocation6 + $0x58] sm:$0xff] %vm5059_vm0, %v7744_v44 }
0x1079   : > { %20203 = vst [vmem:[#allocation78_spill] sm:$0xff] %v18541_v43  ;;  %v20204_v10 = vld [vmem:[#allocation58_spill] sm:$0xff]  ;;  %14797 = vrcp.f32 %v8171_v0  ;;  %v20210_v44 = vld [vmem:[#allocation56_spill] sm:$0xff] }
0x107a   : > { %v8343_v58 = vmul.f32 %v14786_v6, %v20204_v10  ;;  %v18545_v18 = vld [vmem:[#allocation6] ss:$8 sm:$0xf0]  ;;  %v18547_v26 = vld [vmem:[#allocation6 + $0x5] ss:$8 sm:$0xf]  ;;  %v14788_v3 = vpop.eup %14787 }
0x107b   : > { %20205 = vst [vmem:[#allocation72_spill] sm:$0xff] %v18545_v18  ;;  %20206 = vst [vmem:[#allocation82_spill] sm:$0xff] %v18547_v26  ;;  %v18549_v60 = vld [vmem:[#allocation6 + $0x6] ss:$8 sm:$0xf]  ;;  %v7746_v43 = vmul.f32 %v14788_v3, %v20209_v2  ;;  %v8165_v14 = vpop.xlane.xlu1 %8164  ;;  %v14790_v6 = vpop.eup %14789 }
0x107c   : > { %20207 = vst [vmem:[#allocation76_spill] sm:$0xff] %v18549_v60  ;;  %v18551_v49 = vld [vmem:[#allocation6 + $0x7] ss:$8 sm:$0xf]  ;;  %14799 = vrcp.f32 %v8165_v14  ;;  %v8345_v10 = vmul.f32 %v14790_v6, %v20210_v44  ;;  %v8175_v17 = vpop.xlane.xlu0 %8174 }
0x107d   : > { %20208 = vst [vmem:[#allocation189_spill] sm:$0xff] %v18551_v49  ;;  %8359 = vst.msk [vmem:[#allocation6] sm:$0xff] %vm5059_vm0, %v8343_v58  ;;  %14801 = vrcp.f32 %v8175_v17  ;;  %v20211_v60 = vld [vmem:[#allocation186_spill] sm:$0xff] }
0x107e   : > { %7762 = vst.msk [vmem:[#allocation6 + $0x68] sm:$0xff] %vm5059_vm0, %v7746_v43  ;;  %v14792_v0 = vpop.eup %14791  ;;  %8361 = vst.msk [vmem:[#allocation6 + $0x10] sm:$0xff] %vm5059_vm0, %v8345_v10  ;;  %v7784_v2 = vld [vmem:[#allocation6 + $0x3] ss:$8 sm:$0xf0] }
0x107f   : > { %v7748_v27 = vmul.f32 %v14792_v0, %v20211_v60  ;;  %v8169_v61 = vpop.xlane.xlu1 %8168  ;;  %v14794_v38 = vpop.eup %14793  ;;  %v7772_v3 = vld [vmem:[#allocation6 + $0x1] ss:$8 sm:$0xf0]  ;;  %v18561_v23 = vld [vmem:[#allocation6 + $0x2] ss:$8 sm:$0xf0] }
0x1080   : > { %14803 = vrcp.f32 %v8169_v61  ;;  %20212 = vst [vmem:[#allocation110_spill] sm:$0xff] %v18561_v23  ;;  %v20213_v58 = vld [vmem:[#allocation66_spill] sm:$0xff]  ;;  %v8179_v18 = vpop.xlane.xlu0 %8178 }
0x1081   : > { %v8347_v14 = vmul.f32 %v14794_v38, %v20213_v58  ;;  %7764 = vst.msk [vmem:[#allocation6 + $0x78] sm:$0xff] %vm5059_vm0, %v7748_v27  ;;  %v18565_v6 = vld [vmem:[#allocation6 + $0x4] ss:$8 sm:$0xf0]  ;;  %14805 = vrcp.f32 %v8179_v18 }
0x1082   : > { %20214 = vst [vmem:[#allocation80_spill] sm:$0xff] %v18565_v6  ;;  %v18567_v43 = vld [vmem:[#allocation6 + $0x5] ss:$8 sm:$0xf0]  ;;  %v14796_v17 = vpop.eup %14795 }
0x1083   : > { %20215 = vst [vmem:[#allocation191_spill] sm:$0xff] %v18567_v43  ;;  %v18569_v60 = vld [vmem:[#allocation6 + $0x6] ss:$8 sm:$0xf0]  ;;  %v8173_v0 = vpop.xlane.xlu1 %8172  ;;  %v14798_v23 = vpop.eup %14797 }
0x1084   : > { %20216 = vst [vmem:[#allocation109_spill] sm:$0xff] %v18569_v60  ;;  %v18571_v44 = vld [vmem:[#allocation6 + $0x7] ss:$8 sm:$0xf0]  ;;  %14807 = vrcp.f32 %v8173_v0  ;;  %v8183_v27 = vpop.xlane.xlu0 %8182 }
0x1085   : > { %20217 = vst [vmem:[#allocation188_spill] sm:$0xff] %v18571_v44  ;;  %v20218_v61 = vld [vmem:[#allocation62_spill] sm:$0xff]  ;;  %8363 = vst.msk [vmem:[#allocation6 + $0x20] sm:$0xff] %vm5059_vm0, %v8347_v14  ;;  %v20219_v38 = vld [vmem:[#allocation64_spill] sm:$0xff]  ;;  %14809 = vrcp.f32 %v8183_v27  ;;  %v7785_v14 = vor.u32 %v7784_v2, %v18535_v1 }
0x1086   : > { %v8344_v10 = vmul.f32 %v14796_v17, %v20218_v61  ;;  %v8349_v58 = vmul.f32 %v14798_v23, %v20219_v38  ;;  %v14800_v6 = vpop.eup %14799  ;;  %v7786_v43 = vld [vmem:[#allocation6 + $0x43] ss:$8 sm:$0xf]  ;;  %v7774_v49 = vld [vmem:[#allocation6 + $0x41] ss:$8 sm:$0xf] }
0x1087   : > { %v20220_v18 = vld [vmem:[#allocation60_spill] sm:$0xff]  ;;  %v8177_v60 = vpop.xlane.xlu1 %8176  ;;  %v14802_v17 = vpop.eup %14801  ;;  %v20224_v38 = vld [vmem:[#allocation194_spill] sm:$0xff] }
0x1088   : > { %8360 = vst.msk [vmem:[#allocation6 + $0x8] sm:$0xff] %vm5059_vm0, %v8344_v10  ;;  %v8346_v26 = vmul.f32 %v14800_v6, %v20220_v18  ;;  %v18578_v44 = vld [vmem:[#allocation6 + $0x40] ss:$8 sm:$0xf]  ;;  %8365 = vst.msk [vmem:[#allocation6 + $0x30] sm:$0xff] %vm5059_vm0, %v8349_v58  ;;  %14811 = vrcp.f32 %v8177_v60  ;;  %v8351_v27 = vmul.f32 %v14802_v17, %v20224_v38  ;;  %v8187_v34 = vpop.xlane.xlu0 %8186  ;;  %v7773_v18 = vor.u32 %v7772_v3, %v18537_v28 }
0x1089   : > { %20221 = vst [vmem:[#allocation114_spill] sm:$0xff] %v18578_v44  ;;  %v7787_v61 = vld [vmem:[#allocation6 + $0x43] ss:$8 sm:$0xf0]  ;;  %14813 = vrcp.f32 %v8187_v34 }
0x108a   : > { %v7775_v23 = vld [vmem:[#allocation6 + $0x41] ss:$8 sm:$0xf0]  ;;  %v18582_v0 = vld [vmem:[#allocation6 + $0x42] ss:$8 sm:$0xf]  ;;  %v7788_v6 = vor.u32 %v7787_v61, %v7786_v43  ;;  %v14804_v1 = vpop.eup %14803 }
0x108b   : > { %20222 = vst [vmem:[#allocation190_spill] sm:$0xff] %v18582_v0  ;;  %v18584_v10 = vld [vmem:[#allocation6 + $0x44] ss:$8 sm:$0xf]  ;;  %v7776_v57 = vor.u32 %v7775_v23, %v7774_v49  ;;  %8362 = vst.msk [vmem:[#allocation6 + $0x18] sm:$0xff] %vm5059_vm0, %v8346_v26  ;;  %v8181_v61 = vpop.xlane.xlu1 %8180  ;;  %v14806_v3 = vpop.eup %14805 }
0x108c   : > { %20223 = vst [vmem:[#allocation112_spill] sm:$0xff] %v18584_v10  ;;  %v18588_v62 = vld [vmem:[#allocation6 + $0x40] ss:$8 sm:$0xf0]  ;;  %v13341_v28 = vpack.i.bf16 %v7788_v6, %v7785_v14  ;;  %14815 = vrcp.f32 %v8181_v61  ;;  %v8721_v34 = vpop.xlane.xlu0 %8720 }
0x108d   : > { %20225 = vst [vmem:[#allocation113_spill] sm:$0xff] %v18588_v62  ;;  %v18590_v58 = vld [vmem:[#allocation6 + $0x45] ss:$8 sm:$0xf]  ;;  %v13346_v49 = vpack.i.bf16 %v7776_v57, %v7773_v18  ;;  %14817 = vrcp.f32 %v8721_v34 }
0x108e   : > { %20226 = vst [vmem:[#allocation192_spill] sm:$0xff] %v18590_v58  ;;  %v18593_v2 = vld [vmem:[#allocation6 + $0x46] ss:$8 sm:$0xf]  ;;  %13342 = vrot.lane.b32.xlu1 %v13341_v28, %s15242_s8  ;;  %v14808_v10 = vpop.eup %14807 }
0x108f   : > { %20227 = vst [vmem:[#allocation111_spill] sm:$0xff] %v18593_v2  ;;  %v18595_v60 = vld [vmem:[#allocation6 + $0x47] ss:$8 sm:$0xf]  ;;  %13347 = vrot.lane.b32.xlu0 %v13346_v49, %s15242_s8  ;;  %v14810_v57 = vpop.eup %14809 }
0x1090   : > { %20228 = vst [vmem:[#allocation118_spill] sm:$0xff] %v18595_v60  ;;  %v20229_v38 = vld [vmem:[#allocation70_spill] sm:$0xff]  ;;  %8367 = vst.msk [vmem:[#allocation6 + $0x40] sm:$0xff] %vm5059_vm0, %v8351_v27  ;;  %v20230_v23 = vld [vmem:[#allocation193_spill] sm:$0xff]  ;;  %v8725_v18 = vpop.xlane.xlu0 %8724 }
0x1091   : > { %v8348_v43 = vmul.f32 %v14804_v1, %v20229_v38  ;;  %v8353_v26 = vmul.f32 %v14806_v3, %v20230_v23  ;;  %v20231_v17 = vld [vmem:[#allocation68_spill] sm:$0xff]  ;;  %v8185_v38 = vpop.xlane.xlu1 %8184  ;;  %v20233_v27 = vld [vmem:[#allocation198_spill] sm:$0xff]  ;;  %v20239_v34 = vld [vmem:[#allocation197_spill] sm:$0xff] }
0x1092   : > { %v8350_v1 = vmul.f32 %v14808_v10, %v20231_v17  ;;  %14819 = vrcp.f32 %v8185_v38  ;;  %v18607_v14 = vld [vmem:[#allocation6 + $0x42] ss:$8 sm:$0xf0]  ;;  %v8355_v6 = vmul.f32 %v14810_v57, %v20233_v27  ;;  %v18610_v61 = vld [vmem:[#allocation6 + $0x44] ss:$8 sm:$0xf0] }
0x1093   : > { %8364 = vst.msk [vmem:[#allocation6 + $0x28] sm:$0xff] %vm5059_vm0, %v8348_v43  ;;  %8369 = vst.msk [vmem:[#allocation6 + $0x50] sm:$0xff] %vm5059_vm0, %v8353_v26  ;;  %v18612_v28 = vld [vmem:[#allocation6 + $0x45] ss:$8 sm:$0xf0]  ;;  %v14812_v43 = vpop.eup %14811  ;;  %14821 = vrcp.f32 %v8725_v18 }
0x1094   : > { %20232 = vst [vmem:[#allocation116_spill] sm:$0xff] %v18607_v14  ;;  %20234 = vst [vmem:[#allocation117_spill] sm:$0xff] %v18610_v61  ;;  %v18615_v49 = vld [vmem:[#allocation6 + $0x46] ss:$8 sm:$0xf0]  ;;  %v14814_v26 = vpop.eup %14813  ;;  %v8729_v57 = vpop.xlane.xlu0 %8728 }
0x1095   : > { %20235 = vst [vmem:[#allocation115_spill] sm:$0xff] %v18612_v28  ;;  %8366 = vst.msk [vmem:[#allocation6 + $0x38] sm:$0xff] %vm5059_vm0, %v8350_v1  ;;  %v18617_v10 = vld [vmem:[#allocation6 + $0x47] ss:$8 sm:$0xf0]  ;;  %v8189_v23 = vpop.xlane.xlu1 %8188  ;;  %v8357_v38 = vmul.f32 %v14814_v26, %v20239_v34 }
0x1096   : > { %20236 = vst [vmem:[#allocation122_spill] sm:$0xff] %v18615_v49  ;;  %20237 = vst [vmem:[#allocation120_spill] sm:$0xff] %v18617_v10  ;;  %v20238_v17 = vld [vmem:[#allocation196_spill] sm:$0xff]  ;;  %14823 = vrcp.f32 %v8189_v23  ;;  %v14816_v27 = vpop.eup %14815  ;;  %v20240_v1 = vld [vmem:[#allocation195_spill] sm:$0xff] }
0x1097   : > { %v8352_v3 = vmul.f32 %v14812_v43, %v20238_v17  ;;  %8371 = vst.msk [vmem:[#allocation6 + $0x60] sm:$0xff] %vm5059_vm0, %v8355_v6  ;;  %14825 = vrcp.f32 %v8729_v57  ;;  %v8354_v18 = vmul.f32 %v14816_v27, %v20240_v1  ;;  %8373 = vst.msk [vmem:[#allocation6 + $0x70] sm:$0xff] %vm5059_vm0, %v8357_v38  ;;  %v18625_v49 = vld [vmem:[#allocation6] ss:$8 sm:$0xf]  ;;  %v14818_v17 = vpop.eup %14817 }
0x1098   : > { %20241 = vst [vmem:[#allocation121_spill] sm:$0xff] %v18625_v49  ;;  %v18627_v43 = vld [vmem:[#allocation6 + $0x2] ss:$8 sm:$0xf]  ;;  %v8873_v38 = vmul.f32 %v14818_v17, %v17861_v46  ;;  %v8733_v27 = vpop.xlane.xlu0 %8732 }
0x1099   : > { %8368 = vst.msk [vmem:[#allocation6 + $0x48] sm:$0xff] %vm5059_vm0, %v8352_v3  ;;  %v8723_v61 = vpop.xlane.xlu1 %8722  ;;  %20242 = vst [vmem:[#allocation119_spill] sm:$0xff] %v18627_v43  ;;  %v18629_v6 = vld [vmem:[#allocation6 + $0x3] ss:$8 sm:$0xf] }
0x109a   : > { %14827 = vrcp.f32 %v8723_v61  ;;  %v18631_v23 = vld [vmem:[#allocation6 + $0x1] ss:$8 sm:$0xf]  ;;  %v18633_v26 = vld [vmem:[#allocation6 + $0x4] ss:$8 sm:$0xf] }
0x109b   : > { %20243 = vst [vmem:[#allocation135_spill] sm:$0xff] %v18633_v26  ;;  %v18635_v3 = vld [vmem:[#allocation6 + $0x5] ss:$8 sm:$0xf]  ;;  %8370 = vst.msk [vmem:[#allocation6 + $0x58] sm:$0xff] %vm5059_vm0, %v8354_v18  ;;  %14829 = vrcp.f32 %v8733_v27 }
0x109c   : > { %v18637_v34 = vld [vmem:[#allocation6 + $0x6] ss:$8 sm:$0xf]  ;;  %v18639_v57 = vld [vmem:[#allocation6 + $0x7] ss:$8 sm:$0xf]  ;;  %v14820_v2 = vpop.eup %14819  ;;  %v8737_v14 = vpop.xlane.xlu0 %8736 }
0x109d   : > { %20244 = vst [vmem:[#allocation124_spill] sm:$0xff] %v18637_v34  ;;  %v18643_v1 = vld [vmem:[#allocation6] ss:$8 sm:$0xf0]  ;;  %v8727_v28 = vpop.xlane.xlu1 %8726  ;;  %8889 = vst.msk [vmem:[#allocation6] sm:$0xff] %vm5059_vm0, %v8873_v38  ;;  %v14822_v60 = vpop.eup %14821 }
0x109e   : > { %20245 = vst [vmem:[#allocation134_spill] sm:$0xff] %v18643_v1  ;;  %v18645_v61 = vld [vmem:[#allocation6 + $0x2] ss:$8 sm:$0xf0]  ;;  %14831 = vrcp.f32 %v8727_v28 }
0x109f   : > { %20246 = vst [vmem:[#allocation123_spill] sm:$0xff] %v18645_v61  ;;  %v18647_v44 = vld [vmem:[#allocation6 + $0x4] ss:$8 sm:$0xf0]  ;;  %14833 = vrcp.f32 %v8737_v14 }
0x10a0   : > { %20247 = vst [vmem:[#allocation139_spill] sm:$0xff] %v18647_v44  ;;  %v18649_v62 = vld [vmem:[#allocation6 + $0x5] ss:$8 sm:$0xf0]  ;;  %v14824_v38 = vpop.eup %14823  ;;  %v8741_v0 = vpop.xlane.xlu0 %8740 }
0x10a1   : > { %v20248_v46 = vld [vmem:[#allocation200_spill] sm:$0xff]  ;;  %v20250_v49 = vld [vmem:[#allocation199_spill] sm:$0xff]  ;;  %v8731_v1 = vpop.xlane.xlu1 %8730  ;;  %v14826_v10 = vpop.eup %14825 }
0x10a2   : > { %v8356_v17 = vmul.f32 %v14820_v2, %v20248_v46  ;;  %v18656_v18 = vld [vmem:[#allocation6 + $0x6] ss:$8 sm:$0xf0]  ;;  %v18658_v58 = vld [vmem:[#allocation6 + $0x7] ss:$8 sm:$0xf0]  ;;  %v8875_v46 = vmul.f32 %v14822_v60, %v17859_v32  ;;  %v8358_v27 = vmul.f32 %v14824_v38, %v20250_v49  ;;  %14835 = vrcp.f32 %v8731_v1 }
0x10a3   : > { %20249 = vst [vmem:[#allocation137_spill] sm:$0xff] %v18656_v18  ;;  %v8877_v28 = vmul.f32 %v14826_v10, %v17869_v24  ;;  %14837 = vrcp.f32 %v8741_v0  ;;  %v8394_v32 = vld [vmem:[#allocation6 + $0x3] ss:$8 sm:$0xf0] }
0x10a4   : > { %8372 = vst.msk [vmem:[#allocation6 + $0x68] sm:$0xff] %vm5059_vm0, %v8356_v17  ;;  %8891 = vst.msk [vmem:[#allocation6 + $0x10] sm:$0xff] %vm5059_vm0, %v8875_v46  ;;  %v14828_v2 = vpop.eup %14827  ;;  %v8382_v60 = vld [vmem:[#allocation6 + $0x1] ss:$8 sm:$0xf0]  ;;  %v8745_v46 = vpop.xlane.xlu0 %8744 }
0x10a5   : > { %8374 = vst.msk [vmem:[#allocation6 + $0x78] sm:$0xff] %vm5059_vm0, %v8358_v27  ;;  %v8874_v17 = vmul.f32 %v14828_v2, %v17865_v40  ;;  %v8735_v26 = vpop.xlane.xlu1 %8734  ;;  %8893 = vst.msk [vmem:[#allocation6 + $0x20] sm:$0xff] %vm5059_vm0, %v8877_v28  ;;  %v14830_v14 = vpop.eup %14829  ;;  %v8396_v10 = vld [vmem:[#allocation6 + $0x43] ss:$8 sm:$0xf] }
0x10a6   : > { %14839 = vrcp.f32 %v8735_v26  ;;  %v8879_v49 = vmul.f32 %v14830_v14, %v17867_v7  ;;  %v8384_v1 = vld [vmem:[#allocation6 + $0x41] ss:$8 sm:$0xf]  ;;  %v14279_v27 = vld [vmem:[#allocation18 + $0x204] ss:$16 sps:$4 sm:$0xff]   ;;  %v8395_v7 = vor.u32 %v8394_v32, %v18629_v6 }
0x10a7   : > { %8890 = vst.msk [vmem:[#allocation6 + $0x8] sm:$0xff] %vm5059_vm0, %v8874_v17  ;;  %14841 = vrcp.f32 %v8745_v46  ;;  %v18680_v44 = vld [vmem:[#allocation6 + $0x40] ss:$8 sm:$0xf]  ;;  %v14282_v26 = vld [vmem:[#allocation18 + $0x20c] ss:$16 sps:$4 sm:$0xff]   ;;  %10546 = vmatprep.subr.bf16.mxu1 %v14279_v27 }
0x10a8   : > { %v14832_v24 = vpop.eup %14831  ;;  %20251 = vst [vmem:[#allocation138_spill] sm:$0xff] %v18680_v44  ;;  %v18682_v40 = vld [vmem:[#allocation6 + $0x42] ss:$8 sm:$0xf]  ;;  %8895 = vst.msk [vmem:[#allocation6 + $0x30] sm:$0xff] %vm5059_vm0, %v8879_v49  ;;  %v8749_v43 = vpop.xlane.xlu0 %8748  ;;  %v8383_v49 = vor.u32 %v8382_v60, %v18631_v23  ;;  %10772 = vmatprep.subr.bf16.mxu0 %v14282_v26 }
0x10a9   : > { %v8876_v0 = vmul.f32 %v14832_v24, %v17863_v35  ;;  %v8739_v38 = vpop.xlane.xlu1 %8738  ;;  %20252 = vst [vmem:[#allocation136_spill] sm:$0xff] %v18682_v40  ;;  %v14834_v2 = vpop.eup %14833  ;;  %v18686_v14 = vld [vmem:[#allocation6 + $0x44] ss:$8 sm:$0xf] }
0x10aa   : > { %14843 = vrcp.f32 %v8739_v38  ;;  %20253 = vst [vmem:[#allocation143_spill] sm:$0xff] %v18686_v14  ;;  %v8408_v46 = vld [vmem:[#allocation6 + $0x45] ss:$8 sm:$0xf] }
0x10ab   : > { %v18688_v34 = vld [vmem:[#allocation6 + $0x46] ss:$8 sm:$0xf]  ;;  %v8420_v35 = vld [vmem:[#allocation6 + $0x47] ss:$8 sm:$0xf]  ;;  %14845 = vrcp.f32 %v8749_v43 }
0x10ac   : > { %v8397_v28 = vld [vmem:[#allocation6 + $0x43] ss:$8 sm:$0xf0]  ;;  %v8385_v17 = vld [vmem:[#allocation6 + $0x41] ss:$8 sm:$0xf0]  ;;  %v14836_v6 = vpop.eup %14835 }
0x10ad   : > { %20254 = vst [vmem:[#allocation141_spill] sm:$0xff] %v18688_v34  ;;  %v20255_v24 = vld [vmem:[#allocation85_spill] sm:$0xff]  ;;  %v8398_v61 = vor.u32 %v8397_v28, %v8396_v10  ;;  %v8386_v19 = vor.u32 %v8385_v17, %v8384_v1  ;;  %8892 = vst.msk [vmem:[#allocation6 + $0x18] sm:$0xff] %vm5059_vm0, %v8876_v0  ;;  %v20259_v23 = vld [vmem:[#allocation84_spill] sm:$0xff]  ;;  %v8743_v1 = vpop.xlane.xlu1 %8742  ;;  %v14838_v26 = vpop.eup %14837 }
0x10ae   : > { %v8881_v18 = vmul.f32 %v14834_v2, %v20255_v24  ;;  %v18692_v20 = vld [vmem:[#allocation6 + $0x40] ss:$8 sm:$0xf0]  ;;  %v18694_v38 = vld [vmem:[#allocation6 + $0x42] ss:$8 sm:$0xf0]  ;;  %v8878_v60 = vmul.f32 %v14836_v6, %v20259_v23  ;;  %14847 = vrcp.f32 %v8743_v1 }
0x10af   : > { %20256 = vst [vmem:[#allocation142_spill] sm:$0xff] %v18692_v20  ;;  %20257 = vst [vmem:[#allocation140_spill] sm:$0xff] %v18694_v38  ;;  %v18697_v32 = vld [vmem:[#allocation6 + $0x44] ss:$8 sm:$0xf0]  ;;  %v13351_v2 = vpack.i.bf16 %v8398_v61, %v8395_v7  ;;  %v13356_v28 = vpack.i.bf16 %v8386_v19, %v8383_v49  ;;  %v9303_v19 = vpop.xlane.xlu0 %9302  ;;  %v20263_v7 = vor.u32 %v18658_v58, %v18639_v57 }
0x10b0   : > { %20258 = vst [vmem:[#allocation147_spill] sm:$0xff] %v18697_v32  ;;  %v8409_v53 = vld [vmem:[#allocation6 + $0x45] ss:$8 sm:$0xf0]  ;;  %8897 = vst.msk [vmem:[#allocation6 + $0x40] sm:$0xff] %vm5059_vm0, %v8881_v18  ;;  %v14840_v18 = vpop.eup %14839  ;;  %14849 = vrcp.f32 %v9303_v19 }
0x10b1   : > { %v18704_v17 = vld [vmem:[#allocation6 + $0x46] ss:$8 sm:$0xf0]  ;;  %v8421_v0 = vld [vmem:[#allocation6 + $0x47] ss:$8 sm:$0xf0]  ;;  %v8410_v43 = vor.u32 %v8409_v53, %v8408_v46  ;;  %13352 = vrot.lane.b32.xlu1 %v13351_v2, %s15242_s8  ;;  %13357 = vrot.lane.b32.xlu0 %v13356_v28, %s15242_s8  ;;  %v20262_v53 = vor.u32 %v18649_v62, %v18635_v3  ;;  %v8747_v49 = vpop.xlane.xlu1 %8746  ;;  %v14842_v23 = vpop.eup %14841 }
0x10b2   : > { %20260 = vst [vmem:[#allocation145_spill] sm:$0xff] %v18704_v17  ;;  %v8422_v24 = vor.u32 %v8421_v0, %v8420_v35  ;;  %v20261_v44 = vld [vmem:[#allocation90_spill] sm:$0xff]  ;;  %8894 = vst.msk [vmem:[#allocation6 + $0x28] sm:$0xff] %vm5059_vm0, %v8878_v60  ;;  %14851 = vrcp.f32 %v8747_v49  ;;  %v20265_v60 = vld [vmem:[#allocation36_spill] sm:$0xff] }
0x10b3   : > { %v8883_v6 = vmul.f32 %v14838_v26, %v20261_v44  ;;  %v18718_v61 = vpack.i.bf16 %v8410_v43, %v20262_v53  ;;  %v20264_v44 = vld [vmem:[#allocation86_spill] sm:$0xff]  ;;  %v8885_v1 = vmul.f32 %v14842_v23, %v20265_v60  ;;  %v9299_v2 = vpop.xlane.xlu0 %9298  ;;  %v20266_v3 = vld [vmem:[#allocation88_spill] sm:$0xff]  ;;  %v20267_v57 = vld [vmem:[#allocation33_spill] sm:$0xff] }
0x10b4   : > { %v18723_v46 = vpack.i.bf16 %v8422_v24, %v20263_v7  ;;  %v8880_v35 = vmul.f32 %v14840_v18, %v20264_v44  ;;  %v14844_v62 = vpop.eup %14843  ;;  %14853 = vrcp.f32 %v9299_v2  ;;  %v12577_v7 = vpop.f32.mrb[208].mxu1  ;;  %v18735_v44 = vld [vmem:[#allocation6 + $0x3] ss:$8 sm:$0xf] }
0x10b5   : > { %8899 = vst.msk [vmem:[#allocation6 + $0x50] sm:$0xff] %vm5059_vm0, %v8883_v6  ;;  %v8882_v28 = vmul.f32 %v14844_v62, %v20266_v3  ;;  %v8751_v0 = vpop.xlane.xlu1 %8750  ;;  %8901 = vst.msk [vmem:[#allocation6 + $0x60] sm:$0xff] %vm5059_vm0, %v8885_v1  ;;  %v14846_v58 = vpop.eup %14845  ;;  %v20268_v6 = vld [vmem:[#allocation87_spill] sm:$0xff] }
0x10b6   : > { %8896 = vst.msk [vmem:[#allocation6 + $0x38] sm:$0xff] %vm5059_vm0, %v8880_v35  ;;  %14855 = vrcp.f32 %v8751_v0  ;;  %v8887_v43 = vmul.f32 %v14846_v58, %v20267_v57  ;;  %v18737_v35 = vld [vmem:[#allocation6 + $0x1] ss:$8 sm:$0xf]  ;;  %v9404_v3 = vpop.f32.mrb[209].mxu1 }
0x10b7   : > { %v9311_v26 = vpop.xlane.xlu0 %9310  ;;  %8898 = vst.msk [vmem:[#allocation6 + $0x48] sm:$0xff] %vm5059_vm0, %v8882_v28  ;;  %v18739_v49 = vld [vmem:[#allocation6] ss:$8 sm:$0xf]  ;;  %v12578_v57 = vpop.f32.mrb[210].mxu1 }
0x10b8   : > { %v14848_v24 = vpop.eup %14847  ;;  %8903 = vst.msk [vmem:[#allocation6 + $0x70] sm:$0xff] %vm5059_vm0, %v8887_v43  ;;  %20269 = vst [vmem:[#allocation146_spill] sm:$0xff] %v18739_v49  ;;  %v18741_v23 = vld [vmem:[#allocation6 + $0x2] ss:$8 sm:$0xf]  ;;  %v9407_v10 = vpop.f32.mrb[211].mxu1 }
0x10b9   : > { %v8884_v19 = vmul.f32 %v14848_v24, %v20268_v6  ;;  %v9305_v53 = vpop.xlane.xlu1 %9304  ;;  %20270 = vst [vmem:[#allocation144_spill] sm:$0xff] %v18741_v23  ;;  %v18743_v60 = vld [vmem:[#allocation6 + $0x4] ss:$8 sm:$0xf] }
0x10ba   : > { %v14850_v18 = vpop.eup %14849  ;;  %14857 = vrcp.f32 %v9305_v53  ;;  %20271 = vst [vmem:[#allocation57_spill] sm:$0xff] %v18743_v60  ;;  %v18745_v1 = vld [vmem:[#allocation6 + $0x5] ss:$8 sm:$0xf] }
0x10bb   : > { %v18747_v2 = vld [vmem:[#allocation6 + $0x6] ss:$8 sm:$0xf]  ;;  %v9485_v62 = vmul.f32 %v14850_v18, %v12577_v7  ;;  %v9307_v28 = vpop.xlane.xlu0 %9306  ;;  %8900 = vst.msk [vmem:[#allocation6 + $0x58] sm:$0xff] %vm5059_vm0, %v8884_v19 }
0x10bc   : > { %20272 = vst [vmem:[#allocation149_spill] sm:$0xff] %v18747_v2  ;;  %v18750_v0 = vld [vmem:[#allocation6 + $0x7] ss:$8 sm:$0xf]  ;;  %v14852_v58 = vpop.eup %14851 }
0x10bd   : > { %v18752_v43 = vld [vmem:[#allocation6] ss:$8 sm:$0xf0]  ;;  %v9301_v53 = vpop.xlane.xlu1 %9300  ;;  %v18755_v27 = vld [vmem:[#allocation6 + $0x2] ss:$8 sm:$0xf0] }
0x10be   : > { %20273 = vst [vmem:[#allocation55_spill] sm:$0xff] %v18752_v43  ;;  %v20274_v24 = vld [vmem:[#allocation104_spill] sm:$0xff]  ;;  %20275 = vst [vmem:[#allocation148_spill] sm:$0xff] %v18755_v27  ;;  %v14854_v7 = vpop.eup %14853  ;;  %14859 = vrcp.f32 %v9301_v53  ;;  %v20278_v53 = vld [vmem:[#allocation35_spill] sm:$0xff] }
0x10bf   : > { %v8886_v6 = vmul.f32 %v14852_v58, %v20274_v24  ;;  %9501 = vst.msk [vmem:[#allocation6 + $0x10] sm:$0xff] %vm5059_vm0, %v9485_v62  ;;  %v18760_v19 = vld [vmem:[#allocation6 + $0x4] ss:$8 sm:$0xf0]  ;;  %v9483_v32 = vmul.f32 %v14854_v7, %v9404_v3  ;;  %v9319_v34 = vpop.xlane.xlu0 %9318  ;;  %14861 = vrcp.f32 %v9311_v26 }
0x10c0   : > { %20276 = vst [vmem:[#allocation65_spill] sm:$0xff] %v18760_v19  ;;  %v18765_v58 = vld [vmem:[#allocation6 + $0x6] ss:$8 sm:$0xf0]  ;;  %v14856_v62 = vpop.eup %14855  ;;  %14863 = vrcp.f32 %v9307_v28 }
0x10c1   : > { %8902 = vst.msk [vmem:[#allocation6 + $0x68] sm:$0xff] %vm5059_vm0, %v8886_v6  ;;  %20277 = vst [vmem:[#allocation61_spill] sm:$0xff] %v18765_v58  ;;  %v8888_v17 = vmul.f32 %v14856_v62, %v20278_v53  ;;  %v9313_v49 = vpop.xlane.xlu1 %9312  ;;  %v8924_v26 = vld [vmem:[#allocation6 + $0x3] ss:$8 sm:$0xf0]  ;;  %v12581_v58 = vpop.f32.mrb[212].mxu1 }
0x10c2   : > { %9499 = vst.msk [vmem:[#allocation6] sm:$0xff] %vm5059_vm0, %v9483_v32  ;;  %14865 = vrcp.f32 %v9313_v49  ;;  %v8926_v60 = vld [vmem:[#allocation6 + $0x43] ss:$8 sm:$0xf] }
0x10c3   : > { %v9315_v3 = vpop.xlane.xlu0 %9314  ;;  %8904 = vst.msk [vmem:[#allocation6 + $0x78] sm:$0xff] %vm5059_vm0, %v8888_v17  ;;  %v8912_v62 = vld [vmem:[#allocation6 + $0x1] ss:$8 sm:$0xf0]  ;;  %v8925_v17 = vor.u32 %v8924_v26, %v18735_v44 }
0x10c4   : > { %v14858_v6 = vpop.eup %14857  ;;  %v8914_v19 = vld [vmem:[#allocation6 + $0x41] ss:$8 sm:$0xf]  ;;  %v18777_v32 = vld [vmem:[#allocation6 + $0x40] ss:$8 sm:$0xf]  ;;  %v8913_v23 = vor.u32 %v8912_v62, %v18737_v35 }
0x10c5   : > { %v9486_v7 = vmul.f32 %v14858_v6, %v12578_v57  ;;  %v9309_v14 = vpop.xlane.xlu1 %9308  ;;  %v18785_v27 = vld [vmem:[#allocation6 + $0x44] ss:$8 sm:$0xf]  ;;  %v18787_v20 = vld [vmem:[#allocation6 + $0x5] ss:$8 sm:$0xf0] }
0x10c6   : > { %14867 = vrcp.f32 %v9309_v14  ;;  %v18780_v14 = vld [vmem:[#allocation6 + $0x42] ss:$8 sm:$0xf] }
0x10c7   : > { %v18774_v24 = vpop.xlane.xlu0 %9322  ;;  %9502 = vst.msk [vmem:[#allocation6 + $0x18] sm:$0xff] %vm5059_vm0, %v9486_v7  ;;  %14869 = vrcp.f32 %v9319_v34  ;;  %v18789_v34 = vld [vmem:[#allocation6 + $0x7] ss:$8 sm:$0xf0] }
0x10c8   : > { %v14860_v18 = vpop.eup %14859  ;;  %14871 = vrcp.f32 %v9315_v3  ;;  %20279 = vst [vmem:[#allocation63_spill] sm:$0xff] %v18789_v34  ;;  %v9420_v3 = vpop.f32.mrb[213].mxu1 }
0x10c9   : > { %v9484_v28 = vmul.f32 %v14860_v18, %v9407_v10  ;;  %v9321_v53 = vpop.xlane.xlu1 %9320  ;;  %v14862_v49 = vpop.eup %14861 }
0x10ca   : > { %v8927_v57 = vld [vmem:[#allocation6 + $0x43] ss:$8 sm:$0xf0]  ;;  %v8915_v6 = vld [vmem:[#allocation6 + $0x41] ss:$8 sm:$0xf0]  ;;  %v14864_v2 = vpop.eup %14863  ;;  %14873 = vrcp.f32 %v9321_v53  ;;  %v9489_v26 = vmul.f32 %v14862_v49, %v12581_v58 }
0x10cb   : > { %v9327_v7 = vpop.xlane.xlu0 %9326  ;;  %v8928_v43 = vor.u32 %v8927_v57, %v8926_v60  ;;  %v8916_v10 = vor.u32 %v8915_v6, %v8914_v19  ;;  %v18783_v18 = vld [vmem:[#allocation6 + $0x40] ss:$8 sm:$0xf0]  ;;  %9500 = vst.msk [vmem:[#allocation6 + $0x8] sm:$0xff] %vm5059_vm0, %v9484_v28  ;;  %v9487_v60 = vmul.f32 %v14864_v2, %v9420_v3  ;;  %v12582_v19 = vpop.f32.mrb[214].mxu1 }
0x10cc   : > { %v14866_v44 = vpop.eup %14865  ;;  %v18792_v40 = vld [vmem:[#allocation6 + $0x42] ss:$8 sm:$0xf0]  ;;  %v8910_v35 = vor.u32 %v18783_v18, %v18777_v32  ;;  %v18796_v38 = vld [vmem:[#allocation6 + $0x44] ss:$8 sm:$0xf0] }
0x10cd   : > { %v9317_v62 = vpop.xlane.xlu1 %9316  ;;  %v13361_v57 = vpack.i.bf16 %v8928_v43, %v8925_v17  ;;  %v13366_v6 = vpack.i.bf16 %v8916_v10, %v8913_v23  ;;  %v8922_v34 = vor.u32 %v18792_v40, %v18780_v14  ;;  %v9490_v28 = vmul.f32 %v14866_v44, %v12582_v19  ;;  %v9423_v53 = vpop.f32.mrb[215].mxu1  ;;  %9505 = vst.msk [vmem:[#allocation6 + $0x30] sm:$0xff] %vm5059_vm0, %v9489_v26  ;;  %v18807_v43 = vld [vmem:[#allocation6 + $0x46] ss:$8 sm:$0xf] }
0x10ce   : > { %14875 = vrcp.f32 %v9317_v62  ;;  %v5488_v23 = vor.u32 %v18111_v37, %v18076_v55  ;;  %v18809_v49 = vld [vmem:[#allocation6 + $0x46] ss:$8 sm:$0xf0]  ;;  %9503 = vst.msk [vmem:[#allocation6 + $0x20] sm:$0xff] %vm5059_vm0, %v9487_v60  ;;  %v5492_v26 = vor.u32 %v18168_v15, %v18142_v51 }
0x10cf   : > { %13362 = vrot.lane.b32.xlu1 %v13361_v57, %s15242_s8  ;;  %13367 = vrot.lane.b32.xlu0 %v13366_v6, %s15242_s8  ;;  %v13303_v2 = vpop.permute.xlu0 %13302  ;;  %9506 = vst.msk [vmem:[#allocation6 + $0x38] sm:$0xff] %vm5059_vm0, %v9490_v28  ;;  %v8946_v3 = vor.u32 %v18809_v49, %v18807_v43  ;;  %14877 = vrcp.f32 %v9327_v7  ;;  %v20407_v49 = vld [vmem:[#allocation76_spill] sm:$0xff] }
0x10d0   : > { %v14868_v17 = vpop.eup %14867  ;;  %v13305_v10 = vunpack.i.h.bf16 %v13303_v2  ;;  %v13304_v44 = vunpack.i.l.bf16 %v13303_v2  ;;  %14879 = vrcp.f32 %v18774_v24 }
0x10d1   : > { %v9488_v19 = vmul.f32 %v14868_v17, %v9423_v53  ;;  %v9325_v62 = vpop.xlane.xlu1 %9324  ;;  %v14870_v60 = vpop.eup %14869 }
0x10d2   : > { %v5567_v55 = vsel %vm5059_vm0, %v5488_v23, %v13304_v44  ;;  %v5568_v37 = vsel %vm5059_vm0, %v5492_v26, %v13305_v10  ;;  %v14872_v51 = vpop.eup %14871  ;;  %v12585_v53 = vpop.f32.mrb[216].mxu1  ;;  %v20280_v23 = vor.u32 %v18200_v52, %v18190_v25  ;;  %v20281_v10 = vor.u32 %v18258_v59, %v18247_v12  ;;  %v18833_v52 = vld [vmem:[#allocation6 + $0x47] ss:$8 sm:$0xf] }
0x10d3   : > { %v13318_v57 = vpop.permute.xlu0 %13317  ;;  %v5574_v6 = vpack.c.bf16 %v5568_v37, %v5567_v55  ;;  %9504 = vst.msk [vmem:[#allocation6 + $0x28] sm:$0xff] %vm5059_vm0, %v9488_v19  ;;  %v9493_v44 = vmul.f32 %v14870_v60, %v12585_v53  ;;  %v9436_v26 = vpop.f32.mrb[217].mxu1  ;;  %v18831_v55 = vld [vmem:[#allocation6 + $0x45] ss:$8 sm:$0xf]  ;;  %v5472_v12 = vor.u32 %v18107_v11, %v18072_v16  ;;  %v20284_v11 = vor.u32 %v18042_v33, %v18037_v36 }
0x10d4   : > { %v13320_v2 = vunpack.i.h.bf16 %v13318_v57  ;;  %v13319_v58 = vunpack.i.l.bf16 %v13318_v57  ;;  %v14874_v28 = vpop.eup %14873  ;;  %v9491_v57 = vmul.f32 %v14872_v51, %v9436_v26  ;;  %v20282_v51 = vor.u32 %v18311_v50, %v18306_v48  ;;  %v14277_v48 = vld [vmem:[#allocation18 + $0x200] ss:$16 sps:$4 sm:$0xff]   ;;  %v18856_v50 = vld [vmem:[#allocation18 + $0x208] ss:$16 sps:$4 sm:$0xff]  }
0x10d5   : > { %v9329_v15 = vpop.xlane.xlu1 %9328  ;;  %10465 = vmatprep.mubr.bf16.mxu1 %v5574_v6  ;;  %10691 = vmatprep.mubr.bf16.mxu0 %v5574_v6  ;;  %v12586_v6 = vpop.f32.mrb[218].mxu1  ;;  %9509 = vst.msk [vmem:[#allocation6 + $0x50] sm:$0xff] %vm5059_vm0, %v9493_v44  ;;  %v6109_v33 = vor.u32 %v18226_v45, %v18196_v22  ;;  %v18871_v22 = vld [vmem:[#allocation18 + $0x228] ss:$16 sps:$4 sm:$0xff]  }
0x10d6   : > { %14881 = vrcp.f32 %v9329_v15  ;;  %v6175_v17 = vsel %vm5059_vm0, %v20280_v23, %v13319_v58  ;;  %v6176_v7 = vsel %vm5059_vm0, %v20281_v10, %v13320_v2  ;;  %v9494_v58 = vmul.f32 %v14874_v28, %v12586_v6  ;;  %v9439_v23 = vpop.f32.mrb[219].mxu1  ;;  %9507 = vst.msk [vmem:[#allocation6 + $0x40] sm:$0xff] %vm5059_vm0, %v9491_v57  ;;  %v20285_v6 = vld [vmem:[#allocation49_spill] sm:$0xff] }
0x10d7   : > { %14883 = vrcp.f32 %v9325_v62  ;;  %v13328_v24 = vpop.permute.xlu0 %13327  ;;  %v18829_v19 = vpack.c.bf16 %v6176_v7, %v6175_v17  ;;  %v20283_v28 = vor.u32 %v18383_v30, %v18364_v63  ;;  %v18858_v63 = vld [vmem:[#allocation18 + $0x22c] ss:$16 sps:$4 sm:$0xff]  }
0x10d8   : > { %v14876_v37 = vpop.eup %14875  ;;  %v13330_v15 = vunpack.i.h.bf16 %v13328_v24  ;;  %v13329_v25 = vunpack.i.l.bf16 %v13328_v24  ;;  %9510 = vst.msk [vmem:[#allocation6 + $0x58] sm:$0xff] %vm5059_vm0, %v9494_v58  ;;  %v14285_v24 = vld [vmem:[#allocation18 + $0x224] ss:$16 sps:$4 sm:$0xff]  }
0x10d9   : > { %v13308_v59 = vpop.permute.xlu1 %13307  ;;  %v9492_v62 = vmul.f32 %v14876_v37, %v9439_v23  ;;  %v14878_v30 = vpop.eup %14877 }
0x10da   : > { %v13310_v60 = vunpack.i.h.bf16 %v13308_v59  ;;  %v13309_v2 = vunpack.i.l.bf16 %v13308_v59  ;;  %v6705_v53 = vsel %vm5059_vm0, %v20282_v51, %v13329_v25  ;;  %v6706_v16 = vsel %vm5059_vm0, %v20283_v28, %v13330_v15  ;;  %v12589_v37 = vpop.f32.mrb[220].mxu1  ;;  %v14880_v25 = vpop.eup %14879  ;;  %v14283_v59 = vld [vmem:[#allocation18 + $0x220] ss:$16 sps:$4 sm:$0xff]   ;;  %v18868_v28 = vld [vmem:[#allocation6 + $0x47] ss:$8 sm:$0xf0] }
0x10db   : > { %9508 = vst.msk [vmem:[#allocation6 + $0x48] sm:$0xff] %vm5059_vm0, %v9492_v62  ;;  %v18854_v7 = vpack.c.bf16 %v6706_v16, %v6705_v53  ;;  %v6112_v15 = vor.u32 %v18284_v5, %v20285_v6  ;;  %v9497_v58 = vmul.f32 %v14878_v30, %v12589_v37  ;;  %v9452_v23 = vpop.f32.mrb[221].mxu1  ;;  %v14291_v30 = vld [vmem:[#allocation18 + $0x244] ss:$16 sps:$4 sm:$0xff]   ;;  %v18877_v37 = vld [vmem:[#allocation18 + $0x24c] ss:$16 sps:$4 sm:$0xff]  }
0x10dc   : > { %v5566_v17 = vsel %vm5059_vm0, %v20284_v11, %v13310_v60  ;;  %v5565_v10 = vsel %vm5059_vm0, %v5472_v12, %v13309_v2  ;;  %v18864_v12 = vld [vmem:[#allocation6 + $0x45] ss:$8 sm:$0xf0]  ;;  %v9495_v60 = vmul.f32 %v14880_v25, %v9452_v23  ;;  %v12590_v2 = vpop.f32.mrb[222].mxu1 }
0x10dd   : > { %v5573_v44 = vpack.c.bf16 %v5566_v17, %v5565_v10  ;;  %v13313_v26 = vpop.permute.xlu1 %13312  ;;  %v9455_v16 = vpop.f32.mrb[223].mxu1  ;;  %v20286_v10 = vld [vmem:[#allocation47_spill] sm:$0xff]  ;;  %9513 = vst.msk [vmem:[#allocation6 + $0x70] sm:$0xff] %vm5059_vm0, %v9497_v58  ;;  %v20288_v6 = vld [vmem:[#allocation54_spill] sm:$0xff] }
0x10de   : > { %v13315_v57 = vunpack.i.h.bf16 %v13313_v26  ;;  %v13314_v36 = vunpack.i.l.bf16 %v13313_v26  ;;  %9511 = vst.msk [vmem:[#allocation6 + $0x60] sm:$0xff] %vm5059_vm0, %v9495_v60  ;;  %v9516_v40 = vld [vmem:[#allocation6] ss:$8 sm:$0xf0] }
0x10df   : > { %10466 = vmatmul.mubr.bf16.vlgmr.msra.gmra.mrb[224].mxu1 %v5573_v44  ;;  %10692 = vmatmul.mubr.bf16.vlgmr.msra.gmra.mrb[224].mxu0 %v5573_v44  ;;  %v20287_v44 = vld [vmem:[#allocation132_spill] sm:$0xff] }
0x10e0   : > { %v14882_v62 = vpop.eup %14881  ;;  %v6177_v51 = vsel %vm5059_vm0, %v6109_v33, %v13314_v36  ;;  %v6178_v53 = vsel %vm5059_vm0, %v6112_v15, %v13315_v57  ;;  %10547 = vmatpush1.bf16.msra.mxu1 %v14277_v48  ;;  %10773 = vmatpush1.bf16.msra.mxu0 %v18856_v50  ;;  %v6639_v26 = vor.u32 %v20287_v44, %v20286_v10  ;;  %v13338_v33 = vpop.permute.xlu0 %13337  ;;  %v9522_v10 = vld [vmem:[#allocation6 + $0x1] ss:$8 sm:$0xf0]  ;;  %v14303_v44 = vld [vmem:[#allocation18 + $0x284] ss:$16 sps:$4 sm:$0xff]  }
0x10e1   : > { %v14884_v45 = vpop.eup %14883  ;;  %v9498_v5 = vmul.f32 %v14882_v62, %v12590_v2  ;;  %v13323_v11 = vpop.permute.xlu1 %13322  ;;  %v6184_v17 = vpack.c.bf16 %v6178_v53, %v6177_v51  ;;  %10548 = vmatprep.subr.bf16.mxu1 %v14285_v24  ;;  %10774 = vmatprep.subr.bf16.mxu0 %v18858_v63  ;;  %v6642_v15 = vor.u32 %v18398_v47, %v20288_v6  ;;  %v13340_v25 = vunpack.i.h.bf16 %v13338_v33 }
0x10e2   : > { %v9496_v48 = vmul.f32 %v14884_v45, %v9455_v16  ;;  %v13325_v57 = vunpack.i.h.bf16 %v13323_v11  ;;  %v13324_v36 = vunpack.i.l.bf16 %v13323_v11  ;;  %v13339_v23 = vunpack.i.l.bf16 %v13338_v33  ;;  %v14289_v45 = vld [vmem:[#allocation18 + $0x240] ss:$16 sps:$4 sm:$0xff]   ;;  %v14297_v16 = vld [vmem:[#allocation18 + $0x264] ss:$16 sps:$4 sm:$0xff]   ;;  %v18900_v11 = vld [vmem:[#allocation18 + $0x26c] ss:$16 sps:$4 sm:$0xff]  }
0x10e3   : > { %10475 = vmatprep.mubr.bf16.mxu1 %v6184_v17  ;;  %10701 = vmatprep.mubr.bf16.mxu0 %v6184_v17  ;;  %9514 = vst.msk [vmem:[#allocation6 + $0x78] sm:$0xff] %vm5059_vm0, %v9498_v5  ;;  %v20289_v47 = vor.u32 %v18450_v4, %v18434_v31  ;;  %v20290_v51 = vor.u32 %v18496_v54, %v18486_v29  ;;  %v18895_v5 = vld [vmem:[#allocation18 + $0x248] ss:$16 sps:$4 sm:$0xff]   ;;  %v14295_v31 = vld [vmem:[#allocation18 + $0x260] ss:$16 sps:$4 sm:$0xff]  }
0x10e4   : > { %v6707_v24 = vsel %vm5059_vm0, %v6639_v26, %v13324_v36  ;;  %v6708_v58 = vsel %vm5059_vm0, %v6642_v15, %v13325_v57  ;;  %9512 = vst.msk [vmem:[#allocation6 + $0x68] sm:$0xff] %vm5059_vm0, %v9496_v48  ;;  %10549 = vmatpush1.bf16.msra.mxu1 %v14283_v59  ;;  %10775 = vmatpush1.bf16.msra.mxu0 %v18871_v22  ;;  %v18904_v4 = vld [vmem:[#allocation18 + $0x268] ss:$16 sps:$4 sm:$0xff]   ;;  %v18906_v26 = vld [vmem:[#allocation18 + $0x28c] ss:$16 sps:$4 sm:$0xff]  }
0x10e5   : > { %v13333_v62 = vpop.permute.xlu1 %13332  ;;  %v6714_v2 = vpack.c.bf16 %v6708_v58, %v6707_v24  ;;  %v7315_v60 = vsel %vm5059_vm0, %v20289_v47, %v13339_v23  ;;  %v7316_v53 = vsel %vm5059_vm0, %v20290_v51, %v13340_v25  ;;  %10550 = vmatprep.subr.bf16.mxu1 %v14291_v30  ;;  %10776 = vmatprep.subr.bf16.mxu0 %v18877_v37  ;;  %v9534_v17 = vld [vmem:[#allocation6 + $0x3] ss:$8 sm:$0xf0]  ;;  %v9521_v48 = vld [vmem:[#allocation6 + $0x1] ss:$8 sm:$0xf] }
0x10e6   : > { %v18898_v59 = vpack.c.bf16 %v7316_v53, %v7315_v60  ;;  %v13335_v54 = vunpack.i.h.bf16 %v13333_v62  ;;  %v13334_v29 = vunpack.i.l.bf16 %v13333_v62  ;;  %v9533_v30 = vld [vmem:[#allocation6 + $0x3] ss:$8 sm:$0xf]  ;;  %v9524_v36 = vld [vmem:[#allocation6 + $0x41] ss:$8 sm:$0xf]  ;;  %v7252_v33 = vor.u32 %v18515_v21, %v18490_v41 }
0x10e7   : > { %10476 = vmatmul.mubr.bf16.gmra.mrb[228].mxu1 %v18829_v19  ;;  %10702 = vmatmul.mubr.bf16.gmra.mrb[228].mxu0 %v18829_v19  ;;  %v9536_v57 = vld [vmem:[#allocation6 + $0x43] ss:$8 sm:$0xf]  ;;  %v7249_v19 = vor.u32 %v18469_v56, %v18440_v39  ;;  %v9535_v6 = vor.u32 %v9534_v17, %v9533_v30  ;;  %v9523_v25 = vor.u32 %v9522_v10, %v9521_v48  ;;  %v14309_v10 = vld [vmem:[#allocation18 + $0x2a4] ss:$16 sps:$4 sm:$0xff]  }
0x10e8   : > { %10485 = vmatprep.mubr.bf16.mxu1 %v6714_v2  ;;  %10711 = vmatprep.mubr.bf16.mxu0 %v6714_v2  ;;  %v7318_v2 = vsel %vm5059_vm0, %v7252_v33, %v13335_v54  ;;  %v20291_v47 = vld [vmem:[#allocation93_spill] sm:$0xff]  ;;  %v20292_v60 = vld [vmem:[#allocation43_spill] sm:$0xff]  ;;  %v20293_v41 = vld [vmem:[#allocation42_spill] sm:$0xff] }
0x10e9   : > { %10551 = vmatpush1.bf16.msra.mxu1 %v14289_v45  ;;  %10777 = vmatpush1.bf16.msra.mxu0 %v18895_v5  ;;  %v7317_v62 = vsel %vm5059_vm0, %v7249_v19, %v13334_v29  ;;  %v5516_v51 = vor.u32 %v20292_v60, %v20291_v47  ;;  %v20294_v21 = vld [vmem:[#allocation96_spill] sm:$0xff]  ;;  %v14301_v45 = vld [vmem:[#allocation18 + $0x280] ss:$16 sps:$4 sm:$0xff]   ;;  %v20305_v60 = vld [vmem:[#allocation98_spill] sm:$0xff] }
0x10ea   : > { %10552 = vmatprep.subr.bf16.mxu1 %v14297_v16  ;;  %10778 = vmatprep.subr.bf16.mxu0 %v18900_v11  ;;  %v5532_v53 = vor.u32 %v20294_v21, %v20293_v41  ;;  %v18921_v16 = vld [vmem:[#allocation18 + $0x288] ss:$16 sps:$4 sm:$0xff]   ;;  %v7324_v54 = vpack.c.bf16 %v7318_v2, %v7317_v62  ;;  %v18928_v30 = vld [vmem:[#allocation18 + $0x2ac] ss:$16 sps:$4 sm:$0xff]   ;;  %v20298_v48 = vld [vmem:[#allocation91_spill] sm:$0xff] }
0x10eb   : > { %v9537_v15 = vld [vmem:[#allocation6 + $0x43] ss:$8 sm:$0xf0]  ;;  %v9525_v23 = vld [vmem:[#allocation6 + $0x41] ss:$8 sm:$0xf0] }
0x10ec   : > { %v9538_v24 = vor.u32 %v9537_v15, %v9536_v57  ;;  %v9526_v58 = vor.u32 %v9525_v23, %v9524_v36  ;;  %v20295_v29 = vld [vmem:[#allocation40_spill] sm:$0xff]  ;;  %v20299_v33 = vld [vmem:[#allocation125_spill] sm:$0xff]  ;;  %v20301_v15 = vld [vmem:[#allocation46_spill] sm:$0xff] }
0x10ed   : > { %10553 = vmatpush1.bf16.msra.mxu1 %v14295_v31  ;;  %10779 = vmatpush1.bf16.msra.mxu0 %v18904_v4  ;;  %v20296_v31 = vld [vmem:[#allocation38_spill] sm:$0xff]  ;;  %v20303_v62 = vld [vmem:[#allocation100_spill] sm:$0xff]  ;;  %v20304_v2 = vld [vmem:[#allocation101_spill] sm:$0xff] }
0x10ee   : > { %v13371_v39 = vpack.i.bf16 %v9538_v24, %v9535_v6  ;;  %v13376_v56 = vpack.i.bf16 %v9526_v58, %v9523_v25  ;;  %10554 = vmatprep.subr.bf16.mxu1 %v14303_v44  ;;  %10780 = vmatprep.subr.bf16.mxu0 %v18906_v26  ;;  %v5512_v17 = vor.u32 %v20296_v31, %v20295_v29  ;;  %v20297_v44 = vld [vmem:[#allocation108_spill] sm:$0xff]  ;;  %v20302_v25 = vld [vmem:[#allocation126_spill] sm:$0xff]  ;;  %v14307_v24 = vld [vmem:[#allocation18 + $0x2a0] ss:$16 sps:$4 sm:$0xff]  }
0x10ef   : > { %10486 = vmatmul.mubr.bf16.gmra.mrb[232].mxu1 %v18854_v7  ;;  %10712 = vmatmul.mubr.bf16.gmra.mrb[232].mxu0 %v18854_v7  ;;  %v5528_v57 = vor.u32 %v20298_v48, %v20297_v44  ;;  %v20300_v7 = vld [vmem:[#allocation128_spill] sm:$0xff]  ;;  %v6130_v23 = vor.u32 %v20302_v25, %v20301_v15  ;;  %v6139_v47 = vor.u32 %v20304_v2, %v20303_v62  ;;  %v14315_v21 = vld [vmem:[#allocation18 + $0x2c4] ss:$16 sps:$4 sm:$0xff]   ;;  %v20314_v25 = vld [vmem:[#allocation170_spill] sm:$0xff] }
0x10f0   : > { %13372 = vrot.lane.b32.xlu1 %v13371_v39, %s15242_s8  ;;  %13377 = vrot.lane.b32.xlu0 %v13376_v56, %s15242_s8  ;;  %v13386_v36 = vpack.i.bf16 %v5516_v51, %v5512_v17  ;;  %v6142_v6 = vor.u32 %v20300_v7, %v20299_v33  ;;  %v18939_v58 = vld [vmem:[#allocation18 + $0x2a8] ss:$16 sps:$4 sm:$0xff]   ;;  %v20307_v56 = vld [vmem:[#allocation71_spill] sm:$0xff]  ;;  %v20308_v29 = vld [vmem:[#allocation77_spill] sm:$0xff] }
0x10f1   : > { %10495 = vmatprep.mubr.bf16.mxu1 %v7324_v54  ;;  %10721 = vmatprep.mubr.bf16.mxu0 %v7324_v54  ;;  %v13381_v19 = vpack.i.bf16 %v5532_v53, %v5528_v57  ;;  %v20306_v51 = vld [vmem:[#allocation102_spill] sm:$0xff]  ;;  %v6660_v41 = vor.u32 %v18405_v9, %v20307_v56  ;;  %v6672_v31 = vor.u32 %v18413_v42, %v20308_v29  ;;  %v14313_v17 = vld [vmem:[#allocation18 + $0x2c0] ss:$16 sps:$4 sm:$0xff]   ;;  %v14321_v57 = vld [vmem:[#allocation18 + $0x2e4] ss:$16 sps:$4 sm:$0xff]  }
0x10f2   : > { %10555 = vmatpush1.bf16.msra.mxu1 %v14301_v45  ;;  %10781 = vmatpush1.bf16.msra.mxu0 %v18921_v16  ;;  %v6127_v39 = vor.u32 %v20306_v51, %v20305_v60  ;;  %v18950_v53 = vld [vmem:[#allocation18 + $0x2cc] ss:$16 sps:$4 sm:$0xff]   ;;  %v13391_v45 = vpack.i.bf16 %v6142_v6, %v6139_v47  ;;  %v20309_v44 = vld [vmem:[#allocation127_spill] sm:$0xff]  ;;  %v20310_v9 = vld [vmem:[#allocation73_spill] sm:$0xff] }
0x10f3   : > { %10556 = vmatprep.subr.bf16.mxu1 %v14309_v10  ;;  %10782 = vmatprep.subr.bf16.mxu0 %v18928_v30  ;;  %v18955_v10 = vld [vmem:[#allocation18 + $0x2c8] ss:$16 sps:$4 sm:$0xff]   ;;  %v6657_v48 = vor.u32 %v20310_v9, %v20309_v44  ;;  %v20311_v42 = vld [vmem:[#allocation129_spill] sm:$0xff]  ;;  %v20313_v15 = vld [vmem:[#allocation171_spill] sm:$0xff] }
0x10f4   : > { %13382 = vrot.lane.b32.xlu1 %v13381_v19, %s15242_s8  ;;  %13387 = vrot.lane.b32.xlu0 %v13386_v36, %s15242_s8  ;;  %v13396_v54 = vpack.i.bf16 %v6130_v23, %v6127_v39  ;;  %v18961_v36 = vld [vmem:[#allocation18 + $0x2ec] ss:$16 sps:$4 sm:$0xff]   ;;  %v20312_v19 = vld [vmem:[#allocation75_spill] sm:$0xff]  ;;  %v7270_v23 = vor.u32 %v20314_v25, %v20313_v15  ;;  %v18973_v62 = vld [vmem:[#allocation18 + $0x2e8] ss:$16 sps:$4 sm:$0xff]  }
0x10f5   : > { %v6669_v33 = vor.u32 %v20312_v19, %v20311_v42  ;;  %v13406_v7 = vpack.i.bf16 %v6660_v41, %v6657_v48  ;;  %v14327_v2 = vld [vmem:[#allocation18 + $0x304] ss:$16 sps:$4 sm:$0xff]   ;;  %v18976_v47 = vld [vmem:[#allocation18 + $0x30c] ss:$16 sps:$4 sm:$0xff]   ;;  %v14325_v9 = vld [vmem:[#allocation18 + $0x300] ss:$16 sps:$4 sm:$0xff]  }
0x10f6   : > { %10557 = vmatpush1.bf16.msra.mxu1 %v14307_v24  ;;  %10783 = vmatpush1.bf16.msra.mxu0 %v18939_v58  ;;  %v14319_v24 = vld [vmem:[#allocation18 + $0x2e0] ss:$16 sps:$4 sm:$0xff]   ;;  %v20317_v51 = vld [vmem:[#allocation152_spill] sm:$0xff]  ;;  %v20318_v39 = vld [vmem:[#allocation166_spill] sm:$0xff] }
0x10f7   : > { %10496 = vmatmul.mubr.bf16.gmra.mrb[236].mxu1 %v18898_v59  ;;  %10722 = vmatmul.mubr.bf16.gmra.mrb[236].mxu0 %v18898_v59  ;;  %v13401_v6 = vpack.i.bf16 %v6672_v31, %v6669_v33  ;;  %v7282_v59 = vor.u32 %v18525_v13, %v18503_v8  ;;  %v20315_v8 = vld [vmem:[#allocation165_spill] sm:$0xff]  ;;  %v20316_v13 = vld [vmem:[#allocation168_spill] sm:$0xff]  ;;  %v7267_v56 = vor.u32 %v20318_v39, %v20317_v51  ;;  %v20319_v41 = vld [vmem:[#allocation118_spill] sm:$0xff] }
0x10f8   : > { %13392 = vrot.lane.b32.xlu1 %v13391_v45, %s15242_s8  ;;  %13397 = vrot.lane.b32.xlu0 %v13396_v54, %s15242_s8  ;;  %v7279_v60 = vor.u32 %v20316_v13, %v20315_v8  ;;  %v20321_v54 = vld [vmem:[#allocation192_spill] sm:$0xff]  ;;  %v20322_v29 = vld [vmem:[#allocation115_spill] sm:$0xff]  ;;  %v20325_v33 = vld [vmem:[#allocation82_spill] sm:$0xff] }
0x10f9   : > { %10558 = vmatprep.subr.bf16.mxu1 %v14315_v21  ;;  %10784 = vmatprep.subr.bf16.mxu0 %v18950_v53  ;;  %v20320_v21 = vld [vmem:[#allocation120_spill] sm:$0xff]  ;;  %v7800_v31 = vor.u32 %v20322_v29, %v20321_v54  ;;  %v13416_v44 = vpack.i.bf16 %v7270_v23, %v7267_v56  ;;  %v14333_v15 = vld [vmem:[#allocation18 + $0x324] ss:$16 sps:$4 sm:$0xff]   ;;  %v20327_v13 = vld [vmem:[#allocation74_spill] sm:$0xff] }
0x10fa   : > { %10559 = vmatpush1.bf16.msra.mxu1 %v14313_v17  ;;  %10785 = vmatpush1.bf16.msra.mxu0 %v18955_v10  ;;  %v7812_v45 = vor.u32 %v20320_v21, %v20319_v41  ;;  %v13411_v17 = vpack.i.bf16 %v7282_v59, %v7279_v60  ;;  %v18989_v48 = vld [vmem:[#allocation18 + $0x308] ss:$16 sps:$4 sm:$0xff]   ;;  %v18996_v25 = vld [vmem:[#allocation18 + $0x32c] ss:$16 sps:$4 sm:$0xff]  }
0x10fb   : > { %10560 = vmatprep.subr.bf16.mxu1 %v14321_v57  ;;  %10786 = vmatprep.subr.bf16.mxu0 %v18961_v36  ;;  %v20323_v57 = vld [vmem:[#allocation189_spill] sm:$0xff]  ;;  %v20324_v42 = vld [vmem:[#allocation188_spill] sm:$0xff]  ;;  %v20328_v60 = vld [vmem:[#allocation110_spill] sm:$0xff] }
0x10fc   : > { %13402 = vrot.lane.b32.xlu1 %v13401_v6, %s15242_s8  ;;  %13407 = vrot.lane.b32.xlu0 %v13406_v7, %s15242_s8  ;;  %v7809_v19 = vor.u32 %v20324_v42, %v20323_v57  ;;  %v20326_v7 = vld [vmem:[#allocation191_spill] sm:$0xff]  ;;  %v7779_v51 = vor.u32 %v20328_v60, %v20327_v13  ;;  %v20329_v39 = vld [vmem:[#allocation190_spill] sm:$0xff]  ;;  %v20330_v56 = vld [vmem:[#allocation116_spill] sm:$0xff]  ;;  %v8952_v13 = vor.u32 %v18868_v28, %v18833_v52 }
0x10fd   : > { %v7797_v6 = vor.u32 %v20326_v7, %v20325_v33  ;;  %v7782_v41 = vor.u32 %v20330_v56, %v20329_v39  ;;  %v19005_v57 = vld [vmem:[#allocation18 + $0x328] ss:$16 sps:$4 sm:$0xff]   ;;  %v20332_v42 = vld [vmem:[#allocation169_spill] sm:$0xff]  ;;  %v19027_v39 = vld [vmem:[#allocation18 + $0x34c] ss:$16 sps:$4 sm:$0xff]   ;;  %v8937_v56 = vor.u32 %v18787_v20, %v18745_v1 }
0x10fe   : > { %10561 = vmatpush1.bf16.msra.mxu1 %v14319_v24  ;;  %10787 = vmatpush1.bf16.msra.mxu0 %v18973_v62  ;;  %v13421_v24 = vpack.i.bf16 %v7812_v45, %v7809_v19  ;;  %v20334_v7 = vld [vmem:[#allocation113_spill] sm:$0xff]  ;;  %v20337_v52 = vld [vmem:[#allocation63_spill] sm:$0xff] }
0x10ff   : > { %10562 = vmatprep.subr.bf16.mxu1 %v14327_v2  ;;  %10788 = vmatprep.subr.bf16.mxu0 %v18976_v47  ;;  %v13426_v8 = vpack.i.bf16 %v7800_v31, %v7797_v6  ;;  %v20335_v6 = vld [vmem:[#allocation114_spill] sm:$0xff]  ;;  %v14339_v60 = vld [vmem:[#allocation18 + $0x344] ss:$16 sps:$4 sm:$0xff]   ;;  %v8949_v28 = vor.u32 %v20337_v52, %v18750_v0 }
0x1100   : > { %13412 = vrot.lane.b32.xlu1 %v13411_v17, %s15242_s8  ;;  %13417 = vrot.lane.b32.xlu0 %v13416_v44, %s15242_s8  ;;  %v13343_v59 = vpop.permute.xlu1 %13342  ;;  %v14331_v17 = vld [vmem:[#allocation18 + $0x320] ss:$16 sps:$4 sm:$0xff]   ;;  %v20331_v44 = vld [vmem:[#allocation72_spill] sm:$0xff] }
0x1101   : > { %v13348_v23 = vpop.permute.xlu0 %13347  ;;  %v13345_v2 = vunpack.i.h.bf16 %v13343_v59  ;;  %v13344_v21 = vunpack.i.l.bf16 %v13343_v59  ;;  %v20333_v19 = vor.u32 %v20331_v44, %v20332_v42  ;;  %v20336_v59 = vor.u32 %v20334_v7, %v20335_v6  ;;  %v9560_v20 = vld [vmem:[#allocation6 + $0x47] ss:$8 sm:$0xf]  ;;  %v9548_v1 = vld [vmem:[#allocation6 + $0x45] ss:$8 sm:$0xf] }
0x1102   : > { %v13350_v54 = vunpack.i.h.bf16 %v13348_v23  ;;  %v13349_v29 = vunpack.i.l.bf16 %v13348_v23  ;;  %10563 = vmatpush1.bf16.msra.mxu1 %v14325_v9  ;;  %10789 = vmatpush1.bf16.msra.mxu0 %v18989_v48  ;;  %v8940_v23 = vor.u32 %v18864_v12, %v18831_v55  ;;  %v9549_v55 = vld [vmem:[#allocation6 + $0x45] ss:$8 sm:$0xf0]  ;;  %v9531_v14 = vld [vmem:[#allocation6 + $0x42] ss:$8 sm:$0xf0] }
0x1103   : > { %10564 = vmatprep.subr.bf16.mxu1 %v14333_v15  ;;  %10790 = vmatprep.subr.bf16.mxu0 %v18996_v25  ;;  %v7847_v45 = vsel %vm5059_vm0, %v7779_v51, %v13344_v21  ;;  %v7848_v31 = vsel %vm5059_vm0, %v7782_v41, %v13345_v2  ;;  %v19025_v51 = vld [vmem:[#allocation18 + $0x348] ss:$16 sps:$4 sm:$0xff]   ;;  %v9561_v41 = vld [vmem:[#allocation6 + $0x47] ss:$8 sm:$0xf0]  ;;  %v9550_v42 = vor.u32 %v9549_v55, %v9548_v1 }
0x1104   : > { %13422 = vrot.lane.b32.xlu1 %v13421_v24, %s15242_s8  ;;  %13427 = vrot.lane.b32.xlu0 %v13426_v8, %s15242_s8  ;;  %v7845_v9 = vsel %vm5059_vm0, %v20333_v19, %v13349_v29  ;;  %v7854_v33 = vpack.c.bf16 %v7848_v31, %v7847_v45  ;;  %v7846_v15 = vsel %vm5059_vm0, %v20336_v59, %v13350_v54  ;;  %v14337_v24 = vld [vmem:[#allocation18 + $0x340] ss:$16 sps:$4 sm:$0xff]   ;;  %v14345_v12 = vld [vmem:[#allocation18 + $0x364] ss:$16 sps:$4 sm:$0xff]   ;;  %v19031_v2 = vld [vmem:[#allocation18 + $0x36c] ss:$16 sps:$4 sm:$0xff]  }
0x1105   : > { %v7853_v8 = vpack.c.bf16 %v7846_v15, %v7845_v9  ;;  %v9558_v21 = vld [vmem:[#allocation6 + $0x7] ss:$8 sm:$0xf0]  ;;  %v9546_v54 = vld [vmem:[#allocation6 + $0x5] ss:$8 sm:$0xf0]  ;;  %v13446_v29 = vpack.i.bf16 %v8940_v23, %v8937_v56  ;;  %v9562_v31 = vor.u32 %v9561_v41, %v9560_v20 }
0x1106   : > { %10565 = vmatpush1.bf16.msra.mxu1 %v14331_v17  ;;  %10791 = vmatpush1.bf16.msra.mxu0 %v19005_v57  ;;  %v13441_v17 = vpack.i.bf16 %v8952_v13, %v8949_v28  ;;  %v9557_v45 = vld [vmem:[#allocation6 + $0x7] ss:$8 sm:$0xf]  ;;  %v9545_v44 = vld [vmem:[#allocation6 + $0x5] ss:$8 sm:$0xf] }
0x1107   : > { %10505 = vmatprep.mubr.bf16.mxu1 %v7854_v33  ;;  %10731 = vmatprep.mubr.bf16.mxu0 %v7854_v33  ;;  %v9559_v0 = vor.u32 %v9558_v21, %v9557_v45  ;;  %v9547_v19 = vor.u32 %v9546_v54, %v9545_v44  ;;  %v14351_v9 = vld [vmem:[#allocation18 + $0x384] ss:$16 sps:$4 sm:$0xff]   ;;  %v19046_v33 = vld [vmem:[#allocation18 + $0x38c] ss:$16 sps:$4 sm:$0xff]   ;;  %v14349_v59 = vld [vmem:[#allocation18 + $0x380] ss:$16 sps:$4 sm:$0xff]  }
0x1108   : > { %13432 = vrot.lane.b32.xlu1 %v18723_v46, %s15242_s8  ;;  %13437 = vrot.lane.b32.xlu0 %v18718_v61, %s15242_s8  ;;  %v14343_v61 = vld [vmem:[#allocation18 + $0x360] ss:$16 sps:$4 sm:$0xff]   ;;  %v19041_v46 = vld [vmem:[#allocation18 + $0x368] ss:$16 sps:$4 sm:$0xff]   ;;  %v14357_v23 = vld [vmem:[#allocation18 + $0x3a4] ss:$16 sps:$4 sm:$0xff]  }
0x1109   : > { %10506 = vmatmul.mubr.bf16.gmra.mrb[240].mxu1 %v7853_v8  ;;  %10732 = vmatmul.mubr.bf16.gmra.mrb[240].mxu0 %v7853_v8  ;;  %v13451_v7 = vpack.i.bf16 %v9562_v31, %v9559_v0  ;;  %v13456_v6 = vpack.i.bf16 %v9550_v42, %v9547_v19  ;;  %v19049_v15 = vld [vmem:[#allocation18 + $0x388] ss:$16 sps:$4 sm:$0xff]   ;;  %v14355_v8 = vld [vmem:[#allocation18 + $0x3a0] ss:$16 sps:$4 sm:$0xff]   ;;  %v19060_v56 = vld [vmem:[#allocation18 + $0x3cc] ss:$16 sps:$4 sm:$0xff]  }
0x110a   : > { %10566 = vmatprep.subr.bf16.mxu1 %v14339_v60  ;;  %10792 = vmatprep.subr.bf16.mxu0 %v19027_v39  ;;  %v19057_v13 = vld [vmem:[#allocation18 + $0x3a8] ss:$16 sps:$4 sm:$0xff]   ;;  %v14363_v60 = vld [vmem:[#allocation18 + $0x3c4] ss:$16 sps:$4 sm:$0xff]   ;;  %v14361_v41 = vld [vmem:[#allocation18 + $0x3c0] ss:$16 sps:$4 sm:$0xff]  }
0x110b   : > { %10567 = vmatpush1.bf16.msra.mxu1 %v14337_v24  ;;  %10793 = vmatpush1.bf16.msra.mxu0 %v19025_v51  ;;  %v19053_v24 = vld [vmem:[#allocation18 + $0x3ac] ss:$16 sps:$4 sm:$0xff]   ;;  %v19063_v55 = vld [vmem:[#allocation18 + $0x3c8] ss:$16 sps:$4 sm:$0xff]   ;;  %v14367_v28 = vld [vmem:[#allocation18 + $0x3e0] ss:$16 sps:$4 sm:$0xff]  }
0x110c   : > { %13442 = vrot.lane.b32.xlu1 %v13441_v17, %s15242_s8  ;;  %13447 = vrot.lane.b32.xlu0 %v13446_v29, %s15242_s8  ;;  %v19066_v52 = vld [vmem:[#allocation18 + $0x3ec] ss:$16 sps:$4 sm:$0xff]   ;;  %v19069_v21 = vld [vmem:[#allocation18 + $0x3e8] ss:$16 sps:$4 sm:$0xff]   ;;  %v20338_v44 = vld [vmem:[#allocation123_spill] sm:$0xff] }
0x110d   : > { %10568 = vmatprep.subr.bf16.mxu1 %v14345_v12  ;;  %10794 = vmatprep.subr.bf16.mxu0 %v19031_v2  ;;  %v14369_v12 = vld [vmem:[#allocation18 + $0x3e4] ss:$16 sps:$4 sm:$0xff]   ;;  %v14950_v54 = vld [vmem:[#allocation18 + $0x20c] ss:$16 sps:$4 sm:$0xff]  }
0x110e   : > { %v20339_v42 = vld [vmem:[#allocation119_spill] sm:$0xff]  ;;  %v20341_v19 = vld [vmem:[#allocation140_spill] sm:$0xff] }
0x110f   : > { %10569 = vmatpush1.bf16.msra.mxu1 %v14343_v61  ;;  %10795 = vmatpush1.bf16.msra.mxu0 %v19041_v46  ;;  %v20340_v61 = vor.u32 %v20338_v44, %v20339_v42 }
0x1110   : > { %13452 = vrot.lane.b32.xlu1 %v13451_v7, %s15242_s8  ;;  %13457 = vrot.lane.b32.xlu0 %v13456_v6, %s15242_s8  ;;  %s10950_s8 = scalar_lea.sflag [#allocation9], %s15615_s11 }
0x1111   : > { %10570 = vmatprep.subr.bf16.mxu1 %v14351_v9  ;;  %10796 = vmatprep.subr.bf16.mxu0 %v19046_v33  ;;  %v20342_v9 = vld [vmem:[#allocation136_spill] sm:$0xff] }
0x1112   : > { %v20343_v7 = vor.u32 %v20341_v19, %v20342_v9  ;;  %v20350_v9 = vld [vmem:[#allocation148_spill] sm:$0xff] }
0x1113   : > { %10571 = vmatpush1.bf16.msra.mxu1 %v14349_v59  ;;  %10797 = vmatpush1.bf16.msra.mxu0 %v19049_v15  ;;  %v20344_v59 = vld [vmem:[#allocation134_spill] sm:$0xff] }
0x1114   : > { %10572 = vmatprep.subr.bf16.mxu1 %v14357_v23  ;;  %10798 = vmatprep.subr.bf16.mxu0 %v19053_v24  ;;  %v20345_v23 = vld [vmem:[#allocation121_spill] sm:$0xff] }
0x1117   : > { %10573 = vmatpush1.bf16.msra.mxu1 %v14355_v8  ;;  %10799 = vmatpush1.bf16.msra.mxu0 %v19057_v13  ;;  %v20346_v8 = vor.u32 %v20344_v59, %v20345_v23 }
0x1118   : > { %10574 = vmatprep.subr.bf16.mxu1 %v14363_v60  ;;  %10800 = vmatprep.subr.bf16.mxu0 %v19060_v56 }
0x111b   : > { %10575 = vmatpush1.bf16.msra.mxu1 %v14361_v41  ;;  %10801 = vmatpush1.bf16.msra.mxu0 %v19063_v55  ;;  %v20347_v41 = vld [vmem:[#allocation142_spill] sm:$0xff] }
0x111c   : > { %10576 = vmatprep.subr.bf16.mxu1 %v14369_v12  ;;  %10802 = vmatprep.subr.bf16.mxu0 %v19066_v52  ;;  %v20348_v12 = vld [vmem:[#allocation138_spill] sm:$0xff] }
0x111f   : > { %10577 = vmatpush1.bf16.msra.mxu1 %v14367_v28  ;;  %10803 = vmatpush1.bf16.msra.mxu0 %v19069_v21  ;;  %v20349_v28 = vor.u32 %v20347_v41, %v20348_v12 }
0x1120   : > { %12591 = vmatprep.subr.bf16.mxu1 %v14950_v54 }
0x1123   : > { %v13353_v29 = vpop.permute.xlu1 %13352  ;;  %v13358_v20 = vpop.permute.xlu0 %13357 }
0x1124   : > { %v13355_v1 = vunpack.i.h.bf16 %v13353_v29  ;;  %v13354_v17 = vunpack.i.l.bf16 %v13353_v29  ;;  %v13360_v45 = vunpack.i.h.bf16 %v13358_v20  ;;  %v13359_v31 = vunpack.i.l.bf16 %v13358_v20 }
0x1126   : > { %v8457_v0 = vsel %vm5059_vm0, %v20340_v61, %v13354_v17  ;;  %v8458_v6 = vsel %vm5059_vm0, %v20343_v7, %v13355_v1  ;;  %v8455_v60 = vsel %vm5059_vm0, %v20346_v8, %v13359_v31  ;;  %v8456_v54 = vsel %vm5059_vm0, %v20349_v28, %v13360_v45  ;;  %v20351_v7 = vld [vmem:[#allocation144_spill] sm:$0xff] }
0x1127   : > { %v8464_v29 = vpack.c.bf16 %v8458_v6, %v8457_v0  ;;  %v8463_v20 = vpack.c.bf16 %v8456_v54, %v8455_v60  ;;  %v20352_v31 = vor.u32 %v20350_v9, %v20351_v7  ;;  %v20353_v0 = vld [vmem:[#allocation55_spill] sm:$0xff]  ;;  %v20354_v6 = vld [vmem:[#allocation146_spill] sm:$0xff] }
0x1128   : > { %v20355_v23 = vor.u32 %v20353_v0, %v20354_v6  ;;  %v9528_v28 = vld [vmem:[#allocation6 + $0x2] ss:$8 sm:$0xf0] }
0x1129   : > { %10515 = vmatprep.mubr.bf16.mxu1 %v8464_v29  ;;  %10741 = vmatprep.mubr.bf16.mxu0 %v8464_v29  ;;  %v9527_v54 = vld [vmem:[#allocation6 + $0x2] ss:$8 sm:$0xf]  ;;  %v9515_v29 = vld [vmem:[#allocation6] ss:$8 sm:$0xf] }
0x112a   : > { %10516 = vmatmul.mubr.bf16.gmra.mrb[244].mxu1 %v8463_v20  ;;  %10742 = vmatmul.mubr.bf16.gmra.mrb[244].mxu0 %v8463_v20  ;;  %v9530_v20 = vld [vmem:[#allocation6 + $0x42] ss:$8 sm:$0xf]  ;;  %v9517_v18 = vor.u32 %v9516_v40, %v9515_v29 }
0x112b   : > { %v9532_v32 = vor.u32 %v9531_v14, %v9530_v20  ;;  %v20357_v40 = vld [vmem:[#allocation106_spill] sm:$0xff]  ;;  %v20358_v29 = vld [vmem:[#allocation95_spill] sm:$0xff]  ;;  %v20359_v20 = vld [vmem:[#allocation92_spill] sm:$0xff] }
0x1141   : > { %v13363_v17 = vpop.permute.xlu1 %13362  ;;  %v13368_v44 = vpop.permute.xlu0 %13367 }
0x1142   : > { %v13365_v42 = vunpack.i.h.bf16 %v13363_v17  ;;  %v13364_v1 = vunpack.i.l.bf16 %v13363_v17  ;;  %v13370_v61 = vunpack.i.h.bf16 %v13368_v44  ;;  %v13369_v19 = vunpack.i.l.bf16 %v13368_v44  ;;  %v9518_v17 = vld [vmem:[#allocation6 + $0x40] ss:$8 sm:$0xf] }
0x1144   : > { %v8987_v59 = vsel %vm5059_vm0, %v20352_v31, %v13364_v1  ;;  %v8988_v45 = vsel %vm5059_vm0, %v8922_v34, %v13365_v42  ;;  %v8985_v8 = vsel %vm5059_vm0, %v20355_v23, %v13369_v19  ;;  %v8986_v60 = vsel %vm5059_vm0, %v8910_v35, %v13370_v61  ;;  %v9519_v34 = vld [vmem:[#allocation6 + $0x40] ss:$8 sm:$0xf0] }
0x1145   : > { %v8994_v41 = vpack.c.bf16 %v8988_v45, %v8987_v59  ;;  %v8993_v12 = vpack.c.bf16 %v8986_v60, %v8985_v8  ;;  %v9529_v1 = vor.u32 %v9528_v28, %v9527_v54  ;;  %v9520_v35 = vor.u32 %v9519_v34, %v9518_v17  ;;  %v20356_v28 = vld [vmem:[#allocation34_spill] sm:$0xff] }
0x1146   : > { %v5520_v14 = vor.u32 %v20357_v40, %v20356_v28  ;;  %v5524_v17 = vor.u32 %v20359_v20, %v20358_v29 }
0x1147   : > { %10525 = vmatprep.mubr.bf16.mxu1 %v8994_v41  ;;  %10751 = vmatprep.mubr.bf16.mxu0 %v8994_v41 }
0x1148   : > { %10526 = vmatmul.mubr.bf16.gmra.mrb[248].mxu1 %v8993_v12  ;;  %10752 = vmatmul.mubr.bf16.gmra.mrb[248].mxu0 %v8993_v12 }
0x1162   : > { %v13373_v44 = vpop.permute.xlu1 %13372  ;;  %v13378_v42 = vpop.permute.xlu0 %13377 }
0x1163   : > { %v13375_v61 = vunpack.i.h.bf16 %v13373_v44  ;;  %v13374_v19 = vunpack.i.l.bf16 %v13373_v44  ;;  %v13380_v9 = vunpack.i.h.bf16 %v13378_v42  ;;  %v13379_v7 = vunpack.i.l.bf16 %v13378_v42  ;;  %v20360_v42 = vld [vmem:[#allocation37_spill] sm:$0xff] }
0x1165   : > { %v9597_v31 = vsel %vm5059_vm0, %v9529_v1, %v13374_v19  ;;  %v9598_v59 = vsel %vm5059_vm0, %v9532_v32, %v13375_v61  ;;  %v9595_v45 = vsel %vm5059_vm0, %v9517_v18, %v13379_v7  ;;  %v9596_v0 = vsel %vm5059_vm0, %v9520_v35, %v13380_v9  ;;  %v20361_v1 = vld [vmem:[#allocation39_spill] sm:$0xff]  ;;  %v20362_v18 = vld [vmem:[#allocation89_spill] sm:$0xff]  ;;  %v20363_v35 = vld [vmem:[#allocation94_spill] sm:$0xff] }
0x1166   : > { %v13383_v6 = vpop.permute.xlu1 %13382  ;;  %v13388_v23 = vpop.permute.xlu0 %13387  ;;  %v9604_v8 = vpack.c.bf16 %v9598_v59, %v9597_v31  ;;  %v9603_v60 = vpack.c.bf16 %v9596_v0, %v9595_v45  ;;  %v5504_v32 = vor.u32 %v20361_v1, %v20360_v42  ;;  %v5508_v61 = vor.u32 %v20363_v35, %v20362_v18  ;;  %v20364_v45 = vld [vmem:[#allocation44_spill] sm:$0xff]  ;;  %v20365_v0 = vld [vmem:[#allocation99_spill] sm:$0xff] }
0x1167   : > { %v13385_v41 = vunpack.i.h.bf16 %v13383_v6  ;;  %v13384_v12 = vunpack.i.l.bf16 %v13383_v6  ;;  %v13390_v34 = vunpack.i.h.bf16 %v13388_v23  ;;  %v13389_v54 = vunpack.i.l.bf16 %v13388_v23  ;;  %v20366_v23 = vld [vmem:[#allocation48_spill] sm:$0xff] }
0x1168   : > { %10535 = vmatprep.mubr.bf16.mxu1 %v9604_v8  ;;  %10761 = vmatprep.mubr.bf16.mxu0 %v9604_v8  ;;  %v6133_v6 = vor.u32 %v20365_v0, %v20364_v45  ;;  %v20367_v8 = vld [vmem:[#allocation50_spill] sm:$0xff]  ;;  %v20373_v45 = vld [vmem:[#allocation51_spill] sm:$0xff] }
0x1169   : > { %10536 = vmatmul.mubr.bf16.gmra.mrb[252].mxu1 %v9603_v60  ;;  %10762 = vmatmul.mubr.bf16.gmra.mrb[252].mxu0 %v9603_v60  ;;  %v5571_v44 = vsel %vm5059_vm0, %v5520_v14, %v13384_v12  ;;  %v5572_v7 = vsel %vm5059_vm0, %v5524_v17, %v13385_v41  ;;  %v6136_v60 = vor.u32 %v20367_v8, %v20366_v23  ;;  %v20375_v23 = vld [vmem:[#allocation81_spill] sm:$0xff] }
0x116a   : > { %v13393_v19 = vpop.permute.xlu1 %13392  ;;  %v13398_v9 = vpop.permute.xlu0 %13397  ;;  %v5570_v12 = vsel %vm5059_vm0, %v5508_v61, %v13390_v34  ;;  %v5569_v28 = vsel %vm5059_vm0, %v5504_v32, %v13389_v54  ;;  %v5576_v40 = vpack.c.bf16 %v5572_v7, %v5571_v44  ;;  %v20368_v54 = vld [vmem:[#allocation41_spill] sm:$0xff]  ;;  %v20370_v7 = vld [vmem:[#allocation103_spill] sm:$0xff] }
0x116b   : > { %v13395_v31 = vunpack.i.h.bf16 %v13393_v19  ;;  %v13394_v59 = vunpack.i.l.bf16 %v13393_v19  ;;  %v5575_v17 = vpack.c.bf16 %v5570_v12, %v5569_v28  ;;  %v13400_v42 = vunpack.i.h.bf16 %v13398_v9  ;;  %v20369_v44 = vld [vmem:[#allocation97_spill] sm:$0xff] }
0x116c   : > { %10578 = vmatprep.mubr.bf16.mxu1 %v5576_v40  ;;  %10804 = vmatprep.mubr.bf16.mxu0 %v5576_v40  ;;  %v13399_v1 = vunpack.i.l.bf16 %v13398_v9  ;;  %v6121_v32 = vor.u32 %v20369_v44, %v20368_v54  ;;  %v20372_v9 = vld [vmem:[#allocation133_spill] sm:$0xff] }
0x116d   : > { %v6181_v14 = vsel %vm5059_vm0, %v6133_v6, %v13394_v59  ;;  %v6182_v29 = vsel %vm5059_vm0, %v6136_v60, %v13395_v31  ;;  %v20371_v31 = vld [vmem:[#allocation45_spill] sm:$0xff]  ;;  %v6663_v0 = vor.u32 %v20373_v45, %v20372_v9  ;;  %v20374_v6 = vld [vmem:[#allocation83_spill] sm:$0xff] }
0x116e   : > { %v13403_v41 = vpop.permute.xlu1 %13402  ;;  %v13408_v20 = vpop.permute.xlu0 %13407  ;;  %v6186_v18 = vpack.c.bf16 %v6182_v29, %v6181_v14  ;;  %v6124_v59 = vor.u32 %v20371_v31, %v20370_v7  ;;  %v6666_v8 = vor.u32 %v20375_v23, %v20374_v6  ;;  %v6179_v60 = vsel %vm5059_vm0, %v6121_v32, %v13399_v1  ;;  %v20379_v32 = vld [vmem:[#allocation151_spill] sm:$0xff]  ;;  %v20381_v7 = vld [vmem:[#allocation162_spill] sm:$0xff] }
0x116f   : > { %v13405_v35 = vunpack.i.h.bf16 %v13403_v41  ;;  %v13404_v19 = vunpack.i.l.bf16 %v13403_v41  ;;  %v13410_v40 = vunpack.i.h.bf16 %v13408_v20  ;;  %v13409_v14 = vunpack.i.l.bf16 %v13408_v20  ;;  %v20380_v20 = vld [vmem:[#allocation161_spill] sm:$0xff]  ;;  %v20382_v45 = vld [vmem:[#allocation167_spill] sm:$0xff] }
0x1170   : > { %v6180_v12 = vsel %vm5059_vm0, %v6124_v59, %v13400_v42  ;;  %v7273_v31 = vor.u32 %v20381_v7, %v20380_v20  ;;  %v20394_v20 = vld [vmem:[#allocation143_spill] sm:$0xff] }
0x1171   : > { %10579 = vmatmul.mubr.bf16.vlgmr.msra.gmra.mrb[224].mxu1 %v5575_v17  ;;  %10805 = vmatmul.mubr.bf16.vlgmr.msra.gmra.mrb[224].mxu0 %v5575_v17  ;;  %v6712_v28 = vsel %vm5059_vm0, %v6666_v8, %v13405_v35  ;;  %v20376_v17 = vld [vmem:[#allocation130_spill] sm:$0xff] }
0x1172   : > { %v13413_v34 = vpop.permute.xlu1 %13412  ;;  %v19127_v61 = vpop.permute.xlu0 %13417  ;;  %10588 = vmatprep.mubr.bf16.mxu1 %v6186_v18  ;;  %12607 = vmatpush1.bf16.msra.mxu1 %v18856_v50  ;;  %v6711_v50 = vsel %vm5059_vm0, %v6663_v0, %v13404_v19  ;;  %v20378_v19 = vld [vmem:[#allocation79_spill] sm:$0xff] }
0x1173   : > { %10814 = vmatprep.mubr.bf16.mxu0 %v6186_v18  ;;  %12592 = vmatprep.subr.bf16.mxu1 %v18858_v63  ;;  %v6185_v63 = vpack.c.bf16 %v6180_v12, %v6179_v60  ;;  %v20377_v18 = vld [vmem:[#allocation131_spill] sm:$0xff]  ;;  %v13415_v54 = vunpack.i.h.bf16 %v13413_v34  ;;  %v13414_v42 = vunpack.i.l.bf16 %v13413_v34  ;;  %v6716_v44 = vpack.c.bf16 %v6712_v28, %v6711_v50  ;;  %v20384_v28 = vld [vmem:[#allocation137_spill] sm:$0xff] }
0x1174   : > { %v6651_v1 = vor.u32 %v20377_v18, %v20376_v17  ;;  %v6654_v35 = vor.u32 %v20379_v32, %v20378_v19  ;;  %v20383_v34 = vld [vmem:[#allocation107_spill] sm:$0xff]  ;;  %v20388_v17 = vld [vmem:[#allocation141_spill] sm:$0xff] }
0x1175   : > { %v7276_v0 = vor.u32 %v20383_v34, %v20382_v45  ;;  %v7321_v12 = vsel %vm5059_vm0, %v7273_v31, %v13414_v42  ;;  %v20390_v19 = vld [vmem:[#allocation139_spill] sm:$0xff]  ;;  %v20397_v45 = vld [vmem:[#allocation164_spill] sm:$0xff] }
0x1176   : > { %v19143_v29 = vpop.permute.xlu1 %13422  ;;  %v19145_v41 = vpop.permute.xlu0 %13427  ;;  %12608 = vmatpush1.bf16.msra.mxu1 %v18871_v22  ;;  %v6709_v22 = vsel %vm5059_vm0, %v6651_v1, %v13409_v14  ;;  %v20391_v32 = vld [vmem:[#allocation135_spill] sm:$0xff] }
0x1177   : > { %12593 = vmatprep.subr.bf16.mxu1 %v18877_v37  ;;  %v6710_v37 = vsel %vm5059_vm0, %v6654_v35, %v13410_v40  ;;  %v7322_v50 = vsel %vm5059_vm0, %v7276_v0, %v13415_v54  ;;  %v20387_v40 = vld [vmem:[#allocation145_spill] sm:$0xff]  ;;  %v20392_v35 = vor.u32 %v20390_v19, %v20391_v32 }
0x1178   : > { %v20389_v18 = vor.u32 %v20387_v40, %v20388_v17  ;;  %v13425_v40 = vunpack.i.h.bf16 %v19143_v29  ;;  %v7326_v17 = vpack.c.bf16 %v7322_v50, %v7321_v12  ;;  %v20402_v19 = vld [vmem:[#allocation57_spill] sm:$0xff] }
0x1179   : > { %10589 = vmatmul.mubr.bf16.gmra.mrb[228].mxu1 %v6185_v63  ;;  %10815 = vmatmul.mubr.bf16.gmra.mrb[228].mxu0 %v6185_v63  ;;  %v20405_v12 = vld [vmem:[#allocation105_spill] sm:$0xff] }
0x117a   : > { %v13433_v59 = vpop.permute.xlu1 %13432  ;;  %v13438_v9 = vpop.permute.xlu0 %13437  ;;  %10598 = vmatprep.mubr.bf16.mxu1 %v6716_v44  ;;  %12609 = vmatpush1.bf16.msra.mxu1 %v18895_v5  ;;  %v20385_v5 = vld [vmem:[#allocation124_spill] sm:$0xff] }
0x117b   : > { %v13435_v6 = vunpack.i.h.bf16 %v13433_v59  ;;  %v13434_v23 = vunpack.i.l.bf16 %v13433_v59  ;;  %v13440_v8 = vunpack.i.h.bf16 %v13438_v9  ;;  %v13439_v60 = vunpack.i.l.bf16 %v13438_v9  ;;  %10824 = vmatprep.mubr.bf16.mxu0 %v6716_v44  ;;  %12594 = vmatprep.subr.bf16.mxu1 %v18900_v11  ;;  %v20393_v11 = vld [vmem:[#allocation147_spill] sm:$0xff]  ;;  %v20396_v9 = vld [vmem:[#allocation150_spill] sm:$0xff] }
0x117c   : > { %v20386_v63 = vor.u32 %v20384_v28, %v20385_v5  ;;  %v20395_v42 = vor.u32 %v20393_v11, %v20394_v20  ;;  %v6715_v59 = vpack.c.bf16 %v6710_v37, %v6709_v22  ;;  %v7261_v34 = vor.u32 %v20397_v45, %v20396_v9  ;;  %v20398_v22 = vld [vmem:[#allocation61_spill] sm:$0xff]  ;;  %v20409_v20 = vld [vmem:[#allocation111_spill] sm:$0xff] }
0x117d   : > { %v8462_v1 = vsel %vm5059_vm0, %v20389_v18, %v13435_v6  ;;  %v8459_v44 = vsel %vm5059_vm0, %v20392_v35, %v13439_v60  ;;  %v13420_v60 = vunpack.i.h.bf16 %v19127_v61  ;;  %v20399_v37 = vld [vmem:[#allocation149_spill] sm:$0xff]  ;;  %v13429_v9 = vunpack.i.l.bf16 %v19145_v41 }
0x117e   : > { %v8461_v14 = vsel %vm5059_vm0, %v20386_v63, %v13434_v23  ;;  %v8460_v54 = vsel %vm5059_vm0, %v20395_v42, %v13440_v8  ;;  %v13443_v7 = vpop.permute.xlu1 %13442  ;;  %v13448_v31 = vpop.permute.xlu0 %13447  ;;  %12610 = vmatpush1.bf16.msra.mxu1 %v18904_v4  ;;  %v13419_v8 = vunpack.i.l.bf16 %v19127_v61  ;;  %v13424_v4 = vunpack.i.l.bf16 %v19143_v29  ;;  %v20404_v29 = vld [vmem:[#allocation163_spill] sm:$0xff]  ;;  %v20410_v42 = vld [vmem:[#allocation122_spill] sm:$0xff] }
0x117f   : > { %v8466_v0 = vpack.c.bf16 %v8462_v1, %v8461_v14  ;;  %v8465_v6 = vpack.c.bf16 %v8460_v54, %v8459_v44  ;;  %v13445_v23 = vunpack.i.h.bf16 %v13443_v7  ;;  %v13444_v28 = vunpack.i.l.bf16 %v13443_v7  ;;  %12595 = vmatprep.subr.bf16.mxu1 %v18906_v26  ;;  %v20401_v1 = vld [vmem:[#allocation65_spill] sm:$0xff] }
0x1180   : > { %v13450_v5 = vunpack.i.h.bf16 %v13448_v31  ;;  %v13449_v63 = vunpack.i.l.bf16 %v13448_v31  ;;  %v20400_v14 = vor.u32 %v20398_v22, %v20399_v37  ;;  %v20403_v61 = vor.u32 %v20401_v1, %v20402_v19 }
0x1181   : > { %10599 = vmatmul.mubr.bf16.gmra.mrb[232].mxu1 %v6715_v59  ;;  %10825 = vmatmul.mubr.bf16.gmra.mrb[232].mxu0 %v6715_v59  ;;  %v8992_v26 = vsel %vm5059_vm0, %v8946_v3, %v13445_v23  ;;  %v7264_v50 = vor.u32 %v20405_v12, %v20404_v29  ;;  %v20406_v44 = vor.u32 %v18796_v38, %v18785_v27  ;;  %v20408_v3 = vld [vmem:[#allocation109_spill] sm:$0xff]  ;;  %v20412_v23 = vld [vmem:[#allocation80_spill] sm:$0xff] }
0x1182   : > { %v8991_v18 = vsel %vm5059_vm0, %v20400_v14, %v13444_v28  ;;  %v8989_v32 = vsel %vm5059_vm0, %v20403_v61, %v13449_v63  ;;  %10608 = vmatprep.mubr.bf16.mxu1 %v7326_v17  ;;  %12611 = vmatpush1.bf16.msra.mxu1 %v18921_v16  ;;  %v7803_v11 = vor.u32 %v20408_v3, %v20407_v49  ;;  %v20414_v63 = vld [vmem:[#allocation117_spill] sm:$0xff]  ;;  %v20417_v12 = vld [vmem:[#allocation32_spill] sm:$0xff] }
0x1183   : > { %v19202_v35 = vpack.c.bf16 %v8992_v26, %v8991_v18  ;;  %v8990_v43 = vsel %vm5059_vm0, %v20406_v44, %v13450_v5  ;;  %10834 = vmatprep.mubr.bf16.mxu0 %v7326_v17  ;;  %12596 = vmatprep.subr.bf16.mxu1 %v18928_v30  ;;  %v7806_v54 = vor.u32 %v20410_v42, %v20409_v20  ;;  %v13430_v30 = vunpack.i.h.bf16 %v19145_v41  ;;  %v20413_v5 = vld [vmem:[#allocation112_spill] sm:$0xff]  ;;  %v13458_v17 = vpop.permute.xlu0 %13457 }
0x1184   : > { %v7319_v16 = vsel %vm5059_vm0, %v7261_v34, %v13419_v8  ;;  %v7320_v7 = vsel %vm5059_vm0, %v7264_v50, %v13420_v60  ;;  %v19215_v31 = vpack.c.bf16 %v8990_v43, %v8989_v32  ;;  %v7851_v59 = vsel %vm5059_vm0, %v7803_v11, %v13424_v4  ;;  %v20411_v34 = vld [vmem:[#allocation78_spill] sm:$0xff]  ;;  %v20416_v32 = vld [vmem:[#allocation31_spill] sm:$0xff]  ;;  %v20419_v43 = vld [vmem:[#allocation53_spill] sm:$0xff] }
0x1185   : > { %v7852_v38 = vsel %vm5059_vm0, %v7806_v54, %v13425_v40  ;;  %v7325_v27 = vpack.c.bf16 %v7320_v7, %v7319_v16  ;;  %v7791_v28 = vor.u32 %v20412_v23, %v20411_v34  ;;  %v7794_v60 = vor.u32 %v20414_v63, %v20413_v5  ;;  %v9555_v8 = vld [vmem:[#allocation6 + $0x46] ss:$8 sm:$0xf0]  ;;  %v9543_v4 = vld [vmem:[#allocation6 + $0x44] ss:$8 sm:$0xf0] }
0x1186   : > { %12612 = vmatpush1.bf16.msra.mxu1 %v18939_v58  ;;  %v7856_v45 = vpack.c.bf16 %v7852_v38, %v7851_v59  ;;  %v13460_v22 = vunpack.i.h.bf16 %v13458_v17  ;;  %v13459_v37 = vunpack.i.l.bf16 %v13458_v17  ;;  %v9539_v14 = vld [vmem:[#allocation6 + $0x4] ss:$8 sm:$0xf] }
0x1187   : > { %12597 = vmatprep.subr.bf16.mxu1 %v18950_v53  ;;  %v7849_v58 = vsel %vm5059_vm0, %v7791_v28, %v13429_v9  ;;  %v7850_v53 = vsel %vm5059_vm0, %v7794_v60, %v13430_v30 }
0x1188   : > { %v7855_v41 = vpack.c.bf16 %v7850_v53, %v7849_v58 }
0x1189   : > { %10609 = vmatmul.mubr.bf16.gmra.mrb[236].mxu1 %v7325_v27  ;;  %10835 = vmatmul.mubr.bf16.gmra.mrb[236].mxu0 %v7325_v27 }
0x118a   : > { %10618 = vmatprep.mubr.bf16.mxu1 %v7856_v45  ;;  %12613 = vmatpush1.bf16.msra.mxu1 %v18955_v10  ;;  %v13453_v10 = vpop.permute.xlu1 %13452 }
0x118b   : > { %10844 = vmatprep.mubr.bf16.mxu0 %v7856_v45  ;;  %12598 = vmatprep.subr.bf16.mxu1 %v18961_v36  ;;  %v9552_v36 = vld [vmem:[#allocation6 + $0x6] ss:$8 sm:$0xf0]  ;;  %v13455_v40 = vunpack.i.h.bf16 %v13453_v10 }
0x118e   : > { %12614 = vmatpush1.bf16.msra.mxu1 %v18973_v62  ;;  %v13454_v62 = vunpack.i.l.bf16 %v13453_v10 }
0x118f   : > { %12599 = vmatprep.subr.bf16.mxu1 %v18976_v47  ;;  %v9551_v47 = vld [vmem:[#allocation6 + $0x6] ss:$8 sm:$0xf] }
0x1191   : > { %10619 = vmatmul.mubr.bf16.gmra.mrb[240].mxu1 %v7855_v41  ;;  %10845 = vmatmul.mubr.bf16.gmra.mrb[240].mxu0 %v7855_v41 }
0x1192   : > { %10628 = vmatprep.mubr.bf16.mxu1 %v8466_v0  ;;  %12615 = vmatpush1.bf16.msra.mxu1 %v18989_v48  ;;  %v9554_v48 = vld [vmem:[#allocation6 + $0x46] ss:$8 sm:$0xf] }
0x1193   : > { %10854 = vmatprep.mubr.bf16.mxu0 %v8466_v0  ;;  %12600 = vmatprep.subr.bf16.mxu1 %v18996_v25  ;;  %v9553_v25 = vor.u32 %v9552_v36, %v9551_v47  ;;  %v9556_v0 = vor.u32 %v9555_v8, %v9554_v48 }
0x1196   : > { %12616 = vmatpush1.bf16.msra.mxu1 %v19005_v57  ;;  %v9601_v57 = vsel %vm5059_vm0, %v9553_v25, %v13454_v62 }
0x1197   : > { %12601 = vmatprep.subr.bf16.mxu1 %v19027_v39  ;;  %v9602_v39 = vsel %vm5059_vm0, %v9556_v0, %v13455_v40 }
0x1199   : > { %10629 = vmatmul.mubr.bf16.gmra.mrb[244].mxu1 %v8465_v6  ;;  %10855 = vmatmul.mubr.bf16.gmra.mrb[244].mxu0 %v8465_v6  ;;  %v9540_v6 = vld [vmem:[#allocation6 + $0x4] ss:$8 sm:$0xf0] }
0x119a   : > { %10638 = vmatprep.mubr.bf16.mxu1 %v19202_v35  ;;  %12617 = vmatpush1.bf16.msra.mxu1 %v19025_v51  ;;  %v9606_v51 = vpack.c.bf16 %v9602_v39, %v9601_v57  ;;  %v9541_v18 = vor.u32 %v9540_v6, %v9539_v14 }
0x119b   : > { %12602 = vmatprep.subr.bf16.mxu1 %v19031_v2  ;;  %v9542_v2 = vld [vmem:[#allocation6 + $0x44] ss:$8 sm:$0xf] }
0x119c   : > { %v9544_v26 = vor.u32 %v9543_v4, %v9542_v2 }
0x119e   : > { %12618 = vmatpush1.bf16.msra.mxu1 %v19041_v46  ;;  %v9599_v46 = vsel %vm5059_vm0, %v9541_v18, %v13459_v37 }
0x119f   : > { %12603 = vmatprep.subr.bf16.mxu1 %v19046_v33  ;;  %v9600_v33 = vsel %vm5059_vm0, %v9544_v26, %v13460_v22 }
0x11a0   : > { %v9605_v1 = vpack.c.bf16 %v9600_v33, %v9599_v46 }
0x11a1   : > { %10639 = vmatmul.mubr.bf16.gmra.mrb[248].mxu1 %v19215_v31 }
0x11a2   : > { %10648 = vmatprep.mubr.bf16.mxu1 %v9606_v51  ;;  %12619 = vmatpush1.bf16.msra.mxu1 %v19049_v15 }
0x11a3   : > { %12604 = vmatprep.subr.bf16.mxu1 %v19053_v24 }
0x11a6   : > { %12620 = vmatpush1.bf16.msra.mxu1 %v19057_v13 }
0x11a7   : > { %12605 = vmatprep.subr.bf16.mxu1 %v19060_v56 }
0x11a9   : > { %10649 = vmatmul.mubr.bf16.gmra.mrb[252].mxu1 %v9605_v1 }
0x11aa   : > { %12621 = vmatpush1.bf16.msra.mxu1 %v19063_v55  ;;  %10864 = vmatprep.mubr.bf16.mxu1 %v19202_v35  ;;  %v20418_v35 = vld [vmem:[#allocation52_spill] sm:$0xff] }
0x11ab   : > { %12606 = vmatprep.subr.bf16.mxu1 %v19066_v52 }
0x11ae   : > { %12622 = vmatpush1.bf16.msra.mxu1 %v19069_v21  ;;  %v9771_v21 = vld [vmem:[%s20415_s5] sm:$0xf] }
0x11af   : > { %v19277_v29 = vrot.slane %v9771_v21, %v20416_v32  ;;  %v19280_v50 = vrot.slane %v9771_v21, %v20417_v12  ;;  %v19283_v44 = vrot.slane %v9771_v21, %v20418_v35  ;;  %v19286_v49 = vrot.slane %v9771_v21, %v20419_v43 }
0x11b1   : > { %10865 = vmatmul.mubr.bf16.vlgmr.msra.gmra.mrb[0].mxu1 %v19215_v31 }
0x11b2   : > { %10874 = vmatprep.mubr.bf16.mxu1 %v9606_v51 }
0x11b9   : > { %10875 = vmatmul.mubr.bf16.gmra.mrb[4].mxu1 %v9605_v1 }
0x121b   : > { %v19256_v15 = vpop.f32.mrb[248].mxu0 }
0x121c   : > { %v19258_v24 = vpop.f32.mrb[249].mxu0 }
0x121d   : > { %v19260_v13 = vpop.f32.mrb[250].mxu0 }
0x121e   : > { %v19262_v56 = vpop.f32.mrb[251].mxu0 }
0x123c   : > { %v19264_v55 = vpop.f32.mrb[252].mxu0 }
0x123d   : > { %v19266_v19 = vpop.f32.mrb[253].mxu0 }
0x123e   : > { %v19268_v61 = vpop.f32.mrb[254].mxu0 }
0x123f   : > { %v19270_v52 = vpop.f32.mrb[255].mxu0 }
0x1244   : > { %v10580_v3 = vpop.f32.mrb[224].mxu1  ;;  %v10806_v11 = vpop.f32.mrb[224].mxu0 }
0x1245   : > { %v12815_v20 = vadd.f32 %v10580_v3, %v19277_v29  ;;  %v12847_v42 = vadd.f32 %v10806_v11, %v19283_v44  ;;  %v10582_v54 = vpop.f32.mrb[225].mxu1  ;;  %v10808_v16 = vpop.f32.mrb[225].mxu0 }
0x1246   : > { %v12816_v7 = vadd.f32 %v10582_v54, %v19280_v50  ;;  %v12848_v31 = vadd.f32 %v10808_v16, %v19286_v49  ;;  %v10584_v59 = vpop.f32.mrb[226].mxu1  ;;  %v10810_v38 = vpop.f32.mrb[226].mxu0 }
0x1247   : > { %10885 = vst [vmem:[%s19292_s27] sm:$0xff] %v12815_v20  ;;  %10887 = vst [vmem:[%s19292_s27 + $0x10] sm:$0xff] %v12847_v42  ;;  %v12817_v27 = vadd.f32 %v10584_v59, %v19277_v29  ;;  %v12849_v30 = vadd.f32 %v10810_v38, %v19283_v44  ;;  %v10586_v9 = vpop.f32.mrb[227].mxu1  ;;  %v10812_v45 = vpop.f32.mrb[227].mxu0 }
0x1248   : > { %10886 = vst [vmem:[%s19292_s27 + $0x8] sm:$0xff] %v12816_v7  ;;  %10888 = vst [vmem:[%s19292_s27 + $0x18] sm:$0xff] %v12848_v31  ;;  %v12818_v34 = vadd.f32 %v10586_v9, %v19280_v50  ;;  %v12850_v23 = vadd.f32 %v10812_v45, %v19286_v49 }
0x1249   : > { %10889 = vst [vmem:[%s19292_s27 + $0x20] sm:$0xff] %v12817_v27  ;;  %10891 = vst [vmem:[%s19292_s27 + $0x30] sm:$0xff] %v12849_v30 }
0x124a   : > { %10890 = vst [vmem:[%s19292_s27 + $0x28] sm:$0xff] %v12818_v34  ;;  %10892 = vst [vmem:[%s19292_s27 + $0x38] sm:$0xff] %v12850_v23 }
0x124c   : > { %v10590_v28 = vpop.f32.mrb[228].mxu1  ;;  %v10816_v5 = vpop.f32.mrb[228].mxu0 }
0x124d   : > { %v12819_v63 = vadd.f32 %v10590_v28, %v19277_v29  ;;  %v12851_v60 = vadd.f32 %v10816_v5, %v19283_v44  ;;  %v10592_v58 = vpop.f32.mrb[229].mxu1  ;;  %v10818_v53 = vpop.f32.mrb[229].mxu0 }
0x124e   : > { %v12820_v41 = vadd.f32 %v10592_v58, %v19280_v50  ;;  %v12852_v10 = vadd.f32 %v10818_v53, %v19286_v49  ;;  %v10594_v36 = vpop.f32.mrb[230].mxu1  ;;  %v10820_v8 = vpop.f32.mrb[230].mxu0 }
0x124f   : > { %10893 = vst [vmem:[%s19292_s27 + $0x40] sm:$0xff] %v12819_v63  ;;  %10895 = vst [vmem:[%s19292_s27 + $0x50] sm:$0xff] %v12851_v60  ;;  %v12821_v40 = vadd.f32 %v10594_v36, %v19277_v29  ;;  %v12853_v62 = vadd.f32 %v10820_v8, %v19283_v44  ;;  %v10596_v47 = vpop.f32.mrb[231].mxu1  ;;  %v10822_v48 = vpop.f32.mrb[231].mxu0 }
0x1250   : > { %10894 = vst [vmem:[%s19292_s27 + $0x48] sm:$0xff] %v12820_v41  ;;  %10896 = vst [vmem:[%s19292_s27 + $0x58] sm:$0xff] %v12852_v10  ;;  %v12822_v25 = vadd.f32 %v10596_v47, %v19280_v50  ;;  %v12854_v0 = vadd.f32 %v10822_v48, %v19286_v49 }
0x1251   : > { %10897 = vst [vmem:[%s19292_s27 + $0x60] sm:$0xff] %v12821_v40  ;;  %10899 = vst [vmem:[%s19292_s27 + $0x70] sm:$0xff] %v12853_v62 }
0x1252   : > { %10898 = vst [vmem:[%s19292_s27 + $0x68] sm:$0xff] %v12822_v25  ;;  %10900 = vst [vmem:[%s19292_s27 + $0x78] sm:$0xff] %v12854_v0 }
0x1254   : > { %v10600_v17 = vpop.f32.mrb[232].mxu1  ;;  %v10826_v57 = vpop.f32.mrb[232].mxu0 }
0x1255   : > { %v12823_v39 = vadd.f32 %v10600_v17, %v19277_v29  ;;  %v12855_v6 = vadd.f32 %v10826_v57, %v19283_v44  ;;  %v10602_v4 = vpop.f32.mrb[233].mxu1  ;;  %v10828_v22 = vpop.f32.mrb[233].mxu0 }
0x1256   : > { %v12824_v37 = vadd.f32 %v10602_v4, %v19280_v50  ;;  %v12856_v51 = vadd.f32 %v10828_v22, %v19286_v49  ;;  %v10604_v14 = vpop.f32.mrb[234].mxu1  ;;  %v10830_v2 = vpop.f32.mrb[234].mxu0 }
0x1257   : > { %10901 = vst [vmem:[%s19292_s27 + $0x80] sm:$0xff] %v12823_v39  ;;  %10903 = vst [vmem:[%s19292_s27 + $0x90] sm:$0xff] %v12855_v6  ;;  %v12825_v18 = vadd.f32 %v10604_v14, %v19277_v29  ;;  %v12857_v26 = vadd.f32 %v10830_v2, %v19283_v44  ;;  %v10606_v46 = vpop.f32.mrb[235].mxu1  ;;  %v10832_v33 = vpop.f32.mrb[235].mxu0 }
0x1258   : > { %10902 = vst [vmem:[%s19292_s27 + $0x88] sm:$0xff] %v12824_v37  ;;  %10904 = vst [vmem:[%s19292_s27 + $0x98] sm:$0xff] %v12856_v51  ;;  %v12826_v1 = vadd.f32 %v10606_v46, %v19280_v50  ;;  %v12858_v21 = vadd.f32 %v10832_v33, %v19286_v49 }
0x1259   : > { %10905 = vst [vmem:[%s19292_s27 + $0xa0] sm:$0xff] %v12825_v18  ;;  %10907 = vst [vmem:[%s19292_s27 + $0xb0] sm:$0xff] %v12857_v26 }
0x125a   : > { %10906 = vst [vmem:[%s19292_s27 + $0xa8] sm:$0xff] %v12826_v1  ;;  %10908 = vst [vmem:[%s19292_s27 + $0xb8] sm:$0xff] %v12858_v21 }
0x125c   : > { %v10610_v32 = vpop.f32.mrb[236].mxu1  ;;  %v10836_v12 = vpop.f32.mrb[236].mxu0 }
0x125d   : > { %v12827_v35 = vadd.f32 %v10610_v32, %v19277_v29  ;;  %v12859_v43 = vadd.f32 %v10836_v12, %v19283_v44  ;;  %v10612_v3 = vpop.f32.mrb[237].mxu1  ;;  %v10838_v11 = vpop.f32.mrb[237].mxu0 }
0x125e   : > { %v12828_v20 = vadd.f32 %v10612_v3, %v19280_v50  ;;  %v12860_v42 = vadd.f32 %v10838_v11, %v19286_v49  ;;  %v10614_v54 = vpop.f32.mrb[238].mxu1  ;;  %v10840_v16 = vpop.f32.mrb[238].mxu0 }
0x125f   : > { %10909 = vst [vmem:[%s19292_s27 + $0xc0] sm:$0xff] %v12827_v35  ;;  %10911 = vst [vmem:[%s19292_s27 + $0xd0] sm:$0xff] %v12859_v43  ;;  %v12829_v7 = vadd.f32 %v10614_v54, %v19277_v29  ;;  %v12861_v31 = vadd.f32 %v10840_v16, %v19283_v44  ;;  %v10616_v59 = vpop.f32.mrb[239].mxu1  ;;  %v10842_v38 = vpop.f32.mrb[239].mxu0 }
0x1260   : > { %10910 = vst [vmem:[%s19292_s27 + $0xc8] sm:$0xff] %v12828_v20  ;;  %10912 = vst [vmem:[%s19292_s27 + $0xd8] sm:$0xff] %v12860_v42  ;;  %v12830_v27 = vadd.f32 %v10616_v59, %v19280_v50  ;;  %v12862_v30 = vadd.f32 %v10842_v38, %v19286_v49  ;;  %v10754_v59 = vadd.f32 %v19256_v15, %v19283_v44 }
0x1261   : > { %10913 = vst [vmem:[%s19292_s27 + $0xe0] sm:$0xff] %v12829_v7  ;;  %10915 = vst [vmem:[%s19292_s27 + $0xf0] sm:$0xff] %v12861_v31  ;;  %v10756_v38 = vadd.f32 %v19258_v24, %v19286_v49  ;;  %v10764_v24 = vadd.f32 %v19264_v55, %v19283_v44 }
0x1262   : > { %10914 = vst [vmem:[%s19292_s27 + $0xe8] sm:$0xff] %v12830_v27  ;;  %10916 = vst [vmem:[%s19292_s27 + $0xf8] sm:$0xff] %v12862_v30  ;;  %v10758_v30 = vadd.f32 %v19260_v13, %v19283_v44  ;;  %v10766_v13 = vadd.f32 %v19266_v19, %v19286_v49 }
0x1264   : > { %v10620_v9 = vpop.f32.mrb[240].mxu1  ;;  %v10846_v45 = vpop.f32.mrb[240].mxu0 }
0x1265   : > { %v12831_v34 = vadd.f32 %v10620_v9, %v19277_v29  ;;  %v12863_v23 = vadd.f32 %v10846_v45, %v19283_v44  ;;  %v10622_v28 = vpop.f32.mrb[241].mxu1  ;;  %v10848_v5 = vpop.f32.mrb[241].mxu0 }
0x1266   : > { %v12832_v63 = vadd.f32 %v10622_v28, %v19280_v50  ;;  %v12864_v60 = vadd.f32 %v10848_v5, %v19286_v49  ;;  %v10624_v58 = vpop.f32.mrb[242].mxu1  ;;  %v10850_v53 = vpop.f32.mrb[242].mxu0 }
0x1267   : > { %10917 = vst [vmem:[%s19292_s27 + $0x100] sm:$0xff] %v12831_v34  ;;  %10919 = vst [vmem:[%s19292_s27 + $0x110] sm:$0xff] %v12863_v23  ;;  %v12833_v41 = vadd.f32 %v10624_v58, %v19277_v29  ;;  %v12865_v10 = vadd.f32 %v10850_v53, %v19283_v44  ;;  %v10626_v36 = vpop.f32.mrb[243].mxu1  ;;  %v10852_v8 = vpop.f32.mrb[243].mxu0  ;;  %v10770_v58 = vadd.f32 %v19270_v52, %v19286_v49 }
0x1268   : > { %10918 = vst [vmem:[%s19292_s27 + $0x108] sm:$0xff] %v12832_v63  ;;  %10920 = vst [vmem:[%s19292_s27 + $0x118] sm:$0xff] %v12864_v60  ;;  %v12834_v40 = vadd.f32 %v10626_v36, %v19280_v50  ;;  %v12866_v62 = vadd.f32 %v10852_v8, %v19286_v49 }
0x1269   : > { %10921 = vst [vmem:[%s19292_s27 + $0x120] sm:$0xff] %v12833_v41  ;;  %10923 = vst [vmem:[%s19292_s27 + $0x130] sm:$0xff] %v12865_v10 }
0x126a   : > { %10922 = vst [vmem:[%s19292_s27 + $0x128] sm:$0xff] %v12834_v40  ;;  %10924 = vst [vmem:[%s19292_s27 + $0x138] sm:$0xff] %v12866_v62 }
0x126c   : > { %v10630_v47 = vpop.f32.mrb[244].mxu1  ;;  %v10856_v48 = vpop.f32.mrb[244].mxu0 }
0x126d   : > { %v12835_v25 = vadd.f32 %v10630_v47, %v19277_v29  ;;  %v12867_v0 = vadd.f32 %v10856_v48, %v19283_v44  ;;  %v10632_v17 = vpop.f32.mrb[245].mxu1  ;;  %v10858_v57 = vpop.f32.mrb[245].mxu0 }
0x126e   : > { %v12836_v39 = vadd.f32 %v10632_v17, %v19280_v50  ;;  %v12868_v6 = vadd.f32 %v10858_v57, %v19286_v49  ;;  %v10634_v4 = vpop.f32.mrb[246].mxu1  ;;  %v10860_v22 = vpop.f32.mrb[246].mxu0 }
0x126f   : > { %10925 = vst [vmem:[%s19292_s27 + $0x140] sm:$0xff] %v12835_v25  ;;  %10927 = vst [vmem:[%s19292_s27 + $0x150] sm:$0xff] %v12867_v0  ;;  %v12837_v37 = vadd.f32 %v10634_v4, %v19277_v29  ;;  %v12869_v51 = vadd.f32 %v10860_v22, %v19283_v44  ;;  %v10636_v14 = vpop.f32.mrb[247].mxu1  ;;  %v10862_v2 = vpop.f32.mrb[247].mxu0 }
0x1270   : > { %10926 = vst [vmem:[%s19292_s27 + $0x148] sm:$0xff] %v12836_v39  ;;  %10928 = vst [vmem:[%s19292_s27 + $0x158] sm:$0xff] %v12868_v6  ;;  %v12838_v18 = vadd.f32 %v10636_v14, %v19280_v50  ;;  %v12870_v26 = vadd.f32 %v10862_v2, %v19286_v49 }
0x1271   : > { %10929 = vst [vmem:[%s19292_s27 + $0x160] sm:$0xff] %v12837_v37  ;;  %10931 = vst [vmem:[%s19292_s27 + $0x170] sm:$0xff] %v12869_v51 }
0x1272   : > { %10930 = vst [vmem:[%s19292_s27 + $0x168] sm:$0xff] %v12838_v18  ;;  %10932 = vst [vmem:[%s19292_s27 + $0x178] sm:$0xff] %v12870_v26 }
0x1274   : > { %v10640_v46 = vpop.f32.mrb[248].mxu1 }
0x1275   : > { %v12839_v33 = vadd.f32 %v10640_v46, %v19277_v29  ;;  %v10642_v1 = vpop.f32.mrb[249].mxu1 }
0x1276   : > { %v12840_v21 = vadd.f32 %v10642_v1, %v19280_v50  ;;  %v10644_v32 = vpop.f32.mrb[250].mxu1 }
0x1277   : > { %10933 = vst [vmem:[%s19292_s27 + $0x180] sm:$0xff] %v12839_v33  ;;  %v12841_v12 = vadd.f32 %v10644_v32, %v19277_v29  ;;  %v10646_v35 = vpop.f32.mrb[251].mxu1 }
0x1278   : > { %10934 = vst [vmem:[%s19292_s27 + $0x188] sm:$0xff] %v12840_v21  ;;  %v12842_v43 = vadd.f32 %v10646_v35, %v19280_v50 }
0x1279   : > { %10937 = vst [vmem:[%s19292_s27 + $0x1a0] sm:$0xff] %v12841_v12 }
0x127a   : > { %10938 = vst [vmem:[%s19292_s27 + $0x1a8] sm:$0xff] %v12842_v43 }
0x127c   : > { %v10650_v3 = vpop.f32.mrb[252].mxu1 }
0x127d   : > { %v12843_v11 = vadd.f32 %v10650_v3, %v19277_v29  ;;  %v10652_v20 = vpop.f32.mrb[253].mxu1 }
0x127e   : > { %v12844_v42 = vadd.f32 %v10652_v20, %v19280_v50  ;;  %v10654_v54 = vpop.f32.mrb[254].mxu1 }
0x127f   : > { %10941 = vst [vmem:[%s19292_s27 + $0x1c0] sm:$0xff] %v12843_v11  ;;  %v12845_v16 = vadd.f32 %v10654_v54, %v19277_v29  ;;  %v10656_v7 = vpop.f32.mrb[255].mxu1 }
0x1280   : > { %10942 = vst [vmem:[%s19292_s27 + $0x1c8] sm:$0xff] %v12844_v42  ;;  %v12846_v31 = vadd.f32 %v10656_v7, %v19280_v50  ;;  %v10760_v50 = vadd.f32 %v19262_v56, %v19286_v49  ;;  %v10768_v56 = vadd.f32 %v19268_v61, %v19283_v44 }
0x1281   : > { %10945 = vst [vmem:[%s19292_s27 + $0x1e0] sm:$0xff] %v12845_v16 }
0x1282   : > { %10946 = vst [vmem:[%s19292_s27 + $0x1e8] sm:$0xff] %v12846_v31 }
0x1284   : > { %v10866_v27 = vpop.f32.mrb[0].mxu1 }
0x1285   : > { %v10867_v29 = vadd.f32 %v10866_v27, %v10754_v59  ;;  %v10868_v9 = vpop.f32.mrb[1].mxu1 }
0x1286   : > { %v10869_v45 = vadd.f32 %v10868_v9, %v10756_v38  ;;  %v10870_v34 = vpop.f32.mrb[2].mxu1 }
0x1287   : > { %10935 = vst [vmem:[%s19292_s27 + $0x190] sm:$0xff] %v10867_v29  ;;  %v10871_v23 = vadd.f32 %v10870_v34, %v10758_v30  ;;  %v10872_v28 = vpop.f32.mrb[3].mxu1 }
0x1288   : > { %10936 = vst [vmem:[%s19292_s27 + $0x198] sm:$0xff] %v10869_v45  ;;  %v10873_v15 = vadd.f32 %v10872_v28, %v10760_v50 }
0x1289   : > { %10939 = vst [vmem:[%s19292_s27 + $0x1b0] sm:$0xff] %v10871_v23 }
0x128a   : > { %10940 = vst [vmem:[%s19292_s27 + $0x1b8] sm:$0xff] %v10873_v15 }
0x128c   : > { %v10876_v5 = vpop.f32.mrb[4].mxu1 }
0x128d   : > { %v10877_v63 = vadd.f32 %v10876_v5, %v10764_v24  ;;  %v10878_v60 = vpop.f32.mrb[5].mxu1 }
0x128e   : > { %v10879_v55 = vadd.f32 %v10878_v60, %v10766_v13  ;;  %v10880_v53 = vpop.f32.mrb[6].mxu1 }
0x128f   : > { %10943 = vst [vmem:[%s19292_s27 + $0x1d0] sm:$0xff] %v10877_v63  ;;  %v10881_v41 = vadd.f32 %v10880_v53, %v10768_v56  ;;  %v10882_v19 = vpop.f32.mrb[7].mxu1 }
0x1290   : > { %10944 = vst [vmem:[%s19292_s27 + $0x1d8] sm:$0xff] %v10879_v55  ;;  %v10883_v61 = vadd.f32 %v10882_v19, %v10770_v58 }
0x1291   : > { %10947 = vst [vmem:[%s19292_s27 + $0x1f0] sm:$0xff] %v10881_v41 }
0x1292   : > { %10948 = vst [vmem:[%s19292_s27 + $0x1f8] sm:$0xff] %v10883_v61 }
0x1293   : > { %15166 = shalt.err (!%p15163_p12)
}
0x1294   : > { %s15167_s1 = scalar_lea.hbm %s19428_s20, 8192  ;;  %s15171_s28 = scalar_lea.hbm %s20421_s21, 16384 }
0x1295   : > { %p15168_p8 = scmp.ne.s32.totalorder %s19428_s20, %s15167_s1  ;;  %p15172_p1 = scmp.lt.u32.totalorder %s19428_s20, %s20421_s21 }
0x1296   : > { %p15173_p6 = scmp.lt.u32.totalorder %s15171_s28, %s15167_s1  ;;  %p15175_p5 = scmp.lt.u32.totalorder %s15167_s1, %s19428_s20 }
0x1297   : > { %p15169_p10 = pnand %p15168_p8, %p20422_p2 }
0x1298   : > { %p15174_p3 = por %p15173_p6, %p15172_p1 }
0x1299   : > { %p15170_p0 = pneg %p15169_p10 }
0x129a   : > { %p15176_p4 = por %p15175_p5, %p15174_p3 }
0x129c   : > { %p15177_p11 = pnand %p15176_p4, %p15170_p0 }
0x129e   : > { %15180 = shalt.err (!%p15177_p11)
}
0x129f   : > { %s15244_s5 = smov 512   ;;  %s15245_s25 = smov 32  }
0x12a0   : > { %13221 = dma.vmem_to_hbm [thread:$0]  (%p20422_p2), %s19430_s23, 8192, %s19428_s20, %s10950_s8, %s15244_s5, %s15244_s5, %s15245_s25  }
0x12a1 PF: > { %s20423_s27 = sld [smem:[#allocation25_spill]]  ;;  %s20424_s17 = sld [smem:[#allocation27_spill]] }
0x12a2   : > { %s20425_s24 = sld [smem:[#allocation26_spill]] }
0x12a7   : > { %s10978_s10 = sand.u32 1, %s20423_s27   ;;  %p20426_p13 = scmp.ne.s32.totalorder %s20424_s17, 0 }
0x12a8   : > { %p20427_p7 = scmp.ge.s32.totalorder %s20425_s24, 2  ;;  %s10979_s16 = scalar_lea.sflag [#allocation9], %s10978_s10 }
0x12aa   : > { %p13247_p9 = pnand %p20427_p7, %p20426_p13 }
0x12ac   : > { %15214 = dma.done.wait (!%p13247_p9), %s10979_s16, 8192  }
0x12ad   : > { %15216 = vsyncadd (!%p13247_p9), %s10979_s16, 4294959104  ;;  %s20428_s20 = sld [smem:[#allocation28_spill]]  ;;  %s20429_s14 = sld [smem:[#allocation30_spill]] }
0x12ae   : > { %s20430_s17 = smov %s15223_s18  ;;  %s20431_s18 = smov %s15227_s19 }
0x12b3   : > { %p29_p12 = scmp.ge.s32.totalorder %s20428_s20, 4   ;;  %s20432_s19 = smov %s20429_s14 }
0x12b5   :  { %31 = sbr.rel (!%p29_p12) target bundleno = 17 (0x11), region = 164 }
0x12bc   :  { %10984 = vsyncpa [#allocation8], 1 }
0x12bd   :  { %10986 = vsyncpa [#allocation8 + $0x1], 1 }
0x12be   :  { %10987 = vsyncpa [#allocation11], 1 }
0x12bf   :  { %10989 = vsyncpa [#allocation11 + $0x1], 1 }
0x12c0   :  { %10990 = vsyncpa [#allocation14], 1 }
0x12c1   :  { %10991 = vsyncpa [#allocation17], 1 }
0x12c2   :  { %10992 = vsyncpa [#allocation9], 1 }
0x12c3   :  { %10994 = vsyncpa [#allocation9 + $0x1], 1 }

</bundles_post_ra>
